<compile_context>
chip_gen: v7x
topology: tpu7x:2x2x1
jax: 0.10.0
libtpu: 0.0.40
codegen_flags: <defaults>
</compile_context>

<pallas_src>
import functools
import numpy as np

import jax
import jax.numpy as jnp
from jax.experimental import pallas as pl
from jax.experimental.pallas import tpu as pltpu

BN_EPS = 1e-5
NUM_RES_BLOCKS = 8           # matches the 8 residual blocks in the provided Sequential
LANE = 128

# MXU input dtype and inter-layer activation storage dtype.  bf16 halves HBM
# traffic on every generation (v5e's MXU is bf16-native too); accumulation and
# BatchNorm statistics stay f32.
MATMUL_DTYPE = jnp.bfloat16
ACT_DTYPE = jnp.bfloat16


def _round_up(x, m):
    return ((x + m - 1) // m) * m


def _vmem_constants():
    """Generation-aware VMEM accounting (v7x: 64 MiB, v5e/v6e: 128 MiB)."""
    cap = 64 * 1024 * 1024                      # conservative default = smallest (v7x)
    try:
        cap = int(pltpu.get_tpu_info().vmem_capacity_bytes)
    except Exception:
        pass
    budget = (cap * 3) // 8                     # 24 MiB on v7x, 48 MiB on v5e/v6e
    limit = min((cap * 3) // 4, 100 * 1024 * 1024)   # 48 MiB / ~96 MiB scoped-VMEM cap
    max_tile = 4096 if cap <= 64 * 1024 * 1024 else 8192
    return budget, limit, max_tile


VMEM_TILE_BUDGET, VMEM_LIMIT_BYTES, MAX_TILE_P = _vmem_constants()
_TILE_CANDIDATES = (8192, 4096, 2048, 1024, 512, 256, 128, 64, 32, 16, 8)


# ----------------------------------------------------------------------------
# Pallas kernel: fused masked-conv layer
# ----------------------------------------------------------------------------
def _conv_kernel(*refs, has_pre, add_residual, has_res_affine, apply_relu,
                 compute_stats, tile_p, p_valid, mask_rows):
    """[BN-affine+ReLU prologue] + matmul + bias [+ (BN'd) residual] [+ ReLU] [+ BN partials]."""
    it = iter(refs)
    x_ref = next(it)                                   # (tile_p, Kp)  input / im2col patches
    w_ref = next(it)                                   # (Kp, Cout_p)  packed masked weights
    b_ref = next(it)                                   # (1, Cout_p)   bias
    psc_ref = next(it) if has_pre else None            # (1, Kp) BN scale for input channels
    psh_ref = next(it) if has_pre else None            # (1, Kp) BN shift
    r_ref = next(it) if add_residual else None         # (tile_p, Cout_p) residual tile (pre-BN)
    rsc_ref = next(it) if has_res_affine else None     # (1, Cout_p)
    rsh_ref = next(it) if has_res_affine else None     # (1, Cout_p)
    o_ref = next(it)                                   # (tile_p, Cout_p) output tile
    s_ref = next(it) if compute_stats else None        # (8, Cout_p) rows 0/1 = [sum, sumsq]

    x = x_ref[...]
    if has_pre:
        # Fused BatchNorm-affine + ReLU on the stored pre-BN producer output.
        x = jnp.maximum(x.astype(jnp.float32) * psc_ref[...] + psh_ref[...], 0.0)
    acc = jnp.dot(x.astype(MATMUL_DTYPE), w_ref[...],
                  preferred_element_type=jnp.float32)
    acc = acc + b_ref[...]
    if add_residual:
        r = r_ref[...].astype(jnp.float32)
        if has_res_affine:
            r = jnp.maximum(r * rsc_ref[...] + rsh_ref[...], 0.0)
        acc = acc + r
    if apply_relu:
        acc = jnp.maximum(acc, 0.0)
    o_ref[...] = acc.astype(o_ref.dtype)

    if compute_stats:
        a = acc
        if mask_rows:
            # Exclude zero-padded pixel rows from the BatchNorm statistics.
            row = (jax.lax.broadcasted_iota(jnp.int32, acc.shape, 0)
                   + pl.program_id(0) * tile_p)
            a = jnp.where(row < p_valid, acc, 0.0)
        # Write only the two meaningful rows (no zero-block concatenate).
        s_ref[0:1, :] = jnp.sum(a, axis=0, keepdims=True)
        s_ref[1:2, :] = jnp.sum(a * a, axis=0, keepdims=True)


# ----------------------------------------------------------------------------
# Layer wrapper (tile-size choice + pallas_call plumbing)
# ----------------------------------------------------------------------------
def _choose_tile_p(P, kp, cp, *, has_residual, out_itemsize, in_itemsize):
    act = jnp.dtype(ACT_DTYPE).itemsize
    mm = jnp.dtype(MATMUL_DTYPE).itemsize
    per_row = kp * in_itemsize + cp * out_itemsize + (cp * act if has_residual else 0)
    # Weights/bias/scale-shift have constant index maps but are still
    # double-buffered by the pipeline -> account 2x (matters on v7x's 64 MiB).
    fixed = 2 * kp * cp * mm + 256 * 1024
    # Keep >= 2 (ideally >= 4) tiles so the "parallel" grid axis can shard
    # across both TensorCores on v7x and the DMA pipeline has something to hide.
    if P >= 4 * 1024:
        min_tiles = 4
    elif P >= 512:
        min_tiles = 2
    else:
        min_tiles = 1
    for t in _TILE_CANDIDATES:
        if t > MAX_TILE_P:
            continue
        if pl.cdiv(P, t) < min_tiles:
            continue
        if 2 * t * per_row + fixed <= VMEM_TILE_BUDGET:
            return t
    return 8


def masked_conv_layer(x_nhwc, cfg, prm, *, relu, bn,
                      residual=None, res_scale=None, res_shift=None,
                      pre_scale=None, pre_shift=None, out_dtype=None):
    """One fused layer: [BN+ReLU prologue] masked conv + bias [+ BN'd residual]
    [+ ReLU] [+ BN partial stats], tiled over P = N*H*W."""
    if out_dtype is None:
        out_dtype = ACT_DTYPE
    n, h, w, _ = x_nhwc.shape
    k, pad = cfg["k"], cfg["pad"]
    cin, cout, cout_p, kp = cfg["cin"], cfg["cout"], cfg["cout_p"], cfg["kp"]
    P = n * h * w
    has_pre = pre_scale is not None
    has_res = residual is not None
    has_res_affine = has_res and (res_scale is not None)
    assert not (has_pre and k != 1), "BN prologue fusion only wired for 1x1 consumers"

    # glue: fold all k*k taps into a single (P, Kp) matmul LHS
    if k == 1:
        assert x_nhwc.shape[-1] == kp
        patches = x_nhwc.reshape(P, kp)               # 1x1 conv: no im2col needed
    else:
        # TODO(synk): a halo'd spatial BlockSpec with in-kernel tap accumulation would
        # avoid materializing this im2col matrix in HBM (deferred: highest lowering risk).
        xv = x_nhwc[..., :cin].astype(MATMUL_DTYPE)   # cast BEFORE im2col -> bf16 glue traffic
        xp = jnp.pad(xv, ((0, 0), (pad, pad), (pad, pad), (0, 0)))
        cols = [xp[:, i:i + h, j:j + w, :] for i in range(k) for j in range(k)]
        patches = jnp.concatenate(cols, axis=-1).reshape(P, k * k * cin)
        if k * k * cin < kp:
            patches = jnp.pad(patches, ((0, 0), (0, kp - k * k * cin)))
    if not has_pre:
        patches = patches.astype(MATMUL_DTYPE)
    w_mat = prm["w"].astype(MATMUL_DTYPE)

    tile_p = _choose_tile_p(P, kp, cout_p, has_residual=has_res,
                            out_itemsize=jnp.dtype(out_dtype).itemsize,
                            in_itemsize=jnp.dtype(patches.dtype).itemsize)
    pp = _round_up(P, tile_p)
    if pp != P:
        patches = jnp.pad(patches, ((0, pp - P), (0, 0)))
    n_tiles = pp // tile_p

    inputs = [patches, w_mat, prm["b"]]
    in_specs = [pl.BlockSpec((tile_p, kp), lambda i: (i, 0)),
                pl.BlockSpec((kp, cout_p), lambda i: (0, 0)),
                pl.BlockSpec((1, cout_p), lambda i: (0, 0))]
    if has_pre:
        inputs += [pre_scale.reshape(1, kp), pre_shift.reshape(1, kp)]
        in_specs += [pl.BlockSpec((1, kp), lambda i: (0, 0)),
                     pl.BlockSpec((1, kp), lambda i: (0, 0))]
    if has_res:
        r = residual.reshape(P, cout_p)
        if pp != P:
            r = jnp.pad(r, ((0, pp - P), (0, 0)))
        inputs.append(r)
        in_specs.append(pl.BlockSpec((tile_p, cout_p), lambda i: (i, 0)))
        if has_res_affine:
            inputs += [res_scale.reshape(1, cout_p), res_shift.reshape(1, cout_p)]
            in_specs += [pl.BlockSpec((1, cout_p), lambda i: (0, 0)),
                         pl.BlockSpec((1, cout_p), lambda i: (0, 0))]

    y_sds = jax.ShapeDtypeStruct((pp, cout_p), out_dtype)
    y_spec = pl.BlockSpec((tile_p, cout_p), lambda i: (i, 0))
    if bn:
        out_shape = (y_sds, jax.ShapeDtypeStruct((n_tiles * 8, cout_p), jnp.float32))
        out_specs = (y_spec, pl.BlockSpec((8, cout_p), lambda i: (i, 0)))
    else:
        out_shape = y_sds
        out_specs = y_spec

    kern = functools.partial(
        _conv_kernel,
        has_pre=has_pre, add_residual=has_res, has_res_affine=has_res_affine,
        apply_relu=relu, compute_stats=bn,
        tile_p=tile_p, p_valid=P, mask_rows=(pp != P))

    bytes_accessed = sum(int(np.prod(a.shape)) * a.dtype.itemsize for a in inputs)
    bytes_accessed += pp * cout_p * jnp.dtype(out_dtype).itemsize
    if bn:
        bytes_accessed += n_tiles * 8 * cout_p * 4
    cost = pl.CostEstimate(flops=2 * pp * kp * cout_p, transcendentals=0,
                           bytes_accessed=int(bytes_accessed))

    cparams = pltpu.CompilerParams(dimension_semantics=("parallel",),
                                   vmem_limit_bytes=VMEM_LIMIT_BYTES)
    outs = pl.pallas_call(
        kern, out_shape=out_shape, grid=(n_tiles,),
        in_specs=in_specs, out_specs=out_specs,
        compiler_params=cparams, cost_estimate=cost,
    )(*inputs)

    if bn:
        y, stats = outs
        # tiny per-channel glue: fold per-tile f32 partials into BN scale/shift
        stats = stats.reshape(n_tiles, 8, cout_p)
        ssum = jnp.sum(stats[:, 0, :], axis=0)
        ssq = jnp.sum(stats[:, 1, :], axis=0)
        mean = ssum / P
        # TODO(synk): E[x^2]-E[x]^2 in f32 (clamped); switch to shifted/centered
        # accumulation if activations ever develop large means.
        var = jnp.maximum(ssq / P - mean * mean, 0.0)
        scale = prm["gamma"][0] * jax.lax.rsqrt(var + BN_EPS)
        shift = prm["beta"][0] - mean * scale
        # Zero scale/shift on padded channels so garbage can never be amplified
        # (var=0 there would otherwise give scale ~ 1/sqrt(eps)).
        chan_mask = (jnp.arange(cout_p) < cout).astype(jnp.float32)
        scale = scale * chan_mask
        shift = shift * chan_mask
        y = y[:P].reshape(n, h, w, cout_p)
        return y, scale.reshape(1, cout_p), shift.reshape(1, cout_p)

    return outs[:P].reshape(n, h, w, cout_p)


# ----------------------------------------------------------------------------
# Masks & deterministic parameter init (static config kept separate from arrays)
# ----------------------------------------------------------------------------
def _make_mask(mask_type, k, cin, cout, color_cond):
    m = np.zeros((k, k, cin, cout), np.float32)
    c = k // 2
    m[:c, :, :, :] = 1.0          # rows strictly above center
    m[c, :c, :, :] = 1.0          # same row, strictly left of center
    if color_cond:
        assert cin % 3 == 0 and cout % 3 == 0, "color masking needs C % 3 == 0"
        ci, co = cin // 3, cout // 3
        for og in range(3):
            for ig in range(3):
                ok = (ig < og) if mask_type == 'A' else (ig <= og)
                if ok:
                    m[c, c, ig * ci:(ig + 1) * ci, og * co:(og + 1) * co] = 1.0
    elif mask_type == 'B':
        m[c, c, :, :] = 1.0
    return jnp.asarray(m)


def _init_conv(key, mask_type, cin, cout, k, pad, color_cond):
    cin_p = _round_up(cin, LANE)
    cout_p = _round_up(cout, LANE)
    kk = k * k
    kp = cin_p if k == 1 else _round_up(kk * cin, LANE)

    kwk, kb = jax.random.split(key)
    w = jax.random.normal(kwk, (k, k, cin, cout), jnp.float32) / np.sqrt(cin * kk)
    w = w * _make_mask(mask_type, k, cin, cout, color_cond)

    # pack masked weights as a lane-dense (Kp, Cout_p) matmul RHS
    w_packed = jnp.zeros((kp, cout_p), jnp.float32)
    if k == 1:
        w_packed = w_packed.at[:cin, :cout].set(w.reshape(cin, cout))
    else:
        w_packed = w_packed.at[:kk * cin, :cout].set(w.reshape(kk * cin, cout))

    b = jnp.zeros((1, cout_p), jnp.float32)
    b = b.at[:, :cout].set(0.01 * jax.random.normal(kb, (1, cout), jnp.float32))
    gamma = jnp.ones((1, cout_p), jnp.float32)    # BatchNorm2d default init
    beta = jnp.zeros((1, cout_p), jnp.float32)

    cfg = dict(k=k, pad=pad, cin=cin, cout=cout, cin_p=cin_p, cout_p=cout_p, kp=kp)
    prm = dict(w=w_packed, b=b, gamma=gamma, beta=beta)
    return cfg, prm, w                 # w (HWIO, f32) kept host-side for the reference only


def init_model(key, in_channels, out_channels, conv_filters):
    f = conv_filters
    keys = jax.random.split(key, 2 + 3 * NUM_RES_BLOCKS)
    cfgs, params, ref_w = {}, {}, {}
    cfgs["first"], params["first"], ref_w["first"] = _init_conv(
        keys[0], 'A', in_channels, f, 7, 3, False)
    cfgs["blocks"], params["blocks"], ref_w["blocks"] = [], [], []
    ki = 1
    for _ in range(NUM_RES_BLOCKS):
        c1c, c1p, c1w = _init_conv(keys[ki + 0], 'B', f, f // 2, 1, 0, True)
        c2c, c2p, c2w = _init_conv(keys[ki + 1], 'B', f // 2, f // 2, 3, 1, True)
        c3c, c3p, c3w = _init_conv(keys[ki + 2], 'B', f // 2, f, 1, 0, True)
        cfgs["blocks"].append(dict(c1=c1c, c2=c2c, c3=c3c))
        params["blocks"].append(dict(c1=c1p, c2=c2p, c3=c3p))
        ref_w["blocks"].append(dict(c1=c1w, c2=c2w, c3=c3w))
        ki += 3
    cfgs["last"], params["last"], ref_w["last"] = _init_conv(
        keys[ki], 'B', f, out_channels, 1, 0, True)
    return cfgs, params, ref_w


# ----------------------------------------------------------------------------
# Forward pass (mirrors the nn.Sequential of AutoregressiveColorPixelRCNN)
#   conv7x7(A) -> BN -> ReLU -> 8 x [resblock -> BN -> ReLU] -> conv1x1(B)
# BN+ReLU of a producer is applied lazily (fused) inside every consumer.
# ----------------------------------------------------------------------------
def forward(cfgs, params, x_nchw):
    """cfgs holds only static Python ints; bind it via functools.partial before jit."""
    x = jnp.transpose(x_nchw, (0, 2, 3, 1)).astype(jnp.float32)   # NCHW -> NHWC
    # MaskedConv2d('A', 7x7); BN partials only — affine+ReLU fused into consumers.
    y, sc, sh = masked_conv_layer(x, cfgs["first"], params["first"], relu=False, bn=True)
    # TODO(synk): each residual block could be fused into a single pallas_call with
    # halo'd spatial tiling, keeping the f/2-channel intermediates in VMEM scratch.
    for bc, bp in zip(cfgs["blocks"], params["blocks"]):
        a = masked_conv_layer(y, bc["c1"], bp["c1"], relu=True, bn=False,
                              pre_scale=sc, pre_shift=sh)            # h = relu(bn(y)) fused
        b2 = masked_conv_layer(a, bc["c2"], bp["c2"], relu=True, bn=False)
        y, sc, sh = masked_conv_layer(b2, bc["c3"], bp["c3"], relu=False, bn=True,
                                      residual=y, res_scale=sc, res_shift=sh)
    # AutoregressiveMaskedConv2d('B', 1x1): consumes the last BN output, no BN/ReLU after.
    out = masked_conv_layer(y, cfgs["last"], params["last"], relu=False, bn=False,
                            pre_scale=sc, pre_shift=sh, out_dtype=jnp.float32)
    out = out[..., :cfgs["last"]["cout"]]
    return jnp.transpose(out, (0, 3, 1, 2))                          # back to NCHW


# ----------------------------------------------------------------------------
# Pure-JAX reference (numerical sanity check; mirrors the kernel's bf16 cast points)
# ----------------------------------------------------------------------------
def reference_forward(cfgs, params, ref_w, x_nchw):
    f32 = jnp.float32
    x = jnp.transpose(x_nchw, (0, 2, 3, 1)).astype(f32)

    def conv(xin, cfg, prm, w):
        pad = cfg["pad"]
        y = jax.lax.conv_general_dilated(
            xin.astype(MATMUL_DTYPE), w.astype(MATMUL_DTYPE), (1, 1),
            [(pad, pad), (pad, pad)],
            dimension_numbers=("NHWC", "HWIO", "NHWC"),
            preferred_element_type=f32)
        return y + prm["b"][0, :cfg["cout"]].reshape(1, 1, 1, -1)

    def bn_affine(z, cfg, prm):
        mean = jnp.mean(z, axis=(0, 1, 2))
        var = jnp.maximum(jnp.mean(z * z, axis=(0, 1, 2)) - mean * mean, 0.0)
        scale = prm["gamma"][0, :cfg["cout"]] * jax.lax.rsqrt(var + BN_EPS)
        shift = prm["beta"][0, :cfg["cout"]] - mean * scale
        return scale, shift

    def consume(z, scale, shift):
        # producer stores bf16(z); consumer applies affine+ReLU in f32 (as in the kernel)
        return jnp.maximum(z.astype(ACT_DTYPE).astype(f32) * scale + shift, 0.0)

    z = conv(x, cfgs["first"], params["first"], ref_w["first"])
    sc, sh = bn_affine(z, cfgs["first"], params["first"])
    for bc, bp, bw in zip(cfgs["blocks"], params["blocks"], ref_w["blocks"]):
        hcur = consume(z, sc, sh)
        a = jnp.maximum(conv(hcur, bc["c1"], bp["c1"], bw["c1"]), 0.0)
        a = a.astype(ACT_DTYPE).astype(f32)          # kernel stores bf16 between layers
        b2 = jnp.maximum(conv(a, bc["c2"], bp["c2"], bw["c2"]), 0.0)
        b2 = b2.astype(ACT_DTYPE).astype(f32)
        z = conv(b2, bc["c3"], bp["c3"], bw["c3"]) + hcur
        sc, sh = bn_affine(z, bc["c3"], bp["c3"])
    hcur = consume(z, sc, sh)
    out = conv(hcur, cfgs["last"], params["last"], ref_w["last"])
    return jnp.transpose(out, (0, 3, 1, 2))


# ----------------------------------------------------------------------------
if __name__ == "__main__":
    key = jax.random.PRNGKey(0)
    kx, kparam = jax.random.split(key)

    # RGB input, 24 filters (divisible by 3 and 2), 12 output channels.
    # 32x32 spatial gives P = 2048 pixel rows -> 2 P-tiles (tile_p=1024) per layer.
    N, C_IN, H, W = 2, 3, 32, 32
    C_OUT, FILTERS = 12, 24

    x = jax.random.normal(kx, (N, C_IN, H, W), jnp.float32)
    cfgs, params, ref_w = init_model(kparam, C_IN, C_OUT, FILTERS)

    fwd = jax.jit(functools.partial(forward, cfgs))   # static cfg bound via closure
    y = fwd(params, x)
    jax.block_until_ready(y)

    assert y.shape == (N, C_OUT, H, W), y.shape
    assert bool(jnp.all(jnp.isfinite(y)))

    y_ref = reference_forward(cfgs, params, ref_w, x)
    max_err = float(jnp.max(jnp.abs(y - y_ref)))
    assert np.allclose(np.asarray(y), np.asarray(y_ref), rtol=3e-2, atol=3e-2), (
        f"mismatch vs pure-JAX reference (max abs diff {max_err:.4e})")

    print("KERNEL_OK")
</pallas_src>

<mosaic_0001>
module attributes {stable_mosaic.version = 11 : i64} {
  func.func @_conv_kernel(%arg0: i32, %arg1: memref<1024x256xbf16, #tpu.memory_space<vmem>>, %arg2: memref<256x128xbf16, #tpu.memory_space<vmem>>, %arg3: memref<1x128xf32, #tpu.memory_space<vmem>>, %arg4: memref<1024x128xbf16, #tpu.memory_space<vmem>>, %arg5: memref<8x128xf32, #tpu.memory_space<vmem>>) attributes {dimension_semantics = [#tpu.dimension_semantics<parallel>], iteration_bounds = array<i64: 2>, scalar_prefetch = 0 : i64, scratch_operands = 0 : i64, tpu.core_type = #tpu.core_type<tc>, window_params = [{transform_indices = @transform_0, window_bounds = array<i64: 1024, 256>}, {pipeline_mode = #tpu.pipeline_mode<synchronous>, transform_indices = @transform_1, window_bounds = array<i64: 256, 128>}, {pipeline_mode = #tpu.pipeline_mode<synchronous>, transform_indices = @transform_2, window_bounds = array<i64: 1, 128>}, {transform_indices = @transform_3, window_bounds = array<i64: 1024, 128>}, {transform_indices = @transform_4, window_bounds = array<i64: 8, 128>}]} {
    %c0 = arith.constant 0 : index
    %c0_0 = arith.constant 0 : index
    %0 = vector.load %arg1[%c0, %c0_0] : memref<1024x256xbf16, #tpu.memory_space<vmem>>, vector<1024x256xbf16>
    %c0_1 = arith.constant 0 : index
    %c0_2 = arith.constant 0 : index
    %1 = vector.load %arg2[%c0_1, %c0_2] : memref<256x128xbf16, #tpu.memory_space<vmem>>, vector<256x128xbf16>
    %cst = arith.constant dense<0.000000e+00> : vector<1024x128xf32>
    %2 = tpu.matmul %0, %1, %cst {dimension_numbers = #tpu.dot_dimension_numbers<[1], [0], [0], [1], [0, 0, 1, 1], [], []>} : vector<1024x256xbf16>, vector<256x128xbf16>, vector<1024x128xf32> -> vector<1024x128xf32>
    %c0_3 = arith.constant 0 : index
    %c0_4 = arith.constant 0 : index
    %3 = vector.load %arg3[%c0_3, %c0_4] : memref<1x128xf32, #tpu.memory_space<vmem>>, vector<1x128xf32>
    %4 = vector.broadcast %3 : vector<1x128xf32> to vector<1024x128xf32>
    %5 = arith.addf %2, %4 : vector<1024x128xf32>
    %6 = arith.truncf %5 : vector<1024x128xf32> to vector<1024x128xbf16>
    %c0_5 = arith.constant 0 : index
    %c0_6 = arith.constant 0 : index
    %7 = vector.load %arg4[%c0_5, %c0_6] : memref<1024x128xbf16, #tpu.memory_space<vmem>>, vector<1024x128xbf16>
    tpu.vector_store %arg4[%c0_5, %c0_6], %6 {strides = array<i32>} : memref<1024x128xbf16, #tpu.memory_space<vmem>>, vector<1024x128xbf16>,
    %cst_7 = arith.constant dense<0.000000e+00> : vector<128xf32>
    %8 = vector.multi_reduction <add>, %5, %cst_7 [0] : vector<1024x128xf32> to vector<128xf32>
    %9 = vector.shape_cast %8 : vector<128xf32> to vector<1x128xf32>
    %c0_8 = arith.constant 0 : index
    %c0_9 = arith.constant 0 : index
    %10 = vector.load %arg5[%c0_8, %c0_9] : memref<8x128xf32, #tpu.memory_space<vmem>>, vector<1x128xf32>
    tpu.vector_store %arg5[%c0_8, %c0_9], %9 {strides = array<i32>} : memref<8x128xf32, #tpu.memory_space<vmem>>, vector<1x128xf32>,
    %11 = arith.mulf %5, %5 : vector<1024x128xf32>
    %cst_10 = arith.constant dense<0.000000e+00> : vector<128xf32>
    %12 = vector.multi_reduction <add>, %11, %cst_10 [0] : vector<1024x128xf32> to vector<128xf32>
    %13 = vector.shape_cast %12 : vector<128xf32> to vector<1x128xf32>
    %c1 = arith.constant 1 : index
    %c0_11 = arith.constant 0 : index
    %14 = vector.load %arg5[%c1, %c0_11] : memref<8x128xf32, #tpu.memory_space<vmem>>, vector<1x128xf32>
    tpu.vector_store %arg5[%c1, %c0_11], %13 {strides = array<i32>} : memref<8x128xf32, #tpu.memory_space<vmem>>, vector<1x128xf32>,
    return
  }
  func.func @transform_0(%arg0: i32) -> (i32, i32) {
    %c0_i32 = arith.constant 0 : i32
    %c0_i32_0 = arith.constant 0 : i32
    return %arg0, %c0_i32 : i32, i32
  }
  func.func @transform_1(%arg0: i32) -> (i32, i32) {
    %c0_i32 = arith.constant 0 : i32
    %c0_i32_0 = arith.constant 0 : i32
    %c0_i32_1 = arith.constant 0 : i32
    return %c0_i32, %c0_i32_0 : i32, i32
  }
  func.func @transform_2(%arg0: i32) -> (i32, i32) {
    %c0_i32 = arith.constant 0 : i32
    %c0_i32_0 = arith.constant 0 : i32
    %c0_i32_1 = arith.constant 0 : i32
    return %c0_i32, %c0_i32_0 : i32, i32
  }
  func.func @transform_3(%arg0: i32) -> (i32, i32) {
    %c0_i32 = arith.constant 0 : i32
    %c0_i32_0 = arith.constant 0 : i32
    return %arg0, %c0_i32 : i32, i32
  }
  func.func @transform_4(%arg0: i32) -> (i32, i32) {
    %c0_i32 = arith.constant 0 : i32
    %c0_i32_0 = arith.constant 0 : i32
    return %arg0, %c0_i32 : i32, i32
  }
}

module attributes {stable_mosaic.version = 11 : i64} {
  func.func @_conv_kernel(%arg0: i32, %arg1: memref<1024x128xbf16, #tpu.memory_space<vmem>>, %arg2: memref<128x128xbf16, #tpu.memory_space<vmem>>, %arg3: memref<1x128xf32, #tpu.memory_space<vmem>>, %arg4: memref<1x128xf32, #tpu.memory_space<vmem>>, %arg5: memref<1x128xf32, #tpu.memory_space<vmem>>, %arg6: memref<1024x128xbf16, #tpu.memory_space<vmem>>) attributes {dimension_semantics = [#tpu.dimension_semantics<parallel>], iteration_bounds = array<i64: 2>, scalar_prefetch = 0 : i64, scratch_operands = 0 : i64, tpu.core_type = #tpu.core_type<tc>, window_params = [{transform_indices = @transform_0, window_bounds = array<i64: 1024, 128>}, {pipeline_mode = #tpu.pipeline_mode<synchronous>, transform_indices = @transform_1, window_bounds = array<i64: 128, 128>}, {pipeline_mode = #tpu.pipeline_mode<synchronous>, transform_indices = @transform_2, window_bounds = array<i64: 1, 128>}, {pipeline_mode = #tpu.pipeline_mode<synchronous>, transform_indices = @transform_3, window_bounds = array<i64: 1, 128>}, {pipeline_mode = #tpu.pipeline_mode<synchronous>, transform_indices = @transform_4, window_bounds = array<i64: 1, 128>}, {transform_indices = @transform_5, window_bounds = array<i64: 1024, 128>}]} {
    %c0 = arith.constant 0 : index
    %c0_0 = arith.constant 0 : index
    %0 = vector.load %arg1[%c0, %c0_0] : memref<1024x128xbf16, #tpu.memory_space<vmem>>, vector<1024x128xbf16>
    %1 = arith.extf %0 : vector<1024x128xbf16> to vector<1024x128xf32>
    %c0_1 = arith.constant 0 : index
    %c0_2 = arith.constant 0 : index
    %2 = vector.load %arg4[%c0_1, %c0_2] : memref<1x128xf32, #tpu.memory_space<vmem>>, vector<1x128xf32>
    %3 = vector.broadcast %2 : vector<1x128xf32> to vector<1024x128xf32>
    %4 = arith.mulf %1, %3 : vector<1024x128xf32>
    %c0_3 = arith.constant 0 : index
    %c0_4 = arith.constant 0 : index
    %5 = vector.load %arg5[%c0_3, %c0_4] : memref<1x128xf32, #tpu.memory_space<vmem>>, vector<1x128xf32>
    %6 = vector.broadcast %5 : vector<1x128xf32> to vector<1024x128xf32>
    %7 = arith.addf %4, %6 : vector<1024x128xf32>
    %cst = arith.constant 0.000000e+00 : f32
    %8 = vector.broadcast %cst : f32 to vector<1024x128xf32>
    %9 = arith.maximumf %7, %8 : vector<1024x128xf32>
    %10 = arith.truncf %9 : vector<1024x128xf32> to vector<1024x128xbf16>
    %c0_5 = arith.constant 0 : index
    %c0_6 = arith.constant 0 : index
    %11 = vector.load %arg2[%c0_5, %c0_6] : memref<128x128xbf16, #tpu.memory_space<vmem>>, vector<128x128xbf16>
    %cst_7 = arith.constant dense<0.000000e+00> : vector<1024x128xf32>
    %12 = tpu.matmul %10, %11, %cst_7 {dimension_numbers = #tpu.dot_dimension_numbers<[1], [0], [0], [1], [0, 0, 1, 1], [], []>} : vector<1024x128xbf16>, vector<128x128xbf16>, vector<1024x128xf32> -> vector<1024x128xf32>
    %c0_8 = arith.constant 0 : index
    %c0_9 = arith.constant 0 : index
    %13 = vector.load %arg3[%c0_8, %c0_9] : memref<1x128xf32, #tpu.memory_space<vmem>>, vector<1x128xf32>
    %14 = vector.broadcast %13 : vector<1x128xf32> to vector<1024x128xf32>
    %15 = arith.addf %12, %14 : vector<1024x128xf32>
    %cst_10 = arith.constant 0.000000e+00 : f32
    %16 = vector.broadcast %cst_10 : f32 to vector<1024x128xf32>
    %17 = arith.maximumf %15, %16 : vector<1024x128xf32>
    %18 = arith.truncf %17 : vector<1024x128xf32> to vector<1024x128xbf16>
    %c0_11 = arith.constant 0 : index
    %c0_12 = arith.constant 0 : index
    %19 = vector.load %arg6[%c0_11, %c0_12] : memref<1024x128xbf16, #tpu.memory_space<vmem>>, vector<1024x128xbf16>
    tpu.vector_store %arg6[%c0_11, %c0_12], %18 {strides = array<i32>} : memref<1024x128xbf16, #tpu.memory_space<vmem>>, vector<1024x128xbf16>,
    return
  }
  func.func @transform_0(%arg0: i32) -> (i32, i32) {
    %c0_i32 = arith.constant 0 : i32
    %c0_i32_0 = arith.constant 0 : i32
    return %arg0, %c0_i32 : i32, i32
  }
  func.func @transform_1(%arg0: i32) -> (i32, i32) {
    %c0_i32 = arith.constant 0 : i32
    %c0_i32_0 = arith.constant 0 : i32
    %c0_i32_1 = arith.constant 0 : i32
    return %c0_i32, %c0_i32_0 : i32, i32
  }
  func.func @transform_2(%arg0: i32) -> (i32, i32) {
    %c0_i32 = arith.constant 0 : i32
    %c0_i32_0 = arith.constant 0 : i32
    %c0_i32_1 = arith.constant 0 : i32
    return %c0_i32, %c0_i32_0 : i32, i32
  }
  func.func @transform_3(%arg0: i32) -> (i32, i32) {
    %c0_i32 = arith.constant 0 : i32
    %c0_i32_0 = arith.constant 0 : i32
    %c0_i32_1 = arith.constant 0 : i32
    return %c0_i32, %c0_i32_0 : i32, i32
  }
  func.func @transform_4(%arg0: i32) -> (i32, i32) {
    %c0_i32 = arith.constant 0 : i32
    %c0_i32_0 = arith.constant 0 : i32
    %c0_i32_1 = arith.constant 0 : i32
    return %c0_i32, %c0_i32_0 : i32, i32
  }
  func.func @transform_5(%arg0: i32) -> (i32, i32) {
    %c0_i32 = arith.constant 0 : i32
    %c0_i32_0 = arith.constant 0 : i32
    return %arg0, %c0_i32 : i32, i32
  }
}

module attributes {stable_mosaic.version = 11 : i64} {
  func.func @_conv_kernel(%arg0: i32, %arg1: memref<1024x128xbf16, #tpu.memory_space<vmem>>, %arg2: memref<128x128xbf16, #tpu.memory_space<vmem>>, %arg3: memref<1x128xf32, #tpu.memory_space<vmem>>, %arg4: memref<1024x128xbf16, #tpu.memory_space<vmem>>) attributes {dimension_semantics = [#tpu.dimension_semantics<parallel>], iteration_bounds = array<i64: 2>, scalar_prefetch = 0 : i64, scratch_operands = 0 : i64, tpu.core_type = #tpu.core_type<tc>, window_params = [{transform_indices = @transform_0, window_bounds = array<i64: 1024, 128>}, {pipeline_mode = #tpu.pipeline_mode<synchronous>, transform_indices = @transform_1, window_bounds = array<i64: 128, 128>}, {pipeline_mode = #tpu.pipeline_mode<synchronous>, transform_indices = @transform_2, window_bounds = array<i64: 1, 128>}, {transform_indices = @transform_3, window_bounds = array<i64: 1024, 128>}]} {
    %c0 = arith.constant 0 : index
    %c0_0 = arith.constant 0 : index
    %0 = vector.load %arg1[%c0, %c0_0] : memref<1024x128xbf16, #tpu.memory_space<vmem>>, vector<1024x128xbf16>
    %c0_1 = arith.constant 0 : index
    %c0_2 = arith.constant 0 : index
    %1 = vector.load %arg2[%c0_1, %c0_2] : memref<128x128xbf16, #tpu.memory_space<vmem>>, vector<128x128xbf16>
    %cst = arith.constant dense<0.000000e+00> : vector<1024x128xf32>
    %2 = tpu.matmul %0, %1, %cst {dimension_numbers = #tpu.dot_dimension_numbers<[1], [0], [0], [1], [0, 0, 1, 1], [], []>} : vector<1024x128xbf16>, vector<128x128xbf16>, vector<1024x128xf32> -> vector<1024x128xf32>
    %c0_3 = arith.constant 0 : index
    %c0_4 = arith.constant 0 : index
    %3 = vector.load %arg3[%c0_3, %c0_4] : memref<1x128xf32, #tpu.memory_space<vmem>>, vector<1x128xf32>
    %4 = vector.broadcast %3 : vector<1x128xf32> to vector<1024x128xf32>
    %5 = arith.addf %2, %4 : vector<1024x128xf32>
    %cst_5 = arith.constant 0.000000e+00 : f32
    %6 = vector.broadcast %cst_5 : f32 to vector<1024x128xf32>
    %7 = arith.maximumf %5, %6 : vector<1024x128xf32>
    %8 = arith.truncf %7 : vector<1024x128xf32> to vector<1024x128xbf16>
    %c0_6 = arith.constant 0 : index
    %c0_7 = arith.constant 0 : index
    %9 = vector.load %arg4[%c0_6, %c0_7] : memref<1024x128xbf16, #tpu.memory_space<vmem>>, vector<1024x128xbf16>
    tpu.vector_store %arg4[%c0_6, %c0_7], %8 {strides = array<i32>} : memref<1024x128xbf16, #tpu.memory_space<vmem>>, vector<1024x128xbf16>,
    return
  }
  func.func @transform_0(%arg0: i32) -> (i32, i32) {
    %c0_i32 = arith.constant 0 : i32
    %c0_i32_0 = arith.constant 0 : i32
    return %arg0, %c0_i32 : i32, i32
  }
  func.func @transform_1(%arg0: i32) -> (i32, i32) {
    %c0_i32 = arith.constant 0 : i32
    %c0_i32_0 = arith.constant 0 : i32
    %c0_i32_1 = arith.constant 0 : i32
    return %c0_i32, %c0_i32_0 : i32, i32
  }
  func.func @transform_2(%arg0: i32) -> (i32, i32) {
    %c0_i32 = arith.constant 0 : i32
    %c0_i32_0 = arith.constant 0 : i32
    %c0_i32_1 = arith.constant 0 : i32
    return %c0_i32, %c0_i32_0 : i32, i32
  }
  func.func @transform_3(%arg0: i32) -> (i32, i32) {
    %c0_i32 = arith.constant 0 : i32
    %c0_i32_0 = arith.constant 0 : i32
    return %arg0, %c0_i32 : i32, i32
  }
}

module attributes {stable_mosaic.version = 11 : i64} {
  func.func @_conv_kernel(%arg0: i32, %arg1: memref<1024x128xbf16, #tpu.memory_space<vmem>>, %arg2: memref<128x128xbf16, #tpu.memory_space<vmem>>, %arg3: memref<1x128xf32, #tpu.memory_space<vmem>>, %arg4: memref<1024x128xbf16, #tpu.memory_space<vmem>>, %arg5: memref<1x128xf32, #tpu.memory_space<vmem>>, %arg6: memref<1x128xf32, #tpu.memory_space<vmem>>, %arg7: memref<1024x128xbf16, #tpu.memory_space<vmem>>, %arg8: memref<8x128xf32, #tpu.memory_space<vmem>>) attributes {dimension_semantics = [#tpu.dimension_semantics<parallel>], iteration_bounds = array<i64: 2>, scalar_prefetch = 0 : i64, scratch_operands = 0 : i64, tpu.core_type = #tpu.core_type<tc>, window_params = [{transform_indices = @transform_0, window_bounds = array<i64: 1024, 128>}, {pipeline_mode = #tpu.pipeline_mode<synchronous>, transform_indices = @transform_1, window_bounds = array<i64: 128, 128>}, {pipeline_mode = #tpu.pipeline_mode<synchronous>, transform_indices = @transform_2, window_bounds = array<i64: 1, 128>}, {transform_indices = @transform_3, window_bounds = array<i64: 1024, 128>}, {pipeline_mode = #tpu.pipeline_mode<synchronous>, transform_indices = @transform_4, window_bounds = array<i64: 1, 128>}, {pipeline_mode = #tpu.pipeline_mode<synchronous>, transform_indices = @transform_5, window_bounds = array<i64: 1, 128>}, {transform_indices = @transform_6, window_bounds = array<i64: 1024, 128>}, {transform_indices = @transform_7, window_bounds = array<i64: 8, 128>}]} {
    %c0 = arith.constant 0 : index
    %c0_0 = arith.constant 0 : index
    %0 = vector.load %arg1[%c0, %c0_0] : memref<1024x128xbf16, #tpu.memory_space<vmem>>, vector<1024x128xbf16>
    %c0_1 = arith.constant 0 : index
    %c0_2 = arith.constant 0 : index
    %1 = vector.load %arg2[%c0_1, %c0_2] : memref<128x128xbf16, #tpu.memory_space<vmem>>, vector<128x128xbf16>
    %cst = arith.constant dense<0.000000e+00> : vector<1024x128xf32>
    %2 = tpu.matmul %0, %1, %cst {dimension_numbers = #tpu.dot_dimension_numbers<[1], [0], [0], [1], [0, 0, 1, 1], [], []>} : vector<1024x128xbf16>, vector<128x128xbf16>, vector<1024x128xf32> -> vector<1024x128xf32>
    %c0_3 = arith.constant 0 : index
    %c0_4 = arith.constant 0 : index
    %3 = vector.load %arg3[%c0_3, %c0_4] : memref<1x128xf32, #tpu.memory_space<vmem>>, vector<1x128xf32>
    %4 = vector.broadcast %3 : vector<1x128xf32> to vector<1024x128xf32>
    %5 = arith.addf %2, %4 : vector<1024x128xf32>
    %c0_5 = arith.constant 0 : index
    %c0_6 = arith.constant 0 : index
    %6 = vector.load %arg4[%c0_5, %c0_6] : memref<1024x128xbf16, #tpu.memory_space<vmem>>, vector<1024x128xbf16>
    %7 = arith.extf %6 : vector<1024x128xbf16> to vector<1024x128xf32>
    %c0_7 = arith.constant 0 : index
    %c0_8 = arith.constant 0 : index
    %8 = vector.load %arg5[%c0_7, %c0_8] : memref<1x128xf32, #tpu.memory_space<vmem>>, vector<1x128xf32>
    %9 = vector.broadcast %8 : vector<1x128xf32> to vector<1024x128xf32>
    %10 = arith.mulf %7, %9 : vector<1024x128xf32>
    %c0_9 = arith.constant 0 : index
    %c0_10 = arith.constant 0 : index
    %11 = vector.load %arg6[%c0_9, %c0_10] : memref<1x128xf32, #tpu.memory_space<vmem>>, vector<1x128xf32>
    %12 = vector.broadcast %11 : vector<1x128xf32> to vector<1024x128xf32>
    %13 = arith.addf %10, %12 : vector<1024x128xf32>
    %cst_11 = arith.constant 0.000000e+00 : f32
    %14 = vector.broadcast %cst_11 : f32 to vector<1024x128xf32>
    %15 = arith.maximumf %13, %14 : vector<1024x128xf32>
    %16 = arith.addf %5, %15 : vector<1024x128xf32>
    %17 = arith.truncf %16 : vector<1024x128xf32> to vector<1024x128xbf16>
    %c0_12 = arith.constant 0 : index
    %c0_13 = arith.constant 0 : index
    %18 = vector.load %arg7[%c0_12, %c0_13] : memref<1024x128xbf16, #tpu.memory_space<vmem>>, vector<1024x128xbf16>
    tpu.vector_store %arg7[%c0_12, %c0_13], %17 {strides = array<i32>} : memref<1024x128xbf16, #tpu.memory_space<vmem>>, vector<1024x128xbf16>,
    %cst_14 = arith.constant dense<0.000000e+00> : vector<128xf32>
    %19 = vector.multi_reduction <add>, %16, %cst_14 [0] : vector<1024x128xf32> to vector<128xf32>
    %20 = vector.shape_cast %19 : vector<128xf32> to vector<1x128xf32>
    %c0_15 = arith.constant 0 : index
    %c0_16 = arith.constant 0 : index
    %21 = vector.load %arg8[%c0_15, %c0_16] : memref<8x128xf32, #tpu.memory_space<vmem>>, vector<1x128xf32>
    tpu.vector_store %arg8[%c0_15, %c0_16], %20 {strides = array<i32>} : memref<8x128xf32, #tpu.memory_space<vmem>>, vector<1x128xf32>,
    %22 = arith.mulf %16, %16 : vector<1024x128xf32>
    %cst_17 = arith.constant dense<0.000000e+00> : vector<128xf32>
    %23 = vector.multi_reduction <add>, %22, %cst_17 [0] : vector<1024x128xf32> to vector<128xf32>
    %24 = vector.shape_cast %23 : vector<128xf32> to vector<1x128xf32>
    %c1 = arith.constant 1 : index
    %c0_18 = arith.constant 0 : index
    %25 = vector.load %arg8[%c1, %c0_18] : memref<8x128xf32, #tpu.memory_space<vmem>>, vector<1x128xf32>
    tpu.vector_store %arg8[%c1, %c0_18], %24 {strides = array<i32>} : memref<8x128xf32, #tpu.memory_space<vmem>>, vector<1x128xf32>,
    return
  }
  func.func @transform_0(%arg0: i32) -> (i32, i32) {
    %c0_i32 = arith.constant 0 : i32
    %c0_i32_0 = arith.constant 0 : i32
    return %arg0, %c0_i32 : i32, i32
  }
  func.func @transform_1(%arg0: i32) -> (i32, i32) {
    %c0_i32 = arith.constant 0 : i32
    %c0_i32_0 = arith.constant 0 : i32
    %c0_i32_1 = arith.constant 0 : i32
    return %c0_i32, %c0_i32_0 : i32, i32
  }
  func.func @transform_2(%arg0: i32) -> (i32, i32) {
    %c0_i32 = arith.constant 0 : i32
    %c0_i32_0 = arith.constant 0 : i32
    %c0_i32_1 = arith.constant 0 : i32
    return %c0_i32, %c0_i32_0 : i32, i32
  }
  func.func @transform_3(%arg0: i32) -> (i32, i32) {
    %c0_i32 = arith.constant 0 : i32
    %c0_i32_0 = arith.constant 0 : i32
    return %arg0, %c0_i32 : i32, i32
  }
  func.func @transform_4(%arg0: i32) -> (i32, i32) {
    %c0_i32 = arith.constant 0 : i32
    %c0_i32_0 = arith.constant 0 : i32
    %c0_i32_1 = arith.constant 0 : i32
    return %c0_i32, %c0_i32_0 : i32, i32
  }
  func.func @transform_5(%arg0: i32) -> (i32, i32) {
    %c0_i32 = arith.constant 0 : i32
    %c0_i32_0 = arith.constant 0 : i32
    %c0_i32_1 = arith.constant 0 : i32
    return %c0_i32, %c0_i32_0 : i32, i32
  }
  func.func @transform_6(%arg0: i32) -> (i32, i32) {
    %c0_i32 = arith.constant 0 : i32
    %c0_i32_0 = arith.constant 0 : i32
    return %arg0, %c0_i32 : i32, i32
  }
  func.func @transform_7(%arg0: i32) -> (i32, i32) {
    %c0_i32 = arith.constant 0 : i32
    %c0_i32_0 = arith.constant 0 : i32
    return %arg0, %c0_i32 : i32, i32
  }
}

module attributes {stable_mosaic.version = 11 : i64} {
  func.func @_conv_kernel(%arg0: i32, %arg1: memref<1024x128xbf16, #tpu.memory_space<vmem>>, %arg2: memref<128x128xbf16, #tpu.memory_space<vmem>>, %arg3: memref<1x128xf32, #tpu.memory_space<vmem>>, %arg4: memref<1x128xf32, #tpu.memory_space<vmem>>, %arg5: memref<1x128xf32, #tpu.memory_space<vmem>>, %arg6: memref<1024x128xf32, #tpu.memory_space<vmem>>) attributes {dimension_semantics = [#tpu.dimension_semantics<parallel>], iteration_bounds = array<i64: 2>, scalar_prefetch = 0 : i64, scratch_operands = 0 : i64, tpu.core_type = #tpu.core_type<tc>, window_params = [{transform_indices = @transform_0, window_bounds = array<i64: 1024, 128>}, {pipeline_mode = #tpu.pipeline_mode<synchronous>, transform_indices = @transform_1, window_bounds = array<i64: 128, 128>}, {pipeline_mode = #tpu.pipeline_mode<synchronous>, transform_indices = @transform_2, window_bounds = array<i64: 1, 128>}, {pipeline_mode = #tpu.pipeline_mode<synchronous>, transform_indices = @transform_3, window_bounds = array<i64: 1, 128>}, {pipeline_mode = #tpu.pipeline_mode<synchronous>, transform_indices = @transform_4, window_bounds = array<i64: 1, 128>}, {transform_indices = @transform_5, window_bounds = array<i64: 1024, 128>}]} {
    %c0 = arith.constant 0 : index
    %c0_0 = arith.constant 0 : index
    %0 = vector.load %arg1[%c0, %c0_0] : memref<1024x128xbf16, #tpu.memory_space<vmem>>, vector<1024x128xbf16>
    %1 = arith.extf %0 : vector<1024x128xbf16> to vector<1024x128xf32>
    %c0_1 = arith.constant 0 : index
    %c0_2 = arith.constant 0 : index
    %2 = vector.load %arg4[%c0_1, %c0_2] : memref<1x128xf32, #tpu.memory_space<vmem>>, vector<1x128xf32>
    %3 = vector.broadcast %2 : vector<1x128xf32> to vector<1024x128xf32>
    %4 = arith.mulf %1, %3 : vector<1024x128xf32>
    %c0_3 = arith.constant 0 : index
    %c0_4 = arith.constant 0 : index
    %5 = vector.load %arg5[%c0_3, %c0_4] : memref<1x128xf32, #tpu.memory_space<vmem>>, vector<1x128xf32>
    %6 = vector.broadcast %5 : vector<1x128xf32> to vector<1024x128xf32>
    %7 = arith.addf %4, %6 : vector<1024x128xf32>
    %cst = arith.constant 0.000000e+00 : f32
    %8 = vector.broadcast %cst : f32 to vector<1024x128xf32>
    %9 = arith.maximumf %7, %8 : vector<1024x128xf32>
    %10 = arith.truncf %9 : vector<1024x128xf32> to vector<1024x128xbf16>
    %c0_5 = arith.constant 0 : index
    %c0_6 = arith.constant 0 : index
    %11 = vector.load %arg2[%c0_5, %c0_6] : memref<128x128xbf16, #tpu.memory_space<vmem>>, vector<128x128xbf16>
    %cst_7 = arith.constant dense<0.000000e+00> : vector<1024x128xf32>
    %12 = tpu.matmul %10, %11, %cst_7 {dimension_numbers = #tpu.dot_dimension_numbers<[1], [0], [0], [1], [0, 0, 1, 1], [], []>} : vector<1024x128xbf16>, vector<128x128xbf16>, vector<1024x128xf32> -> vector<1024x128xf32>
    %c0_8 = arith.constant 0 : index
    %c0_9 = arith.constant 0 : index
    %13 = vector.load %arg3[%c0_8, %c0_9] : memref<1x128xf32, #tpu.memory_space<vmem>>, vector<1x128xf32>
    %14 = vector.broadcast %13 : vector<1x128xf32> to vector<1024x128xf32>
    %15 = arith.addf %12, %14 : vector<1024x128xf32>
    %c0_10 = arith.constant 0 : index
    %c0_11 = arith.constant 0 : index
    %16 = vector.load %arg6[%c0_10, %c0_11] : memref<1024x128xf32, #tpu.memory_space<vmem>>, vector<1024x128xf32>
    tpu.vector_store %arg6[%c0_10, %c0_11], %15 {strides = array<i32>} : memref<1024x128xf32, #tpu.memory_space<vmem>>, vector<1024x128xf32>,
    return
  }
  func.func @transform_0(%arg0: i32) -> (i32, i32) {
    %c0_i32 = arith.constant 0 : i32
    %c0_i32_0 = arith.constant 0 : i32
    return %arg0, %c0_i32 : i32, i32
  }
  func.func @transform_1(%arg0: i32) -> (i32, i32) {
    %c0_i32 = arith.constant 0 : i32
    %c0_i32_0 = arith.constant 0 : i32
    %c0_i32_1 = arith.constant 0 : i32
    return %c0_i32, %c0_i32_0 : i32, i32
  }
  func.func @transform_2(%arg0: i32) -> (i32, i32) {
    %c0_i32 = arith.constant 0 : i32
    %c0_i32_0 = arith.constant 0 : i32
    %c0_i32_1 = arith.constant 0 : i32
    return %c0_i32, %c0_i32_0 : i32, i32
  }
  func.func @transform_3(%arg0: i32) -> (i32, i32) {
    %c0_i32 = arith.constant 0 : i32
    %c0_i32_0 = arith.constant 0 : i32
    %c0_i32_1 = arith.constant 0 : i32
    return %c0_i32, %c0_i32_0 : i32, i32
  }
  func.func @transform_4(%arg0: i32) -> (i32, i32) {
    %c0_i32 = arith.constant 0 : i32
    %c0_i32_0 = arith.constant 0 : i32
    %c0_i32_1 = arith.constant 0 : i32
    return %c0_i32, %c0_i32_0 : i32, i32
  }
  func.func @transform_5(%arg0: i32) -> (i32, i32) {
    %c0_i32 = arith.constant 0 : i32
    %c0_i32_0 = arith.constant 0 : i32
    return %arg0, %c0_i32 : i32, i32
  }
}

</mosaic_0001>

<bundles_post_ra>
// kernel: forward.26
= control target key start
LH: loop header
LB: loop body
LE: loop exit
PB: predicated region body
PF: predicated region fallthrough
CT: control target
= control target key end

     0   :  { %s3869_s15 = smov 0   ;;  %s4696_s0 = inlined_call_operand.vmem [shape: bf16[2048,256], index: 0, kind: input, shape index: {}]   ;;  %s4697_s1 = inlined_call_operand.vmem [shape: bf16[256,128], index: 1, kind: input, shape index: {}]   ;;  %s4698_s2 = inlined_call_operand.vmem [shape: f32[1,128], index: 2, kind: input, shape index: {}]   ;;  %s4699_s3 = inlined_call_operand.vmem [shape: bf16[2048,128], index: 3, kind: output, shape index: {0}]   ;;  %s4700_s4 = inlined_call_operand.vmem [shape: f32[16,128], index: 4, kind: output, shape index: {1}]  }
   0x1 LB: > { %s3875_s16 = sadd.s32 4294967295, %s3841_s15   ;;  %p2791_p0 = scmp.ge.s32.totalorder %s3841_s15, 1  ;;  %s3841_s15 = sphi %s3869_s15, %s15_s15  }
   0x2   : > { %p167_p1 = scmp.lt.s32.totalorder %s3841_s15, 3 }
   0x4   : > { %p168_p2 = pnand %p2791_p0, %p167_p1 }
   0x6   : > { %171 = sbr.rel (%p168_p2) target bundleno = 687 (0x2af), region = 32 }
   0xd   : > { %v3626_v0 = vld [vmem:[%s4697_s1] sm:$0xff]   ;;  %v3843_v1 = vmov 0   ;;  %s2792_s19 = sshll.u32 %s3875_s16, 7  ;;  %v3627_v2 = vld [vmem:[%s4697_s1 + $0x8] sm:$0xff]   ;;  %v3628_v3 = vld [vmem:[%s4697_s1 + $0x10] sm:$0xff]   ;;  %p211_p4 = scmp.lt.s32.totalorder %s3875_s16, 1 }
   0xe   : > { %1119 = vmatprep.subr.bf16.mxu0 %v3843_v1  ;;  %3585 = vmatprep.subr.bf16.mxu1 %v3843_v1  ;;  %p199_p3 = scmp.lt.s32.totalorder %s2792_s19, 255  ;;  %v3629_v4 = vld [vmem:[%s4697_s1 + $0x18] sm:$0xff]   ;;  %v3630_v5 = vld [vmem:[%s4697_s1 + $0x20] sm:$0xff]   ;;  %v3631_v7 = vld [vmem:[%s4697_s1 + $0x28] sm:$0xff]  }
   0xf   : > { %1120 = vmatpush1.bf16.msra.mxu0 %v3626_v0  ;;  %3601 = vmatpush1.bf16.msra.mxu1 %v3626_v0  ;;  %v3632_v8 = vld [vmem:[%s4697_s1 + $0x30] sm:$0xff]   ;;  %v3633_v9 = vld [vmem:[%s4697_s1 + $0x38] sm:$0xff]   ;;  %v3634_v10 = vld [vmem:[%s4697_s1 + $0x40] sm:$0xff]   ;;  %s4772_s16 = smov (!%p211_p4, %s3875_s16), 1 }
  0x10   : > { %1121 = vmatprep.subr.bf16.mxu0 %v3843_v1  ;;  %3586 = vmatprep.subr.bf16.mxu1 %v3843_v1  ;;  %s4770_s19 = smov (!%p199_p3, %s2792_s19), 255  ;;  %v3635_v11 = vld [vmem:[%s4697_s1 + $0x48] sm:$0xff]   ;;  %v3636_v12 = vld [vmem:[%s4697_s1 + $0x50] sm:$0xff]   ;;  %v3637_v13 = vld [vmem:[%s4697_s1 + $0x58] sm:$0xff]   ;;  %s2797_s12 = sshll.u32 %s4772_s16, 3 }
  0x11   : > { %s3073_s26 = sshll.u32 %s4770_s19, 3  ;;  %v3638_v14 = vld [vmem:[%s4697_s1 + $0x60] sm:$0xff]   ;;  %v3639_v15 = vld [vmem:[%s4697_s1 + $0x68] sm:$0xff]   ;;  %v3640_v16 = vld [vmem:[%s4697_s1 + $0x70] sm:$0xff]   ;;  %s2796_s8 = sshll.u32 %s4770_s19, 2 }
  0x12   : > { %s3909_s5 = scalar_lea.vmem %s4696_s0, %s3073_s26  ;;  %v3641_v18 = vld [vmem:[%s4697_s1 + $0x78] sm:$0xff]   ;;  %s4098_s10 = scalar_lea.vmem %s4699_s3, %s2796_s8 }
  0x13   : > { %1122 = vmatpush1.bf16.msra.mxu0 %v3627_v2  ;;  %3602 = vmatpush1.bf16.msra.mxu1 %v3627_v2  ;;  %v3644_v6 = vld [vmem:[%s3909_s5 + $0x4] ss:$8 sps:$4 sm:$0xff]   ;;  %v3642_v19 = vld [vmem:[%s3909_s5] ss:$8 sps:$4 sm:$0xff]   ;;  %v3645_v21 = vld [vmem:[%s3909_s5 + $0x14] ss:$8 sps:$4 sm:$0xff]   ;;  %s214_s17 = scalar_lea.vmem %s4700_s4, %s2797_s12 }
  0x14   : > { %1123 = vmatprep.subr.bf16.mxu0 %v3843_v1  ;;  %3587 = vmatprep.subr.bf16.mxu1 %v3843_v1  ;;  %v3692_v17 = vld [vmem:[%s3909_s5 + $0x204] ss:$8 sps:$4 sm:$0xff]   ;;  %v3690_v20 = vld [vmem:[%s3909_s5 + $0x200] ss:$8 sps:$4 sm:$0xff]   ;;  %v3696_v22 = vld [vmem:[%s3909_s5 + $0x214] ss:$8 sps:$4 sm:$0xff]  }
  0x15   : > { %1151 = vmatprep.mubr.bf16.mxu0 %v3644_v6  ;;  %1407 = vmatprep.mubr.bf16.mxu1 %v3692_v17  ;;  %v3647_v23 = vld [vmem:[%s3909_s5 + $0x10] ss:$8 sps:$4 sm:$0xff]   ;;  %v3648_v25 = vld [vmem:[%s3909_s5 + $0x24] ss:$8 sps:$4 sm:$0xff]   ;;  %v3650_v27 = vld [vmem:[%s3909_s5 + $0x20] ss:$8 sps:$4 sm:$0xff]  }
  0x16   : > { %v3698_v24 = vld [vmem:[%s3909_s5 + $0x210] ss:$8 sps:$4 sm:$0xff]   ;;  %v3702_v26 = vld [vmem:[%s3909_s5 + $0x224] ss:$8 sps:$4 sm:$0xff]   ;;  %v3704_v28 = vld [vmem:[%s3909_s5 + $0x220] ss:$8 sps:$4 sm:$0xff]  }
  0x17   : > { %1124 = vmatpush1.bf16.msra.mxu0 %v3628_v3  ;;  %3603 = vmatpush1.bf16.msra.mxu1 %v3628_v3  ;;  %v3651_v29 = vld [vmem:[%s3909_s5 + $0x34] ss:$8 sps:$4 sm:$0xff]   ;;  %v3653_v31 = vld [vmem:[%s3909_s5 + $0x30] ss:$8 sps:$4 sm:$0xff]   ;;  %v3654_v33 = vld [vmem:[%s3909_s5 + $0x44] ss:$8 sps:$4 sm:$0xff]  }
  0x18   : > { %1125 = vmatprep.subr.bf16.mxu0 %v3843_v1  ;;  %3588 = vmatprep.subr.bf16.mxu1 %v3843_v1  ;;  %v3708_v30 = vld [vmem:[%s3909_s5 + $0x234] ss:$8 sps:$4 sm:$0xff]   ;;  %v3710_v32 = vld [vmem:[%s3909_s5 + $0x230] ss:$8 sps:$4 sm:$0xff]   ;;  %v3714_v34 = vld [vmem:[%s3909_s5 + $0x244] ss:$8 sps:$4 sm:$0xff]  }
  0x19   : > { %v3656_v35 = vld [vmem:[%s3909_s5 + $0x40] ss:$8 sps:$4 sm:$0xff]   ;;  %v3657_v37 = vld [vmem:[%s3909_s5 + $0x54] ss:$8 sps:$4 sm:$0xff]   ;;  %v3659_v39 = vld [vmem:[%s3909_s5 + $0x50] ss:$8 sps:$4 sm:$0xff]  }
  0x1a   : > { %v3716_v36 = vld [vmem:[%s3909_s5 + $0x240] ss:$8 sps:$4 sm:$0xff]   ;;  %v3720_v38 = vld [vmem:[%s3909_s5 + $0x254] ss:$8 sps:$4 sm:$0xff]   ;;  %v3722_v40 = vld [vmem:[%s3909_s5 + $0x250] ss:$8 sps:$4 sm:$0xff]  }
  0x1b   : > { %1126 = vmatpush1.bf16.msra.mxu0 %v3629_v4  ;;  %3604 = vmatpush1.bf16.msra.mxu1 %v3629_v4  ;;  %v3660_v41 = vld [vmem:[%s3909_s5 + $0x64] ss:$8 sps:$4 sm:$0xff]   ;;  %v3662_v43 = vld [vmem:[%s3909_s5 + $0x60] ss:$8 sps:$4 sm:$0xff]   ;;  %v3663_v45 = vld [vmem:[%s3909_s5 + $0x74] ss:$8 sps:$4 sm:$0xff]  }
  0x1c   : > { %1127 = vmatprep.subr.bf16.mxu0 %v3843_v1  ;;  %3589 = vmatprep.subr.bf16.mxu1 %v3843_v1  ;;  %v3726_v42 = vld [vmem:[%s3909_s5 + $0x264] ss:$8 sps:$4 sm:$0xff]   ;;  %v3728_v44 = vld [vmem:[%s3909_s5 + $0x260] ss:$8 sps:$4 sm:$0xff]   ;;  %v3732_v46 = vld [vmem:[%s3909_s5 + $0x274] ss:$8 sps:$4 sm:$0xff]  }
  0x1d   : > { %v3665_v47 = vld [vmem:[%s3909_s5 + $0x70] ss:$8 sps:$4 sm:$0xff]   ;;  %v3666_v49 = vld [vmem:[%s3909_s5 + $0x84] ss:$8 sps:$4 sm:$0xff]   ;;  %v3668_v51 = vld [vmem:[%s3909_s5 + $0x80] ss:$8 sps:$4 sm:$0xff]  }
  0x1e   : > { %v3734_v48 = vld [vmem:[%s3909_s5 + $0x270] ss:$8 sps:$4 sm:$0xff]   ;;  %v3738_v50 = vld [vmem:[%s3909_s5 + $0x284] ss:$8 sps:$4 sm:$0xff]   ;;  %v3740_v52 = vld [vmem:[%s3909_s5 + $0x280] ss:$8 sps:$4 sm:$0xff]  }
  0x1f   : > { %1128 = vmatpush1.bf16.msra.mxu0 %v3630_v5  ;;  %3605 = vmatpush1.bf16.msra.mxu1 %v3630_v5  ;;  %v3669_v53 = vld [vmem:[%s3909_s5 + $0x94] ss:$8 sps:$4 sm:$0xff]   ;;  %v3671_v55 = vld [vmem:[%s3909_s5 + $0x90] ss:$8 sps:$4 sm:$0xff]   ;;  %v3672_v57 = vld [vmem:[%s3909_s5 + $0xa4] ss:$8 sps:$4 sm:$0xff]  }
  0x20   : > { %1129 = vmatprep.subr.bf16.mxu0 %v3843_v1  ;;  %3590 = vmatprep.subr.bf16.mxu1 %v3843_v1  ;;  %v3744_v54 = vld [vmem:[%s3909_s5 + $0x294] ss:$8 sps:$4 sm:$0xff]   ;;  %v3746_v56 = vld [vmem:[%s3909_s5 + $0x290] ss:$8 sps:$4 sm:$0xff]   ;;  %v3750_v58 = vld [vmem:[%s3909_s5 + $0x2a4] ss:$8 sps:$4 sm:$0xff]  }
  0x21   : > { %v3674_v59 = vld [vmem:[%s3909_s5 + $0xa0] ss:$8 sps:$4 sm:$0xff]   ;;  %v3675_v61 = vld [vmem:[%s3909_s5 + $0xb4] ss:$8 sps:$4 sm:$0xff]   ;;  %v3677_v63 = vld [vmem:[%s3909_s5 + $0xb0] ss:$8 sps:$4 sm:$0xff]  }
  0x22   : > { %v3752_v60 = vld [vmem:[%s3909_s5 + $0x2a0] ss:$8 sps:$4 sm:$0xff]   ;;  %v3756_v62 = vld [vmem:[%s3909_s5 + $0x2b4] ss:$8 sps:$4 sm:$0xff]   ;;  %v3758_v0 = vld [vmem:[%s3909_s5 + $0x2b0] ss:$8 sps:$4 sm:$0xff]  }
  0x23   : > { %1130 = vmatpush1.bf16.msra.mxu0 %v3631_v7  ;;  %3606 = vmatpush1.bf16.msra.mxu1 %v3631_v7  ;;  %v3762_v2 = vld [vmem:[%s3909_s5 + $0x2c4] ss:$8 sps:$4 sm:$0xff]   ;;  %v3680_v3 = vld [vmem:[%s3909_s5 + $0xc0] ss:$8 sps:$4 sm:$0xff]   ;;  %v3681_v5 = vld [vmem:[%s3909_s5 + $0xd4] ss:$8 sps:$4 sm:$0xff]  }
  0x24   : > { %1131 = vmatprep.subr.bf16.mxu0 %v3843_v1  ;;  %3591 = vmatprep.subr.bf16.mxu1 %v3843_v1  ;;  %v3764_v4 = vld [vmem:[%s3909_s5 + $0x2c0] ss:$8 sps:$4 sm:$0xff]   ;;  %v3768_v6 = vld [vmem:[%s3909_s5 + $0x2d4] ss:$8 sps:$4 sm:$0xff]   ;;  %v3683_v7 = vld [vmem:[%s3909_s5 + $0xd0] ss:$8 sps:$4 sm:$0xff]  }
  0x25   : > { %v3693_v17 = vld [vmem:[%s3909_s5 + $0x104] ss:$8 sps:$4 sm:$0xff]  }
  0x27   : > { %1132 = vmatpush1.bf16.msra.mxu0 %v3632_v8  ;;  %3607 = vmatpush1.bf16.msra.mxu1 %v3632_v8  ;;  %v3770_v8 = vld [vmem:[%s3909_s5 + $0x2d0] ss:$8 sps:$4 sm:$0xff]  }
  0x28   : > { %1133 = vmatprep.subr.bf16.mxu0 %v3843_v1  ;;  %3592 = vmatprep.subr.bf16.mxu1 %v3843_v1 }
  0x2b   : > { %1134 = vmatpush1.bf16.msra.mxu0 %v3633_v9  ;;  %3608 = vmatpush1.bf16.msra.mxu1 %v3633_v9  ;;  %v3684_v9 = vld [vmem:[%s3909_s5 + $0xe4] ss:$8 sps:$4 sm:$0xff]  }
  0x2c   : > { %1135 = vmatprep.subr.bf16.mxu0 %v3843_v1  ;;  %3593 = vmatprep.subr.bf16.mxu1 %v3843_v1 }
  0x2f   : > { %1136 = vmatpush1.bf16.msra.mxu0 %v3634_v10  ;;  %3609 = vmatpush1.bf16.msra.mxu1 %v3634_v10  ;;  %v3774_v10 = vld [vmem:[%s3909_s5 + $0x2e4] ss:$8 sps:$4 sm:$0xff]  }
  0x30   : > { %1137 = vmatprep.subr.bf16.mxu0 %v3843_v1  ;;  %3594 = vmatprep.subr.bf16.mxu1 %v3843_v1 }
  0x33   : > { %1138 = vmatpush1.bf16.msra.mxu0 %v3635_v11  ;;  %3610 = vmatpush1.bf16.msra.mxu1 %v3635_v11  ;;  %v3686_v11 = vld [vmem:[%s3909_s5 + $0xe0] ss:$8 sps:$4 sm:$0xff]  }
  0x34   : > { %1139 = vmatprep.subr.bf16.mxu0 %v3843_v1  ;;  %3595 = vmatprep.subr.bf16.mxu1 %v3843_v1 }
  0x37   : > { %1140 = vmatpush1.bf16.msra.mxu0 %v3636_v12  ;;  %3611 = vmatpush1.bf16.msra.mxu1 %v3636_v12  ;;  %v3776_v12 = vld [vmem:[%s3909_s5 + $0x2e0] ss:$8 sps:$4 sm:$0xff]  }
  0x38   : > { %1141 = vmatprep.subr.bf16.mxu0 %v3843_v1  ;;  %3596 = vmatprep.subr.bf16.mxu1 %v3843_v1 }
  0x3b   : > { %1142 = vmatpush1.bf16.msra.mxu0 %v3637_v13  ;;  %3612 = vmatpush1.bf16.msra.mxu1 %v3637_v13  ;;  %v3687_v13 = vld [vmem:[%s3909_s5 + $0xf4] ss:$8 sps:$4 sm:$0xff]  }
  0x3c   : > { %1143 = vmatprep.subr.bf16.mxu0 %v3843_v1  ;;  %3597 = vmatprep.subr.bf16.mxu1 %v3843_v1 }
  0x3f   : > { %1144 = vmatpush1.bf16.msra.mxu0 %v3638_v14  ;;  %3613 = vmatpush1.bf16.msra.mxu1 %v3638_v14  ;;  %v3780_v14 = vld [vmem:[%s3909_s5 + $0x2f4] ss:$8 sps:$4 sm:$0xff]  }
  0x40   : > { %1145 = vmatprep.subr.bf16.mxu0 %v3843_v1  ;;  %3598 = vmatprep.subr.bf16.mxu1 %v3843_v1 }
  0x43   : > { %1146 = vmatpush1.bf16.msra.mxu0 %v3639_v15  ;;  %3614 = vmatpush1.bf16.msra.mxu1 %v3639_v15  ;;  %v3689_v15 = vld [vmem:[%s3909_s5 + $0xf0] ss:$8 sps:$4 sm:$0xff]  }
  0x44   : > { %1147 = vmatprep.subr.bf16.mxu0 %v3843_v1  ;;  %3599 = vmatprep.subr.bf16.mxu1 %v3843_v1 }
  0x47   : > { %1148 = vmatpush1.bf16.msra.mxu0 %v3640_v16  ;;  %3615 = vmatpush1.bf16.msra.mxu1 %v3640_v16  ;;  %v3782_v16 = vld [vmem:[%s3909_s5 + $0x2f0] ss:$8 sps:$4 sm:$0xff]  }
  0x48   : > { %1149 = vmatprep.subr.bf16.mxu0 %v3843_v1  ;;  %3600 = vmatprep.subr.bf16.mxu1 %v3843_v1  ;;  %v3678_v1 = vld [vmem:[%s3909_s5 + $0xc4] ss:$8 sps:$4 sm:$0xff]  }
  0x4b   : > { %1150 = vmatpush1.bf16.msra.mxu0 %v3641_v18  ;;  %3616 = vmatpush1.bf16.msra.mxu1 %v3641_v18  ;;  %v3786_v18 = vld [vmem:[%s3909_s5 + $0x304] ss:$8 sps:$4 sm:$0xff]  }
  0x4e   : > { %1152 = vmatmul.mubr.bf16.vlgmr.msra.gmra.mrb[0].mxu0 %v3642_v19  ;;  %1408 = vmatmul.mubr.bf16.vlgmr.msra.gmra.mrb[0].mxu1 %v3690_v20  ;;  %v3695_v19 = vld [vmem:[%s3909_s5 + $0x100] ss:$8 sps:$4 sm:$0xff]  }
  0x4f   : > { %1159 = vmatprep.mubr.bf16.mxu0 %v3645_v21  ;;  %1415 = vmatprep.mubr.bf16.mxu1 %v3696_v22  ;;  %v3788_v20 = vld [vmem:[%s3909_s5 + $0x300] ss:$8 sps:$4 sm:$0xff]   ;;  %v3699_v21 = vld [vmem:[%s3909_s5 + $0x114] ss:$8 sps:$4 sm:$0xff]  }
  0x50   : > { %v3789_v22 = vld [vmem:[%s3909_s5 + $0x314] ss:$8 sps:$4 sm:$0xff]  }
  0x56   : > { %1160 = vmatmul.mubr.bf16.gmra.mrb[4].mxu0 %v3647_v23  ;;  %1416 = vmatmul.mubr.bf16.gmra.mrb[4].mxu1 %v3698_v24  ;;  %v3701_v23 = vld [vmem:[%s3909_s5 + $0x110] ss:$8 sps:$4 sm:$0xff]  }
  0x57   : > { %1167 = vmatprep.mubr.bf16.mxu0 %v3648_v25  ;;  %1423 = vmatprep.mubr.bf16.mxu1 %v3702_v26  ;;  %v3791_v24 = vld [vmem:[%s3909_s5 + $0x310] ss:$8 sps:$4 sm:$0xff]   ;;  %v3705_v25 = vld [vmem:[%s3909_s5 + $0x124] ss:$8 sps:$4 sm:$0xff]  }
  0x58   : > { %v3792_v26 = vld [vmem:[%s3909_s5 + $0x324] ss:$8 sps:$4 sm:$0xff]  }
  0x5e   : > { %1168 = vmatmul.mubr.bf16.gmra.mrb[8].mxu0 %v3650_v27  ;;  %1424 = vmatmul.mubr.bf16.gmra.mrb[8].mxu1 %v3704_v28  ;;  %v3707_v27 = vld [vmem:[%s3909_s5 + $0x120] ss:$8 sps:$4 sm:$0xff]  }
  0x5f   : > { %1175 = vmatprep.mubr.bf16.mxu0 %v3651_v29  ;;  %1431 = vmatprep.mubr.bf16.mxu1 %v3708_v30  ;;  %v3794_v28 = vld [vmem:[%s3909_s5 + $0x320] ss:$8 sps:$4 sm:$0xff]   ;;  %v3711_v29 = vld [vmem:[%s3909_s5 + $0x134] ss:$8 sps:$4 sm:$0xff]  }
  0x60   : > { %v3795_v30 = vld [vmem:[%s3909_s5 + $0x334] ss:$8 sps:$4 sm:$0xff]  }
  0x66   : > { %1176 = vmatmul.mubr.bf16.gmra.mrb[12].mxu0 %v3653_v31  ;;  %1432 = vmatmul.mubr.bf16.gmra.mrb[12].mxu1 %v3710_v32  ;;  %v3713_v31 = vld [vmem:[%s3909_s5 + $0x130] ss:$8 sps:$4 sm:$0xff]  }
  0x67   : > { %1183 = vmatprep.mubr.bf16.mxu0 %v3654_v33  ;;  %1439 = vmatprep.mubr.bf16.mxu1 %v3714_v34  ;;  %v3797_v32 = vld [vmem:[%s3909_s5 + $0x330] ss:$8 sps:$4 sm:$0xff]   ;;  %v3717_v33 = vld [vmem:[%s3909_s5 + $0x144] ss:$8 sps:$4 sm:$0xff]  }
  0x68   : > { %v3798_v34 = vld [vmem:[%s3909_s5 + $0x344] ss:$8 sps:$4 sm:$0xff]  }
  0x6e   : > { %1184 = vmatmul.mubr.bf16.gmra.mrb[16].mxu0 %v3656_v35  ;;  %1440 = vmatmul.mubr.bf16.gmra.mrb[16].mxu1 %v3716_v36  ;;  %v3719_v35 = vld [vmem:[%s3909_s5 + $0x140] ss:$8 sps:$4 sm:$0xff]  }
  0x6f   : > { %1191 = vmatprep.mubr.bf16.mxu0 %v3657_v37  ;;  %1447 = vmatprep.mubr.bf16.mxu1 %v3720_v38  ;;  %v3800_v36 = vld [vmem:[%s3909_s5 + $0x340] ss:$8 sps:$4 sm:$0xff]   ;;  %v3723_v37 = vld [vmem:[%s3909_s5 + $0x154] ss:$8 sps:$4 sm:$0xff]  }
  0x70   : > { %v3801_v38 = vld [vmem:[%s3909_s5 + $0x354] ss:$8 sps:$4 sm:$0xff]  }
  0x76   : > { %1192 = vmatmul.mubr.bf16.gmra.mrb[20].mxu0 %v3659_v39  ;;  %1448 = vmatmul.mubr.bf16.gmra.mrb[20].mxu1 %v3722_v40  ;;  %v3725_v39 = vld [vmem:[%s3909_s5 + $0x150] ss:$8 sps:$4 sm:$0xff]  }
  0x77   : > { %1199 = vmatprep.mubr.bf16.mxu0 %v3660_v41  ;;  %1455 = vmatprep.mubr.bf16.mxu1 %v3726_v42  ;;  %v3803_v40 = vld [vmem:[%s3909_s5 + $0x350] ss:$8 sps:$4 sm:$0xff]   ;;  %v3729_v41 = vld [vmem:[%s3909_s5 + $0x164] ss:$8 sps:$4 sm:$0xff]  }
  0x78   : > { %v3804_v42 = vld [vmem:[%s3909_s5 + $0x364] ss:$8 sps:$4 sm:$0xff]  }
  0x7e   : > { %1200 = vmatmul.mubr.bf16.gmra.mrb[24].mxu0 %v3662_v43  ;;  %1456 = vmatmul.mubr.bf16.gmra.mrb[24].mxu1 %v3728_v44  ;;  %v3731_v43 = vld [vmem:[%s3909_s5 + $0x160] ss:$8 sps:$4 sm:$0xff]  }
  0x7f   : > { %1207 = vmatprep.mubr.bf16.mxu0 %v3663_v45  ;;  %1463 = vmatprep.mubr.bf16.mxu1 %v3732_v46  ;;  %v3806_v44 = vld [vmem:[%s3909_s5 + $0x360] ss:$8 sps:$4 sm:$0xff]   ;;  %v3735_v45 = vld [vmem:[%s3909_s5 + $0x174] ss:$8 sps:$4 sm:$0xff]  }
  0x80   : > { %v3807_v46 = vld [vmem:[%s3909_s5 + $0x374] ss:$8 sps:$4 sm:$0xff]  }
  0x86   : > { %1208 = vmatmul.mubr.bf16.gmra.mrb[28].mxu0 %v3665_v47  ;;  %1464 = vmatmul.mubr.bf16.gmra.mrb[28].mxu1 %v3734_v48  ;;  %v3737_v47 = vld [vmem:[%s3909_s5 + $0x170] ss:$8 sps:$4 sm:$0xff]  }
  0x87   : > { %1215 = vmatprep.mubr.bf16.mxu0 %v3666_v49  ;;  %1471 = vmatprep.mubr.bf16.mxu1 %v3738_v50  ;;  %v3809_v48 = vld [vmem:[%s3909_s5 + $0x370] ss:$8 sps:$4 sm:$0xff]   ;;  %v3741_v49 = vld [vmem:[%s3909_s5 + $0x184] ss:$8 sps:$4 sm:$0xff]  }
  0x88   : > { %v3810_v50 = vld [vmem:[%s3909_s5 + $0x384] ss:$8 sps:$4 sm:$0xff]  }
  0x8e   : > { %1216 = vmatmul.mubr.bf16.gmra.mrb[32].mxu0 %v3668_v51  ;;  %1472 = vmatmul.mubr.bf16.gmra.mrb[32].mxu1 %v3740_v52  ;;  %v3743_v51 = vld [vmem:[%s3909_s5 + $0x180] ss:$8 sps:$4 sm:$0xff]  }
  0x8f   : > { %1223 = vmatprep.mubr.bf16.mxu0 %v3669_v53  ;;  %1479 = vmatprep.mubr.bf16.mxu1 %v3744_v54  ;;  %v3812_v52 = vld [vmem:[%s3909_s5 + $0x380] ss:$8 sps:$4 sm:$0xff]   ;;  %v3747_v53 = vld [vmem:[%s3909_s5 + $0x194] ss:$8 sps:$4 sm:$0xff]  }
  0x90   : > { %v3813_v54 = vld [vmem:[%s3909_s5 + $0x394] ss:$8 sps:$4 sm:$0xff]  }
  0x96   : > { %1224 = vmatmul.mubr.bf16.gmra.mrb[36].mxu0 %v3671_v55  ;;  %1480 = vmatmul.mubr.bf16.gmra.mrb[36].mxu1 %v3746_v56  ;;  %v3749_v55 = vld [vmem:[%s3909_s5 + $0x190] ss:$8 sps:$4 sm:$0xff]  }
  0x97   : > { %1231 = vmatprep.mubr.bf16.mxu0 %v3672_v57  ;;  %1487 = vmatprep.mubr.bf16.mxu1 %v3750_v58  ;;  %v3815_v56 = vld [vmem:[%s3909_s5 + $0x390] ss:$8 sps:$4 sm:$0xff]   ;;  %v3753_v57 = vld [vmem:[%s3909_s5 + $0x1a4] ss:$8 sps:$4 sm:$0xff]  }
  0x98   : > { %v3816_v58 = vld [vmem:[%s3909_s5 + $0x3a4] ss:$8 sps:$4 sm:$0xff]  }
  0x9e   : > { %1232 = vmatmul.mubr.bf16.gmra.mrb[40].mxu0 %v3674_v59  ;;  %1488 = vmatmul.mubr.bf16.gmra.mrb[40].mxu1 %v3752_v60  ;;  %v3755_v59 = vld [vmem:[%s3909_s5 + $0x1a0] ss:$8 sps:$4 sm:$0xff]  }
  0x9f   : > { %1239 = vmatprep.mubr.bf16.mxu0 %v3675_v61  ;;  %1495 = vmatprep.mubr.bf16.mxu1 %v3756_v62  ;;  %v3818_v60 = vld [vmem:[%s3909_s5 + $0x3a0] ss:$8 sps:$4 sm:$0xff]   ;;  %v3759_v61 = vld [vmem:[%s3909_s5 + $0x1b4] ss:$8 sps:$4 sm:$0xff]  }
  0xa0   : > { %v4080_v62 = vld [vmem:[%s4698_s2] ss:$0 sm:$0xff] }
  0xa6   : > { %1240 = vmatmul.mubr.bf16.gmra.mrb[44].mxu0 %v3677_v63  ;;  %1496 = vmatmul.mubr.bf16.gmra.mrb[44].mxu1 %v3758_v0  ;;  %v3819_v63 = vld [vmem:[%s3909_s5 + $0x3b4] ss:$8 sps:$4 sm:$0xff]  }
  0xa7   : > { %1247 = vmatprep.mubr.bf16.mxu0 %v3678_v1  ;;  %1503 = vmatprep.mubr.bf16.mxu1 %v3762_v2 }
  0xae   : > { %1248 = vmatmul.mubr.bf16.gmra.mrb[48].mxu0 %v3680_v3  ;;  %1504 = vmatmul.mubr.bf16.gmra.mrb[48].mxu1 %v3764_v4  ;;  %v3761_v4 = vld [vmem:[%s3909_s5 + $0x1b0] ss:$8 sps:$4 sm:$0xff]  }
  0xaf   : > { %1255 = vmatprep.mubr.bf16.mxu0 %v3681_v5  ;;  %1511 = vmatprep.mubr.bf16.mxu1 %v3768_v6 }
  0xb6   : > { %1256 = vmatmul.mubr.bf16.gmra.mrb[52].mxu0 %v3683_v7  ;;  %1512 = vmatmul.mubr.bf16.gmra.mrb[52].mxu1 %v3770_v8  ;;  %v3765_v8 = vld [vmem:[%s3909_s5 + $0x1c4] ss:$8 sps:$4 sm:$0xff]  }
  0xb7   : > { %1263 = vmatprep.mubr.bf16.mxu0 %v3684_v9  ;;  %1519 = vmatprep.mubr.bf16.mxu1 %v3774_v10  ;;  %v3821_v10 = vld [vmem:[%s3909_s5 + $0x3b0] ss:$8 sps:$4 sm:$0xff]  }
  0xbe   : > { %1264 = vmatmul.mubr.bf16.gmra.mrb[56].mxu0 %v3686_v11  ;;  %1520 = vmatmul.mubr.bf16.gmra.mrb[56].mxu1 %v3776_v12 }
  0xbf   : > { %1271 = vmatprep.mubr.bf16.mxu0 %v3687_v13  ;;  %1527 = vmatprep.mubr.bf16.mxu1 %v3780_v14 }
  0xc6   : > { %1272 = vmatmul.mubr.bf16.gmra.mrb[60].mxu0 %v3689_v15  ;;  %1528 = vmatmul.mubr.bf16.gmra.mrb[60].mxu1 %v3782_v16 }
  0xc7   : > { %1279 = vmatprep.mubr.bf16.mxu0 %v3693_v17  ;;  %1535 = vmatprep.mubr.bf16.mxu1 %v3786_v18 }
  0xce   : > { %1280 = vmatmul.mubr.bf16.gmra.mrb[64].mxu0 %v3695_v19  ;;  %1536 = vmatmul.mubr.bf16.gmra.mrb[64].mxu1 %v3788_v20 }
  0xcf   : > { %1287 = vmatprep.mubr.bf16.mxu0 %v3699_v21  ;;  %1543 = vmatprep.mubr.bf16.mxu1 %v3789_v22  ;;  %v3822_v21 = vld [vmem:[%s3909_s5 + $0x3c4] ss:$8 sps:$4 sm:$0xff]  }
  0xd6   : > { %1288 = vmatmul.mubr.bf16.gmra.mrb[68].mxu0 %v3701_v23  ;;  %1544 = vmatmul.mubr.bf16.gmra.mrb[68].mxu1 %v3791_v24 }
  0xd7   : > { %1295 = vmatprep.mubr.bf16.mxu0 %v3705_v25  ;;  %1551 = vmatprep.mubr.bf16.mxu1 %v3792_v26  ;;  %v3767_v26 = vld [vmem:[%s3909_s5 + $0x1c0] ss:$8 sps:$4 sm:$0xff]  }
  0xde   : > { %1296 = vmatmul.mubr.bf16.gmra.mrb[72].mxu0 %v3707_v27  ;;  %1552 = vmatmul.mubr.bf16.gmra.mrb[72].mxu1 %v3794_v28 }
  0xdf   : > { %1303 = vmatprep.mubr.bf16.mxu0 %v3711_v29  ;;  %1559 = vmatprep.mubr.bf16.mxu1 %v3795_v30  ;;  %v3771_v29 = vld [vmem:[%s3909_s5 + $0x1d4] ss:$8 sps:$4 sm:$0xff]  }
  0xe6   : > { %1304 = vmatmul.mubr.bf16.gmra.mrb[76].mxu0 %v3713_v31  ;;  %1560 = vmatmul.mubr.bf16.gmra.mrb[76].mxu1 %v3797_v32  ;;  %v3824_v32 = vld [vmem:[%s3909_s5 + $0x3c0] ss:$8 sps:$4 sm:$0xff]  }
  0xe7   : > { %1311 = vmatprep.mubr.bf16.mxu0 %v3717_v33  ;;  %1567 = vmatprep.mubr.bf16.mxu1 %v3798_v34 }
  0xee   : > { %1312 = vmatmul.mubr.bf16.gmra.mrb[80].mxu0 %v3719_v35  ;;  %1568 = vmatmul.mubr.bf16.gmra.mrb[80].mxu1 %v3800_v36 }
  0xef   : > { %1319 = vmatprep.mubr.bf16.mxu0 %v3723_v37  ;;  %1575 = vmatprep.mubr.bf16.mxu1 %v3801_v38 }
  0xf6   : > { %1320 = vmatmul.mubr.bf16.gmra.mrb[84].mxu0 %v3725_v39  ;;  %1576 = vmatmul.mubr.bf16.gmra.mrb[84].mxu1 %v3803_v40 }
  0xf7   : > { %1327 = vmatprep.mubr.bf16.mxu0 %v3729_v41  ;;  %1583 = vmatprep.mubr.bf16.mxu1 %v3804_v42 }
  0xfe   : > { %1328 = vmatmul.mubr.bf16.gmra.mrb[88].mxu0 %v3731_v43  ;;  %1584 = vmatmul.mubr.bf16.gmra.mrb[88].mxu1 %v3806_v44 }
  0xff   : > { %1335 = vmatprep.mubr.bf16.mxu0 %v3735_v45  ;;  %1591 = vmatprep.mubr.bf16.mxu1 %v3807_v46  ;;  %v3825_v45 = vld [vmem:[%s3909_s5 + $0x3d4] ss:$8 sps:$4 sm:$0xff]  }
 0x106   : > { %1336 = vmatmul.mubr.bf16.gmra.mrb[92].mxu0 %v3737_v47  ;;  %1592 = vmatmul.mubr.bf16.gmra.mrb[92].mxu1 %v3809_v48 }
 0x107   : > { %1343 = vmatprep.mubr.bf16.mxu0 %v3741_v49  ;;  %1599 = vmatprep.mubr.bf16.mxu1 %v3810_v50  ;;  %v3773_v50 = vld [vmem:[%s3909_s5 + $0x1d0] ss:$8 sps:$4 sm:$0xff]  }
 0x10e   : > { %1344 = vmatmul.mubr.bf16.gmra.mrb[96].mxu0 %v3743_v51  ;;  %1600 = vmatmul.mubr.bf16.gmra.mrb[96].mxu1 %v3812_v52 }
 0x10f   : > { %1351 = vmatprep.mubr.bf16.mxu0 %v3747_v53  ;;  %1607 = vmatprep.mubr.bf16.mxu1 %v3813_v54  ;;  %v3777_v53 = vld [vmem:[%s3909_s5 + $0x1e4] ss:$8 sps:$4 sm:$0xff]  }
 0x116   : > { %1352 = vmatmul.mubr.bf16.gmra.mrb[100].mxu0 %v3749_v55  ;;  %1608 = vmatmul.mubr.bf16.gmra.mrb[100].mxu1 %v3815_v56  ;;  %v3827_v56 = vld [vmem:[%s3909_s5 + $0x3d0] ss:$8 sps:$4 sm:$0xff]  }
 0x117   : > { %1359 = vmatprep.mubr.bf16.mxu0 %v3753_v57  ;;  %1615 = vmatprep.mubr.bf16.mxu1 %v3816_v58 }
 0x11e   : > { %1360 = vmatmul.mubr.bf16.gmra.mrb[104].mxu0 %v3755_v59  ;;  %1616 = vmatmul.mubr.bf16.gmra.mrb[104].mxu1 %v3818_v60 }
 0x11f   : > { %1367 = vmatprep.mubr.bf16.mxu0 %v3759_v61  ;;  %1623 = vmatprep.mubr.bf16.mxu1 %v3819_v63 }
 0x121   : > { %v1153_v0 = vpop.f32.mrb[0].mxu0  ;;  %v1409_v1 = vpop.f32.mrb[0].mxu1 }
 0x122   : > { %v1154_v2 = vadd.f32 %v4080_v62, %v1153_v0  ;;  %v1155_v3 = vpop.f32.mrb[1].mxu0  ;;  %v4087_v5 = vadd.f32 %v4080_v62, %v1409_v1  ;;  %v1411_v6 = vpop.f32.mrb[1].mxu1 }
 0x123   : > { %v1156_v7 = vpop.f32.mrb[2].mxu0  ;;  %v1412_v9 = vpop.f32.mrb[2].mxu1 }
 0x124   : > { %v1157_v11 = vadd.f32 %v4080_v62, %v1156_v7  ;;  %v1158_v12 = vpop.f32.mrb[3].mxu0  ;;  %v4093_v13 = vadd.f32 %v4080_v62, %v1412_v9  ;;  %v1414_v14 = vpop.f32.mrb[3].mxu1  ;;  %v2438_v15 = vmul.f32 %v1154_v2, %v1154_v2  ;;  %v3828_v7 = vld [vmem:[%s3909_s5 + $0x3e4] ss:$8 sps:$4 sm:$0xff]  }
 0x125   : > { %v3779_v12 = vld [vmem:[%s3909_s5 + $0x1e0] ss:$8 sps:$4 sm:$0xff]  }
 0x126   : > { %v3205_v16 = vpack.c.bf16 %v1157_v11, %v1154_v2  ;;  %v2304_v17 = vadd.f32 %v1157_v11, %v1154_v2  ;;  %v2439_v18 = vmul.f32 %v1157_v11, %v1157_v11  ;;  %1368 = vmatmul.mubr.bf16.gmra.mrb[108].mxu0 %v3761_v4  ;;  %v3365_v19 = vpack.c.bf16 %v4093_v13, %v4087_v5 }
 0x127   : > { %1375 = vmatprep.mubr.bf16.mxu0 %v3765_v8  ;;  %1624 = vmatmul.mubr.bf16.gmra.mrb[108].mxu1 %v3821_v10 }
 0x128   : > { %3206 = vst [vmem:[%s4098_s10] sm:$0xff] %v3205_v16   ;;  %v2566_v20 = vadd.f32 %v2439_v18, %v2438_v15  ;;  %3553 = vst [vmem:[%s4098_s10 + $0x100] sm:$0xff] %v3365_v19   ;;  %1631 = vmatprep.mubr.bf16.mxu1 %v3822_v21  ;;  %v3783_v16 = vld [vmem:[%s3909_s5 + $0x1f4] ss:$8 sps:$4 sm:$0xff]   ;;  %v3830_v19 = vld [vmem:[%s3909_s5 + $0x3e0] ss:$8 sps:$4 sm:$0xff]  }
 0x129   : > { %v1161_v22 = vpop.f32.mrb[4].mxu0  ;;  %v1417_v23 = vpop.f32.mrb[4].mxu1 }
 0x12a   : > { %v1162_v24 = vadd.f32 %v4080_v62, %v1161_v22  ;;  %v1163_v25 = vpop.f32.mrb[5].mxu0  ;;  %v1419_v27 = vpop.f32.mrb[5].mxu1  ;;  %v4109_v30 = vadd.f32 %v4080_v62, %v1417_v23 }
 0x12b   : > { %v1164_v28 = vpop.f32.mrb[6].mxu0  ;;  %v1420_v31 = vpop.f32.mrb[6].mxu1 }
 0x12c   : > { %v2305_v33 = vadd.f32 %v2304_v17, %v1162_v24  ;;  %v2440_v34 = vmul.f32 %v1162_v24, %v1162_v24  ;;  %v1165_v35 = vadd.f32 %v4080_v62, %v1164_v28  ;;  %v1166_v36 = vpop.f32.mrb[7].mxu0  ;;  %v1422_v37 = vpop.f32.mrb[7].mxu1  ;;  %v4114_v38 = vadd.f32 %v4080_v62, %v1420_v31 }
 0x12e   : > { %v2567_v39 = vadd.f32 %v2566_v20, %v2440_v34  ;;  %v3210_v40 = vpack.c.bf16 %v1165_v35, %v1162_v24  ;;  %v2306_v41 = vadd.f32 %v2305_v33, %v1165_v35  ;;  %v2441_v42 = vmul.f32 %v1165_v35, %v1165_v35  ;;  %1376 = vmatmul.mubr.bf16.gmra.mrb[112].mxu0 %v3767_v26  ;;  %v3831_v33 = vld [vmem:[%s3909_s5 + $0x3f4] ss:$8 sps:$4 sm:$0xff]  }
 0x12f   : > { %1383 = vmatprep.mubr.bf16.mxu0 %v3771_v29  ;;  %v3370_v43 = vpack.c.bf16 %v4114_v38, %v4109_v30  ;;  %1632 = vmatmul.mubr.bf16.gmra.mrb[112].mxu1 %v3824_v32 }
 0x130   : > { %3522 = vst [vmem:[%s4098_s10 + $0x8] sm:$0xff] %v3210_v40   ;;  %v2568_v44 = vadd.f32 %v2567_v39, %v2441_v42  ;;  %1639 = vmatprep.mubr.bf16.mxu1 %v3825_v45  ;;  %v3785_v39 = vld [vmem:[%s3909_s5 + $0x1f0] ss:$8 sps:$4 sm:$0xff]  }
 0x131   : > { %v1169_v46 = vpop.f32.mrb[8].mxu0  ;;  %3554 = vst [vmem:[%s4098_s10 + $0x108] sm:$0xff] %v3370_v43   ;;  %v1425_v47 = vpop.f32.mrb[8].mxu1 }
 0x132   : > { %v1170_v48 = vadd.f32 %v4080_v62, %v1169_v46  ;;  %v1171_v49 = vpop.f32.mrb[9].mxu0  ;;  %v1427_v51 = vpop.f32.mrb[9].mxu1  ;;  %v4125_v54 = vadd.f32 %v4080_v62, %v1425_v47 }
 0x133   : > { %v1172_v52 = vpop.f32.mrb[10].mxu0  ;;  %v1428_v55 = vpop.f32.mrb[10].mxu1 }
 0x134   : > { %v2307_v57 = vadd.f32 %v2306_v41, %v1170_v48  ;;  %v2442_v58 = vmul.f32 %v1170_v48, %v1170_v48  ;;  %v1173_v59 = vadd.f32 %v4080_v62, %v1172_v52  ;;  %v1174_v60 = vpop.f32.mrb[11].mxu0  ;;  %v1430_v61 = vpop.f32.mrb[11].mxu1  ;;  %v4130_v63 = vadd.f32 %v4080_v62, %v1428_v55 }
 0x136   : > { %v2569_v0 = vadd.f32 %v2568_v44, %v2442_v58  ;;  %v3215_v1 = vpack.c.bf16 %v1173_v59, %v1170_v48  ;;  %v2308_v2 = vadd.f32 %v2307_v57, %v1173_v59  ;;  %v2443_v3 = vmul.f32 %v1173_v59, %v1173_v59  ;;  %1384 = vmatmul.mubr.bf16.gmra.mrb[116].mxu0 %v3773_v50  ;;  %v3833_v44 = vld [vmem:[%s3909_s5 + $0x3f0] ss:$8 sps:$4 sm:$0xff]  }
 0x137   : > { %1391 = vmatprep.mubr.bf16.mxu0 %v3777_v53  ;;  %v3375_v4 = vpack.c.bf16 %v4130_v63, %v4125_v54  ;;  %1640 = vmatmul.mubr.bf16.gmra.mrb[116].mxu1 %v3827_v56 }
 0x138   : > { %3523 = vst [vmem:[%s4098_s10 + $0x10] sm:$0xff] %v3215_v1   ;;  %v2570_v6 = vadd.f32 %v2569_v0, %v2443_v3  ;;  %1647 = vmatprep.mubr.bf16.mxu1 %v3828_v7 }
 0x139   : > { %v1177_v8 = vpop.f32.mrb[12].mxu0  ;;  %3555 = vst [vmem:[%s4098_s10 + $0x110] sm:$0xff] %v3375_v4   ;;  %v1433_v9 = vpop.f32.mrb[12].mxu1 }
 0x13a   : > { %v1178_v10 = vadd.f32 %v4080_v62, %v1177_v8  ;;  %v1179_v11 = vpop.f32.mrb[13].mxu0  ;;  %v1435_v14 = vpop.f32.mrb[13].mxu1  ;;  %v4141_v17 = vadd.f32 %v4080_v62, %v1433_v9 }
 0x13b   : > { %v1180_v15 = vpop.f32.mrb[14].mxu0  ;;  %v1436_v18 = vpop.f32.mrb[14].mxu1 }
 0x13c   : > { %v2309_v20 = vadd.f32 %v2308_v2, %v1178_v10  ;;  %v2444_v21 = vmul.f32 %v1178_v10, %v1178_v10  ;;  %v1181_v22 = vadd.f32 %v4080_v62, %v1180_v15  ;;  %v1182_v23 = vpop.f32.mrb[15].mxu0  ;;  %v1438_v24 = vpop.f32.mrb[15].mxu1  ;;  %v4146_v25 = vadd.f32 %v4080_v62, %v1436_v18 }
 0x13e   : > { %v2571_v26 = vadd.f32 %v2570_v6, %v2444_v21  ;;  %v3220_v27 = vpack.c.bf16 %v1181_v22, %v1178_v10  ;;  %v2310_v28 = vadd.f32 %v2309_v20, %v1181_v22  ;;  %v2445_v29 = vmul.f32 %v1181_v22, %v1181_v22  ;;  %1392 = vmatmul.mubr.bf16.gmra.mrb[120].mxu0 %v3779_v12 }
 0x13f   : > { %1399 = vmatprep.mubr.bf16.mxu0 %v3783_v16  ;;  %v3380_v31 = vpack.c.bf16 %v4146_v25, %v4141_v17  ;;  %1648 = vmatmul.mubr.bf16.gmra.mrb[120].mxu1 %v3830_v19 }
 0x140   : > { %3524 = vst [vmem:[%s4098_s10 + $0x18] sm:$0xff] %v3220_v27   ;;  %v2572_v32 = vadd.f32 %v2571_v26, %v2445_v29  ;;  %1655 = vmatprep.mubr.bf16.mxu1 %v3831_v33 }
 0x141   : > { %v1185_v34 = vpop.f32.mrb[16].mxu0  ;;  %3556 = vst [vmem:[%s4098_s10 + $0x118] sm:$0xff] %v3380_v31   ;;  %v1441_v35 = vpop.f32.mrb[16].mxu1 }
 0x142   : > { %v1186_v36 = vadd.f32 %v4080_v62, %v1185_v34  ;;  %v1187_v37 = vpop.f32.mrb[17].mxu0  ;;  %v1443_v40 = vpop.f32.mrb[17].mxu1  ;;  %v4156_v42 = vadd.f32 %v4080_v62, %v1441_v35 }
 0x143   : > { %v1188_v41 = vpop.f32.mrb[18].mxu0  ;;  %v1444_v43 = vpop.f32.mrb[18].mxu1 }
 0x144   : > { %v2311_v45 = vadd.f32 %v2310_v28, %v1186_v36  ;;  %v2446_v46 = vmul.f32 %v1186_v36, %v1186_v36  ;;  %v1189_v47 = vadd.f32 %v4080_v62, %v1188_v41  ;;  %v1190_v48 = vpop.f32.mrb[19].mxu0  ;;  %v1446_v49 = vpop.f32.mrb[19].mxu1  ;;  %v4161_v50 = vadd.f32 %v4080_v62, %v1444_v43 }
 0x146   : > { %v2573_v51 = vadd.f32 %v2572_v32, %v2446_v46  ;;  %v3225_v52 = vpack.c.bf16 %v1189_v47, %v1186_v36  ;;  %v2312_v53 = vadd.f32 %v2311_v45, %v1189_v47  ;;  %v2447_v55 = vmul.f32 %v1189_v47, %v1189_v47  ;;  %1400 = vmatmul.mubr.bf16.gmra.mrb[124].mxu0 %v3785_v39 }
 0x147   : > { %v3385_v56 = vpack.c.bf16 %v4161_v50, %v4156_v42  ;;  %1656 = vmatmul.mubr.bf16.gmra.mrb[124].mxu1 %v3833_v44 }
 0x148   : > { %3525 = vst [vmem:[%s4098_s10 + $0x20] sm:$0xff] %v3225_v52   ;;  %v2574_v57 = vadd.f32 %v2573_v51, %v2447_v55 }
 0x149   : > { %v1193_v58 = vpop.f32.mrb[20].mxu0  ;;  %3557 = vst [vmem:[%s4098_s10 + $0x120] sm:$0xff] %v3385_v56   ;;  %v1449_v59 = vpop.f32.mrb[20].mxu1 }
 0x14a   : > { %v1194_v60 = vadd.f32 %v4080_v62, %v1193_v58  ;;  %v1195_v61 = vpop.f32.mrb[21].mxu0  ;;  %v1451_v0 = vpop.f32.mrb[21].mxu1  ;;  %v4169_v2 = vadd.f32 %v4080_v62, %v1449_v59 }
 0x14b   : > { %v1196_v1 = vpop.f32.mrb[22].mxu0  ;;  %v1452_v3 = vpop.f32.mrb[22].mxu1 }
 0x14c   : > { %v2313_v4 = vadd.f32 %v2312_v53, %v1194_v60  ;;  %v2448_v6 = vmul.f32 %v1194_v60, %v1194_v60  ;;  %v1197_v7 = vadd.f32 %v4080_v62, %v1196_v1  ;;  %v1198_v8 = vpop.f32.mrb[23].mxu0  ;;  %v1454_v9 = vpop.f32.mrb[23].mxu1  ;;  %v4173_v10 = vadd.f32 %v4080_v62, %v1452_v3 }
 0x14e   : > { %v2575_v11 = vadd.f32 %v2574_v57, %v2448_v6  ;;  %v3230_v12 = vpack.c.bf16 %v1197_v7, %v1194_v60  ;;  %v2314_v14 = vadd.f32 %v2313_v4, %v1197_v7  ;;  %v2449_v15 = vmul.f32 %v1197_v7, %v1197_v7 }
 0x14f   : > { %v3390_v16 = vpack.c.bf16 %v4173_v10, %v4169_v2 }
 0x150   : > { %3526 = vst [vmem:[%s4098_s10 + $0x28] sm:$0xff] %v3230_v12   ;;  %v2576_v18 = vadd.f32 %v2575_v11, %v2449_v15 }
 0x151   : > { %v1201_v19 = vpop.f32.mrb[24].mxu0  ;;  %3558 = vst [vmem:[%s4098_s10 + $0x128] sm:$0xff] %v3390_v16   ;;  %v1457_v20 = vpop.f32.mrb[24].mxu1 }
 0x152   : > { %v1202_v21 = vadd.f32 %v4080_v62, %v1201_v19  ;;  %v1203_v22 = vpop.f32.mrb[25].mxu0  ;;  %v1459_v23 = vpop.f32.mrb[25].mxu1  ;;  %v4181_v26 = vadd.f32 %v4080_v62, %v1457_v20 }
 0x153   : > { %v1204_v24 = vpop.f32.mrb[26].mxu0  ;;  %v1460_v27 = vpop.f32.mrb[26].mxu1 }
 0x154   : > { %v2315_v28 = vadd.f32 %v2314_v14, %v1202_v21  ;;  %v2450_v29 = vmul.f32 %v1202_v21, %v1202_v21  ;;  %v1205_v31 = vadd.f32 %v4080_v62, %v1204_v24  ;;  %v1206_v32 = vpop.f32.mrb[27].mxu0  ;;  %v1462_v33 = vpop.f32.mrb[27].mxu1  ;;  %v4185_v34 = vadd.f32 %v4080_v62, %v1460_v27 }
 0x156   : > { %v2577_v35 = vadd.f32 %v2576_v18, %v2450_v29  ;;  %v3235_v36 = vpack.c.bf16 %v1205_v31, %v1202_v21  ;;  %v2316_v37 = vadd.f32 %v2315_v28, %v1205_v31  ;;  %v2451_v39 = vmul.f32 %v1205_v31, %v1205_v31 }
 0x157   : > { %v3395_v40 = vpack.c.bf16 %v4185_v34, %v4181_v26 }
 0x158   : > { %3527 = vst [vmem:[%s4098_s10 + $0x30] sm:$0xff] %v3235_v36   ;;  %v2578_v41 = vadd.f32 %v2577_v35, %v2451_v39 }
 0x159   : > { %v1209_v43 = vpop.f32.mrb[28].mxu0  ;;  %3559 = vst [vmem:[%s4098_s10 + $0x130] sm:$0xff] %v3395_v40   ;;  %v1465_v44 = vpop.f32.mrb[28].mxu1 }
 0x15a   : > { %v1210_v45 = vadd.f32 %v4080_v62, %v1209_v43  ;;  %v1211_v46 = vpop.f32.mrb[29].mxu0  ;;  %v1467_v47 = vpop.f32.mrb[29].mxu1  ;;  %v4193_v49 = vadd.f32 %v4080_v62, %v1465_v44 }
 0x15b   : > { %v1212_v48 = vpop.f32.mrb[30].mxu0  ;;  %v1468_v51 = vpop.f32.mrb[30].mxu1 }
 0x15c   : > { %v2317_v52 = vadd.f32 %v2316_v37, %v1210_v45  ;;  %v2452_v53 = vmul.f32 %v1210_v45, %v1210_v45  ;;  %v1213_v55 = vadd.f32 %v4080_v62, %v1212_v48  ;;  %v1214_v56 = vpop.f32.mrb[31].mxu0  ;;  %v1470_v57 = vpop.f32.mrb[31].mxu1  ;;  %v4197_v58 = vadd.f32 %v4080_v62, %v1468_v51 }
 0x15e   : > { %v2579_v59 = vadd.f32 %v2578_v41, %v2452_v53  ;;  %v3240_v60 = vpack.c.bf16 %v1213_v55, %v1210_v45  ;;  %v2318_v61 = vadd.f32 %v2317_v52, %v1213_v55  ;;  %v2453_v0 = vmul.f32 %v1213_v55, %v1213_v55 }
 0x15f   : > { %v3400_v1 = vpack.c.bf16 %v4197_v58, %v4193_v49 }
 0x160   : > { %3528 = vst [vmem:[%s4098_s10 + $0x38] sm:$0xff] %v3240_v60   ;;  %v2580_v3 = vadd.f32 %v2579_v59, %v2453_v0 }
 0x161   : > { %v1217_v4 = vpop.f32.mrb[32].mxu0  ;;  %3560 = vst [vmem:[%s4098_s10 + $0x138] sm:$0xff] %v3400_v1   ;;  %v1473_v6 = vpop.f32.mrb[32].mxu1 }
 0x162   : > { %v1218_v7 = vadd.f32 %v4080_v62, %v1217_v4  ;;  %v1219_v8 = vpop.f32.mrb[33].mxu0  ;;  %v1475_v9 = vpop.f32.mrb[33].mxu1  ;;  %v4205_v12 = vadd.f32 %v4080_v62, %v1473_v6 }
 0x163   : > { %v1220_v11 = vpop.f32.mrb[34].mxu0  ;;  %v1476_v14 = vpop.f32.mrb[34].mxu1 }
 0x164   : > { %v2319_v15 = vadd.f32 %v2318_v61, %v1218_v7  ;;  %v2454_v16 = vmul.f32 %v1218_v7, %v1218_v7  ;;  %v1221_v18 = vadd.f32 %v4080_v62, %v1220_v11  ;;  %v1222_v19 = vpop.f32.mrb[35].mxu0  ;;  %v1478_v20 = vpop.f32.mrb[35].mxu1  ;;  %v4209_v21 = vadd.f32 %v4080_v62, %v1476_v14 }
 0x166   : > { %v2581_v22 = vadd.f32 %v2580_v3, %v2454_v16  ;;  %v3245_v23 = vpack.c.bf16 %v1221_v18, %v1218_v7  ;;  %v2320_v24 = vadd.f32 %v2319_v15, %v1221_v18  ;;  %v2455_v27 = vmul.f32 %v1221_v18, %v1221_v18 }
 0x167   : > { %v3405_v28 = vpack.c.bf16 %v4209_v21, %v4205_v12 }
 0x168   : > { %3529 = vst [vmem:[%s4098_s10 + $0x40] sm:$0xff] %v3245_v23   ;;  %v2582_v29 = vadd.f32 %v2581_v22, %v2455_v27 }
 0x169   : > { %v1225_v31 = vpop.f32.mrb[36].mxu0  ;;  %3561 = vst [vmem:[%s4098_s10 + $0x140] sm:$0xff] %v3405_v28   ;;  %v1481_v32 = vpop.f32.mrb[36].mxu1 }
 0x16a   : > { %v1226_v33 = vadd.f32 %v4080_v62, %v1225_v31  ;;  %v1227_v35 = vpop.f32.mrb[37].mxu0  ;;  %v1483_v36 = vpop.f32.mrb[37].mxu1  ;;  %v4217_v39 = vadd.f32 %v4080_v62, %v1481_v32 }
 0x16b   : > { %v1228_v37 = vpop.f32.mrb[38].mxu0  ;;  %v1484_v40 = vpop.f32.mrb[38].mxu1 }
 0x16c   : > { %v2321_v41 = vadd.f32 %v2320_v24, %v1226_v33  ;;  %v2456_v43 = vmul.f32 %v1226_v33, %v1226_v33  ;;  %v1229_v44 = vadd.f32 %v4080_v62, %v1228_v37  ;;  %v1230_v45 = vpop.f32.mrb[39].mxu0  ;;  %v1486_v46 = vpop.f32.mrb[39].mxu1  ;;  %v4221_v47 = vadd.f32 %v4080_v62, %v1484_v40 }
 0x16e   : > { %v2583_v48 = vadd.f32 %v2582_v29, %v2456_v43  ;;  %v3250_v51 = vpack.c.bf16 %v1229_v44, %v1226_v33  ;;  %v2322_v52 = vadd.f32 %v2321_v41, %v1229_v44  ;;  %v2457_v53 = vmul.f32 %v1229_v44, %v1229_v44 }
 0x16f   : > { %v3410_v55 = vpack.c.bf16 %v4221_v47, %v4217_v39 }
 0x170   : > { %3530 = vst [vmem:[%s4098_s10 + $0x48] sm:$0xff] %v3250_v51   ;;  %v2584_v56 = vadd.f32 %v2583_v48, %v2457_v53 }
 0x171   : > { %v1233_v57 = vpop.f32.mrb[40].mxu0  ;;  %3562 = vst [vmem:[%s4098_s10 + $0x148] sm:$0xff] %v3410_v55   ;;  %v1489_v59 = vpop.f32.mrb[40].mxu1 }
 0x172   : > { %v1234_v60 = vadd.f32 %v4080_v62, %v1233_v57  ;;  %v1235_v61 = vpop.f32.mrb[41].mxu0  ;;  %v1491_v0 = vpop.f32.mrb[41].mxu1  ;;  %v4229_v3 = vadd.f32 %v4080_v62, %v1489_v59 }
 0x173   : > { %v1236_v1 = vpop.f32.mrb[42].mxu0  ;;  %v1492_v4 = vpop.f32.mrb[42].mxu1 }
 0x174   : > { %v2323_v6 = vadd.f32 %v2322_v52, %v1234_v60  ;;  %v2458_v7 = vmul.f32 %v1234_v60, %v1234_v60  ;;  %v1237_v8 = vadd.f32 %v4080_v62, %v1236_v1  ;;  %v1238_v9 = vpop.f32.mrb[43].mxu0  ;;  %v1494_v11 = vpop.f32.mrb[43].mxu1  ;;  %v4233_v14 = vadd.f32 %v4080_v62, %v1492_v4 }
 0x176   : > { %v2585_v15 = vadd.f32 %v2584_v56, %v2458_v7  ;;  %v3255_v16 = vpack.c.bf16 %v1237_v8, %v1234_v60  ;;  %v2324_v18 = vadd.f32 %v2323_v6, %v1237_v8  ;;  %v2459_v19 = vmul.f32 %v1237_v8, %v1237_v8 }
 0x177   : > { %v3415_v20 = vpack.c.bf16 %v4233_v14, %v4229_v3 }
 0x178   : > { %3531 = vst [vmem:[%s4098_s10 + $0x50] sm:$0xff] %v3255_v16   ;;  %v2586_v22 = vadd.f32 %v2585_v15, %v2459_v19 }
 0x179   : > { %v1241_v23 = vpop.f32.mrb[44].mxu0  ;;  %3563 = vst [vmem:[%s4098_s10 + $0x150] sm:$0xff] %v3415_v20   ;;  %v1497_v24 = vpop.f32.mrb[44].mxu1 }
 0x17a   : > { %v1242_v27 = vadd.f32 %v4080_v62, %v1241_v23  ;;  %v1243_v28 = vpop.f32.mrb[45].mxu0  ;;  %v1499_v29 = vpop.f32.mrb[45].mxu1  ;;  %v4241_v32 = vadd.f32 %v4080_v62, %v1497_v24 }
 0x17b   : > { %v1244_v31 = vpop.f32.mrb[46].mxu0  ;;  %v1500_v33 = vpop.f32.mrb[46].mxu1 }
 0x17c   : > { %v2325_v35 = vadd.f32 %v2324_v18, %v1242_v27  ;;  %v2460_v36 = vmul.f32 %v1242_v27, %v1242_v27  ;;  %v1245_v37 = vadd.f32 %v4080_v62, %v1244_v31  ;;  %v1246_v40 = vpop.f32.mrb[47].mxu0  ;;  %v1502_v41 = vpop.f32.mrb[47].mxu1  ;;  %v4245_v43 = vadd.f32 %v4080_v62, %v1500_v33 }
 0x17e   : > { %v2587_v44 = vadd.f32 %v2586_v22, %v2460_v36  ;;  %v3260_v45 = vpack.c.bf16 %v1245_v37, %v1242_v27  ;;  %v2326_v46 = vadd.f32 %v2325_v35, %v1245_v37  ;;  %v2461_v48 = vmul.f32 %v1245_v37, %v1245_v37 }
 0x17f   : > { %v3420_v51 = vpack.c.bf16 %v4245_v43, %v4241_v32 }
 0x180   : > { %3532 = vst [vmem:[%s4098_s10 + $0x58] sm:$0xff] %v3260_v45   ;;  %v2588_v52 = vadd.f32 %v2587_v44, %v2461_v48 }
 0x181   : > { %v1249_v53 = vpop.f32.mrb[48].mxu0  ;;  %3564 = vst [vmem:[%s4098_s10 + $0x158] sm:$0xff] %v3420_v51   ;;  %v1505_v55 = vpop.f32.mrb[48].mxu1 }
 0x182   : > { %v1250_v56 = vadd.f32 %v4080_v62, %v1249_v53  ;;  %v1251_v57 = vpop.f32.mrb[49].mxu0  ;;  %v1507_v59 = vpop.f32.mrb[49].mxu1  ;;  %v4253_v61 = vadd.f32 %v4080_v62, %v1505_v55 }
 0x183   : > { %v1252_v60 = vpop.f32.mrb[50].mxu0  ;;  %v1508_v0 = vpop.f32.mrb[50].mxu1 }
 0x184   : > { %v2327_v1 = vadd.f32 %v2326_v46, %v1250_v56  ;;  %v2462_v4 = vmul.f32 %v1250_v56, %v1250_v56  ;;  %v1253_v6 = vadd.f32 %v4080_v62, %v1252_v60  ;;  %v1254_v7 = vpop.f32.mrb[51].mxu0  ;;  %v1510_v8 = vpop.f32.mrb[51].mxu1  ;;  %v4257_v9 = vadd.f32 %v4080_v62, %v1508_v0 }
 0x186   : > { %v2589_v11 = vadd.f32 %v2588_v52, %v2462_v4  ;;  %v3265_v15 = vpack.c.bf16 %v1253_v6, %v1250_v56  ;;  %v2328_v16 = vadd.f32 %v2327_v1, %v1253_v6  ;;  %v2463_v18 = vmul.f32 %v1253_v6, %v1253_v6 }
 0x187   : > { %v3425_v19 = vpack.c.bf16 %v4257_v9, %v4253_v61 }
 0x188   : > { %3533 = vst [vmem:[%s4098_s10 + $0x60] sm:$0xff] %v3265_v15   ;;  %v2590_v20 = vadd.f32 %v2589_v11, %v2463_v18 }
 0x189   : > { %v1257_v22 = vpop.f32.mrb[52].mxu0  ;;  %3565 = vst [vmem:[%s4098_s10 + $0x160] sm:$0xff] %v3425_v19   ;;  %v1513_v23 = vpop.f32.mrb[52].mxu1 }
 0x18a   : > { %v1258_v24 = vadd.f32 %v4080_v62, %v1257_v22  ;;  %v1259_v27 = vpop.f32.mrb[53].mxu0  ;;  %v1515_v28 = vpop.f32.mrb[53].mxu1  ;;  %v4265_v31 = vadd.f32 %v4080_v62, %v1513_v23 }
 0x18b   : > { %v1260_v29 = vpop.f32.mrb[54].mxu0  ;;  %v1516_v33 = vpop.f32.mrb[54].mxu1 }
 0x18c   : > { %v2329_v35 = vadd.f32 %v2328_v16, %v1258_v24  ;;  %v2464_v36 = vmul.f32 %v1258_v24, %v1258_v24  ;;  %v1261_v37 = vadd.f32 %v4080_v62, %v1260_v29  ;;  %v1262_v40 = vpop.f32.mrb[55].mxu0  ;;  %v1518_v41 = vpop.f32.mrb[55].mxu1  ;;  %v4269_v44 = vadd.f32 %v4080_v62, %v1516_v33 }
 0x18e   : > { %v2591_v45 = vadd.f32 %v2590_v20, %v2464_v36  ;;  %v3270_v46 = vpack.c.bf16 %v1261_v37, %v1258_v24  ;;  %v2330_v48 = vadd.f32 %v2329_v35, %v1261_v37  ;;  %v2465_v51 = vmul.f32 %v1261_v37, %v1261_v37 }
 0x18f   : > { %v3430_v52 = vpack.c.bf16 %v4269_v44, %v4265_v31 }
 0x190   : > { %3534 = vst [vmem:[%s4098_s10 + $0x68] sm:$0xff] %v3270_v46   ;;  %v2592_v53 = vadd.f32 %v2591_v45, %v2465_v51 }
 0x191   : > { %v1265_v55 = vpop.f32.mrb[56].mxu0  ;;  %3566 = vst [vmem:[%s4098_s10 + $0x168] sm:$0xff] %v3430_v52   ;;  %v1521_v56 = vpop.f32.mrb[56].mxu1 }
 0x192   : > { %v1266_v57 = vadd.f32 %v4080_v62, %v1265_v55  ;;  %v1267_v59 = vpop.f32.mrb[57].mxu0  ;;  %v1523_v60 = vpop.f32.mrb[57].mxu1  ;;  %v4277_v1 = vadd.f32 %v4080_v62, %v1521_v56 }
 0x193   : > { %v1268_v0 = vpop.f32.mrb[58].mxu0  ;;  %v1524_v4 = vpop.f32.mrb[58].mxu1 }
 0x194   : > { %v2331_v6 = vadd.f32 %v2330_v48, %v1266_v57  ;;  %v2466_v7 = vmul.f32 %v1266_v57, %v1266_v57  ;;  %v1269_v8 = vadd.f32 %v4080_v62, %v1268_v0  ;;  %v1270_v11 = vpop.f32.mrb[59].mxu0  ;;  %v1526_v15 = vpop.f32.mrb[59].mxu1  ;;  %v4281_v16 = vadd.f32 %v4080_v62, %v1524_v4 }
 0x196   : > { %v2593_v18 = vadd.f32 %v2592_v53, %v2466_v7  ;;  %v3275_v19 = vpack.c.bf16 %v1269_v8, %v1266_v57  ;;  %v2332_v20 = vadd.f32 %v2331_v6, %v1269_v8  ;;  %v2467_v22 = vmul.f32 %v1269_v8, %v1269_v8 }
 0x197   : > { %v3435_v23 = vpack.c.bf16 %v4281_v16, %v4277_v1 }
 0x198   : > { %3535 = vst [vmem:[%s4098_s10 + $0x70] sm:$0xff] %v3275_v19   ;;  %v2594_v24 = vadd.f32 %v2593_v18, %v2467_v22 }
 0x199   : > { %v1273_v27 = vpop.f32.mrb[60].mxu0  ;;  %3567 = vst [vmem:[%s4098_s10 + $0x170] sm:$0xff] %v3435_v23   ;;  %v1529_v28 = vpop.f32.mrb[60].mxu1 }
 0x19a   : > { %v1274_v29 = vadd.f32 %v4080_v62, %v1273_v27  ;;  %v1275_v33 = vpop.f32.mrb[61].mxu0  ;;  %v1531_v35 = vpop.f32.mrb[61].mxu1  ;;  %v4289_v37 = vadd.f32 %v4080_v62, %v1529_v28 }
 0x19b   : > { %v1276_v36 = vpop.f32.mrb[62].mxu0  ;;  %v1532_v40 = vpop.f32.mrb[62].mxu1 }
 0x19c   : > { %v2333_v41 = vadd.f32 %v2332_v20, %v1274_v29  ;;  %v2468_v45 = vmul.f32 %v1274_v29, %v1274_v29  ;;  %v1277_v46 = vadd.f32 %v4080_v62, %v1276_v36  ;;  %v1278_v48 = vpop.f32.mrb[63].mxu0  ;;  %v1534_v51 = vpop.f32.mrb[63].mxu1  ;;  %v4293_v52 = vadd.f32 %v4080_v62, %v1532_v40 }
 0x19e   : > { %v2595_v53 = vadd.f32 %v2594_v24, %v2468_v45  ;;  %v3280_v55 = vpack.c.bf16 %v1277_v46, %v1274_v29  ;;  %v2334_v56 = vadd.f32 %v2333_v41, %v1277_v46  ;;  %v2469_v57 = vmul.f32 %v1277_v46, %v1277_v46 }
 0x19f   : > { %v3440_v59 = vpack.c.bf16 %v4293_v52, %v4289_v37 }
 0x1a0   : > { %3536 = vst [vmem:[%s4098_s10 + $0x78] sm:$0xff] %v3280_v55   ;;  %v2596_v60 = vadd.f32 %v2595_v53, %v2469_v57 }
 0x1a1   : > { %v1281_v0 = vpop.f32.mrb[64].mxu0  ;;  %3568 = vst [vmem:[%s4098_s10 + $0x178] sm:$0xff] %v3440_v59   ;;  %v1537_v4 = vpop.f32.mrb[64].mxu1 }
 0x1a2   : > { %v1282_v6 = vadd.f32 %v4080_v62, %v1281_v0  ;;  %v1283_v7 = vpop.f32.mrb[65].mxu0  ;;  %v1539_v8 = vpop.f32.mrb[65].mxu1  ;;  %v4301_v15 = vadd.f32 %v4080_v62, %v1537_v4 }
 0x1a3   : > { %v1284_v11 = vpop.f32.mrb[66].mxu0  ;;  %v1540_v18 = vpop.f32.mrb[66].mxu1 }
 0x1a4   : > { %v2335_v19 = vadd.f32 %v2334_v56, %v1282_v6  ;;  %v2470_v20 = vmul.f32 %v1282_v6, %v1282_v6  ;;  %v1285_v22 = vadd.f32 %v4080_v62, %v1284_v11  ;;  %v1286_v23 = vpop.f32.mrb[67].mxu0  ;;  %v1542_v24 = vpop.f32.mrb[67].mxu1  ;;  %v4305_v27 = vadd.f32 %v4080_v62, %v1540_v18 }
 0x1a6   : > { %v2597_v28 = vadd.f32 %v2596_v60, %v2470_v20  ;;  %v3285_v29 = vpack.c.bf16 %v1285_v22, %v1282_v6  ;;  %v2336_v33 = vadd.f32 %v2335_v19, %v1285_v22  ;;  %v2471_v35 = vmul.f32 %v1285_v22, %v1285_v22 }
 0x1a7   : > { %v3445_v36 = vpack.c.bf16 %v4305_v27, %v4301_v15 }
 0x1a8   : > { %3537 = vst [vmem:[%s4098_s10 + $0x80] sm:$0xff] %v3285_v29   ;;  %v2598_v40 = vadd.f32 %v2597_v28, %v2471_v35 }
 0x1a9   : > { %v1289_v41 = vpop.f32.mrb[68].mxu0  ;;  %3569 = vst [vmem:[%s4098_s10 + $0x180] sm:$0xff] %v3445_v36   ;;  %v1545_v45 = vpop.f32.mrb[68].mxu1 }
 0x1aa   : > { %v1290_v46 = vadd.f32 %v4080_v62, %v1289_v41  ;;  %v1291_v48 = vpop.f32.mrb[69].mxu0  ;;  %v1547_v51 = vpop.f32.mrb[69].mxu1  ;;  %v4313_v55 = vadd.f32 %v4080_v62, %v1545_v45 }
 0x1ab   : > { %v1292_v53 = vpop.f32.mrb[70].mxu0  ;;  %v1548_v56 = vpop.f32.mrb[70].mxu1 }
 0x1ac   : > { %v2337_v57 = vadd.f32 %v2336_v33, %v1290_v46  ;;  %v2472_v59 = vmul.f32 %v1290_v46, %v1290_v46  ;;  %v1293_v60 = vadd.f32 %v4080_v62, %v1292_v53  ;;  %v1294_v0 = vpop.f32.mrb[71].mxu0  ;;  %v1550_v4 = vpop.f32.mrb[71].mxu1  ;;  %v4317_v6 = vadd.f32 %v4080_v62, %v1548_v56 }
 0x1ae   : > { %v2599_v7 = vadd.f32 %v2598_v40, %v2472_v59  ;;  %v3290_v8 = vpack.c.bf16 %v1293_v60, %v1290_v46  ;;  %v2338_v11 = vadd.f32 %v2337_v57, %v1293_v60  ;;  %v2473_v18 = vmul.f32 %v1293_v60, %v1293_v60 }
 0x1af   : > { %v3450_v19 = vpack.c.bf16 %v4317_v6, %v4313_v55 }
 0x1b0   : > { %3538 = vst [vmem:[%s4098_s10 + $0x88] sm:$0xff] %v3290_v8   ;;  %v2600_v20 = vadd.f32 %v2599_v7, %v2473_v18 }
 0x1b1   : > { %v1297_v22 = vpop.f32.mrb[72].mxu0  ;;  %3570 = vst [vmem:[%s4098_s10 + $0x188] sm:$0xff] %v3450_v19   ;;  %v1553_v23 = vpop.f32.mrb[72].mxu1 }
 0x1b2   : > { %v1298_v24 = vadd.f32 %v4080_v62, %v1297_v22  ;;  %v1299_v28 = vpop.f32.mrb[73].mxu0  ;;  %v1555_v29 = vpop.f32.mrb[73].mxu1  ;;  %v4325_v35 = vadd.f32 %v4080_v62, %v1553_v23 }
 0x1b3   : > { %v1300_v33 = vpop.f32.mrb[74].mxu0  ;;  %v1556_v36 = vpop.f32.mrb[74].mxu1 }
 0x1b4   : > { %v2339_v40 = vadd.f32 %v2338_v11, %v1298_v24  ;;  %v2474_v41 = vmul.f32 %v1298_v24, %v1298_v24  ;;  %v1301_v45 = vadd.f32 %v4080_v62, %v1300_v33  ;;  %v1302_v46 = vpop.f32.mrb[75].mxu0  ;;  %v1558_v48 = vpop.f32.mrb[75].mxu1  ;;  %v4329_v51 = vadd.f32 %v4080_v62, %v1556_v36 }
 0x1b6   : > { %v2601_v53 = vadd.f32 %v2600_v20, %v2474_v41  ;;  %v3295_v56 = vpack.c.bf16 %v1301_v45, %v1298_v24  ;;  %v2340_v57 = vadd.f32 %v2339_v40, %v1301_v45  ;;  %v2475_v59 = vmul.f32 %v1301_v45, %v1301_v45 }
 0x1b7   : > { %v3455_v60 = vpack.c.bf16 %v4329_v51, %v4325_v35 }
 0x1b8   : > { %3539 = vst [vmem:[%s4098_s10 + $0x90] sm:$0xff] %v3295_v56   ;;  %v2602_v0 = vadd.f32 %v2601_v53, %v2475_v59 }
 0x1b9   : > { %v1305_v4 = vpop.f32.mrb[76].mxu0  ;;  %3571 = vst [vmem:[%s4098_s10 + $0x190] sm:$0xff] %v3455_v60   ;;  %v1561_v7 = vpop.f32.mrb[76].mxu1 }
 0x1ba   : > { %v1306_v8 = vadd.f32 %v4080_v62, %v1305_v4  ;;  %v1307_v11 = vpop.f32.mrb[77].mxu0  ;;  %v1563_v18 = vpop.f32.mrb[77].mxu1  ;;  %v4337_v22 = vadd.f32 %v4080_v62, %v1561_v7 }
 0x1bb   : > { %v1308_v19 = vpop.f32.mrb[78].mxu0  ;;  %v1564_v20 = vpop.f32.mrb[78].mxu1 }
 0x1bc   : > { %v2341_v23 = vadd.f32 %v2340_v57, %v1306_v8  ;;  %v2476_v24 = vmul.f32 %v1306_v8, %v1306_v8  ;;  %v1309_v28 = vadd.f32 %v4080_v62, %v1308_v19  ;;  %v1310_v29 = vpop.f32.mrb[79].mxu0  ;;  %v1566_v33 = vpop.f32.mrb[79].mxu1  ;;  %v4341_v36 = vadd.f32 %v4080_v62, %v1564_v20 }
 0x1be   : > { %v2603_v40 = vadd.f32 %v2602_v0, %v2476_v24  ;;  %v3300_v41 = vpack.c.bf16 %v1309_v28, %v1306_v8  ;;  %v2342_v45 = vadd.f32 %v2341_v23, %v1309_v28  ;;  %v2477_v46 = vmul.f32 %v1309_v28, %v1309_v28 }
 0x1bf   : > { %v3460_v48 = vpack.c.bf16 %v4341_v36, %v4337_v22 }
 0x1c0   : > { %3540 = vst [vmem:[%s4098_s10 + $0x98] sm:$0xff] %v3300_v41   ;;  %v2604_v53 = vadd.f32 %v2603_v40, %v2477_v46 }
 0x1c1   : > { %v1313_v56 = vpop.f32.mrb[80].mxu0  ;;  %3572 = vst [vmem:[%s4098_s10 + $0x198] sm:$0xff] %v3460_v48   ;;  %v1569_v57 = vpop.f32.mrb[80].mxu1 }
 0x1c2   : > { %v1314_v59 = vadd.f32 %v4080_v62, %v1313_v56  ;;  %v1315_v60 = vpop.f32.mrb[81].mxu0  ;;  %v1571_v4 = vpop.f32.mrb[81].mxu1  ;;  %v4349_v11 = vadd.f32 %v4080_v62, %v1569_v57 }
 0x1c3   : > { %v1316_v7 = vpop.f32.mrb[82].mxu0  ;;  %v1572_v0 = vpop.f32.mrb[82].mxu1 }
 0x1c4   : > { %v2343_v8 = vadd.f32 %v2342_v45, %v1314_v59  ;;  %v2478_v18 = vmul.f32 %v1314_v59, %v1314_v59  ;;  %v1317_v19 = vadd.f32 %v4080_v62, %v1316_v7  ;;  %v1318_v20 = vpop.f32.mrb[83].mxu0  ;;  %v1574_v23 = vpop.f32.mrb[83].mxu1  ;;  %v4353_v24 = vadd.f32 %v4080_v62, %v1572_v0 }
 0x1c6   : > { %v2605_v28 = vadd.f32 %v2604_v53, %v2478_v18  ;;  %v3305_v29 = vpack.c.bf16 %v1317_v19, %v1314_v59  ;;  %v2344_v33 = vadd.f32 %v2343_v8, %v1317_v19  ;;  %v2479_v40 = vmul.f32 %v1317_v19, %v1317_v19  ;;  %v4366_v8 = vld [vmem:[%s4698_s2] ss:$0 sm:$0xff] }
 0x1c7   : > { %v3465_v41 = vpack.c.bf16 %v4353_v24, %v4349_v11 }
 0x1c8   : > { %3541 = vst [vmem:[%s4098_s10 + $0xa0] sm:$0xff] %v3305_v29   ;;  %v2606_v46 = vadd.f32 %v2605_v28, %v2479_v40 }
 0x1c9   : > { %v1321_v48 = vpop.f32.mrb[84].mxu0  ;;  %3573 = vst [vmem:[%s4098_s10 + $0x1a0] sm:$0xff] %v3465_v41   ;;  %v1577_v45 = vpop.f32.mrb[84].mxu1 }
 0x1ca   : > { %v1322_v56 = vadd.f32 %v4080_v62, %v1321_v48  ;;  %v1323_v57 = vpop.f32.mrb[85].mxu0  ;;  %v1579_v60 = vpop.f32.mrb[85].mxu1  ;;  %v4361_v7 = vadd.f32 %v4080_v62, %v1577_v45 }
 0x1cb   : > { %v1324_v4 = vpop.f32.mrb[86].mxu0  ;;  %v1580_v53 = vpop.f32.mrb[86].mxu1 }
 0x1cc   : > { %v2345_v59 = vadd.f32 %v2344_v33, %v1322_v56  ;;  %v2480_v0 = vmul.f32 %v1322_v56, %v1322_v56  ;;  %v1325_v18 = vadd.f32 %v4366_v8, %v1324_v4  ;;  %v1326_v19 = vpop.f32.mrb[87].mxu0  ;;  %v1582_v20 = vpop.f32.mrb[87].mxu1  ;;  %v4370_v23 = vadd.f32 %v4366_v8, %v1580_v53 }
 0x1ce   : > { %4735 = vst [vmem:[#allocation2_spill] sm:$0xff] %v4370_v23  ;;  %v2607_v28 = vadd.f32 %v2606_v46, %v2480_v0  ;;  %v3310_v29 = vpack.c.bf16 %v1325_v18, %v1322_v56  ;;  %v2346_v62 = vadd.f32 %v2345_v59, %v1325_v18  ;;  %v2481_v40 = vmul.f32 %v1325_v18, %v1325_v18 }
 0x1cf   : > { %v3470_v33 = vpack.c.bf16 %v4370_v23, %v4361_v7 }
 0x1d0   : > { %3542 = vst [vmem:[%s4098_s10 + $0xa8] sm:$0xff] %v3310_v29   ;;  %v2608_v41 = vadd.f32 %v2607_v28, %v2481_v40 }
 0x1d1   : > { %v1329_v48 = vpop.f32.mrb[88].mxu0  ;;  %3574 = vst [vmem:[%s4098_s10 + $0x1a8] sm:$0xff] %v3470_v33   ;;  %v1585_v45 = vpop.f32.mrb[88].mxu1 }
 0x1d2   : > { %v1330_v57 = vadd.f32 %v4366_v8, %v1329_v48  ;;  %v1331_v60 = vpop.f32.mrb[89].mxu0  ;;  %v1587_v4 = vpop.f32.mrb[89].mxu1  ;;  %v4378_v53 = vadd.f32 %v4366_v8, %v1585_v45 }
 0x1d3   : > { %v1332_v19 = vpop.f32.mrb[90].mxu0  ;;  %v1588_v46 = vpop.f32.mrb[90].mxu1 }
 0x1d4   : > { %4736 = vst [vmem:[#allocation3_spill] sm:$0xff] %v4378_v53  ;;  %v2347_v56 = vadd.f32 %v2346_v62, %v1330_v57  ;;  %v2482_v59 = vmul.f32 %v1330_v57, %v1330_v57  ;;  %v1333_v0 = vadd.f32 %v4366_v8, %v1332_v19  ;;  %v1334_v18 = vpop.f32.mrb[91].mxu0  ;;  %v1590_v20 = vpop.f32.mrb[91].mxu1  ;;  %v4382_v28 = vadd.f32 %v4366_v8, %v1588_v46 }
 0x1d6   : > { %4737 = vst [vmem:[#allocation4_spill] sm:$0xff] %v4382_v28  ;;  %v2609_v29 = vadd.f32 %v2608_v41, %v2482_v59  ;;  %v3315_v40 = vpack.c.bf16 %v1333_v0, %v1330_v57  ;;  %v2348_v33 = vadd.f32 %v2347_v56, %v1333_v0  ;;  %v2483_v48 = vmul.f32 %v1333_v0, %v1333_v0 }
 0x1d7   : > { %v3475_v60 = vpack.c.bf16 %v4382_v28, %v4378_v53 }
 0x1d8   : > { %3543 = vst [vmem:[%s4098_s10 + $0xb0] sm:$0xff] %v3315_v40   ;;  %v2610_v45 = vadd.f32 %v2609_v29, %v2483_v48 }
 0x1d9   : > { %v1337_v4 = vpop.f32.mrb[92].mxu0  ;;  %3575 = vst [vmem:[%s4098_s10 + $0x1b0] sm:$0xff] %v3475_v60   ;;  %v1593_v62 = vpop.f32.mrb[92].mxu1 }
 0x1da   : > { %v1338_v23 = vadd.f32 %v4366_v8, %v1337_v4  ;;  %v1339_v19 = vpop.f32.mrb[93].mxu0  ;;  %v1595_v18 = vpop.f32.mrb[93].mxu1  ;;  %v4390_v46 = vadd.f32 %v4366_v8, %v1593_v62 }
 0x1db   : > { %v1340_v20 = vpop.f32.mrb[94].mxu0  ;;  %v1596_v41 = vpop.f32.mrb[94].mxu1 }
 0x1dc   : > { %4738 = vst [vmem:[#allocation5_spill] sm:$0xff] %v4390_v46  ;;  %v2349_v57 = vadd.f32 %v2348_v33, %v1338_v23  ;;  %v2484_v56 = vmul.f32 %v1338_v23, %v1338_v23  ;;  %v1341_v59 = vadd.f32 %v4366_v8, %v1340_v20  ;;  %v1342_v0 = vpop.f32.mrb[95].mxu0  ;;  %v1598_v29 = vpop.f32.mrb[95].mxu1  ;;  %v4394_v40 = vadd.f32 %v4366_v8, %v1596_v41 }
 0x1de   : > { %4739 = vst [vmem:[#allocation6_spill] sm:$0xff] %v4394_v40  ;;  %v2611_v48 = vadd.f32 %v2610_v45, %v2484_v56  ;;  %v3320_v60 = vpack.c.bf16 %v1341_v59, %v1338_v23  ;;  %v2350_v4 = vadd.f32 %v2349_v57, %v1341_v59  ;;  %v2485_v19 = vmul.f32 %v1341_v59, %v1341_v59 }
 0x1df   : > { %v3480_v18 = vpack.c.bf16 %v4394_v40, %v4390_v46 }
 0x1e0   : > { %3544 = vst [vmem:[%s4098_s10 + $0xb8] sm:$0xff] %v3320_v60   ;;  %v2612_v62 = vadd.f32 %v2611_v48, %v2485_v19 }
 0x1e1   : > { %v1345_v28 = vpop.f32.mrb[96].mxu0  ;;  %3576 = vst [vmem:[%s4098_s10 + $0x1b8] sm:$0xff] %v3480_v18   ;;  %v1601_v33 = vpop.f32.mrb[96].mxu1 }
 0x1e2   : > { %v1346_v53 = vadd.f32 %v4366_v8, %v1345_v28  ;;  %v1347_v20 = vpop.f32.mrb[97].mxu0  ;;  %v1603_v0 = vpop.f32.mrb[97].mxu1  ;;  %v4402_v41 = vadd.f32 %v4366_v8, %v1601_v33 }
 0x1e3   : > { %v1348_v29 = vpop.f32.mrb[98].mxu0  ;;  %v1604_v23 = vpop.f32.mrb[98].mxu1 }
 0x1e4   : > { %4740 = vst [vmem:[#allocation7_spill] sm:$0xff] %v4402_v41  ;;  %v2351_v45 = vadd.f32 %v2350_v4, %v1346_v53  ;;  %v2486_v57 = vmul.f32 %v1346_v53, %v1346_v53  ;;  %v1349_v56 = vadd.f32 %v4366_v8, %v1348_v29  ;;  %v1350_v59 = vpop.f32.mrb[99].mxu0  ;;  %v1606_v48 = vpop.f32.mrb[99].mxu1  ;;  %v4406_v60 = vadd.f32 %v4366_v8, %v1604_v23 }
 0x1e6   : > { %4741 = vst [vmem:[#allocation8_spill] sm:$0xff] %v4406_v60  ;;  %v2613_v19 = vadd.f32 %v2612_v62, %v2486_v57  ;;  %v3325_v28 = vpack.c.bf16 %v1349_v56, %v1346_v53  ;;  %v2352_v18 = vadd.f32 %v2351_v45, %v1349_v56  ;;  %v2487_v20 = vmul.f32 %v1349_v56, %v1349_v56 }
 0x1e7   : > { %v3485_v0 = vpack.c.bf16 %v4406_v60, %v4402_v41 }
 0x1e8   : > { %3545 = vst [vmem:[%s4098_s10 + $0xc0] sm:$0xff] %v3325_v28   ;;  %v2614_v33 = vadd.f32 %v2613_v19, %v2487_v20 }
 0x1e9   : > { %v1353_v40 = vpop.f32.mrb[100].mxu0  ;;  %3577 = vst [vmem:[%s4098_s10 + $0x1c0] sm:$0xff] %v3485_v0   ;;  %v1609_v4 = vpop.f32.mrb[100].mxu1 }
 0x1ea   : > { %v1354_v46 = vadd.f32 %v4366_v8, %v1353_v40  ;;  %v1355_v29 = vpop.f32.mrb[101].mxu0  ;;  %v1611_v59 = vpop.f32.mrb[101].mxu1  ;;  %v4414_v23 = vadd.f32 %v4366_v8, %v1609_v4 }
 0x1eb   : > { %v1356_v48 = vpop.f32.mrb[102].mxu0  ;;  %v1612_v53 = vpop.f32.mrb[102].mxu1 }
 0x1ec   : > { %4742 = vst [vmem:[#allocation9_spill] sm:$0xff] %v4414_v23  ;;  %v2353_v62 = vadd.f32 %v2352_v18, %v1354_v46  ;;  %v2488_v45 = vmul.f32 %v1354_v46, %v1354_v46  ;;  %v1357_v57 = vadd.f32 %v4366_v8, %v1356_v48  ;;  %v1358_v56 = vpop.f32.mrb[103].mxu0  ;;  %v1614_v19 = vpop.f32.mrb[103].mxu1  ;;  %v4418_v28 = vadd.f32 %v4366_v8, %v1612_v53 }
 0x1ee   : > { %4743 = vst [vmem:[#allocation10_spill] sm:$0xff] %v4418_v28  ;;  %v2615_v20 = vadd.f32 %v2614_v33, %v2488_v45  ;;  %v3330_v40 = vpack.c.bf16 %v1357_v57, %v1354_v46  ;;  %v2354_v0 = vadd.f32 %v2353_v62, %v1357_v57  ;;  %v2489_v29 = vmul.f32 %v1357_v57, %v1357_v57 }
 0x1ef   : > { %v3490_v59 = vpack.c.bf16 %v4418_v28, %v4414_v23 }
 0x1f0   : > { %3546 = vst [vmem:[%s4098_s10 + $0xc8] sm:$0xff] %v3330_v40   ;;  %v2616_v4 = vadd.f32 %v2615_v20, %v2489_v29 }
 0x1f1   : > { %v1361_v60 = vpop.f32.mrb[104].mxu0  ;;  %3578 = vst [vmem:[%s4098_s10 + $0x1c8] sm:$0xff] %v3490_v59   ;;  %v1617_v18 = vpop.f32.mrb[104].mxu1 }
 0x1f2   : > { %v1362_v41 = vadd.f32 %v4366_v8, %v1361_v60  ;;  %v1363_v48 = vpop.f32.mrb[105].mxu0  ;;  %v1619_v56 = vpop.f32.mrb[105].mxu1  ;;  %v4426_v53 = vadd.f32 %v4366_v8, %v1617_v18 }
 0x1f3   : > { %v1364_v19 = vpop.f32.mrb[106].mxu0  ;;  %v1620_v46 = vpop.f32.mrb[106].mxu1 }
 0x1f4   : > { %4744 = vst [vmem:[#allocation11_spill] sm:$0xff] %v4426_v53  ;;  %v2355_v33 = vadd.f32 %v2354_v0, %v1362_v41  ;;  %v2490_v62 = vmul.f32 %v1362_v41, %v1362_v41  ;;  %v1365_v45 = vadd.f32 %v4366_v8, %v1364_v19  ;;  %v1366_v57 = vpop.f32.mrb[107].mxu0  ;;  %v1622_v20 = vpop.f32.mrb[107].mxu1  ;;  %v4430_v40 = vadd.f32 %v4366_v8, %v1620_v46 }
 0x1f6   : > { %4745 = vst [vmem:[#allocation12_spill] sm:$0xff] %v4430_v40  ;;  %v2617_v29 = vadd.f32 %v2616_v4, %v2490_v62  ;;  %v3335_v60 = vpack.c.bf16 %v1365_v45, %v1362_v41  ;;  %v2356_v59 = vadd.f32 %v2355_v33, %v1365_v45  ;;  %v2491_v48 = vmul.f32 %v1365_v45, %v1365_v45 }
 0x1f7   : > { %v3495_v56 = vpack.c.bf16 %v4430_v40, %v4426_v53 }
 0x1f8   : > { %3547 = vst [vmem:[%s4098_s10 + $0xd0] sm:$0xff] %v3335_v60   ;;  %v2618_v18 = vadd.f32 %v2617_v29, %v2491_v48 }
 0x1f9   : > { %v1369_v28 = vpop.f32.mrb[108].mxu0  ;;  %3579 = vst [vmem:[%s4098_s10 + $0x1d0] sm:$0xff] %v3495_v56  }
 0x1fa   : > { %v1370_v0 = vadd.f32 %v4366_v8, %v1369_v28  ;;  %v1371_v23 = vpop.f32.mrb[109].mxu0  ;;  %v1625_v19 = vpop.f32.mrb[108].mxu1 }
 0x1fb   : > { %v1372_v57 = vpop.f32.mrb[110].mxu0  ;;  %v4438_v46 = vadd.f32 %v4366_v8, %v1625_v19  ;;  %v1627_v4 = vpop.f32.mrb[109].mxu1 }
 0x1fc   : > { %v2357_v41 = vadd.f32 %v2356_v59, %v1370_v0  ;;  %v2492_v33 = vmul.f32 %v1370_v0, %v1370_v0  ;;  %v1373_v62 = vadd.f32 %v4366_v8, %v1372_v57  ;;  %v1374_v45 = vpop.f32.mrb[111].mxu0  ;;  %v1628_v20 = vpop.f32.mrb[110].mxu1 }
 0x1fd   : > { %4746 = vst [vmem:[#allocation13_spill] sm:$0xff] %v4438_v46  ;;  %v4442_v29 = vadd.f32 %v4366_v8, %v1628_v20  ;;  %v1630_v60 = vpop.f32.mrb[111].mxu1 }
 0x1fe   : > { %v2619_v28 = vadd.f32 %v2618_v18, %v2492_v33  ;;  %v3340_v23 = vpack.c.bf16 %v1373_v62, %v1370_v0  ;;  %v2358_v48 = vadd.f32 %v2357_v41, %v1373_v62  ;;  %v2493_v56 = vmul.f32 %v1373_v62, %v1373_v62 }
 0x1ff   : > { %4747 = vst [vmem:[#allocation14_spill] sm:$0xff] %v4442_v29  ;;  %v3500_v19 = vpack.c.bf16 %v4442_v29, %v4438_v46 }
 0x200   : > { %3548 = vst [vmem:[%s4098_s10 + $0xd8] sm:$0xff] %v3340_v23   ;;  %v2620_v4 = vadd.f32 %v2619_v28, %v2493_v56 }
 0x201   : > { %v1377_v40 = vpop.f32.mrb[112].mxu0  ;;  %3580 = vst [vmem:[%s4098_s10 + $0x1d8] sm:$0xff] %v3500_v19  }
 0x202   : > { %v1378_v59 = vadd.f32 %v4366_v8, %v1377_v40  ;;  %v1379_v57 = vpop.f32.mrb[113].mxu0  ;;  %v1633_v45 = vpop.f32.mrb[112].mxu1 }
 0x203   : > { %v1380_v53 = vpop.f32.mrb[114].mxu0  ;;  %v4450_v20 = vadd.f32 %v4366_v8, %v1633_v45  ;;  %v1635_v18 = vpop.f32.mrb[113].mxu1 }
 0x204   : > { %v2359_v0 = vadd.f32 %v2358_v48, %v1378_v59  ;;  %v2494_v41 = vmul.f32 %v1378_v59, %v1378_v59  ;;  %v1381_v33 = vadd.f32 %v4366_v8, %v1380_v53  ;;  %v1382_v62 = vpop.f32.mrb[115].mxu0  ;;  %v1636_v60 = vpop.f32.mrb[114].mxu1 }
 0x205   : > { %4748 = vst [vmem:[#allocation15_spill] sm:$0xff] %v4450_v20  ;;  %v4454_v28 = vadd.f32 %v4366_v8, %v1636_v60  ;;  %v1638_v23 = vpop.f32.mrb[115].mxu1 }
 0x206   : > { %v2621_v40 = vadd.f32 %v2620_v4, %v2494_v41  ;;  %v3345_v56 = vpack.c.bf16 %v1381_v33, %v1378_v59  ;;  %v2360_v19 = vadd.f32 %v2359_v0, %v1381_v33  ;;  %v2495_v57 = vmul.f32 %v1381_v33, %v1381_v33 }
 0x207   : > { %4749 = vst [vmem:[#allocation16_spill] sm:$0xff] %v4454_v28  ;;  %v3505_v45 = vpack.c.bf16 %v4454_v28, %v4450_v20 }
 0x208   : > { %3549 = vst [vmem:[%s4098_s10 + $0xe0] sm:$0xff] %v3345_v56   ;;  %v2622_v18 = vadd.f32 %v2621_v40, %v2495_v57 }
 0x209   : > { %v1385_v29 = vpop.f32.mrb[116].mxu0  ;;  %3581 = vst [vmem:[%s4098_s10 + $0x1e0] sm:$0xff] %v3505_v45  }
 0x20a   : > { %v1386_v48 = vadd.f32 %v4366_v8, %v1385_v29  ;;  %v1387_v53 = vpop.f32.mrb[117].mxu0  ;;  %v1641_v62 = vpop.f32.mrb[116].mxu1 }
 0x20b   : > { %v1388_v46 = vpop.f32.mrb[118].mxu0  ;;  %v4462_v60 = vadd.f32 %v4366_v8, %v1641_v62  ;;  %v1643_v4 = vpop.f32.mrb[117].mxu1 }
 0x20c   : > { %v2361_v59 = vadd.f32 %v2360_v19, %v1386_v48  ;;  %v2496_v0 = vmul.f32 %v1386_v48, %v1386_v48  ;;  %v1389_v41 = vadd.f32 %v4366_v8, %v1388_v46  ;;  %v1390_v33 = vpop.f32.mrb[119].mxu0  ;;  %v1644_v23 = vpop.f32.mrb[118].mxu1 }
 0x20d   : > { %4750 = vst [vmem:[#allocation17_spill] sm:$0xff] %v4462_v60  ;;  %v4466_v40 = vadd.f32 %v4366_v8, %v1644_v23  ;;  %v1646_v56 = vpop.f32.mrb[119].mxu1 }
 0x20e   : > { %v2623_v29 = vadd.f32 %v2622_v18, %v2496_v0  ;;  %v3350_v57 = vpack.c.bf16 %v1389_v41, %v1386_v48  ;;  %v2362_v45 = vadd.f32 %v2361_v59, %v1389_v41  ;;  %v2497_v53 = vmul.f32 %v1389_v41, %v1389_v41 }
 0x20f   : > { %4751 = vst [vmem:[#allocation18_spill] sm:$0xff] %v4466_v40  ;;  %v3510_v62 = vpack.c.bf16 %v4466_v40, %v4462_v60 }
 0x210   : > { %3550 = vst [vmem:[%s4098_s10 + $0xe8] sm:$0xff] %v3350_v57   ;;  %v2624_v4 = vadd.f32 %v2623_v29, %v2497_v53 }
 0x211   : > { %v1393_v28 = vpop.f32.mrb[120].mxu0  ;;  %3582 = vst [vmem:[%s4098_s10 + $0x1e8] sm:$0xff] %v3510_v62  }
 0x212   : > { %v1394_v19 = vadd.f32 %v4366_v8, %v1393_v28  ;;  %v1395_v46 = vpop.f32.mrb[121].mxu0  ;;  %v1649_v33 = vpop.f32.mrb[120].mxu1 }
 0x213   : > { %v1396_v20 = vpop.f32.mrb[122].mxu0  ;;  %v4474_v23 = vadd.f32 %v4366_v8, %v1649_v33  ;;  %v1651_v18 = vpop.f32.mrb[121].mxu1 }
 0x214   : > { %v2363_v48 = vadd.f32 %v2362_v45, %v1394_v19  ;;  %v2498_v59 = vmul.f32 %v1394_v19, %v1394_v19  ;;  %v1397_v0 = vadd.f32 %v4366_v8, %v1396_v20  ;;  %v1398_v41 = vpop.f32.mrb[123].mxu0  ;;  %v1652_v56 = vpop.f32.mrb[122].mxu1 }
 0x215   : > { %v4478_v29 = vadd.f32 %v4366_v8, %v1652_v56  ;;  %v1654_v57 = vpop.f32.mrb[123].mxu1 }
 0x216   : > { %v2625_v28 = vadd.f32 %v2624_v4, %v2498_v59  ;;  %v3355_v53 = vpack.c.bf16 %v1397_v0, %v1394_v19  ;;  %v2364_v62 = vadd.f32 %v2363_v48, %v1397_v0  ;;  %v2499_v46 = vmul.f32 %v1397_v0, %v1397_v0 }
 0x217   : > { %v3515_v33 = vpack.c.bf16 %v4478_v29, %v4474_v23 }
 0x218   : > { %3551 = vst [vmem:[%s4098_s10 + $0xf0] sm:$0xff] %v3355_v53   ;;  %v2626_v18 = vadd.f32 %v2625_v28, %v2499_v46 }
 0x219   : > { %v1401_v40 = vpop.f32.mrb[124].mxu0  ;;  %3583 = vst [vmem:[%s4098_s10 + $0x1f0] sm:$0xff] %v3515_v33  }
 0x21a   : > { %v1402_v45 = vadd.f32 %v4366_v8, %v1401_v40  ;;  %v1403_v20 = vpop.f32.mrb[125].mxu0  ;;  %v1657_v41 = vpop.f32.mrb[124].mxu1 }
 0x21b   : > { %v1404_v60 = vpop.f32.mrb[126].mxu0  ;;  %v4486_v56 = vadd.f32 %v4366_v8, %v1657_v41  ;;  %v1659_v4 = vpop.f32.mrb[125].mxu1 }
 0x21c   : > { %v2365_v19 = vadd.f32 %v2364_v62, %v1402_v45  ;;  %v2500_v48 = vmul.f32 %v1402_v45, %v1402_v45  ;;  %v1405_v59 = vadd.f32 %v4366_v8, %v1404_v60  ;;  %v1406_v0 = vpop.f32.mrb[127].mxu0  ;;  %v1660_v57 = vpop.f32.mrb[126].mxu1  ;;  %v2502_v62 = vmul.f32 %v4087_v5, %v4087_v5 }
 0x21d   : > { %v4490_v28 = vadd.f32 %v4366_v8, %v1660_v57  ;;  %v1662_v53 = vpop.f32.mrb[127].mxu1  ;;  %v2503_v8 = vmul.f32 %v4093_v13, %v4093_v13 }
 0x21e   : > { %v2627_v40 = vadd.f32 %v2626_v18, %v2500_v48  ;;  %v3360_v46 = vpack.c.bf16 %v1405_v59, %v1402_v45  ;;  %v2366_v33 = vadd.f32 %v2365_v19, %v1405_v59  ;;  %v2501_v20 = vmul.f32 %v1405_v59, %v1405_v59 }
 0x21f   : > { %v3520_v41 = vpack.c.bf16 %v4490_v28, %v4486_v56  ;;  %v2504_v45 = vmul.f32 %v4109_v30, %v4109_v30  ;;  %v2505_v59 = vmul.f32 %v4114_v38, %v4114_v38  ;;  %v2506_v53 = vmul.f32 %v4125_v54, %v4125_v54 }
 0x220   : > { %3552 = vst [vmem:[%s4098_s10 + $0xf8] sm:$0xff] %v3360_v46   ;;  %v2367_v4 = vadd.f32 %v2366_v33, %v4087_v5  ;;  %v2628_v60 = vadd.f32 %v2627_v40, %v2501_v20 }
 0x221   : > { %3584 = vst [vmem:[%s4098_s10 + $0x1f8] sm:$0xff] %v3520_v41  }
 0x222   : > { %v2368_v0 = vadd.f32 %v2367_v4, %v4093_v13  ;;  %v2629_v18 = vadd.f32 %v2628_v60, %v2502_v62  ;;  %v2507_v13 = vmul.f32 %v4130_v63, %v4130_v63 }
 0x224   : > { %v2369_v19 = vadd.f32 %v2368_v0, %v4109_v30  ;;  %v2630_v48 = vadd.f32 %v2629_v18, %v2503_v8  ;;  %v2508_v30 = vmul.f32 %v4141_v17, %v4141_v17 }
 0x226   : > { %v2370_v57 = vadd.f32 %v2369_v19, %v4114_v38  ;;  %v2631_v5 = vadd.f32 %v2630_v48, %v2504_v45  ;;  %v2509_v38 = vmul.f32 %v4146_v25, %v4146_v25 }
 0x228   : > { %v2371_v40 = vadd.f32 %v2370_v57, %v4125_v54  ;;  %v2632_v46 = vadd.f32 %v2631_v5, %v2505_v59  ;;  %v2510_v54 = vmul.f32 %v4156_v42, %v4156_v42 }
 0x22a   : > { %v2372_v33 = vadd.f32 %v2371_v40, %v4130_v63  ;;  %v2633_v20 = vadd.f32 %v2632_v46, %v2506_v53  ;;  %v2511_v63 = vmul.f32 %v4161_v50, %v4161_v50 }
 0x22c   : > { %v2373_v41 = vadd.f32 %v2372_v33, %v4141_v17  ;;  %v2634_v62 = vadd.f32 %v2633_v20, %v2507_v13  ;;  %v2512_v17 = vmul.f32 %v4169_v2, %v4169_v2 }
 0x22e   : > { %v2374_v4 = vadd.f32 %v2373_v41, %v4146_v25  ;;  %v2635_v60 = vadd.f32 %v2634_v62, %v2508_v30  ;;  %v2513_v25 = vmul.f32 %v4173_v10, %v4173_v10 }
 0x230   : > { %v2375_v8 = vadd.f32 %v2374_v4, %v4156_v42  ;;  %v2636_v0 = vadd.f32 %v2635_v60, %v2509_v38  ;;  %v2514_v42 = vmul.f32 %v4181_v26, %v4181_v26 }
 0x232   : > { %v2376_v18 = vadd.f32 %v2375_v8, %v4161_v50  ;;  %v2637_v45 = vadd.f32 %v2636_v0, %v2510_v54  ;;  %v2515_v50 = vmul.f32 %v4185_v34, %v4185_v34 }
 0x234   : > { %v2377_v19 = vadd.f32 %v2376_v18, %v4169_v2  ;;  %v2638_v48 = vadd.f32 %v2637_v45, %v2511_v63  ;;  %v2516_v2 = vmul.f32 %v4193_v49, %v4193_v49 }
 0x236   : > { %v2378_v59 = vadd.f32 %v2377_v19, %v4173_v10  ;;  %v2639_v57 = vadd.f32 %v2638_v48, %v2512_v17  ;;  %v2517_v10 = vmul.f32 %v4197_v58, %v4197_v58 }
 0x238   : > { %v2379_v5 = vadd.f32 %v2378_v59, %v4181_v26  ;;  %v2640_v53 = vadd.f32 %v2639_v57, %v2513_v25  ;;  %v2518_v26 = vmul.f32 %v4205_v12, %v4205_v12 }
 0x23a   : > { %v2380_v40 = vadd.f32 %v2379_v5, %v4185_v34  ;;  %v2641_v46 = vadd.f32 %v2640_v53, %v2514_v42  ;;  %v2519_v34 = vmul.f32 %v4209_v21, %v4209_v21 }
 0x23c   : > { %v2381_v13 = vadd.f32 %v2380_v40, %v4193_v49  ;;  %v2642_v33 = vadd.f32 %v2641_v46, %v2515_v50  ;;  %v2520_v49 = vmul.f32 %v4217_v39, %v4217_v39 }
 0x23e   : > { %v2382_v20 = vadd.f32 %v2381_v13, %v4197_v58  ;;  %v2643_v30 = vadd.f32 %v2642_v33, %v2516_v2  ;;  %v2521_v58 = vmul.f32 %v4221_v47, %v4221_v47 }
 0x240   : > { %v2383_v41 = vadd.f32 %v2382_v20, %v4205_v12  ;;  %v2644_v62 = vadd.f32 %v2643_v30, %v2517_v10  ;;  %v2522_v12 = vmul.f32 %v4229_v3, %v4229_v3 }
 0x242   : > { %v2645_v38 = vadd.f32 %v2644_v62, %v2518_v26  ;;  %v2384_v4 = vadd.f32 %v2383_v41, %v4209_v21  ;;  %v2523_v21 = vmul.f32 %v4233_v14, %v4233_v14 }
 0x244   : > { %v2385_v60 = vadd.f32 %v2384_v4, %v4217_v39  ;;  %v2646_v54 = vadd.f32 %v2645_v38, %v2519_v34  ;;  %v2524_v39 = vmul.f32 %v4241_v32, %v4241_v32  ;;  %v2534_v34 = vmul.f32 %v4301_v15, %v4301_v15 }
 0x246   : > { %v2386_v8 = vadd.f32 %v2385_v60, %v4221_v47  ;;  %v2647_v0 = vadd.f32 %v2646_v54, %v2520_v49  ;;  %v2525_v47 = vmul.f32 %v4245_v43, %v4245_v43  ;;  %v2535_v49 = vmul.f32 %v4305_v27, %v4305_v27 }
 0x247   : > { %v2536_v54 = vmul.f32 %v4313_v55, %v4313_v55 }
 0x248   : > { %v2387_v63 = vadd.f32 %v2386_v8, %v4229_v3  ;;  %v2648_v18 = vadd.f32 %v2647_v0, %v2521_v58  ;;  %v2526_v3 = vmul.f32 %v4253_v61, %v4253_v61  ;;  %v2537_v8 = vmul.f32 %v4317_v6, %v4317_v6 }
 0x24a   : > { %v2388_v45 = vadd.f32 %v2387_v63, %v4233_v14  ;;  %v2649_v17 = vadd.f32 %v2648_v18, %v2522_v12  ;;  %v2527_v14 = vmul.f32 %v4257_v9, %v4257_v9  ;;  %v2538_v12 = vmul.f32 %v4325_v35, %v4325_v35 }
 0x24b   : > { %v2539_v18 = vmul.f32 %v4329_v51, %v4329_v51 }
 0x24c   : > { %v2389_v19 = vadd.f32 %v2388_v45, %v4241_v32  ;;  %v2650_v48 = vadd.f32 %v2649_v17, %v2523_v21  ;;  %v2528_v32 = vmul.f32 %v4265_v31, %v4265_v31  ;;  %v2540_v45 = vmul.f32 %v4337_v22, %v4337_v22 }
 0x24e   : > { %v2390_v25 = vadd.f32 %v2389_v19, %v4245_v43  ;;  %v2651_v59 = vadd.f32 %v2650_v48, %v2524_v39  ;;  %v2529_v43 = vmul.f32 %v4269_v44, %v4269_v44  ;;  %v2541_v39 = vmul.f32 %v4341_v36, %v4341_v36 }
 0x24f   : > { %v2542_v48 = vmul.f32 %v4349_v11, %v4349_v11 }
 0x250   : > { %v2391_v57 = vadd.f32 %v2390_v25, %v4253_v61  ;;  %v2652_v42 = vadd.f32 %v2651_v59, %v2525_v47  ;;  %v2530_v61 = vmul.f32 %v4277_v1, %v4277_v1  ;;  %v2543_v25 = vmul.f32 %v4353_v24, %v4353_v24 }
 0x252   : > { %v2392_v5 = vadd.f32 %v2391_v57, %v4257_v9  ;;  %v2653_v53 = vadd.f32 %v2652_v42, %v2526_v3  ;;  %v2531_v9 = vmul.f32 %v4281_v16, %v4281_v16  ;;  %v2544_v3 = vmul.f32 %v4361_v7, %v4361_v7 }
 0x254   : > { %v2393_v50 = vadd.f32 %v2392_v5, %v4265_v31  ;;  %v2654_v40 = vadd.f32 %v2653_v53, %v2527_v14  ;;  %v2532_v31 = vmul.f32 %v4289_v37, %v4289_v37 }
 0x256   : > { %v2394_v46 = vadd.f32 %v2393_v50, %v4269_v44  ;;  %v2655_v2 = vadd.f32 %v2654_v40, %v2528_v32  ;;  %v2533_v44 = vmul.f32 %v4293_v52, %v4293_v52 }
 0x258   : > { %v2395_v13 = vadd.f32 %v2394_v46, %v4277_v1  ;;  %v2656_v33 = vadd.f32 %v2655_v2, %v2529_v43 }
 0x25a   : > { %v2396_v10 = vadd.f32 %v2395_v13, %v4281_v16  ;;  %v2657_v20 = vadd.f32 %v2656_v33, %v2530_v61  ;;  %v4756_v33 = vld [vmem:[#allocation6_spill] sm:$0xff] }
 0x25c   : > { %v2397_v30 = vadd.f32 %v2396_v10, %v4289_v37  ;;  %v2658_v26 = vadd.f32 %v2657_v20, %v2531_v9  ;;  %v2549_v10 = vmul.f32 %v4756_v33, %v4756_v33 }
 0x25e   : > { %v2398_v41 = vadd.f32 %v2397_v30, %v4293_v52  ;;  %v2659_v62 = vadd.f32 %v2658_v26, %v2532_v31  ;;  %v4757_v31 = vld [vmem:[#allocation7_spill] sm:$0xff] }
 0x25f   : > { %v2550_v26 = vmul.f32 %v4757_v31, %v4757_v31 }
 0x260   : > { %v2399_v1 = vadd.f32 %v2398_v41, %v4301_v15  ;;  %v2660_v38 = vadd.f32 %v2659_v62, %v2533_v44  ;;  %v4758_v41 = vld [vmem:[#allocation8_spill] sm:$0xff] }
 0x262   : > { %v2661_v16 = vadd.f32 %v2660_v38, %v2534_v34  ;;  %v2400_v4 = vadd.f32 %v2399_v1, %v4305_v27  ;;  %v2551_v1 = vmul.f32 %v4758_v41, %v4758_v41  ;;  %v4759_v38 = vld [vmem:[#allocation9_spill] sm:$0xff] }
 0x264   : > { %v2662_v37 = vadd.f32 %v2661_v16, %v2535_v49  ;;  %v2401_v60 = vadd.f32 %v2400_v4, %v4313_v55  ;;  %v2552_v4 = vmul.f32 %v4759_v38, %v4759_v38 }
 0x266   : > { %v2663_v52 = vadd.f32 %v2662_v37, %v2536_v54  ;;  %v2402_v58 = vadd.f32 %v2401_v60, %v4317_v6  ;;  %v4760_v37 = vld [vmem:[#allocation10_spill] sm:$0xff] }
 0x267   : > { %v2553_v54 = vmul.f32 %v4760_v37, %v4760_v37 }
 0x268   : > { %v2664_v15 = vadd.f32 %v2663_v52, %v2537_v8  ;;  %v2403_v0 = vadd.f32 %v2402_v58, %v4325_v35  ;;  %v4761_v58 = vld [vmem:[#allocation11_spill] sm:$0xff] }
 0x26a   : > { %v2665_v63 = vadd.f32 %v2664_v15, %v2538_v12  ;;  %v2404_v27 = vadd.f32 %v2403_v0, %v4329_v51  ;;  %v2554_v15 = vmul.f32 %v4761_v58, %v4761_v58  ;;  %v4762_v12 = vld [vmem:[#allocation12_spill] sm:$0xff] }
 0x26c   : > { %v2666_v21 = vadd.f32 %v2665_v63, %v2539_v18  ;;  %v2405_v55 = vadd.f32 %v2404_v27, %v4337_v22  ;;  %v2555_v27 = vmul.f32 %v4762_v12, %v4762_v12 }
 0x26e   : > { %v2667_v17 = vadd.f32 %v2666_v21, %v2540_v45  ;;  %v2406_v6 = vadd.f32 %v2405_v55, %v4341_v36  ;;  %v4752_v36 = vld [vmem:[#allocation2_spill] sm:$0xff]  ;;  %v4763_v21 = vld [vmem:[#allocation13_spill] sm:$0xff] }
 0x26f   : > { %v2545_v14 = vmul.f32 %v4752_v36, %v4752_v36  ;;  %v2556_v45 = vmul.f32 %v4763_v21, %v4763_v21 }
 0x270   : > { %v2668_v19 = vadd.f32 %v2667_v17, %v2541_v39  ;;  %v2407_v35 = vadd.f32 %v2406_v6, %v4349_v11  ;;  %v4753_v11 = vld [vmem:[#allocation3_spill] sm:$0xff]  ;;  %v4764_v6 = vld [vmem:[#allocation14_spill] sm:$0xff] }
 0x271   : > { %v2546_v32 = vmul.f32 %v4753_v11, %v4753_v11 }
 0x272   : > { %v2669_v47 = vadd.f32 %v2668_v19, %v2542_v48  ;;  %v2408_v51 = vadd.f32 %v2407_v35, %v4353_v24  ;;  %v4754_v24 = vld [vmem:[#allocation4_spill] sm:$0xff]  ;;  %v2557_v19 = vmul.f32 %v4764_v6, %v4764_v6  ;;  %v4765_v48 = vld [vmem:[#allocation15_spill] sm:$0xff] }
 0x273   : > { %v2547_v43 = vmul.f32 %v4754_v24, %v4754_v24 }
 0x274   : > { %v2670_v59 = vadd.f32 %v2669_v47, %v2543_v25  ;;  %v2409_v22 = vadd.f32 %v2408_v51, %v4361_v7  ;;  %v4755_v7 = vld [vmem:[#allocation5_spill] sm:$0xff]  ;;  %v2558_v51 = vmul.f32 %v4765_v48, %v4765_v48 }
 0x275   : > { %v2548_v61 = vmul.f32 %v4755_v7, %v4755_v7 }
 0x276   : > { %v2671_v57 = vadd.f32 %v2670_v59, %v2544_v3  ;;  %v2410_v42 = vadd.f32 %v2409_v22, %v4752_v36  ;;  %v4766_v59 = vld [vmem:[#allocation16_spill] sm:$0xff]  ;;  %v4767_v36 = vld [vmem:[#allocation17_spill] sm:$0xff] }
 0x277   : > { %v2559_v3 = vmul.f32 %v4766_v59, %v4766_v59 }
 0x278   : > { %v2672_v5 = vadd.f32 %v2671_v57, %v2545_v14  ;;  %v2411_v53 = vadd.f32 %v2410_v42, %v4753_v11  ;;  %v2560_v14 = vmul.f32 %v4767_v36, %v4767_v36  ;;  %v4768_v11 = vld [vmem:[#allocation18_spill] sm:$0xff] }
 0x27a   : > { %v2673_v50 = vadd.f32 %v2672_v5, %v2546_v32  ;;  %v2412_v40 = vadd.f32 %v2411_v53, %v4754_v24  ;;  %v2561_v32 = vmul.f32 %v4768_v11, %v4768_v11 }
 0x27c   : > { %v2674_v46 = vadd.f32 %v2673_v50, %v2547_v43  ;;  %v2413_v2 = vadd.f32 %v2412_v40, %v4755_v7  ;;  %v2562_v40 = vmul.f32 %v4474_v23, %v4474_v23  ;;  %v2563_v7 = vmul.f32 %v4478_v29, %v4478_v29 }
 0x27e   : > { %v2675_v13 = vadd.f32 %v2674_v46, %v2548_v61  ;;  %v2414_v9 = vadd.f32 %v2413_v2, %v4756_v33  ;;  %v2564_v2 = vmul.f32 %v4486_v56, %v4486_v56 }
 0x280   : > { %v2676_v20 = vadd.f32 %v2675_v13, %v2549_v10  ;;  %v2415_v30 = vadd.f32 %v2414_v9, %v4757_v31  ;;  %v2565_v10 = vmul.f32 %v4490_v28, %v4490_v28 }
 0x282   : > { %v2677_v44 = vadd.f32 %v2676_v20, %v2550_v26  ;;  %v2416_v62 = vadd.f32 %v2415_v30, %v4758_v41 }
 0x284   : > { %v2678_v34 = vadd.f32 %v2677_v44, %v2551_v1  ;;  %v2417_v16 = vadd.f32 %v2416_v62, %v4759_v38 }
 0x286   : > { %v2679_v49 = vadd.f32 %v2678_v34, %v2552_v4  ;;  %v2418_v60 = vadd.f32 %v2417_v16, %v4760_v37 }
 0x288   : > { %v2680_v52 = vadd.f32 %v2679_v49, %v2553_v54  ;;  %v2419_v8 = vadd.f32 %v2418_v60, %v4761_v58 }
 0x28a   : > { %v2681_v0 = vadd.f32 %v2680_v52, %v2554_v15  ;;  %v2420_v63 = vadd.f32 %v2419_v8, %v4762_v12 }
 0x28c   : > { %v2682_v18 = vadd.f32 %v2681_v0, %v2555_v27  ;;  %v2421_v55 = vadd.f32 %v2420_v63, %v4763_v21 }
 0x28e   : > { %v2683_v17 = vadd.f32 %v2682_v18, %v2556_v45  ;;  %v2422_v39 = vadd.f32 %v2421_v55, %v4764_v6 }
 0x290   : > { %v2684_v35 = vadd.f32 %v2683_v17, %v2557_v19  ;;  %v2423_v47 = vadd.f32 %v2422_v39, %v4765_v48 }
 0x292   : > { %v2685_v25 = vadd.f32 %v2684_v35, %v2558_v51  ;;  %v2424_v22 = vadd.f32 %v2423_v47, %v4766_v59 }
 0x294   : > { %v2686_v57 = vadd.f32 %v2685_v25, %v2559_v3  ;;  %v2425_v42 = vadd.f32 %v2424_v22, %v4767_v36 }
 0x296   : > { %v2687_v5 = vadd.f32 %v2686_v57, %v2560_v14  ;;  %v2426_v53 = vadd.f32 %v2425_v42, %v4768_v11 }
 0x298   : > { %v2688_v50 = vadd.f32 %v2687_v5, %v2561_v32  ;;  %v2427_v24 = vadd.f32 %v2426_v53, %v4474_v23 }
 0x29a   : > { %v2689_v43 = vadd.f32 %v2688_v50, %v2562_v40  ;;  %v2428_v46 = vadd.f32 %v2427_v24, %v4478_v29 }
 0x29c   : > { %v2690_v61 = vadd.f32 %v2689_v43, %v2563_v7  ;;  %v2429_v13 = vadd.f32 %v2428_v46, %v4486_v56 }
 0x29e   : > { %v2691_v33 = vadd.f32 %v2690_v61, %v2564_v2  ;;  %v2430_v9 = vadd.f32 %v2429_v13, %v4490_v28 }
 0x2a0   : > { %v2431_v23 = vrot.slane %v2430_v9, 4  ;;  %v2692_v20 = vadd.f32 %v2691_v33, %v2565_v10 }
 0x2a2   : > { %v2432_v31 = vadd.f32 %v2431_v23, %v2430_v9  ;;  %v2693_v30 = vrot.slane %v2692_v20, 4 }
 0x2a4   : > { %v2433_v26 = vrot.slane %v2432_v31, 2  ;;  %v2694_v29 = vadd.f32 %v2693_v30, %v2692_v20 }
 0x2a6   : > { %v2434_v44 = vadd.f32 %v2433_v26, %v2432_v31  ;;  %v2695_v41 = vrot.slane %v2694_v29, 2 }
 0x2a8   : > { %v2435_v62 = vrot.slane %v2434_v44, 1  ;;  %v2696_v1 = vadd.f32 %v2695_v41, %v2694_v29 }
 0x2aa   : > { %v2436_v56 = vadd.f32 %v2435_v62, %v2434_v44  ;;  %v2697_v34 = vrot.slane %v2696_v1, 1 }
 0x2ac   : > { %2437 = vst [vmem:[%s214_s17] sm:$0x1] %v2436_v56  ;;  %v2698_v28 = vadd.f32 %v2697_v34, %v2696_v1 }
 0x2ae   : > { %2699 = vst [vmem:[%s214_s17 + $0x1] sm:$0x1] %v2698_v28 }
 0x2af PF: > { %s15_s15 = sadd.s32 1, %s3841_s15  }
 0x2b0   : > { %p12_p5 = scmp.ge.s32.totalorder %s15_s15, 4  }
 0x2b2   :  { %14 = sbr.rel (!%p12_p5) target bundleno = 1 (0x1), region = 74 }

// kernel: forward.27
= control target key start
LH: loop header
LB: loop body
LE: loop exit
PB: predicated region body
PF: predicated region fallthrough
CT: control target
= control target key end

     0   :  { %s3655_s18 = smov 0   ;;  %s4253_s0 = inlined_call_operand.vmem [shape: bf16[2048,128], index: 0, kind: input, shape index: {}]   ;;  %s4254_s1 = inlined_call_operand.vmem [shape: bf16[128,128], index: 1, kind: input, shape index: {}]   ;;  %s4255_s2 = inlined_call_operand.vmem [shape: f32[1,128], index: 2, kind: input, shape index: {}]   ;;  %s4256_s3 = inlined_call_operand.vmem [shape: f32[1,128], index: 3, kind: input, shape index: {}]   ;;  %s4257_s4 = inlined_call_operand.vmem [shape: f32[1,128], index: 4, kind: input, shape index: {}]   ;;  %s4258_s5 = inlined_call_operand.vmem [shape: bf16[2048,128], index: 5, kind: output, shape index: {}]  }
   0x1 LB: > { %s2387_s19 = sadd.s32 4294967295, %s3623_s18   ;;  %p2391_p0 = scmp.ge.s32.totalorder %s3623_s18, 1  ;;  %s3623_s18 = sphi %s3655_s18, %s15_s18  }
   0x2   : > { %p188_p1 = scmp.lt.s32.totalorder %s3623_s18, 3 }
   0x4   : > { %p189_p2 = pnand %p2391_p0, %p188_p1 }
   0x5   : > { %v3607_v0 = vld [vmem:[%s4254_s1] sm:$0xff] (!%p189_p2)   ;;  %s2392_s22 = sshll.u32 (!%p189_p2), %s2387_s19, 7  ;;  %v3608_v1 = vld [vmem:[%s4254_s1 + $0x8] sm:$0xff] (!%p189_p2)   ;;  %v3609_v2 = vld [vmem:[%s4254_s1 + $0x10] sm:$0xff] (!%p189_p2)  }
   0x6   : > { %192 = sbr.rel (%p189_p2) target bundleno = 388 (0x184), region = 40  ;;  %p217_p3 = scmp.lt.s32.totalorder (!%p189_p2), %s2392_s22, 255  ;;  %3439 = vmatprep.subr.bf16.mxu0 (!%p189_p2), %v3607_v0  ;;  %3583 = vmatprep.subr.bf16.mxu1 (!%p189_p2), %v3607_v0  ;;  %v3610_v3 = vld [vmem:[%s4254_s1 + $0x18] sm:$0xff] (!%p189_p2)   ;;  %v3689_v5 = vld [vmem:[%s4256_s3] ss:$0 sm:$0xff] (!%p189_p2)  ;;  %v3612_v39 = vld [vmem:[%s4254_s1 + $0x28] sm:$0xff] (!%p189_p2)  }
   0x7   : > { %3440 = vmatpush3.bf16.msra.mxu0 (!%p189_p2), %v3607_v0  ;;  %3591 = vmatpush3.bf16.msra.mxu1 (!%p189_p2), %v3607_v0  ;;  %v3697_v11 = vld [vmem:[%s4257_s4] ss:$0 sm:$0xff] (!%p189_p2)  ;;  %v3613_v58 = vld [vmem:[%s4254_s1 + $0x30] sm:$0xff] (!%p189_p2)  }
   0x8   : > { %3441 = vmatprep.subr.bf16.mxu0 (!%p189_p2), %v3608_v1  ;;  %3584 = vmatprep.subr.bf16.mxu1 (!%p189_p2), %v3608_v1  ;;  %v3611_v21 = vld [vmem:[%s4254_s1 + $0x20] sm:$0xff] (!%p189_p2)  }
   0xb   : > { %3442 = vmatpush3.bf16.msra.mxu0 (!%p189_p2), %v3608_v1  ;;  %3592 = vmatpush3.bf16.msra.mxu1 (!%p189_p2), %v3608_v1 }
   0xc   : > { %3443 = vmatprep.subr.bf16.mxu0 (!%p189_p2), %v3609_v2  ;;  %3585 = vmatprep.subr.bf16.mxu1 (!%p189_p2), %v3609_v2 }
   0xd   : > { %s4260_s22 = smov (!%p217_p3, %s2392_s22), 255 }
   0xe   : > { %s2393_s27 = sshll.u32 %s4260_s22, 2 }
   0xf   : > { %s3680_s30 = scalar_lea.vmem %s4253_s0, %s2393_s27  ;;  %3444 = vmatpush3.bf16.msra.mxu0 %v3609_v2  ;;  %3593 = vmatpush3.bf16.msra.mxu1 %v3609_v2  ;;  %s4064_s6 = scalar_lea.vmem %s4258_s5, %s2393_s27 }
  0x10   : > { %v2666_v4 = vld [vmem:[%s3680_s30] sm:$0xff]   ;;  %v3241_v9 = vld [vmem:[%s3680_s30 + $0x8] sm:$0xff]   ;;  %v3242_v16 = vld [vmem:[%s3680_s30 + $0x10] sm:$0xff]   ;;  %3445 = vmatprep.subr.bf16.mxu0 %v3610_v3  ;;  %3586 = vmatprep.subr.bf16.mxu1 %v3610_v3 }
  0x11   : > { %v2667_v6 = vunpack.c.l.bf16 %v2666_v4  ;;  %v2668_v7 = vunpack.c.h.bf16 %v2666_v4  ;;  %v3272_v8 = vld [vmem:[%s3680_s30 + $0x100] sm:$0xff]   ;;  %v3273_v10 = vld [vmem:[%s3680_s30 + $0x108] sm:$0xff]   ;;  %v2671_v14 = vunpack.c.l.bf16 %v3241_v9  ;;  %v2672_v15 = vunpack.c.h.bf16 %v3241_v9  ;;  %v3274_v38 = vld [vmem:[%s3680_s30 + $0x110] sm:$0xff]  }
  0x12   : > { %v2795_v12 = vunpack.c.l.bf16 %v3272_v8  ;;  %v2796_v13 = vunpack.c.h.bf16 %v3272_v8  ;;  %v2799_v19 = vunpack.c.l.bf16 %v3273_v10  ;;  %v2800_v20 = vunpack.c.h.bf16 %v3273_v10  ;;  %v3243_v44 = vld [vmem:[%s3680_s30 + $0x18] sm:$0xff]  }
  0x13   : > { %v492_v17 = vmul.f32 %v2667_v6, %v3689_v5  ;;  %v493_v18 = vmul.f32 %v2668_v7, %v3689_v5  ;;  %v494_v24 = vmul.f32 %v2671_v14, %v3689_v5  ;;  %v2675_v25 = vunpack.c.l.bf16 %v3242_v16  ;;  %3446 = vmatpush3.bf16.msra.mxu0 %v3610_v3  ;;  %3594 = vmatpush3.bf16.msra.mxu1 %v3610_v3  ;;  %v3275_v53 = vld [vmem:[%s3680_s30 + $0x118] sm:$0xff]   ;;  %v3244_v3 = vld [vmem:[%s3680_s30 + $0x20] sm:$0xff]  }
  0x14   : > { %v556_v22 = vmul.f32 %v2795_v12, %v3689_v5  ;;  %v557_v23 = vmul.f32 %v2796_v13, %v3689_v5  ;;  %v495_v28 = vmul.f32 %v2672_v15, %v3689_v5  ;;  %v558_v29 = vmul.f32 %v2799_v19, %v3689_v5  ;;  %3447 = vmatprep.subr.bf16.mxu0 %v3611_v21  ;;  %v3614_v14 = vld [vmem:[%s4254_s1 + $0x38] sm:$0xff]   ;;  %v3276_v19 = vld [vmem:[%s3680_s30 + $0x120] sm:$0xff]  }
  0x15   : > { %v627_v26 = vadd.f32 %v3697_v11, %v492_v17  ;;  %v628_v27 = vadd.f32 %v3697_v11, %v493_v18  ;;  %v629_v32 = vadd.f32 %v3697_v11, %v494_v24  ;;  %v559_v33 = vmul.f32 %v2800_v20, %v3689_v5  ;;  %3587 = vmatprep.subr.bf16.mxu1 %v3611_v21 }
  0x16   : > { %v691_v30 = vadd.f32 %v3697_v11, %v556_v22  ;;  %v692_v31 = vadd.f32 %v3697_v11, %v557_v23  ;;  %v630_v36 = vadd.f32 %v3697_v11, %v495_v28  ;;  %v693_v37 = vadd.f32 %v3697_v11, %v558_v29  ;;  %v3245_v28 = vld [vmem:[%s3680_s30 + $0x28] sm:$0xff]  }
  0x17   : > { %v755_v34 = vmax.f32 %v627_v26, 0.0  ;;  %v756_v35 = vmax.f32 %v628_v27, 0.0  ;;  %v757_v42 = vmax.f32 %v629_v32, 0.0  ;;  %v694_v43 = vadd.f32 %v3697_v11, %v559_v33  ;;  %3448 = vmatpush3.bf16.msra.mxu0 %v3611_v21  ;;  %3595 = vmatpush3.bf16.msra.mxu1 %v3611_v21  ;;  %v3277_v33 = vld [vmem:[%s3680_s30 + $0x128] sm:$0xff]  }
  0x18   : > { %v819_v40 = vmax.f32 %v691_v30, 0.0  ;;  %v820_v41 = vmax.f32 %v692_v31, 0.0  ;;  %v758_v46 = vmax.f32 %v630_v36, 0.0  ;;  %v821_v47 = vmax.f32 %v693_v37, 0.0  ;;  %3449 = vmatprep.subr.bf16.mxu0 %v3612_v39  ;;  %3588 = vmatprep.subr.bf16.mxu1 %v3612_v39 }
  0x19   : > { %v883_v45 = vpack.c.bf16 %v756_v35, %v755_v34  ;;  %v2676_v48 = vunpack.c.h.bf16 %v3242_v16  ;;  %v822_v50 = vmax.f32 %v694_v43, 0.0  ;;  %v496_v51 = vmul.f32 %v2675_v25, %v3689_v5 }
  0x1a   : > { %v915_v49 = vpack.c.bf16 %v820_v41, %v819_v40  ;;  %v2803_v52 = vunpack.c.l.bf16 %v3274_v38  ;;  %v3726_v54 = vpack.c.bf16 %v758_v46, %v757_v42  ;;  %v2804_v56 = vunpack.c.h.bf16 %v3274_v38  ;;  %v3246_v42 = vld [vmem:[%s3680_s30 + $0x30] sm:$0xff]  }
  0x1b   : > { %v497_v55 = vmul.f32 %v2676_v48, %v3689_v5  ;;  %v2679_v57 = vunpack.c.l.bf16 %v3243_v44  ;;  %v3732_v59 = vpack.c.bf16 %v822_v50, %v821_v47  ;;  %v631_v60 = vadd.f32 %v3697_v11, %v496_v51  ;;  %3455 = vmatprep.mubr.bf16.mxu0 %v883_v45  ;;  %3450 = vmatpush3.bf16.msra.mxu0 %v3612_v39 }
  0x1c   : > { %v560_v61 = vmul.f32 %v2803_v52, %v3689_v5  ;;  %v2680_v62 = vunpack.c.h.bf16 %v3243_v44  ;;  %3519 = vmatprep.mubr.bf16.mxu1 %v915_v49  ;;  %v561_v0 = vmul.f32 %v2804_v56, %v3689_v5  ;;  %v2807_v2 = vunpack.c.l.bf16 %v3275_v53  ;;  %3596 = vmatpush3.bf16.msra.mxu1 %v3612_v39 }
  0x1d   : > { %v632_v63 = vadd.f32 %v3697_v11, %v497_v55  ;;  %v498_v1 = vmul.f32 %v2679_v57, %v3689_v5  ;;  %v759_v4 = vmax.f32 %v631_v60, 0.0  ;;  %v2808_v8 = vunpack.c.h.bf16 %v3275_v53  ;;  %3451 = vmatprep.subr.bf16.mxu0 %v3613_v58  ;;  %3589 = vmatprep.subr.bf16.mxu1 %v3613_v58 }
  0x1e   : > { %v695_v6 = vadd.f32 %v3697_v11, %v560_v61  ;;  %v499_v7 = vmul.f32 %v2680_v62, %v3689_v5  ;;  %v696_v10 = vadd.f32 %v3697_v11, %v561_v0  ;;  %v562_v13 = vmul.f32 %v2807_v2, %v3689_v5  ;;  %v3278_v61 = vld [vmem:[%s3680_s30 + $0x130] sm:$0xff]   ;;  %v3247_v2 = vld [vmem:[%s3680_s30 + $0x38] sm:$0xff]  }
  0x1f   : > { %v760_v9 = vmax.f32 %v632_v63, 0.0  ;;  %v633_v12 = vadd.f32 %v3697_v11, %v498_v1  ;;  %v563_v17 = vmul.f32 %v2808_v8, %v3689_v5  ;;  %v2683_v18 = vunpack.c.l.bf16 %v3244_v3  ;;  %3452 = vmatpush3.bf16.msra.mxu0 %v3613_v58 }
  0x20   : > { %v823_v15 = vmax.f32 %v695_v6, 0.0  ;;  %v634_v16 = vadd.f32 %v3697_v11, %v499_v7  ;;  %v824_v21 = vmax.f32 %v696_v10, 0.0  ;;  %v697_v23 = vadd.f32 %v3697_v11, %v562_v13  ;;  %3597 = vmatpush3.bf16.msra.mxu1 %v3613_v58  ;;  %3453 = vmatprep.subr.bf16.mxu0 %v3614_v14 }
  0x21   : > { %v885_v20 = vpack.c.bf16 %v760_v9, %v759_v4  ;;  %v761_v22 = vmax.f32 %v633_v12, 0.0  ;;  %v698_v25 = vadd.f32 %v3697_v11, %v563_v17  ;;  %v2684_v26 = vunpack.c.h.bf16 %v3244_v3  ;;  %3590 = vmatprep.subr.bf16.mxu1 %v3614_v14 }
  0x22   : > { %v762_v24 = vmax.f32 %v634_v16, 0.0  ;;  %v500_v27 = vmul.f32 %v2683_v18, %v3689_v5  ;;  %v917_v29 = vpack.c.bf16 %v824_v21, %v823_v15  ;;  %v825_v30 = vmax.f32 %v697_v23, 0.0  ;;  %v3279_v15 = vld [vmem:[%s3680_s30 + $0x138] sm:$0xff]  }
  0x23   : > { %v2811_v31 = vunpack.c.l.bf16 %v3276_v19  ;;  %v2812_v32 = vunpack.c.h.bf16 %v3276_v19  ;;  %v826_v35 = vmax.f32 %v698_v25, 0.0  ;;  %v501_v36 = vmul.f32 %v2684_v26, %v3689_v5  ;;  %3454 = vmatpush3.bf16.msra.mxu0 %v3614_v14 }
  0x24   : > { %v3756_v34 = vpack.c.bf16 %v762_v24, %v761_v22  ;;  %v635_v37 = vadd.f32 %v3697_v11, %v500_v27  ;;  %v2687_v40 = vunpack.c.l.bf16 %v3245_v28  ;;  %v2688_v41 = vunpack.c.h.bf16 %v3245_v28  ;;  %3598 = vmatpush3.bf16.msra.mxu1 %v3614_v14 }
  0x25   : > { %v564_v38 = vmul.f32 %v2811_v31, %v3689_v5  ;;  %v565_v39 = vmul.f32 %v2812_v32, %v3689_v5  ;;  %v918_v43 = vpack.c.bf16 %v826_v35, %v825_v30  ;;  %v636_v44 = vadd.f32 %v3697_v11, %v501_v36 }
  0x26   : > { %v763_v45 = vmax.f32 %v635_v37, 0.0  ;;  %v2815_v46 = vunpack.c.l.bf16 %v3277_v33  ;;  %v502_v49 = vmul.f32 %v2687_v40, %v3689_v5  ;;  %v2816_v50 = vunpack.c.h.bf16 %v3277_v33  ;;  %3456 = vmatmul.mubr.bf16.vlgmr.msra.gmra.mrb[0].mxu0 %v3726_v54  ;;  %v3280_v33 = vld [vmem:[%s3680_s30 + $0x140] sm:$0xff]  }
  0x27   : > { %v699_v47 = vadd.f32 %v3697_v11, %v564_v38  ;;  %v700_v48 = vadd.f32 %v3697_v11, %v565_v39  ;;  %v764_v51 = vmax.f32 %v636_v44, 0.0  ;;  %v503_v52 = vmul.f32 %v2688_v41, %v3689_v5  ;;  %3520 = vmatmul.mubr.bf16.vlgmr.msra.gmra.mrb[0].mxu1 %v3732_v59  ;;  %3459 = vmatprep.mubr.bf16.mxu0 %v885_v20  ;;  %v3248_v20 = vld [vmem:[%s3680_s30 + $0x40] sm:$0xff]  }
  0x28   : > { %v566_v53 = vmul.f32 %v2815_v46, %v3689_v5  ;;  %v2691_v55 = vunpack.c.l.bf16 %v3246_v42  ;;  %v637_v58 = vadd.f32 %v3697_v11, %v502_v49  ;;  %v567_v60 = vmul.f32 %v2816_v50, %v3689_v5  ;;  %3523 = vmatprep.mubr.bf16.mxu1 %v917_v29  ;;  %v3249_v46 = vld [vmem:[%s3680_s30 + $0x48] sm:$0xff]  }
  0x29   : > { %v827_v56 = vmax.f32 %v699_v47, 0.0  ;;  %v828_v57 = vmax.f32 %v700_v48, 0.0  ;;  %v887_v62 = vpack.c.bf16 %v764_v51, %v763_v45  ;;  %v638_v63 = vadd.f32 %v3697_v11, %v503_v52  ;;  %v3281_v51 = vld [vmem:[%s3680_s30 + $0x148] sm:$0xff]  }
  0x2a   : > { %v701_v0 = vadd.f32 %v3697_v11, %v566_v53  ;;  %v2692_v1 = vunpack.c.h.bf16 %v3246_v42  ;;  %v765_v4 = vmax.f32 %v637_v58, 0.0  ;;  %v702_v6 = vadd.f32 %v3697_v11, %v567_v60 }
  0x2b   : > { %v919_v3 = vpack.c.bf16 %v828_v57, %v827_v56  ;;  %v504_v7 = vmul.f32 %v2691_v55, %v3689_v5  ;;  %v766_v54 = vmax.f32 %v638_v63, 0.0  ;;  %v2819_v9 = vunpack.c.l.bf16 %v3278_v61 }
  0x2c   : > { %v829_v8 = vmax.f32 %v701_v0, 0.0  ;;  %v505_v59 = vmul.f32 %v2692_v1, %v3689_v5  ;;  %v830_v10 = vmax.f32 %v702_v6, 0.0  ;;  %v2820_v13 = vunpack.c.h.bf16 %v3278_v61 }
  0x2d   : > { %v639_v12 = vadd.f32 %v3697_v11, %v504_v7  ;;  %v2695_v14 = vunpack.c.l.bf16 %v3247_v2  ;;  %v888_v16 = vpack.c.bf16 %v766_v54, %v765_v4  ;;  %v568_v18 = vmul.f32 %v2819_v9, %v3689_v5 }
  0x2e   : > { %v640_v17 = vadd.f32 %v3697_v11, %v505_v59  ;;  %v2696_v19 = vunpack.c.h.bf16 %v3247_v2  ;;  %v920_v21 = vpack.c.bf16 %v830_v10, %v829_v8  ;;  %v569_v23 = vmul.f32 %v2820_v13, %v3689_v5  ;;  %3460 = vmatmul.mubr.bf16.gmra.mrb[4].mxu0 %v3756_v34  ;;  %v3250_v2 = vld [vmem:[%s3680_s30 + $0x50] sm:$0xff]  }
  0x2f   : > { %v767_v22 = vmax.f32 %v639_v12, 0.0  ;;  %v506_v24 = vmul.f32 %v2695_v14, %v3689_v5  ;;  %v703_v26 = vadd.f32 %v3697_v11, %v568_v18  ;;  %v2823_v28 = vunpack.c.l.bf16 %v3279_v15  ;;  %3524 = vmatmul.mubr.bf16.gmra.mrb[4].mxu1 %v918_v43  ;;  %3463 = vmatprep.mubr.bf16.mxu0 %v887_v62  ;;  %v3282_v10 = vld [vmem:[%s3680_s30 + $0x150] sm:$0xff]  }
  0x30   : > { %v768_v25 = vmax.f32 %v640_v17, 0.0  ;;  %v507_v27 = vmul.f32 %v2696_v19, %v3689_v5  ;;  %v704_v29 = vadd.f32 %v3697_v11, %v569_v23  ;;  %v2824_v31 = vunpack.c.h.bf16 %v3279_v15  ;;  %3527 = vmatprep.mubr.bf16.mxu1 %v919_v3 }
  0x31   : > { %v641_v30 = vadd.f32 %v3697_v11, %v506_v24  ;;  %v2699_v32 = vunpack.c.l.bf16 %v3248_v20  ;;  %v831_v36 = vmax.f32 %v703_v26, 0.0  ;;  %v570_v38 = vmul.f32 %v2823_v28, %v3689_v5 }
  0x32   : > { %v889_v35 = vpack.c.bf16 %v768_v25, %v767_v22  ;;  %v642_v37 = vadd.f32 %v3697_v11, %v507_v27  ;;  %v832_v39 = vmax.f32 %v704_v29, 0.0  ;;  %v571_v41 = vmul.f32 %v2824_v31, %v3689_v5 }
  0x33   : > { %v769_v40 = vmax.f32 %v641_v30, 0.0  ;;  %v2700_v42 = vunpack.c.h.bf16 %v3248_v20  ;;  %v705_v45 = vadd.f32 %v3697_v11, %v570_v38  ;;  %v508_v34 = vmul.f32 %v2699_v32, %v3689_v5  ;;  %v3251_v20 = vld [vmem:[%s3680_s30 + $0x58] sm:$0xff]  }
  0x34   : > { %v770_v44 = vmax.f32 %v642_v37, 0.0  ;;  %v2827_v43 = vunpack.c.l.bf16 %v3280_v33  ;;  %v921_v47 = vpack.c.bf16 %v832_v39, %v831_v36  ;;  %v706_v48 = vadd.f32 %v3697_v11, %v571_v41 }
  0x35   : > { %v509_v49 = vmul.f32 %v2700_v42, %v3689_v5  ;;  %v2828_v50 = vunpack.c.h.bf16 %v3280_v33  ;;  %v833_v53 = vmax.f32 %v705_v45, 0.0  ;;  %v643_v55 = vadd.f32 %v3697_v11, %v508_v34  ;;  %v3283_v33 = vld [vmem:[%s3680_s30 + $0x158] sm:$0xff]  }
  0x36   : > { %v890_v52 = vpack.c.bf16 %v770_v44, %v769_v40  ;;  %v572_v56 = vmul.f32 %v2827_v43, %v3689_v5  ;;  %v834_v57 = vmax.f32 %v706_v48, 0.0  ;;  %v2703_v61 = vunpack.c.l.bf16 %v3249_v46  ;;  %3464 = vmatmul.mubr.bf16.gmra.mrb[8].mxu0 %v888_v16  ;;  %v3252_v44 = vld [vmem:[%s3680_s30 + $0x60] sm:$0xff]  }
  0x37   : > { %v644_v58 = vadd.f32 %v3697_v11, %v509_v49  ;;  %v573_v60 = vmul.f32 %v2828_v50, %v3689_v5  ;;  %v771_v62 = vmax.f32 %v643_v55, 0.0  ;;  %v2704_v0 = vunpack.c.h.bf16 %v3249_v46  ;;  %3528 = vmatmul.mubr.bf16.gmra.mrb[8].mxu1 %v920_v21  ;;  %3467 = vmatprep.mubr.bf16.mxu0 %v889_v35 }
  0x38   : > { %v707_v63 = vadd.f32 %v3697_v11, %v572_v56  ;;  %v2831_v1 = vunpack.c.l.bf16 %v3281_v51  ;;  %v922_v3 = vpack.c.bf16 %v834_v57, %v833_v53  ;;  %v510_v7 = vmul.f32 %v2703_v61, %v3689_v5  ;;  %3531 = vmatprep.mubr.bf16.mxu1 %v921_v47 }
  0x39   : > { %v772_v4 = vmax.f32 %v644_v58, 0.0  ;;  %v708_v6 = vadd.f32 %v3697_v11, %v573_v60  ;;  %v511_v8 = vmul.f32 %v2704_v0, %v3689_v5  ;;  %v2832_v59 = vunpack.c.h.bf16 %v3281_v51  ;;  %v3284_v51 = vld [vmem:[%s3680_s30 + $0x160] sm:$0xff]  }
  0x3a   : > { %v835_v54 = vmax.f32 %v707_v63, 0.0  ;;  %v574_v9 = vmul.f32 %v2831_v1, %v3689_v5  ;;  %v645_v14 = vadd.f32 %v3697_v11, %v510_v7  ;;  %v2707_v15 = vunpack.c.l.bf16 %v3250_v2 }
  0x3b   : > { %v891_v12 = vpack.c.bf16 %v772_v4, %v771_v62  ;;  %v836_v13 = vmax.f32 %v708_v6, 0.0  ;;  %v646_v17 = vadd.f32 %v3697_v11, %v511_v8  ;;  %v575_v16 = vmul.f32 %v2832_v59, %v3689_v5 }
  0x3c   : > { %v709_v18 = vadd.f32 %v3697_v11, %v574_v9  ;;  %v2708_v19 = vunpack.c.h.bf16 %v3250_v2  ;;  %v773_v22 = vmax.f32 %v645_v14, 0.0  ;;  %v512_v23 = vmul.f32 %v2707_v15, %v3689_v5  ;;  %v3253_v2 = vld [vmem:[%s3680_s30 + $0x68] sm:$0xff]  }
  0x3d   : > { %v923_v21 = vpack.c.bf16 %v836_v13, %v835_v54  ;;  %v2835_v24 = vunpack.c.l.bf16 %v3282_v10  ;;  %v774_v25 = vmax.f32 %v646_v17, 0.0  ;;  %v710_v26 = vadd.f32 %v3697_v11, %v575_v16  ;;  %v3285_v54 = vld [vmem:[%s3680_s30 + $0x168] sm:$0xff]  }
  0x3e   : > { %v837_v27 = vmax.f32 %v709_v18, 0.0  ;;  %v513_v28 = vmul.f32 %v2708_v19, %v3689_v5  ;;  %v647_v29 = vadd.f32 %v3697_v11, %v512_v23  ;;  %v2836_v30 = vunpack.c.h.bf16 %v3282_v10  ;;  %3468 = vmatmul.mubr.bf16.gmra.mrb[12].mxu0 %v890_v52 }
  0x3f   : > { %v576_v31 = vmul.f32 %v2835_v24, %v3689_v5  ;;  %v2711_v32 = vunpack.c.l.bf16 %v3251_v20  ;;  %v892_v35 = vpack.c.bf16 %v774_v25, %v773_v22  ;;  %v838_v36 = vmax.f32 %v710_v26, 0.0  ;;  %3532 = vmatmul.mubr.bf16.gmra.mrb[12].mxu1 %v922_v3  ;;  %3471 = vmatprep.mubr.bf16.mxu0 %v891_v12 }
  0x40   : > { %v648_v37 = vadd.f32 %v3697_v11, %v513_v28  ;;  %v2712_v38 = vunpack.c.h.bf16 %v3251_v20  ;;  %v775_v39 = vmax.f32 %v647_v29, 0.0  ;;  %v577_v40 = vmul.f32 %v2836_v30, %v3689_v5  ;;  %3535 = vmatprep.mubr.bf16.mxu1 %v923_v21  ;;  %v3254_v20 = vld [vmem:[%s3680_s30 + $0x70] sm:$0xff]  }
  0x41   : > { %v711_v41 = vadd.f32 %v3697_v11, %v576_v31  ;;  %v514_v42 = vmul.f32 %v2711_v32, %v3689_v5  ;;  %v924_v45 = vpack.c.bf16 %v838_v36, %v837_v27  ;;  %v2839_v46 = vunpack.c.l.bf16 %v3283_v33  ;;  %v3286_v29 = vld [vmem:[%s3680_s30 + $0x170] sm:$0xff]  }
  0x42   : > { %v776_v34 = vmax.f32 %v648_v37, 0.0  ;;  %v515_v43 = vmul.f32 %v2712_v38, %v3689_v5  ;;  %v712_v47 = vadd.f32 %v3697_v11, %v577_v40  ;;  %v2840_v50 = vunpack.c.h.bf16 %v3283_v33 }
  0x43   : > { %v839_v48 = vmax.f32 %v711_v41, 0.0  ;;  %v649_v49 = vadd.f32 %v3697_v11, %v514_v42  ;;  %v578_v52 = vmul.f32 %v2839_v46, %v3689_v5  ;;  %v2715_v56 = vunpack.c.l.bf16 %v3252_v44 }
  0x44   : > { %v893_v53 = vpack.c.bf16 %v776_v34, %v775_v39  ;;  %v650_v55 = vadd.f32 %v3697_v11, %v515_v43  ;;  %v840_v57 = vmax.f32 %v712_v47, 0.0  ;;  %v579_v60 = vmul.f32 %v2840_v50, %v3689_v5  ;;  %v3255_v39 = vld [vmem:[%s3680_s30 + $0x78] sm:$0xff]  }
  0x45   : > { %v777_v58 = vmax.f32 %v649_v49, 0.0  ;;  %v2716_v61 = vunpack.c.h.bf16 %v3252_v44  ;;  %v713_v63 = vadd.f32 %v3697_v11, %v578_v52  ;;  %v516_v0 = vmul.f32 %v2715_v56, %v3689_v5 }
  0x46   : > { %v778_v62 = vmax.f32 %v650_v55, 0.0  ;;  %v2843_v1 = vunpack.c.l.bf16 %v3284_v51  ;;  %v925_v3 = vpack.c.bf16 %v840_v57, %v839_v48  ;;  %v714_v4 = vadd.f32 %v3697_v11, %v579_v60  ;;  %3472 = vmatmul.mubr.bf16.gmra.mrb[16].mxu0 %v892_v35 }
  0x47   : > { %v517_v6 = vmul.f32 %v2716_v61, %v3689_v5  ;;  %v2844_v7 = vunpack.c.h.bf16 %v3284_v51  ;;  %v841_v59 = vmax.f32 %v713_v63, 0.0  ;;  %v651_v9 = vadd.f32 %v3697_v11, %v516_v0  ;;  %3536 = vmatmul.mubr.bf16.gmra.mrb[16].mxu1 %v924_v45  ;;  %3475 = vmatprep.mubr.bf16.mxu0 %v893_v53  ;;  %v3287_v51 = vld [vmem:[%s3680_s30 + $0x178] sm:$0xff]  }
  0x48   : > { %v894_v8 = vpack.c.bf16 %v778_v62, %v777_v58  ;;  %v580_v10 = vmul.f32 %v2843_v1, %v3689_v5  ;;  %v842_v12 = vmax.f32 %v714_v4, 0.0  ;;  %v2719_v15 = vunpack.c.l.bf16 %v3253_v2  ;;  %3539 = vmatprep.mubr.bf16.mxu1 %v925_v3  ;;  %v3256_v62 = vld [vmem:[%s3680_s30 + $0x80] sm:$0xff]  }
  0x49   : > { %v652_v13 = vadd.f32 %v3697_v11, %v517_v6  ;;  %v581_v14 = vmul.f32 %v2844_v7, %v3689_v5  ;;  %v779_v17 = vmax.f32 %v651_v9, 0.0  ;;  %v2720_v18 = vunpack.c.h.bf16 %v3253_v2 }
  0x4a   : > { %v715_v16 = vadd.f32 %v3697_v11, %v580_v10  ;;  %v2847_v19 = vunpack.c.l.bf16 %v3285_v54  ;;  %v926_v21 = vpack.c.bf16 %v842_v12, %v841_v59  ;;  %v518_v24 = vmul.f32 %v2719_v15, %v3689_v5 }
  0x4b   : > { %v780_v22 = vmax.f32 %v652_v13, 0.0  ;;  %v716_v23 = vadd.f32 %v3697_v11, %v581_v14  ;;  %v519_v26 = vmul.f32 %v2720_v18, %v3689_v5  ;;  %v2848_v27 = vunpack.c.h.bf16 %v3285_v54  ;;  %v3288_v54 = vld [vmem:[%s3680_s30 + $0x180] sm:$0xff]  }
  0x4c   : > { %v843_v25 = vmax.f32 %v715_v16, 0.0  ;;  %v582_v28 = vmul.f32 %v2847_v19, %v3689_v5  ;;  %v653_v32 = vadd.f32 %v3697_v11, %v518_v24  ;;  %v2723_v33 = vunpack.c.l.bf16 %v3254_v20 }
  0x4d   : > { %v895_v30 = vpack.c.bf16 %v780_v22, %v779_v17  ;;  %v844_v31 = vmax.f32 %v716_v23, 0.0  ;;  %v654_v35 = vadd.f32 %v3697_v11, %v519_v26  ;;  %v583_v36 = vmul.f32 %v2848_v27, %v3689_v5 }
  0x4e   : > { %v717_v37 = vadd.f32 %v3697_v11, %v582_v28  ;;  %v2724_v38 = vunpack.c.h.bf16 %v3254_v20  ;;  %v781_v41 = vmax.f32 %v653_v32, 0.0  ;;  %v520_v42 = vmul.f32 %v2723_v33, %v3689_v5  ;;  %3476 = vmatmul.mubr.bf16.gmra.mrb[20].mxu0 %v894_v8  ;;  %v3257_v20 = vld [vmem:[%s3680_s30 + $0x88] sm:$0xff]  }
  0x4f   : > { %v927_v40 = vpack.c.bf16 %v844_v31, %v843_v25  ;;  %v2851_v44 = vunpack.c.l.bf16 %v3286_v29  ;;  %v782_v45 = vmax.f32 %v654_v35, 0.0  ;;  %v718_v34 = vadd.f32 %v3697_v11, %v583_v36  ;;  %3540 = vmatmul.mubr.bf16.gmra.mrb[20].mxu1 %v926_v21  ;;  %3479 = vmatprep.mubr.bf16.mxu0 %v895_v30  ;;  %v3289_v25 = vld [vmem:[%s3680_s30 + $0x188] sm:$0xff]  }
  0x50   : > { %v845_v43 = vmax.f32 %v717_v37, 0.0  ;;  %v521_v46 = vmul.f32 %v2724_v38, %v3689_v5  ;;  %v655_v47 = vadd.f32 %v3697_v11, %v520_v42  ;;  %v2852_v48 = vunpack.c.h.bf16 %v3286_v29 }
  0x51   : > { %v584_v49 = vmul.f32 %v2851_v44, %v3689_v5  ;;  %v2727_v50 = vunpack.c.l.bf16 %v3255_v39  ;;  %v896_v53 = vpack.c.bf16 %v782_v45, %v781_v41  ;;  %v846_v55 = vmax.f32 %v718_v34, 0.0  ;;  %3543 = vmatprep.mubr.bf16.mxu1 %v927_v40 }
  0x52   : > { %v656_v52 = vadd.f32 %v3697_v11, %v521_v46  ;;  %v2728_v56 = vunpack.c.h.bf16 %v3255_v39  ;;  %v783_v57 = vmax.f32 %v655_v47, 0.0  ;;  %v585_v58 = vmul.f32 %v2852_v48, %v3689_v5  ;;  %v3258_v39 = vld [vmem:[%s3680_s30 + $0x90] sm:$0xff]  }
  0x53   : > { %v719_v60 = vadd.f32 %v3697_v11, %v584_v49  ;;  %v522_v61 = vmul.f32 %v2727_v50, %v3689_v5  ;;  %v928_v63 = vpack.c.bf16 %v846_v55, %v845_v43  ;;  %v2855_v2 = vunpack.c.l.bf16 %v3287_v51  ;;  %v3290_v47 = vld [vmem:[%s3680_s30 + $0x190] sm:$0xff]  }
  0x54   : > { %v784_v0 = vmax.f32 %v656_v52, 0.0  ;;  %v523_v1 = vmul.f32 %v2728_v56, %v3689_v5  ;;  %v720_v3 = vadd.f32 %v3697_v11, %v585_v58  ;;  %v2856_v7 = vunpack.c.h.bf16 %v3287_v51 }
  0x55   : > { %v847_v4 = vmax.f32 %v719_v60, 0.0  ;;  %v657_v6 = vadd.f32 %v3697_v11, %v522_v61  ;;  %v586_v9 = vmul.f32 %v2855_v2, %v3689_v5  ;;  %v2731_v10 = vunpack.c.l.bf16 %v3256_v62 }
  0x56   : > { %v897_v8 = vpack.c.bf16 %v784_v0, %v783_v57  ;;  %v658_v59 = vadd.f32 %v3697_v11, %v523_v1  ;;  %v848_v12 = vmax.f32 %v720_v3, 0.0  ;;  %v587_v14 = vmul.f32 %v2856_v7, %v3689_v5  ;;  %3480 = vmatmul.mubr.bf16.gmra.mrb[24].mxu0 %v896_v53  ;;  %v3259_v57 = vld [vmem:[%s3680_s30 + $0x98] sm:$0xff]  }
  0x57   : > { %v785_v13 = vmax.f32 %v657_v6, 0.0  ;;  %v2732_v15 = vunpack.c.h.bf16 %v3256_v62  ;;  %v721_v16 = vadd.f32 %v3697_v11, %v586_v9  ;;  %v524_v18 = vmul.f32 %v2731_v10, %v3689_v5  ;;  %3544 = vmatmul.mubr.bf16.gmra.mrb[24].mxu1 %v928_v63 }
  0x58   : > { %v786_v17 = vmax.f32 %v658_v59, 0.0  ;;  %v2859_v19 = vunpack.c.l.bf16 %v3288_v54  ;;  %v929_v21 = vpack.c.bf16 %v848_v12, %v847_v4  ;;  %v722_v22 = vadd.f32 %v3697_v11, %v587_v14  ;;  %3483 = vmatprep.mubr.bf16.mxu0 %v897_v8 }
  0x59   : > { %v525_v23 = vmul.f32 %v2732_v15, %v3689_v5  ;;  %v2860_v24 = vunpack.c.h.bf16 %v3288_v54  ;;  %v849_v27 = vmax.f32 %v721_v16, 0.0  ;;  %v659_v28 = vadd.f32 %v3697_v11, %v524_v18  ;;  %v3291_v54 = vld [vmem:[%s3680_s30 + $0x198] sm:$0xff]  }
  0x5a   : > { %v898_v26 = vpack.c.bf16 %v786_v17, %v785_v13  ;;  %v588_v29 = vmul.f32 %v2859_v19, %v3689_v5  ;;  %3547 = vmatprep.mubr.bf16.mxu1 %v929_v21  ;;  %v850_v30 = vmax.f32 %v722_v22, 0.0  ;;  %v2735_v33 = vunpack.c.l.bf16 %v3257_v20  ;;  %v3260_v17 = vld [vmem:[%s3680_s30 + $0xa0] sm:$0xff]  }
  0x5b   : > { %v660_v31 = vadd.f32 %v3697_v11, %v525_v23  ;;  %v589_v32 = vmul.f32 %v2860_v24, %v3689_v5  ;;  %v787_v35 = vmax.f32 %v659_v28, 0.0  ;;  %v2736_v37 = vunpack.c.h.bf16 %v3257_v20 }
  0x5c   : > { %v723_v36 = vadd.f32 %v3697_v11, %v588_v29  ;;  %v2863_v38 = vunpack.c.l.bf16 %v3289_v25  ;;  %v930_v40 = vpack.c.bf16 %v850_v30, %v849_v27  ;;  %v526_v44 = vmul.f32 %v2735_v33, %v3689_v5 }
  0x5d   : > { %v788_v41 = vmax.f32 %v660_v31, 0.0  ;;  %v724_v42 = vadd.f32 %v3697_v11, %v589_v32  ;;  %v527_v34 = vmul.f32 %v2736_v37, %v3689_v5  ;;  %v2864_v43 = vunpack.c.h.bf16 %v3289_v25  ;;  %v3292_v25 = vld [vmem:[%s3680_s30 + $0x1a0] sm:$0xff]  }
  0x5e   : > { %v851_v45 = vmax.f32 %v723_v36, 0.0  ;;  %v590_v46 = vmul.f32 %v2863_v38, %v3689_v5  ;;  %v661_v50 = vadd.f32 %v3697_v11, %v526_v44  ;;  %v2739_v51 = vunpack.c.l.bf16 %v3258_v39  ;;  %3484 = vmatmul.mubr.bf16.gmra.mrb[28].mxu0 %v898_v26 }
  0x5f   : > { %v899_v48 = vpack.c.bf16 %v788_v41, %v787_v35  ;;  %v852_v49 = vmax.f32 %v724_v42, 0.0  ;;  %v662_v53 = vadd.f32 %v3697_v11, %v527_v34  ;;  %v591_v55 = vmul.f32 %v2864_v43, %v3689_v5  ;;  %3548 = vmatmul.mubr.bf16.gmra.mrb[28].mxu1 %v930_v40 }
  0x60   : > { %v725_v52 = vadd.f32 %v3697_v11, %v590_v46  ;;  %v2740_v56 = vunpack.c.h.bf16 %v3258_v39  ;;  %v789_v60 = vmax.f32 %v661_v50, 0.0  ;;  %v528_v61 = vmul.f32 %v2739_v51, %v3689_v5  ;;  %v3261_v39 = vld [vmem:[%s3680_s30 + $0xa8] sm:$0xff]  }
  0x61   : > { %v931_v58 = vpack.c.bf16 %v852_v49, %v851_v45  ;;  %v2867_v62 = vunpack.c.l.bf16 %v3290_v47  ;;  %v790_v63 = vmax.f32 %v662_v53, 0.0  ;;  %v726_v0 = vadd.f32 %v3697_v11, %v591_v55  ;;  %3487 = vmatprep.mubr.bf16.mxu0 %v899_v48  ;;  %v3293_v45 = vld [vmem:[%s3680_s30 + $0x1a8] sm:$0xff]  }
  0x62   : > { %v853_v1 = vmax.f32 %v725_v52, 0.0  ;;  %v529_v2 = vmul.f32 %v2740_v56, %v3689_v5  ;;  %v663_v3 = vadd.f32 %v3697_v11, %v528_v61  ;;  %v2868_v4 = vunpack.c.h.bf16 %v3290_v47 }
  0x63   : > { %3551 = vmatprep.mubr.bf16.mxu1 %v931_v58  ;;  %v592_v6 = vmul.f32 %v2867_v62, %v3689_v5  ;;  %v2743_v7 = vunpack.c.l.bf16 %v3259_v57  ;;  %v900_v8 = vpack.c.bf16 %v790_v63, %v789_v60  ;;  %v854_v59 = vmax.f32 %v726_v0, 0.0 }
  0x64   : > { %v664_v9 = vadd.f32 %v3697_v11, %v529_v2  ;;  %v2744_v10 = vunpack.c.h.bf16 %v3259_v57  ;;  %v791_v12 = vmax.f32 %v663_v3, 0.0  ;;  %v593_v13 = vmul.f32 %v2868_v4, %v3689_v5  ;;  %v3262_v57 = vld [vmem:[%s3680_s30 + $0xb0] sm:$0xff]  }
  0x65   : > { %v727_v14 = vadd.f32 %v3697_v11, %v592_v6  ;;  %v530_v15 = vmul.f32 %v2743_v7, %v3689_v5  ;;  %v932_v16 = vpack.c.bf16 %v854_v59, %v853_v1  ;;  %v2871_v20 = vunpack.c.l.bf16 %v3291_v54  ;;  %v3294_v3 = vld [vmem:[%s3680_s30 + $0x1b0] sm:$0xff]  }
  0x66   : > { %v792_v18 = vmax.f32 %v664_v9, 0.0  ;;  %v531_v19 = vmul.f32 %v2744_v10, %v3689_v5  ;;  %v728_v21 = vadd.f32 %v3697_v11, %v593_v13  ;;  %v2872_v24 = vunpack.c.h.bf16 %v3291_v54  ;;  %3488 = vmatmul.mubr.bf16.gmra.mrb[32].mxu0 %v900_v8 }
  0x67   : > { %v855_v22 = vmax.f32 %v727_v14, 0.0  ;;  %v665_v23 = vadd.f32 %v3697_v11, %v530_v15  ;;  %v594_v28 = vmul.f32 %v2871_v20, %v3689_v5  ;;  %v2747_v29 = vunpack.c.l.bf16 %v3260_v17  ;;  %3552 = vmatmul.mubr.bf16.gmra.mrb[32].mxu1 %v932_v16  ;;  %v3943_v20 = vld [vmem:[%s4256_s3] ss:$0 sm:$0xff] }
  0x68   : > { %v901_v26 = vpack.c.bf16 %v792_v18, %v791_v12  ;;  %v666_v27 = vadd.f32 %v3697_v11, %v531_v19  ;;  %v856_v30 = vmax.f32 %v728_v21, 0.0  ;;  %v595_v32 = vmul.f32 %v2872_v24, %v3689_v5  ;;  %v3263_v12 = vld [vmem:[%s3680_s30 + $0xb8] sm:$0xff]  }
  0x69   : > { %v793_v31 = vmax.f32 %v665_v23, 0.0  ;;  %v2748_v33 = vunpack.c.h.bf16 %v3260_v17  ;;  %v729_v36 = vadd.f32 %v3697_v11, %v594_v28  ;;  %v532_v37 = vmul.f32 %v2747_v29, %v3689_v5  ;;  %v3952_v28 = vld [vmem:[%s4257_s4] ss:$0 sm:$0xff] }
  0x6a   : > { %v794_v35 = vmax.f32 %v666_v27, 0.0  ;;  %v2875_v38 = vunpack.c.l.bf16 %v3292_v25  ;;  %3491 = vmatprep.mubr.bf16.mxu0 %v901_v26  ;;  %v933_v40 = vpack.c.bf16 %v856_v30, %v855_v22  ;;  %v730_v41 = vadd.f32 %v3697_v11, %v595_v32 }
  0x6b   : > { %v533_v42 = vmul.f32 %v2748_v33, %v3689_v5  ;;  %v2876_v44 = vunpack.c.h.bf16 %v3292_v25  ;;  %v857_v43 = vmax.f32 %v729_v36, 0.0  ;;  %v667_v46 = vadd.f32 %v3697_v11, %v532_v37  ;;  %v3295_v25 = vld [vmem:[%s3680_s30 + $0x1b8] sm:$0xff]  }
  0x6c   : > { %v902_v34 = vpack.c.bf16 %v794_v35, %v793_v31  ;;  %v596_v47 = vmul.f32 %v2875_v38, %v3689_v5  ;;  %3555 = vmatprep.mubr.bf16.mxu1 %v933_v40  ;;  %v858_v48 = vmax.f32 %v730_v41, 0.0  ;;  %v2751_v51 = vunpack.c.l.bf16 %v3261_v39  ;;  %v3264_v35 = vld [vmem:[%s3680_s30 + $0xc0] sm:$0xff]  }
  0x6d   : > { %v668_v49 = vadd.f32 %v3697_v11, %v533_v42  ;;  %v597_v50 = vmul.f32 %v2876_v44, %v3689_v5  ;;  %v795_v53 = vmax.f32 %v667_v46, 0.0  ;;  %v2752_v52 = vunpack.c.h.bf16 %v3261_v39 }
  0x6e   : > { %v731_v55 = vadd.f32 %v3697_v11, %v596_v47  ;;  %v2879_v56 = vunpack.c.l.bf16 %v3293_v45  ;;  %v934_v58 = vpack.c.bf16 %v858_v48, %v857_v43  ;;  %v534_v62 = vmul.f32 %v2751_v51, %v3689_v5  ;;  %3492 = vmatmul.mubr.bf16.gmra.mrb[36].mxu0 %v902_v34 }
  0x6f   : > { %v796_v60 = vmax.f32 %v668_v49, 0.0  ;;  %v732_v61 = vadd.f32 %v3697_v11, %v597_v50  ;;  %v535_v0 = vmul.f32 %v2752_v52, %v3689_v5  ;;  %v2880_v1 = vunpack.c.h.bf16 %v3293_v45  ;;  %v3296_v45 = vld [vmem:[%s3680_s30 + $0x1c0] sm:$0xff]  }
  0x70   : > { %v859_v63 = vmax.f32 %v731_v55, 0.0  ;;  %v598_v2 = vmul.f32 %v2879_v56, %v3689_v5  ;;  %v669_v7 = vadd.f32 %v3697_v11, %v534_v62  ;;  %v2755_v54 = vunpack.c.l.bf16 %v3262_v57  ;;  %3556 = vmatmul.mubr.bf16.gmra.mrb[36].mxu1 %v934_v58 }
  0x71   : > { %v903_v4 = vpack.c.bf16 %v796_v60, %v795_v53  ;;  %v860_v6 = vmax.f32 %v732_v61, 0.0  ;;  %v670_v8 = vadd.f32 %v3697_v11, %v535_v0  ;;  %v599_v59 = vmul.f32 %v2880_v1, %v3689_v5 }
  0x72   : > { %v733_v9 = vadd.f32 %v3697_v11, %v598_v2  ;;  %v2756_v10 = vunpack.c.h.bf16 %v3262_v57  ;;  %v797_v14 = vmax.f32 %v669_v7, 0.0  ;;  %v536_v15 = vmul.f32 %v2755_v54, %v3689_v5  ;;  %v3265_v57 = vld [vmem:[%s3680_s30 + $0xc8] sm:$0xff]  }
  0x73   : > { %3495 = vmatprep.mubr.bf16.mxu0 %v903_v4  ;;  %v935_v13 = vpack.c.bf16 %v860_v6, %v859_v63  ;;  %v2883_v17 = vunpack.c.l.bf16 %v3294_v3  ;;  %v798_v16 = vmax.f32 %v670_v8, 0.0  ;;  %v734_v18 = vadd.f32 %v3697_v11, %v599_v59  ;;  %v3297_v63 = vld [vmem:[%s3680_s30 + $0x1c8] sm:$0xff]  }
  0x74   : > { %v861_v19 = vmax.f32 %v733_v9, 0.0  ;;  %v537_v21 = vmul.f32 %v3943_v20, %v2756_v10  ;;  %v671_v22 = vadd.f32 %v3697_v11, %v536_v15  ;;  %v2884_v23 = vunpack.c.h.bf16 %v3294_v3 }
  0x75   : > { %3559 = vmatprep.mubr.bf16.mxu1 %v935_v13  ;;  %v600_v24 = vmul.f32 %v3943_v20, %v2883_v17  ;;  %v2759_v5 = vunpack.c.l.bf16 %v3263_v12  ;;  %v904_v26 = vpack.c.bf16 %v798_v16, %v797_v14  ;;  %v862_v27 = vmax.f32 %v734_v18, 0.0 }
  0x76   : > { %v672_v29 = vadd.f32 %v3952_v28, %v537_v21  ;;  %v2760_v30 = vunpack.c.h.bf16 %v3263_v12  ;;  %v799_v31 = vmax.f32 %v671_v22, 0.0  ;;  %v601_v32 = vmul.f32 %v3943_v20, %v2884_v23  ;;  %v3266_v12 = vld [vmem:[%s3680_s30 + $0xd0] sm:$0xff]  }
  0x77   : > { %v735_v11 = vadd.f32 %v3952_v28, %v600_v24  ;;  %v538_v33 = vmul.f32 %v3943_v20, %v2759_v5  ;;  %v936_v36 = vpack.c.bf16 %v862_v27, %v861_v19  ;;  %v2887_v39 = vunpack.c.l.bf16 %v3295_v25  ;;  %3496 = vmatmul.mubr.bf16.gmra.mrb[40].mxu0 %v904_v26  ;;  %v3298_v22 = vld [vmem:[%s3680_s30 + $0x1d0] sm:$0xff]  }
  0x78   : > { %v800_v37 = vmax.f32 %v672_v29, 0.0  ;;  %v539_v38 = vmul.f32 %v3943_v20, %v2760_v30  ;;  %v736_v40 = vadd.f32 %v3952_v28, %v601_v32  ;;  %v2888_v44 = vunpack.c.h.bf16 %v3295_v25 }
  0x79   : > { %v863_v41 = vmax.f32 %v735_v11, 0.0  ;;  %v673_v42 = vadd.f32 %v3952_v28, %v538_v33  ;;  %3560 = vmatmul.mubr.bf16.gmra.mrb[40].mxu1 %v936_v36  ;;  %v602_v46 = vmul.f32 %v3943_v20, %v2887_v39  ;;  %v2763_v47 = vunpack.c.l.bf16 %v3264_v35 }
  0x7a   : > { %v905_v34 = vpack.c.bf16 %v800_v37, %v799_v31  ;;  %v674_v43 = vadd.f32 %v3952_v28, %v539_v38  ;;  %v864_v48 = vmax.f32 %v736_v40, 0.0  ;;  %v603_v50 = vmul.f32 %v3943_v20, %v2888_v44  ;;  %v3267_v31 = vld [vmem:[%s3680_s30 + $0xd8] sm:$0xff]  }
  0x7b   : > { %v801_v49 = vmax.f32 %v673_v42, 0.0  ;;  %v2764_v51 = vunpack.c.h.bf16 %v3264_v35  ;;  %v737_v55 = vadd.f32 %v3952_v28, %v602_v46  ;;  %v540_v52 = vmul.f32 %v3943_v20, %v2763_v47 }
  0x7c   : > { %3499 = vmatprep.mubr.bf16.mxu0 %v905_v34  ;;  %v802_v53 = vmax.f32 %v674_v43, 0.0  ;;  %v2891_v56 = vunpack.c.l.bf16 %v3296_v45  ;;  %v937_v58 = vpack.c.bf16 %v864_v48, %v863_v41  ;;  %v738_v60 = vadd.f32 %v3952_v28, %v603_v50 }
  0x7d   : > { %v541_v61 = vmul.f32 %v3943_v20, %v2764_v51  ;;  %v2892_v62 = vunpack.c.h.bf16 %v3296_v45  ;;  %v865_v1 = vmax.f32 %v737_v55, 0.0  ;;  %v675_v2 = vadd.f32 %v3952_v28, %v540_v52  ;;  %v3299_v45 = vld [vmem:[%s3680_s30 + $0x1d8] sm:$0xff]  }
  0x7e   : > { %v906_v0 = vpack.c.bf16 %v802_v53, %v801_v49  ;;  %v604_v3 = vmul.f32 %v3943_v20, %v2891_v56  ;;  %3563 = vmatprep.mubr.bf16.mxu1 %v937_v58  ;;  %v866_v4 = vmax.f32 %v738_v60, 0.0  ;;  %v2767_v54 = vunpack.c.l.bf16 %v3265_v57  ;;  %v3268_v53 = vld [vmem:[%s3680_s30 + $0xe0] sm:$0xff]  }
  0x7f   : > { %v676_v6 = vadd.f32 %v3952_v28, %v541_v61  ;;  %v605_v7 = vmul.f32 %v3943_v20, %v2892_v62  ;;  %v803_v8 = vmax.f32 %v675_v2, 0.0  ;;  %v2768_v9 = vunpack.c.h.bf16 %v3265_v57 }
  0x80   : > { %v739_v59 = vadd.f32 %v3952_v28, %v604_v3  ;;  %v2895_v10 = vunpack.c.l.bf16 %v3297_v63  ;;  %v938_v13 = vpack.c.bf16 %v866_v4, %v865_v1  ;;  %v542_v17 = vmul.f32 %v3943_v20, %v2767_v54  ;;  %3500 = vmatmul.mubr.bf16.gmra.mrb[44].mxu0 %v906_v0 }
  0x81   : > { %v804_v14 = vmax.f32 %v676_v6, 0.0  ;;  %v740_v15 = vadd.f32 %v3952_v28, %v605_v7  ;;  %v543_v18 = vmul.f32 %v3943_v20, %v2768_v9  ;;  %v2896_v19 = vunpack.c.h.bf16 %v3297_v63  ;;  %v3300_v63 = vld [vmem:[%s3680_s30 + $0x1e0] sm:$0xff]  }
  0x82   : > { %v867_v16 = vmax.f32 %v739_v59, 0.0  ;;  %v606_v21 = vmul.f32 %v3943_v20, %v2895_v10  ;;  %3564 = vmatmul.mubr.bf16.gmra.mrb[44].mxu1 %v938_v13  ;;  %v677_v5 = vadd.f32 %v3952_v28, %v542_v17  ;;  %v2771_v25 = vunpack.c.l.bf16 %v3266_v12 }
  0x83   : > { %v907_v23 = vpack.c.bf16 %v804_v14, %v803_v8  ;;  %v868_v24 = vmax.f32 %v740_v15, 0.0  ;;  %v678_v26 = vadd.f32 %v3952_v28, %v543_v18  ;;  %v607_v27 = vmul.f32 %v3943_v20, %v2896_v19 }
  0x84   : > { %v741_v29 = vadd.f32 %v3952_v28, %v606_v21  ;;  %v2772_v30 = vunpack.c.h.bf16 %v3266_v12  ;;  %v805_v11 = vmax.f32 %v677_v5, 0.0  ;;  %v544_v33 = vmul.f32 %v3943_v20, %v2771_v25  ;;  %v3269_v12 = vld [vmem:[%s3680_s30 + $0xe8] sm:$0xff]  }
  0x85   : > { %3503 = vmatprep.mubr.bf16.mxu0 %v907_v23  ;;  %v939_v32 = vpack.c.bf16 %v868_v24, %v867_v16  ;;  %v2899_v35 = vunpack.c.l.bf16 %v3298_v22  ;;  %v806_v36 = vmax.f32 %v678_v26, 0.0  ;;  %v742_v37 = vadd.f32 %v3952_v28, %v607_v27  ;;  %v3301_v16 = vld [vmem:[%s3680_s30 + $0x1e8] sm:$0xff]  }
  0x86   : > { %v869_v38 = vmax.f32 %v741_v29, 0.0  ;;  %v545_v39 = vmul.f32 %v3943_v20, %v2772_v30  ;;  %v679_v40 = vadd.f32 %v3952_v28, %v544_v33  ;;  %v2900_v41 = vunpack.c.h.bf16 %v3298_v22 }
  0x87   : > { %3567 = vmatprep.mubr.bf16.mxu1 %v939_v32  ;;  %v608_v42 = vmul.f32 %v3943_v20, %v2899_v35  ;;  %v2775_v44 = vunpack.c.l.bf16 %v3267_v31  ;;  %v908_v34 = vpack.c.bf16 %v806_v36, %v805_v11  ;;  %v870_v43 = vmax.f32 %v742_v37, 0.0 }
  0x88   : > { %v680_v46 = vadd.f32 %v3952_v28, %v545_v39  ;;  %v2776_v47 = vunpack.c.h.bf16 %v3267_v31  ;;  %v807_v48 = vmax.f32 %v679_v40, 0.0  ;;  %v609_v49 = vmul.f32 %v3943_v20, %v2900_v41  ;;  %v3270_v31 = vld [vmem:[%s3680_s30 + $0xf0] sm:$0xff]  }
  0x89   : > { %v743_v50 = vadd.f32 %v3952_v28, %v608_v42  ;;  %v546_v51 = vmul.f32 %v3943_v20, %v2775_v44  ;;  %3504 = vmatmul.mubr.bf16.gmra.mrb[48].mxu0 %v908_v34  ;;  %v940_v55 = vpack.c.bf16 %v870_v43, %v869_v38  ;;  %v2903_v57 = vunpack.c.l.bf16 %v3299_v45  ;;  %v3302_v40 = vld [vmem:[%s3680_s30 + $0x1f0] sm:$0xff]  }
  0x8a   : > { %v808_v52 = vmax.f32 %v680_v46, 0.0  ;;  %v547_v56 = vmul.f32 %v3943_v20, %v2776_v47  ;;  %v744_v58 = vadd.f32 %v3952_v28, %v609_v49  ;;  %v2904_v62 = vunpack.c.h.bf16 %v3299_v45 }
  0x8b   : > { %v871_v60 = vmax.f32 %v743_v50, 0.0  ;;  %v681_v61 = vadd.f32 %v3952_v28, %v546_v51  ;;  %3568 = vmatmul.mubr.bf16.gmra.mrb[48].mxu1 %v940_v55  ;;  %v610_v2 = vmul.f32 %v3943_v20, %v2903_v57  ;;  %v2779_v3 = vunpack.c.l.bf16 %v3268_v53 }
  0x8c   : > { %v909_v0 = vpack.c.bf16 %v808_v52, %v807_v48  ;;  %v682_v1 = vadd.f32 %v3952_v28, %v547_v56  ;;  %v872_v4 = vmax.f32 %v744_v58, 0.0  ;;  %v611_v7 = vmul.f32 %v3943_v20, %v2904_v62  ;;  %v3271_v48 = vld [vmem:[%s3680_s30 + $0xf8] sm:$0xff]  }
  0x8d   : > { %v809_v6 = vmax.f32 %v681_v61, 0.0  ;;  %v2780_v54 = vunpack.c.h.bf16 %v3268_v53  ;;  %v745_v59 = vadd.f32 %v3952_v28, %v610_v2  ;;  %v548_v9 = vmul.f32 %v3943_v20, %v2779_v3 }
  0x8e   : > { %3507 = vmatprep.mubr.bf16.mxu0 %v909_v0  ;;  %v810_v8 = vmax.f32 %v682_v1, 0.0  ;;  %v2907_v10 = vunpack.c.l.bf16 %v3300_v63  ;;  %v941_v13 = vpack.c.bf16 %v872_v4, %v871_v60  ;;  %v746_v14 = vadd.f32 %v3952_v28, %v611_v7 }
  0x8f   : > { %v549_v15 = vmul.f32 %v3943_v20, %v2780_v54  ;;  %v2908_v17 = vunpack.c.h.bf16 %v3300_v63  ;;  %v873_v19 = vmax.f32 %v745_v59, 0.0  ;;  %v683_v21 = vadd.f32 %v3952_v28, %v548_v9  ;;  %v3303_v63 = vld [vmem:[%s3680_s30 + $0x1f8] sm:$0xff]  }
  0x90   : > { %v910_v18 = vpack.c.bf16 %v810_v8, %v809_v6  ;;  %v612_v22 = vmul.f32 %v3943_v20, %v2907_v10  ;;  %3571 = vmatprep.mubr.bf16.mxu1 %v941_v13  ;;  %v874_v23 = vmax.f32 %v746_v14, 0.0  ;;  %v2783_v25 = vunpack.c.l.bf16 %v3269_v12 }
  0x91   : > { %v684_v24 = vadd.f32 %v3952_v28, %v549_v15  ;;  %v613_v5 = vmul.f32 %v3943_v20, %v2908_v17  ;;  %v811_v26 = vmax.f32 %v683_v21, 0.0  ;;  %v2784_v29 = vunpack.c.h.bf16 %v3269_v12 }
  0x92   : > { %3508 = vmatmul.mubr.bf16.gmra.mrb[52].mxu0 %v910_v18  ;;  %v747_v27 = vadd.f32 %v3952_v28, %v612_v22  ;;  %v2911_v30 = vunpack.c.l.bf16 %v3301_v16  ;;  %v942_v32 = vpack.c.bf16 %v874_v23, %v873_v19  ;;  %v550_v35 = vmul.f32 %v3943_v20, %v2783_v25 }
  0x93   : > { %v812_v11 = vmax.f32 %v684_v24, 0.0  ;;  %v748_v33 = vadd.f32 %v3952_v28, %v613_v5  ;;  %v551_v37 = vmul.f32 %v3943_v20, %v2784_v29  ;;  %v2912_v38 = vunpack.c.h.bf16 %v3301_v16 }
  0x94   : > { %v875_v36 = vmax.f32 %v747_v27, 0.0  ;;  %v614_v39 = vmul.f32 %v3943_v20, %v2911_v30  ;;  %3572 = vmatmul.mubr.bf16.gmra.mrb[52].mxu1 %v942_v32  ;;  %v685_v44 = vadd.f32 %v3952_v28, %v550_v35  ;;  %v2787_v45 = vunpack.c.l.bf16 %v3270_v31 }
  0x95   : > { %v911_v41 = vpack.c.bf16 %v812_v11, %v811_v26  ;;  %v876_v42 = vmax.f32 %v748_v33, 0.0  ;;  %v686_v34 = vadd.f32 %v3952_v28, %v551_v37  ;;  %v615_v43 = vmul.f32 %v3943_v20, %v2912_v38 }
  0x96   : > { %v749_v46 = vadd.f32 %v3952_v28, %v614_v39  ;;  %v2788_v47 = vunpack.c.h.bf16 %v3270_v31  ;;  %v813_v50 = vmax.f32 %v685_v44, 0.0  ;;  %v552_v51 = vmul.f32 %v3943_v20, %v2787_v45  ;;  %v4049_v31 = vld [vmem:[%s4255_s2] ss:$0 sm:$0xff] }
  0x97   : > { %3511 = vmatprep.mubr.bf16.mxu0 %v911_v41  ;;  %v943_v49 = vpack.c.bf16 %v876_v42, %v875_v36  ;;  %v2915_v53 = vunpack.c.l.bf16 %v3302_v40  ;;  %v814_v55 = vmax.f32 %v686_v34, 0.0  ;;  %v750_v52 = vadd.f32 %v3952_v28, %v615_v43 }
  0x98   : > { %v877_v56 = vmax.f32 %v749_v46, 0.0  ;;  %v553_v57 = vmul.f32 %v3943_v20, %v2788_v47  ;;  %v687_v58 = vadd.f32 %v3952_v28, %v552_v51  ;;  %v2916_v60 = vunpack.c.h.bf16 %v3302_v40 }
  0x99   : > { %3575 = vmatprep.mubr.bf16.mxu1 %v943_v49  ;;  %v616_v61 = vmul.f32 %v3943_v20, %v2915_v53  ;;  %v2791_v62 = vunpack.c.l.bf16 %v3271_v48  ;;  %v912_v0 = vpack.c.bf16 %v814_v55, %v813_v50  ;;  %v878_v1 = vmax.f32 %v750_v52, 0.0 }
  0x9a   : > { %v688_v2 = vadd.f32 %v3952_v28, %v553_v57  ;;  %v2792_v3 = vunpack.c.h.bf16 %v3271_v48  ;;  %v815_v4 = vmax.f32 %v687_v58, 0.0  ;;  %v617_v6 = vmul.f32 %v3943_v20, %v2916_v60 }
  0x9b   : > { %v751_v7 = vadd.f32 %v3952_v28, %v616_v61  ;;  %v554_v54 = vmul.f32 %v3943_v20, %v2791_v62  ;;  %3512 = vmatmul.mubr.bf16.gmra.mrb[56].mxu0 %v912_v0  ;;  %v944_v8 = vpack.c.bf16 %v878_v1, %v877_v56  ;;  %v2919_v10 = vunpack.c.l.bf16 %v3303_v63 }
  0x9c   : > { %v816_v59 = vmax.f32 %v688_v2, 0.0  ;;  %v555_v9 = vmul.f32 %v3943_v20, %v2792_v3  ;;  %v752_v12 = vadd.f32 %v3952_v28, %v617_v6  ;;  %v2920_v15 = vunpack.c.h.bf16 %v3303_v63 }
  0x9d   : > { %v879_v13 = vmax.f32 %v751_v7, 0.0  ;;  %v689_v14 = vadd.f32 %v3952_v28, %v554_v54  ;;  %3576 = vmatmul.mubr.bf16.gmra.mrb[56].mxu1 %v944_v8  ;;  %v618_v18 = vmul.f32 %v3943_v20, %v2919_v10 }
  0x9e   : > { %v913_v17 = vpack.c.bf16 %v816_v59, %v815_v4  ;;  %v690_v16 = vadd.f32 %v3952_v28, %v555_v9  ;;  %v880_v19 = vmax.f32 %v752_v12, 0.0  ;;  %v619_v22 = vmul.f32 %v3943_v20, %v2920_v15 }
  0x9f   : > { %v817_v21 = vmax.f32 %v689_v14, 0.0  ;;  %v753_v24 = vadd.f32 %v3952_v28, %v618_v18 }
  0xa0   : > { %3515 = vmatprep.mubr.bf16.mxu0 %v913_v17  ;;  %v818_v23 = vmax.f32 %v690_v16, 0.0  ;;  %v945_v5 = vpack.c.bf16 %v880_v19, %v879_v13  ;;  %v754_v25 = vadd.f32 %v3952_v28, %v619_v22 }
  0xa1   : > { %v881_v27 = vmax.f32 %v753_v24, 0.0 }
  0xa2   : > { %v914_v26 = vpack.c.bf16 %v818_v23, %v817_v21  ;;  %3579 = vmatprep.mubr.bf16.mxu1 %v945_v5  ;;  %v882_v29 = vmax.f32 %v754_v25, 0.0 }
  0xa4   : > { %3516 = vmatmul.mubr.bf16.gmra.mrb[60].mxu0 %v914_v26  ;;  %v946_v30 = vpack.c.bf16 %v882_v29, %v881_v27 }
  0xa6   : > { %3580 = vmatmul.mubr.bf16.gmra.mrb[60].mxu1 %v946_v30 }
  0xf9   : > { %v3457_v20 = vpop.f32.mrb[0].mxu0 }
  0xfa   : > { %v3521_v32 = vpop.f32.mrb[0].mxu1  ;;  %v1061_v11 = vadd.f32 %v3457_v20, %v4049_v31  ;;  %v1052_v35 = vpop.f32.mrb[1].mxu0 }
  0xfb   : > { %v1317_v33 = vadd.f32 %v3521_v32, %v4049_v31  ;;  %v1308_v28 = vpop.f32.mrb[1].mxu1  ;;  %v1053_v36 = vadd.f32 %v4049_v31, %v1052_v35  ;;  %v3458_v38 = vpop.f32.mrb[2].mxu0 }
  0xfc   : > { %v1309_v37 = vadd.f32 %v4049_v31, %v1308_v28  ;;  %v3522_v39 = vpop.f32.mrb[2].mxu1  ;;  %v1064_v40 = vadd.f32 %v3458_v38, %v4049_v31  ;;  %v1055_v42 = vpop.f32.mrb[3].mxu0  ;;  %v1565_v43 = vmax.f32 %v1061_v11, 0.0 }
  0xfd   : > { %v1320_v41 = vadd.f32 %v3522_v39, %v4049_v31  ;;  %v1311_v44 = vpop.f32.mrb[3].mxu1  ;;  %v1056_v45 = vadd.f32 %v4049_v31, %v1055_v42  ;;  %v1629_v46 = vmax.f32 %v1317_v33, 0.0  ;;  %v1563_v49 = vmax.f32 %v1053_v36, 0.0 }
  0xfe   : > { %v1312_v34 = vadd.f32 %v4049_v31, %v1311_v44  ;;  %v1566_v47 = vmax.f32 %v1064_v40, 0.0  ;;  %v1627_v50 = vmax.f32 %v1309_v37, 0.0 }
  0xff   : > { %v1630_v48 = vmax.f32 %v1320_v41, 0.0  ;;  %v1564_v51 = vmax.f32 %v1056_v45, 0.0 }
 0x100   : > { %v1628_v53 = vmax.f32 %v1312_v34, 0.0  ;;  %v2929_v55 = vpack.c.bf16 %v1566_v47, %v1565_v43 }
 0x101   : > { %v3089_v52 = vpack.c.bf16 %v1630_v48, %v1629_v46  ;;  %v2924_v56 = vpack.c.bf16 %v1564_v51, %v1563_v49  ;;  %v3461_v58 = vpop.f32.mrb[4].mxu0 }
 0x102   : > { %v3084_v57 = vpack.c.bf16 %v1628_v53, %v1627_v50  ;;  %v3525_v60 = vpop.f32.mrb[4].mxu1  ;;  %3304 = vst [vmem:[%s4064_s6 + $0x8] sm:$0xff] %v2929_v55   ;;  %v1077_v61 = vadd.f32 %v3461_v58, %v4049_v31  ;;  %v1068_v63 = vpop.f32.mrb[5].mxu0 }
 0x103   : > { %3336 = vst [vmem:[%s4064_s6 + $0x108] sm:$0xff] %v3089_v52   ;;  %v1333_v62 = vadd.f32 %v3525_v60, %v4049_v31  ;;  %v1324_v0 = vpop.f32.mrb[5].mxu1  ;;  %2925 = vst [vmem:[%s4064_s6] sm:$0xff] %v2924_v56   ;;  %v1069_v1 = vadd.f32 %v4049_v31, %v1068_v63  ;;  %v3462_v3 = vpop.f32.mrb[6].mxu0 }
 0x104   : > { %3335 = vst [vmem:[%s4064_s6 + $0x100] sm:$0xff] %v3084_v57   ;;  %v1325_v2 = vadd.f32 %v4049_v31, %v1324_v0  ;;  %v3526_v4 = vpop.f32.mrb[6].mxu1  ;;  %v1080_v6 = vadd.f32 %v3462_v3, %v4049_v31  ;;  %v1071_v54 = vpop.f32.mrb[7].mxu0  ;;  %v1569_v10 = vmax.f32 %v1077_v61, 0.0 }
 0x105   : > { %v1336_v7 = vadd.f32 %v3526_v4, %v4049_v31  ;;  %v1327_v8 = vpop.f32.mrb[7].mxu1  ;;  %v1072_v59 = vadd.f32 %v4049_v31, %v1071_v54  ;;  %v1633_v12 = vmax.f32 %v1333_v62, 0.0  ;;  %v1567_v15 = vmax.f32 %v1069_v1, 0.0 }
 0x106   : > { %v1328_v9 = vadd.f32 %v4049_v31, %v1327_v8  ;;  %v1570_v13 = vmax.f32 %v1080_v6, 0.0  ;;  %v1631_v17 = vmax.f32 %v1325_v2, 0.0 }
 0x107   : > { %v1634_v14 = vmax.f32 %v1336_v7, 0.0  ;;  %v1568_v16 = vmax.f32 %v1072_v59, 0.0 }
 0x108   : > { %v1632_v18 = vmax.f32 %v1328_v9, 0.0  ;;  %v2939_v19 = vpack.c.bf16 %v1570_v13, %v1569_v10 }
 0x109   : > { %v3099_v21 = vpack.c.bf16 %v1634_v14, %v1633_v12  ;;  %v2934_v22 = vpack.c.bf16 %v1568_v16, %v1567_v15  ;;  %v3465_v24 = vpop.f32.mrb[8].mxu0 }
 0x10a   : > { %v3094_v23 = vpack.c.bf16 %v1632_v18, %v1631_v17  ;;  %v3529_v5 = vpop.f32.mrb[8].mxu1  ;;  %3306 = vst [vmem:[%s4064_s6 + $0x18] sm:$0xff] %v2939_v19   ;;  %v1093_v25 = vadd.f32 %v3465_v24, %v4049_v31  ;;  %v1084_v27 = vpop.f32.mrb[9].mxu0 }
 0x10b   : > { %3338 = vst [vmem:[%s4064_s6 + $0x118] sm:$0xff] %v3099_v21   ;;  %v1349_v26 = vadd.f32 %v3529_v5, %v4049_v31  ;;  %v1340_v29 = vpop.f32.mrb[9].mxu1  ;;  %3305 = vst [vmem:[%s4064_s6 + $0x10] sm:$0xff] %v2934_v22   ;;  %v1085_v30 = vadd.f32 %v4049_v31, %v1084_v27  ;;  %v3466_v32 = vpop.f32.mrb[10].mxu0 }
 0x10c   : > { %3337 = vst [vmem:[%s4064_s6 + $0x110] sm:$0xff] %v3094_v23   ;;  %v1341_v20 = vadd.f32 %v4049_v31, %v1340_v29  ;;  %v3530_v11 = vpop.f32.mrb[10].mxu1  ;;  %v1096_v33 = vadd.f32 %v3466_v32, %v4049_v31  ;;  %v1087_v28 = vpop.f32.mrb[11].mxu0  ;;  %v1573_v39 = vmax.f32 %v1093_v25, 0.0 }
 0x10d   : > { %v1352_v35 = vadd.f32 %v3530_v11, %v4049_v31  ;;  %v1343_v36 = vpop.f32.mrb[11].mxu1  ;;  %v1088_v37 = vadd.f32 %v4049_v31, %v1087_v28  ;;  %v1637_v40 = vmax.f32 %v1349_v26, 0.0  ;;  %v1571_v44 = vmax.f32 %v1085_v30, 0.0 }
 0x10e   : > { %v1344_v38 = vadd.f32 %v4049_v31, %v1343_v36  ;;  %v1574_v41 = vmax.f32 %v1096_v33, 0.0  ;;  %v1635_v45 = vmax.f32 %v1341_v20, 0.0 }
 0x10f   : > { %v1638_v42 = vmax.f32 %v1352_v35, 0.0  ;;  %v1572_v34 = vmax.f32 %v1088_v37, 0.0 }
 0x110   : > { %v1636_v43 = vmax.f32 %v1344_v38, 0.0  ;;  %v2949_v46 = vpack.c.bf16 %v1574_v41, %v1573_v39 }
 0x111   : > { %v3109_v47 = vpack.c.bf16 %v1638_v42, %v1637_v40  ;;  %v2944_v48 = vpack.c.bf16 %v1572_v34, %v1571_v44  ;;  %v3469_v50 = vpop.f32.mrb[12].mxu0 }
 0x112   : > { %v3104_v49 = vpack.c.bf16 %v1636_v43, %v1635_v45  ;;  %v3533_v51 = vpop.f32.mrb[12].mxu1  ;;  %3308 = vst [vmem:[%s4064_s6 + $0x28] sm:$0xff] %v2949_v46   ;;  %v1109_v53 = vadd.f32 %v3469_v50, %v4049_v31  ;;  %v1100_v52 = vpop.f32.mrb[13].mxu0 }
 0x113   : > { %3340 = vst [vmem:[%s4064_s6 + $0x128] sm:$0xff] %v3109_v47   ;;  %v1365_v55 = vadd.f32 %v3533_v51, %v4049_v31  ;;  %v1356_v56 = vpop.f32.mrb[13].mxu1  ;;  %3307 = vst [vmem:[%s4064_s6 + $0x20] sm:$0xff] %v2944_v48   ;;  %v1101_v57 = vadd.f32 %v4049_v31, %v1100_v52  ;;  %v3470_v60 = vpop.f32.mrb[14].mxu0 }
 0x114   : > { %3339 = vst [vmem:[%s4064_s6 + $0x120] sm:$0xff] %v3104_v49   ;;  %v1357_v58 = vadd.f32 %v4049_v31, %v1356_v56  ;;  %v3534_v61 = vpop.f32.mrb[14].mxu1  ;;  %v1112_v62 = vadd.f32 %v3470_v60, %v4049_v31  ;;  %v1103_v0 = vpop.f32.mrb[15].mxu0  ;;  %v1577_v4 = vmax.f32 %v1109_v53, 0.0 }
 0x115   : > { %v1368_v63 = vadd.f32 %v3534_v61, %v4049_v31  ;;  %v1359_v1 = vpop.f32.mrb[15].mxu1  ;;  %v1104_v2 = vadd.f32 %v4049_v31, %v1103_v0  ;;  %v1641_v6 = vmax.f32 %v1365_v55, 0.0  ;;  %v1575_v8 = vmax.f32 %v1101_v57, 0.0 }
 0x116   : > { %v1360_v3 = vadd.f32 %v4049_v31, %v1359_v1  ;;  %v1578_v7 = vmax.f32 %v1112_v62, 0.0  ;;  %v1639_v59 = vmax.f32 %v1357_v58, 0.0 }
 0x117   : > { %v1642_v54 = vmax.f32 %v1368_v63, 0.0  ;;  %v1576_v9 = vmax.f32 %v1104_v2, 0.0 }
 0x118   : > { %v1640_v10 = vmax.f32 %v1360_v3, 0.0  ;;  %v2959_v12 = vpack.c.bf16 %v1578_v7, %v1577_v4 }
 0x119   : > { %v3119_v13 = vpack.c.bf16 %v1642_v54, %v1641_v6  ;;  %v2954_v14 = vpack.c.bf16 %v1576_v9, %v1575_v8  ;;  %v3473_v17 = vpop.f32.mrb[16].mxu0 }
 0x11a   : > { %v3114_v15 = vpack.c.bf16 %v1640_v10, %v1639_v59  ;;  %v3537_v16 = vpop.f32.mrb[16].mxu1  ;;  %3310 = vst [vmem:[%s4064_s6 + $0x38] sm:$0xff] %v2959_v12   ;;  %v1125_v18 = vadd.f32 %v3473_v17, %v4049_v31  ;;  %v1116_v21 = vpop.f32.mrb[17].mxu0 }
 0x11b   : > { %3342 = vst [vmem:[%s4064_s6 + $0x138] sm:$0xff] %v3119_v13   ;;  %v1381_v19 = vadd.f32 %v3537_v16, %v4049_v31  ;;  %v1372_v22 = vpop.f32.mrb[17].mxu1  ;;  %3309 = vst [vmem:[%s4064_s6 + $0x30] sm:$0xff] %v2954_v14   ;;  %v1117_v23 = vadd.f32 %v4049_v31, %v1116_v21  ;;  %v3474_v5 = vpop.f32.mrb[18].mxu0 }
 0x11c   : > { %3341 = vst [vmem:[%s4064_s6 + $0x130] sm:$0xff] %v3114_v15   ;;  %v1373_v24 = vadd.f32 %v4049_v31, %v1372_v22  ;;  %v3538_v25 = vpop.f32.mrb[18].mxu1  ;;  %v1128_v26 = vadd.f32 %v3474_v5, %v4049_v31  ;;  %v1119_v29 = vpop.f32.mrb[19].mxu0  ;;  %v1581_v11 = vmax.f32 %v1125_v18, 0.0 }
 0x11d   : > { %v1384_v27 = vadd.f32 %v3538_v25, %v4049_v31  ;;  %v1375_v30 = vpop.f32.mrb[19].mxu1  ;;  %v1120_v20 = vadd.f32 %v4049_v31, %v1119_v29  ;;  %v1645_v33 = vmax.f32 %v1381_v19, 0.0  ;;  %v1579_v36 = vmax.f32 %v1117_v23, 0.0 }
 0x11e   : > { %v1376_v32 = vadd.f32 %v4049_v31, %v1375_v30  ;;  %v1582_v35 = vmax.f32 %v1128_v26, 0.0  ;;  %v1643_v37 = vmax.f32 %v1373_v24, 0.0 }
 0x11f   : > { %v1646_v28 = vmax.f32 %v1384_v27, 0.0  ;;  %v1580_v38 = vmax.f32 %v1120_v20, 0.0 }
 0x120   : > { %v1644_v39 = vmax.f32 %v1376_v32, 0.0  ;;  %v2969_v40 = vpack.c.bf16 %v1582_v35, %v1581_v11 }
 0x121   : > { %v3129_v41 = vpack.c.bf16 %v1646_v28, %v1645_v33  ;;  %v2964_v42 = vpack.c.bf16 %v1580_v38, %v1579_v36  ;;  %v3477_v45 = vpop.f32.mrb[20].mxu0 }
 0x122   : > { %v3124_v44 = vpack.c.bf16 %v1644_v39, %v1643_v37  ;;  %v3541_v34 = vpop.f32.mrb[20].mxu1  ;;  %3312 = vst [vmem:[%s4064_s6 + $0x48] sm:$0xff] %v2969_v40   ;;  %v1141_v43 = vadd.f32 %v3477_v45, %v4049_v31  ;;  %v1132_v47 = vpop.f32.mrb[21].mxu0 }
 0x123   : > { %3344 = vst [vmem:[%s4064_s6 + $0x148] sm:$0xff] %v3129_v41   ;;  %v1397_v46 = vadd.f32 %v3541_v34, %v4049_v31  ;;  %v1388_v48 = vpop.f32.mrb[21].mxu1  ;;  %3311 = vst [vmem:[%s4064_s6 + $0x40] sm:$0xff] %v2964_v42   ;;  %v1133_v49 = vadd.f32 %v4049_v31, %v1132_v47  ;;  %v3478_v51 = vpop.f32.mrb[22].mxu0 }
 0x124   : > { %3343 = vst [vmem:[%s4064_s6 + $0x140] sm:$0xff] %v3124_v44   ;;  %v1389_v50 = vadd.f32 %v4049_v31, %v1388_v48  ;;  %v3542_v53 = vpop.f32.mrb[22].mxu1  ;;  %v1144_v55 = vadd.f32 %v3478_v51, %v4049_v31  ;;  %v1135_v56 = vpop.f32.mrb[23].mxu0  ;;  %v1585_v61 = vmax.f32 %v1141_v43, 0.0 }
 0x125   : > { %v1400_v52 = vadd.f32 %v3542_v53, %v4049_v31  ;;  %v1391_v57 = vpop.f32.mrb[23].mxu1  ;;  %v1136_v58 = vadd.f32 %v4049_v31, %v1135_v56  ;;  %v1649_v62 = vmax.f32 %v1397_v46, 0.0  ;;  %v1583_v1 = vmax.f32 %v1133_v49, 0.0 }
 0x126   : > { %v1392_v60 = vadd.f32 %v4049_v31, %v1391_v57  ;;  %v1586_v63 = vmax.f32 %v1144_v55, 0.0  ;;  %v1647_v2 = vmax.f32 %v1389_v50, 0.0 }
 0x127   : > { %v1650_v0 = vmax.f32 %v1400_v52, 0.0  ;;  %v1584_v3 = vmax.f32 %v1136_v58, 0.0 }
 0x128   : > { %v1648_v4 = vmax.f32 %v1392_v60, 0.0  ;;  %v2979_v6 = vpack.c.bf16 %v1586_v63, %v1585_v61 }
 0x129   : > { %v3139_v7 = vpack.c.bf16 %v1650_v0, %v1649_v62  ;;  %v2974_v54 = vpack.c.bf16 %v1584_v3, %v1583_v1  ;;  %v3481_v59 = vpop.f32.mrb[24].mxu0 }
 0x12a   : > { %v3134_v8 = vpack.c.bf16 %v1648_v4, %v1647_v2  ;;  %v3545_v9 = vpop.f32.mrb[24].mxu1  ;;  %3314 = vst [vmem:[%s4064_s6 + $0x58] sm:$0xff] %v2979_v6   ;;  %v1157_v10 = vadd.f32 %v3481_v59, %v4049_v31  ;;  %v1148_v13 = vpop.f32.mrb[25].mxu0 }
 0x12b   : > { %3346 = vst [vmem:[%s4064_s6 + $0x158] sm:$0xff] %v3139_v7   ;;  %v1413_v12 = vadd.f32 %v3545_v9, %v4049_v31  ;;  %v1404_v14 = vpop.f32.mrb[25].mxu1  ;;  %3313 = vst [vmem:[%s4064_s6 + $0x50] sm:$0xff] %v2974_v54   ;;  %v1149_v15 = vadd.f32 %v4049_v31, %v1148_v13  ;;  %v3482_v16 = vpop.f32.mrb[26].mxu0 }
 0x12c   : > { %3345 = vst [vmem:[%s4064_s6 + $0x150] sm:$0xff] %v3134_v8   ;;  %v1405_v17 = vadd.f32 %v4049_v31, %v1404_v14  ;;  %v3546_v18 = vpop.f32.mrb[26].mxu1  ;;  %v1160_v19 = vadd.f32 %v3482_v16, %v4049_v31  ;;  %v1151_v22 = vpop.f32.mrb[27].mxu0  ;;  %v1589_v25 = vmax.f32 %v1157_v10, 0.0 }
 0x12d   : > { %v1416_v21 = vadd.f32 %v3546_v18, %v4049_v31  ;;  %v1407_v23 = vpop.f32.mrb[27].mxu1  ;;  %v1152_v24 = vadd.f32 %v4049_v31, %v1151_v22  ;;  %v1653_v26 = vmax.f32 %v1413_v12, 0.0  ;;  %v1587_v30 = vmax.f32 %v1149_v15, 0.0 }
 0x12e   : > { %v1408_v5 = vadd.f32 %v4049_v31, %v1407_v23  ;;  %v1590_v27 = vmax.f32 %v1160_v19, 0.0  ;;  %v1651_v20 = vmax.f32 %v1405_v17, 0.0 }
 0x12f   : > { %v1654_v29 = vmax.f32 %v1416_v21, 0.0  ;;  %v1588_v32 = vmax.f32 %v1152_v24, 0.0 }
 0x130   : > { %v1652_v11 = vmax.f32 %v1408_v5, 0.0  ;;  %v2989_v33 = vpack.c.bf16 %v1590_v27, %v1589_v25 }
 0x131   : > { %v3149_v35 = vpack.c.bf16 %v1654_v29, %v1653_v26  ;;  %v2984_v28 = vpack.c.bf16 %v1588_v32, %v1587_v30  ;;  %v3485_v37 = vpop.f32.mrb[28].mxu0 }
 0x132   : > { %v3144_v36 = vpack.c.bf16 %v1652_v11, %v1651_v20  ;;  %v3549_v38 = vpop.f32.mrb[28].mxu1  ;;  %3316 = vst [vmem:[%s4064_s6 + $0x68] sm:$0xff] %v2989_v33   ;;  %v1173_v39 = vadd.f32 %v3485_v37, %v4049_v31  ;;  %v1164_v41 = vpop.f32.mrb[29].mxu0 }
 0x133   : > { %3348 = vst [vmem:[%s4064_s6 + $0x168] sm:$0xff] %v3149_v35   ;;  %v1429_v40 = vadd.f32 %v3549_v38, %v4049_v31  ;;  %v1420_v42 = vpop.f32.mrb[29].mxu1  ;;  %3315 = vst [vmem:[%s4064_s6 + $0x60] sm:$0xff] %v2984_v28   ;;  %v1165_v44 = vadd.f32 %v4049_v31, %v1164_v41  ;;  %v3486_v34 = vpop.f32.mrb[30].mxu0 }
 0x134   : > { %3347 = vst [vmem:[%s4064_s6 + $0x160] sm:$0xff] %v3144_v36   ;;  %v1421_v45 = vadd.f32 %v4049_v31, %v1420_v42  ;;  %v3550_v43 = vpop.f32.mrb[30].mxu1  ;;  %v1176_v46 = vadd.f32 %v3486_v34, %v4049_v31  ;;  %v1167_v48 = vpop.f32.mrb[31].mxu0  ;;  %v1593_v53 = vmax.f32 %v1173_v39, 0.0 }
 0x135   : > { %v1432_v47 = vadd.f32 %v3550_v43, %v4049_v31  ;;  %v1423_v49 = vpop.f32.mrb[31].mxu1  ;;  %v1168_v50 = vadd.f32 %v4049_v31, %v1167_v48  ;;  %v1657_v55 = vmax.f32 %v1429_v40, 0.0  ;;  %v1591_v57 = vmax.f32 %v1165_v44, 0.0 }
 0x136   : > { %v1424_v51 = vadd.f32 %v4049_v31, %v1423_v49  ;;  %v1594_v52 = vmax.f32 %v1176_v46, 0.0  ;;  %v1655_v58 = vmax.f32 %v1421_v45, 0.0 }
 0x137   : > { %v1658_v56 = vmax.f32 %v1432_v47, 0.0  ;;  %v1592_v60 = vmax.f32 %v1168_v50, 0.0 }
 0x138   : > { %v1656_v61 = vmax.f32 %v1424_v51, 0.0  ;;  %v2999_v62 = vpack.c.bf16 %v1594_v52, %v1593_v53 }
 0x139   : > { %v3159_v63 = vpack.c.bf16 %v1658_v56, %v1657_v55  ;;  %v2994_v0 = vpack.c.bf16 %v1592_v60, %v1591_v57  ;;  %v3489_v2 = vpop.f32.mrb[32].mxu0 }
 0x13a   : > { %v3154_v1 = vpack.c.bf16 %v1656_v61, %v1655_v58  ;;  %v3553_v3 = vpop.f32.mrb[32].mxu1  ;;  %3318 = vst [vmem:[%s4064_s6 + $0x78] sm:$0xff] %v2999_v62   ;;  %v1189_v4 = vadd.f32 %v3489_v2, %v4049_v31  ;;  %v1180_v7 = vpop.f32.mrb[33].mxu0 }
 0x13b   : > { %3350 = vst [vmem:[%s4064_s6 + $0x178] sm:$0xff] %v3159_v63   ;;  %v1445_v6 = vadd.f32 %v3553_v3, %v4049_v31  ;;  %v1436_v54 = vpop.f32.mrb[33].mxu1  ;;  %3317 = vst [vmem:[%s4064_s6 + $0x70] sm:$0xff] %v2994_v0   ;;  %v1181_v8 = vadd.f32 %v4049_v31, %v1180_v7  ;;  %v3490_v9 = vpop.f32.mrb[34].mxu0 }
 0x13c   : > { %3349 = vst [vmem:[%s4064_s6 + $0x170] sm:$0xff] %v3154_v1   ;;  %v1437_v59 = vadd.f32 %v4049_v31, %v1436_v54  ;;  %v3554_v10 = vpop.f32.mrb[34].mxu1  ;;  %v1192_v12 = vadd.f32 %v3490_v9, %v4049_v31  ;;  %v1183_v14 = vpop.f32.mrb[35].mxu0  ;;  %v1597_v18 = vmax.f32 %v1189_v4, 0.0 }
 0x13d   : > { %v1448_v13 = vadd.f32 %v3554_v10, %v4049_v31  ;;  %v1439_v15 = vpop.f32.mrb[35].mxu1  ;;  %v1184_v17 = vadd.f32 %v4049_v31, %v1183_v14  ;;  %v1661_v19 = vmax.f32 %v1445_v6, 0.0  ;;  %v1595_v23 = vmax.f32 %v1181_v8, 0.0 }
 0x13e   : > { %v1440_v16 = vadd.f32 %v4049_v31, %v1439_v15  ;;  %v1598_v21 = vmax.f32 %v1192_v12, 0.0  ;;  %v1659_v24 = vmax.f32 %v1437_v59, 0.0 }
 0x13f   : > { %v1662_v22 = vmax.f32 %v1448_v13, 0.0  ;;  %v1596_v5 = vmax.f32 %v1184_v17, 0.0 }
 0x140   : > { %v1660_v25 = vmax.f32 %v1440_v16, 0.0  ;;  %v3009_v26 = vpack.c.bf16 %v1598_v21, %v1597_v18 }
 0x141   : > { %v3169_v27 = vpack.c.bf16 %v1662_v22, %v1661_v19  ;;  %v3004_v29 = vpack.c.bf16 %v1596_v5, %v1595_v23  ;;  %v3493_v20 = vpop.f32.mrb[36].mxu0 }
 0x142   : > { %v3164_v30 = vpack.c.bf16 %v1660_v25, %v1659_v24  ;;  %3320 = vst [vmem:[%s4064_s6 + $0x88] sm:$0xff] %v3009_v26   ;;  %v1205_v11 = vadd.f32 %v3493_v20, %v4049_v31  ;;  %v1196_v35 = vpop.f32.mrb[37].mxu0 }
 0x143   : > { %v3557_v32 = vpop.f32.mrb[36].mxu1  ;;  %3352 = vst [vmem:[%s4064_s6 + $0x188] sm:$0xff] %v3169_v27   ;;  %3319 = vst [vmem:[%s4064_s6 + $0x80] sm:$0xff] %v3004_v29   ;;  %v1197_v36 = vadd.f32 %v4049_v31, %v1196_v35  ;;  %v3494_v38 = vpop.f32.mrb[38].mxu0 }
 0x144   : > { %v1461_v33 = vadd.f32 %v3557_v32, %v4049_v31  ;;  %v1452_v28 = vpop.f32.mrb[37].mxu1  ;;  %3351 = vst [vmem:[%s4064_s6 + $0x180] sm:$0xff] %v3164_v30   ;;  %v1208_v40 = vadd.f32 %v3494_v38, %v4049_v31  ;;  %v1199_v42 = vpop.f32.mrb[39].mxu0  ;;  %v1601_v43 = vmax.f32 %v1205_v11, 0.0 }
 0x145   : > { %v1453_v37 = vadd.f32 %v4049_v31, %v1452_v28  ;;  %v3558_v39 = vpop.f32.mrb[38].mxu1  ;;  %v1200_v45 = vadd.f32 %v4049_v31, %v1199_v42  ;;  %v1599_v49 = vmax.f32 %v1197_v36, 0.0 }
 0x146   : > { %v1464_v41 = vadd.f32 %v3558_v39, %v4049_v31  ;;  %v1455_v44 = vpop.f32.mrb[39].mxu1  ;;  %v1665_v46 = vmax.f32 %v1461_v33, 0.0  ;;  %v1602_v47 = vmax.f32 %v1208_v40, 0.0 }
 0x147   : > { %v1456_v34 = vadd.f32 %v4049_v31, %v1455_v44  ;;  %v1663_v50 = vmax.f32 %v1453_v37, 0.0  ;;  %v1600_v51 = vmax.f32 %v1200_v45, 0.0 }
 0x148   : > { %v1666_v48 = vmax.f32 %v1464_v41, 0.0  ;;  %v3019_v55 = vpack.c.bf16 %v1602_v47, %v1601_v43 }
 0x149   : > { %v1664_v53 = vmax.f32 %v1456_v34, 0.0  ;;  %v3014_v56 = vpack.c.bf16 %v1600_v51, %v1599_v49 }
 0x14a   : > { %v3179_v52 = vpack.c.bf16 %v1666_v48, %v1665_v46  ;;  %v3497_v58 = vpop.f32.mrb[40].mxu0  ;;  %3322 = vst [vmem:[%s4064_s6 + $0x98] sm:$0xff] %v3019_v55  }
 0x14b   : > { %v3174_v57 = vpack.c.bf16 %v1664_v53, %v1663_v50  ;;  %v1221_v61 = vadd.f32 %v3497_v58, %v4049_v31  ;;  %v1212_v63 = vpop.f32.mrb[41].mxu0  ;;  %3321 = vst [vmem:[%s4064_s6 + $0x90] sm:$0xff] %v3014_v56  }
 0x14c   : > { %v3561_v60 = vpop.f32.mrb[40].mxu1  ;;  %3354 = vst [vmem:[%s4064_s6 + $0x198] sm:$0xff] %v3179_v52   ;;  %v1213_v1 = vadd.f32 %v4049_v31, %v1212_v63  ;;  %v3498_v3 = vpop.f32.mrb[42].mxu0 }
 0x14d   : > { %v1477_v62 = vadd.f32 %v3561_v60, %v4049_v31  ;;  %v1468_v0 = vpop.f32.mrb[41].mxu1  ;;  %3353 = vst [vmem:[%s4064_s6 + $0x190] sm:$0xff] %v3174_v57   ;;  %v1224_v6 = vadd.f32 %v3498_v3, %v4049_v31  ;;  %v1215_v54 = vpop.f32.mrb[43].mxu0  ;;  %v1605_v10 = vmax.f32 %v1221_v61, 0.0 }
 0x14e   : > { %v1469_v2 = vadd.f32 %v4049_v31, %v1468_v0  ;;  %v3562_v4 = vpop.f32.mrb[42].mxu1  ;;  %v1216_v59 = vadd.f32 %v4049_v31, %v1215_v54  ;;  %v1603_v15 = vmax.f32 %v1213_v1, 0.0 }
 0x14f   : > { %v1480_v7 = vadd.f32 %v3562_v4, %v4049_v31  ;;  %v1471_v8 = vpop.f32.mrb[43].mxu1  ;;  %v1669_v12 = vmax.f32 %v1477_v62, 0.0  ;;  %v1606_v13 = vmax.f32 %v1224_v6, 0.0 }
 0x150   : > { %v1472_v9 = vadd.f32 %v4049_v31, %v1471_v8  ;;  %v1667_v17 = vmax.f32 %v1469_v2, 0.0  ;;  %v1604_v16 = vmax.f32 %v1216_v59, 0.0 }
 0x151   : > { %v1670_v14 = vmax.f32 %v1480_v7, 0.0  ;;  %v3029_v19 = vpack.c.bf16 %v1606_v13, %v1605_v10 }
 0x152   : > { %v1668_v18 = vmax.f32 %v1472_v9, 0.0  ;;  %v3024_v22 = vpack.c.bf16 %v1604_v16, %v1603_v15 }
 0x153   : > { %v3189_v21 = vpack.c.bf16 %v1670_v14, %v1669_v12  ;;  %v3501_v24 = vpop.f32.mrb[44].mxu0  ;;  %3324 = vst [vmem:[%s4064_s6 + $0xa8] sm:$0xff] %v3029_v19  }
 0x154   : > { %v3184_v23 = vpack.c.bf16 %v1668_v18, %v1667_v17  ;;  %v1237_v5 = vadd.f32 %v3501_v24, %v4049_v31  ;;  %v1228_v26 = vpop.f32.mrb[45].mxu0  ;;  %3323 = vst [vmem:[%s4064_s6 + $0xa0] sm:$0xff] %v3024_v22  }
 0x155   : > { %3356 = vst [vmem:[%s4064_s6 + $0x1a8] sm:$0xff] %v3189_v21   ;;  %v3565_v25 = vpop.f32.mrb[44].mxu1  ;;  %v1229_v29 = vadd.f32 %v4049_v31, %v1228_v26  ;;  %v3502_v20 = vpop.f32.mrb[46].mxu0 }
 0x156   : > { %3355 = vst [vmem:[%s4064_s6 + $0x1a0] sm:$0xff] %v3184_v23   ;;  %v1493_v27 = vadd.f32 %v3565_v25, %v4049_v31  ;;  %v1484_v30 = vpop.f32.mrb[45].mxu1  ;;  %v1240_v11 = vadd.f32 %v3502_v20, %v4049_v31  ;;  %v1231_v35 = vpop.f32.mrb[47].mxu0  ;;  %v1609_v38 = vmax.f32 %v1237_v5, 0.0 }
 0x157   : > { %v1485_v32 = vadd.f32 %v4049_v31, %v1484_v30  ;;  %v3566_v33 = vpop.f32.mrb[46].mxu1  ;;  %v1232_v36 = vadd.f32 %v4049_v31, %v1231_v35  ;;  %v1607_v42 = vmax.f32 %v1229_v29, 0.0 }
 0x158   : > { %v1496_v28 = vadd.f32 %v3566_v33, %v4049_v31  ;;  %v1487_v37 = vpop.f32.mrb[47].mxu1  ;;  %v1610_v39 = vmax.f32 %v1240_v11, 0.0  ;;  %v1673_v41 = vmax.f32 %v1493_v27, 0.0 }
 0x159   : > { %v1488_v40 = vadd.f32 %v4049_v31, %v1487_v37  ;;  %v1608_v45 = vmax.f32 %v1232_v36, 0.0  ;;  %v1671_v34 = vmax.f32 %v1485_v32, 0.0 }
 0x15a   : > { %v1674_v44 = vmax.f32 %v1496_v28, 0.0  ;;  %v3039_v43 = vpack.c.bf16 %v1610_v39, %v1609_v38 }
 0x15b   : > { %v1672_v46 = vmax.f32 %v1488_v40, 0.0  ;;  %v3034_v48 = vpack.c.bf16 %v1608_v45, %v1607_v42 }
 0x15c   : > { %v3199_v47 = vpack.c.bf16 %v1674_v44, %v1673_v41  ;;  %v3505_v49 = vpop.f32.mrb[48].mxu0  ;;  %3326 = vst [vmem:[%s4064_s6 + $0xb8] sm:$0xff] %v3039_v43  }
 0x15d   : > { %v3194_v50 = vpack.c.bf16 %v1672_v46, %v1671_v34  ;;  %v1253_v51 = vadd.f32 %v3505_v49, %v4049_v31  ;;  %v1244_v53 = vpop.f32.mrb[49].mxu0  ;;  %3325 = vst [vmem:[%s4064_s6 + $0xb0] sm:$0xff] %v3034_v48  }
 0x15e   : > { %3358 = vst [vmem:[%s4064_s6 + $0x1b8] sm:$0xff] %v3199_v47   ;;  %v3569_v55 = vpop.f32.mrb[48].mxu1  ;;  %v1245_v52 = vadd.f32 %v4049_v31, %v1244_v53  ;;  %v3506_v56 = vpop.f32.mrb[50].mxu0 }
 0x15f   : > { %3357 = vst [vmem:[%s4064_s6 + $0x1b0] sm:$0xff] %v3194_v50   ;;  %v1509_v57 = vadd.f32 %v3569_v55, %v4049_v31  ;;  %v1500_v58 = vpop.f32.mrb[49].mxu1  ;;  %v1256_v60 = vadd.f32 %v3506_v56, %v4049_v31  ;;  %v1247_v61 = vpop.f32.mrb[51].mxu0  ;;  %v1613_v1 = vmax.f32 %v1253_v51, 0.0 }
 0x160   : > { %v1501_v62 = vadd.f32 %v4049_v31, %v1500_v58  ;;  %v3570_v63 = vpop.f32.mrb[50].mxu1  ;;  %v1248_v0 = vadd.f32 %v4049_v31, %v1247_v61  ;;  %v1611_v6 = vmax.f32 %v1245_v52, 0.0 }
 0x161   : > { %v1614_v2 = vmax.f32 %v1256_v60, 0.0  ;;  %v1512_v3 = vadd.f32 %v3570_v63, %v4049_v31  ;;  %v1503_v4 = vpop.f32.mrb[51].mxu1  ;;  %v1677_v8 = vmax.f32 %v1509_v57, 0.0 }
 0x162   : > { %v1612_v7 = vmax.f32 %v1248_v0, 0.0  ;;  %v1504_v54 = vadd.f32 %v4049_v31, %v1503_v4  ;;  %v1675_v10 = vmax.f32 %v1501_v62, 0.0 }
 0x163   : > { %v3049_v59 = vpack.c.bf16 %v1614_v2, %v1613_v1  ;;  %v1678_v9 = vmax.f32 %v1512_v3, 0.0 }
 0x164   : > { %v3044_v12 = vpack.c.bf16 %v1612_v7, %v1611_v6  ;;  %v1676_v13 = vmax.f32 %v1504_v54, 0.0 }
 0x165   : > { %v3509_v14 = vpop.f32.mrb[52].mxu0  ;;  %3328 = vst [vmem:[%s4064_s6 + $0xc8] sm:$0xff] %v3049_v59   ;;  %v3209_v15 = vpack.c.bf16 %v1678_v9, %v1677_v8 }
 0x166   : > { %v1269_v17 = vadd.f32 %v3509_v14, %v4049_v31  ;;  %v1260_v16 = vpop.f32.mrb[53].mxu0  ;;  %3327 = vst [vmem:[%s4064_s6 + $0xc0] sm:$0xff] %v3044_v12   ;;  %v3204_v18 = vpack.c.bf16 %v1676_v13, %v1675_v10 }
 0x167   : > { %v1261_v19 = vadd.f32 %v4049_v31, %v1260_v16  ;;  %v3510_v21 = vpop.f32.mrb[54].mxu0  ;;  %3360 = vst [vmem:[%s4064_s6 + $0x1c8] sm:$0xff] %v3209_v15   ;;  %v3573_v22 = vpop.f32.mrb[52].mxu1 }
 0x168   : > { %v1272_v23 = vadd.f32 %v3510_v21, %v4049_v31  ;;  %v1263_v24 = vpop.f32.mrb[55].mxu0  ;;  %3359 = vst [vmem:[%s4064_s6 + $0x1c0] sm:$0xff] %v3204_v18   ;;  %v1525_v5 = vadd.f32 %v3573_v22, %v4049_v31  ;;  %v1516_v25 = vpop.f32.mrb[53].mxu1  ;;  %v1617_v27 = vmax.f32 %v1269_v17, 0.0 }
 0x169   : > { %v1264_v26 = vadd.f32 %v4049_v31, %v1263_v24  ;;  %v1517_v29 = vadd.f32 %v4049_v31, %v1516_v25  ;;  %v3574_v20 = vpop.f32.mrb[54].mxu1  ;;  %v1615_v32 = vmax.f32 %v1261_v19, 0.0 }
 0x16a   : > { %v1618_v30 = vmax.f32 %v1272_v23, 0.0  ;;  %v1528_v11 = vadd.f32 %v3574_v20, %v4049_v31  ;;  %v1519_v35 = vpop.f32.mrb[55].mxu1  ;;  %v1681_v37 = vmax.f32 %v1525_v5, 0.0 }
 0x16b   : > { %v1616_v33 = vmax.f32 %v1264_v26, 0.0  ;;  %v1520_v36 = vadd.f32 %v4049_v31, %v1519_v35  ;;  %v1679_v40 = vmax.f32 %v1517_v29, 0.0 }
 0x16c   : > { %v3059_v28 = vpack.c.bf16 %v1618_v30, %v1617_v27  ;;  %v1682_v38 = vmax.f32 %v1528_v11, 0.0 }
 0x16d   : > { %v3054_v39 = vpack.c.bf16 %v1616_v33, %v1615_v32  ;;  %v1680_v41 = vmax.f32 %v1520_v36, 0.0 }
 0x16e   : > { %3330 = vst [vmem:[%s4064_s6 + $0xd8] sm:$0xff] %v3059_v28   ;;  %v3219_v42 = vpack.c.bf16 %v1682_v38, %v1681_v37  ;;  %v3513_v44 = vpop.f32.mrb[56].mxu0 }
 0x16f   : > { %3329 = vst [vmem:[%s4064_s6 + $0xd0] sm:$0xff] %v3054_v39   ;;  %v3214_v45 = vpack.c.bf16 %v1680_v41, %v1679_v40  ;;  %v1285_v34 = vadd.f32 %v3513_v44, %v4049_v31  ;;  %v1276_v43 = vpop.f32.mrb[57].mxu0 }
 0x170   : > { %3362 = vst [vmem:[%s4064_s6 + $0x1d8] sm:$0xff] %v3219_v42   ;;  %v3577_v46 = vpop.f32.mrb[56].mxu1  ;;  %v1277_v47 = vadd.f32 %v4049_v31, %v1276_v43  ;;  %v3514_v48 = vpop.f32.mrb[58].mxu0 }
 0x171   : > { %3361 = vst [vmem:[%s4064_s6 + $0x1d0] sm:$0xff] %v3214_v45   ;;  %v1541_v49 = vadd.f32 %v3577_v46, %v4049_v31  ;;  %v1532_v50 = vpop.f32.mrb[57].mxu1  ;;  %v1288_v51 = vadd.f32 %v3514_v48, %v4049_v31  ;;  %v1279_v53 = vpop.f32.mrb[59].mxu0  ;;  %v1621_v57 = vmax.f32 %v1285_v34, 0.0 }
 0x172   : > { %v1533_v55 = vadd.f32 %v4049_v31, %v1532_v50  ;;  %v3578_v52 = vpop.f32.mrb[58].mxu1  ;;  %v1280_v56 = vadd.f32 %v4049_v31, %v1279_v53  ;;  %v1619_v62 = vmax.f32 %v1277_v47, 0.0 }
 0x173   : > { %v1622_v58 = vmax.f32 %v1288_v51, 0.0  ;;  %v1544_v60 = vadd.f32 %v3578_v52, %v4049_v31  ;;  %v1535_v61 = vpop.f32.mrb[59].mxu1  ;;  %v1685_v1 = vmax.f32 %v1541_v49, 0.0 }
 0x174   : > { %v1620_v63 = vmax.f32 %v1280_v56, 0.0  ;;  %v1536_v0 = vadd.f32 %v4049_v31, %v1535_v61  ;;  %v1683_v4 = vmax.f32 %v1533_v55, 0.0 }
 0x175   : > { %v3069_v2 = vpack.c.bf16 %v1622_v58, %v1621_v57  ;;  %v1686_v3 = vmax.f32 %v1544_v60, 0.0 }
 0x176   : > { %v3064_v6 = vpack.c.bf16 %v1620_v63, %v1619_v62  ;;  %v1684_v7 = vmax.f32 %v1536_v0, 0.0 }
 0x177   : > { %v3517_v54 = vpop.f32.mrb[60].mxu0  ;;  %3332 = vst [vmem:[%s4064_s6 + $0xe8] sm:$0xff] %v3069_v2   ;;  %v3229_v8 = vpack.c.bf16 %v1686_v3, %v1685_v1 }
 0x178   : > { %v1301_v59 = vadd.f32 %v3517_v54, %v4049_v31  ;;  %v1292_v9 = vpop.f32.mrb[61].mxu0  ;;  %3331 = vst [vmem:[%s4064_s6 + $0xe0] sm:$0xff] %v3064_v6   ;;  %v3224_v10 = vpack.c.bf16 %v1684_v7, %v1683_v4 }
 0x179   : > { %v1293_v12 = vadd.f32 %v4049_v31, %v1292_v9  ;;  %v3518_v13 = vpop.f32.mrb[62].mxu0  ;;  %3364 = vst [vmem:[%s4064_s6 + $0x1e8] sm:$0xff] %v3229_v8   ;;  %v3581_v14 = vpop.f32.mrb[60].mxu1 }
 0x17a   : > { %v1304_v15 = vadd.f32 %v3518_v13, %v4049_v31  ;;  %v1295_v17 = vpop.f32.mrb[63].mxu0  ;;  %3363 = vst [vmem:[%s4064_s6 + $0x1e0] sm:$0xff] %v3224_v10   ;;  %v1557_v16 = vadd.f32 %v3581_v14, %v4049_v31  ;;  %v1548_v18 = vpop.f32.mrb[61].mxu1  ;;  %v1625_v21 = vmax.f32 %v1301_v59, 0.0 }
 0x17b   : > { %v1296_v19 = vadd.f32 %v4049_v31, %v1295_v17  ;;  %v1549_v22 = vadd.f32 %v4049_v31, %v1548_v18  ;;  %v3582_v24 = vpop.f32.mrb[62].mxu1  ;;  %v1623_v5 = vmax.f32 %v1293_v12, 0.0 }
 0x17c   : > { %v1626_v23 = vmax.f32 %v1304_v15, 0.0  ;;  %v1560_v25 = vadd.f32 %v3582_v24, %v4049_v31  ;;  %v1551_v27 = vpop.f32.mrb[63].mxu1  ;;  %v1689_v20 = vmax.f32 %v1557_v16, 0.0 }
 0x17d   : > { %v1624_v26 = vmax.f32 %v1296_v19, 0.0  ;;  %v1552_v30 = vadd.f32 %v4049_v31, %v1551_v27  ;;  %v1687_v33 = vmax.f32 %v1549_v22, 0.0 }
 0x17e   : > { %v3079_v29 = vpack.c.bf16 %v1626_v23, %v1625_v21  ;;  %v1690_v32 = vmax.f32 %v1560_v25, 0.0 }
 0x17f   : > { %v3074_v11 = vpack.c.bf16 %v1624_v26, %v1623_v5  ;;  %v1688_v35 = vmax.f32 %v1552_v30, 0.0 }
 0x180   : > { %3334 = vst [vmem:[%s4064_s6 + $0xf8] sm:$0xff] %v3079_v29   ;;  %v3239_v28 = vpack.c.bf16 %v1690_v32, %v1689_v20 }
 0x181   : > { %3333 = vst [vmem:[%s4064_s6 + $0xf0] sm:$0xff] %v3074_v11   ;;  %v3234_v36 = vpack.c.bf16 %v1688_v35, %v1687_v33 }
 0x182   : > { %3366 = vst [vmem:[%s4064_s6 + $0x1f8] sm:$0xff] %v3239_v28  }
 0x183   : > { %3365 = vst [vmem:[%s4064_s6 + $0x1f0] sm:$0xff] %v3234_v36  }
 0x184 PF: > { %s15_s18 = sadd.s32 1, %s3623_s18  }
 0x185   : > { %p12_p4 = scmp.ge.s32.totalorder %s15_s18, 4  }
 0x187   :  { %14 = sbr.rel (!%p12_p4) target bundleno = 1 (0x1), region = 70 }

// kernel: forward.28
= control target key start
LH: loop header
LB: loop body
LE: loop exit
PB: predicated region body
PF: predicated region fallthrough
CT: control target
= control target key end

     0   :  { %s3190_s12 = smov 0   ;;  %s3503_s0 = inlined_call_operand.vmem [shape: bf16[2048,128], index: 0, kind: input, shape index: {}]   ;;  %s3504_s1 = inlined_call_operand.vmem [shape: bf16[128,128], index: 1, kind: input, shape index: {}]   ;;  %s3505_s2 = inlined_call_operand.vmem [shape: f32[1,128], index: 2, kind: input, shape index: {}]   ;;  %s3506_s3 = inlined_call_operand.vmem [shape: bf16[2048,128], index: 3, kind: output, shape index: {}]  }
   0x1 LB: > { %s2127_s13 = sadd.s32 4294967295, %s3168_s12   ;;  %p2131_p0 = scmp.ge.s32.totalorder %s3168_s12, 1  ;;  %s3168_s12 = sphi %s3190_s12, %s13_s12  }
   0x2   : > { %p138_p1 = scmp.lt.s32.totalorder %s3168_s12, 3 }
   0x4   : > { %p139_p2 = pnand %p2131_p0, %p138_p1 }
   0x5   : > { %v3090_v0 = vld [vmem:[%s3504_s1] sm:$0xff] (!%p139_p2)   ;;  %s2132_s16 = sshll.u32 (!%p139_p2), %s2127_s13, 7  ;;  %v3091_v1 = vld [vmem:[%s3504_s1 + $0x8] sm:$0xff] (!%p139_p2)   ;;  %v3092_v2 = vld [vmem:[%s3504_s1 + $0x10] sm:$0xff] (!%p139_p2)  }
   0x6   : > { %142 = sbr.rel (%p139_p2) target bundleno = 380 (0x17c), region = 32  ;;  %p163_p3 = scmp.lt.s32.totalorder (!%p139_p2), %s2132_s16, 255  ;;  %2922 = vmatprep.subr.bf16.mxu0 (!%p139_p2), %v3090_v0  ;;  %3066 = vmatprep.subr.bf16.mxu1 (!%p139_p2), %v3090_v0  ;;  %v3093_v3 = vld [vmem:[%s3504_s1 + $0x18] sm:$0xff] (!%p139_p2)   ;;  %v3094_v6 = vld [vmem:[%s3504_s1 + $0x20] sm:$0xff] (!%p139_p2)   ;;  %v3095_v7 = vld [vmem:[%s3504_s1 + $0x28] sm:$0xff] (!%p139_p2)  }
   0x7   : > { %2923 = vmatpush3.bf16.msra.mxu0 (!%p139_p2), %v3090_v0  ;;  %3074 = vmatpush3.bf16.msra.mxu1 (!%p139_p2), %v3090_v0  ;;  %v3096_v8 = vld [vmem:[%s3504_s1 + $0x30] sm:$0xff] (!%p139_p2)   ;;  %v3097_v9 = vld [vmem:[%s3504_s1 + $0x38] sm:$0xff] (!%p139_p2)  }
   0x8   : > { %2924 = vmatprep.subr.bf16.mxu0 (!%p139_p2), %v3091_v1  ;;  %3067 = vmatprep.subr.bf16.mxu1 (!%p139_p2), %v3091_v1 }
   0xb   : > { %2925 = vmatpush3.bf16.msra.mxu0 (!%p139_p2), %v3091_v1  ;;  %3075 = vmatpush3.bf16.msra.mxu1 (!%p139_p2), %v3091_v1 }
   0xc   : > { %2926 = vmatprep.subr.bf16.mxu0 (!%p139_p2), %v3092_v2  ;;  %3068 = vmatprep.subr.bf16.mxu1 (!%p139_p2), %v3092_v2 }
   0xd   : > { %s3508_s16 = smov (!%p163_p3, %s2132_s16), 255 }
   0xe   : > { %s2133_s21 = sshll.u32 %s3508_s16, 2 }
   0xf   : > { %s3215_s24 = scalar_lea.vmem %s3503_s0, %s2133_s21  ;;  %2927 = vmatpush3.bf16.msra.mxu0 %v3092_v2  ;;  %3076 = vmatpush3.bf16.msra.mxu1 %v3092_v2  ;;  %s3314_s13 = scalar_lea.vmem %s3506_s3, %s2133_s21 }
  0x10   : > { %v3098_v4 = vld [vmem:[%s3215_s24] sm:$0xff]   ;;  %2928 = vmatprep.subr.bf16.mxu0 %v3093_v3  ;;  %3069 = vmatprep.subr.bf16.mxu1 %v3093_v3  ;;  %v3100_v10 = vld [vmem:[%s3215_s24 + $0x8] sm:$0xff]   ;;  %v3102_v12 = vld [vmem:[%s3215_s24 + $0x10] sm:$0xff]  }
  0x11   : > { %v3099_v5 = vld [vmem:[%s3215_s24 + $0x100] sm:$0xff]   ;;  %2938 = vmatprep.mubr.bf16.mxu0 %v3098_v4  ;;  %v3101_v11 = vld [vmem:[%s3215_s24 + $0x108] sm:$0xff]   ;;  %v3103_v13 = vld [vmem:[%s3215_s24 + $0x110] sm:$0xff]  }
  0x12   : > { %3002 = vmatprep.mubr.bf16.mxu1 %v3099_v5  ;;  %v3104_v14 = vld [vmem:[%s3215_s24 + $0x18] sm:$0xff]   ;;  %v3106_v16 = vld [vmem:[%s3215_s24 + $0x20] sm:$0xff]   ;;  %v3108_v18 = vld [vmem:[%s3215_s24 + $0x28] sm:$0xff]  }
  0x13   : > { %2929 = vmatpush3.bf16.msra.mxu0 %v3093_v3  ;;  %3077 = vmatpush3.bf16.msra.mxu1 %v3093_v3  ;;  %v3105_v15 = vld [vmem:[%s3215_s24 + $0x118] sm:$0xff]   ;;  %v3107_v17 = vld [vmem:[%s3215_s24 + $0x120] sm:$0xff]   ;;  %v3109_v19 = vld [vmem:[%s3215_s24 + $0x128] sm:$0xff]  }
  0x14   : > { %2930 = vmatprep.subr.bf16.mxu0 %v3094_v6  ;;  %3070 = vmatprep.subr.bf16.mxu1 %v3094_v6  ;;  %v3110_v20 = vld [vmem:[%s3215_s24 + $0x30] sm:$0xff]   ;;  %v3112_v22 = vld [vmem:[%s3215_s24 + $0x38] sm:$0xff]   ;;  %v3114_v24 = vld [vmem:[%s3215_s24 + $0x40] sm:$0xff]  }
  0x15   : > { %v3111_v21 = vld [vmem:[%s3215_s24 + $0x130] sm:$0xff]   ;;  %v3113_v23 = vld [vmem:[%s3215_s24 + $0x138] sm:$0xff]   ;;  %v3115_v25 = vld [vmem:[%s3215_s24 + $0x140] sm:$0xff]  }
  0x16   : > { %v3116_v26 = vld [vmem:[%s3215_s24 + $0x48] sm:$0xff]   ;;  %v3118_v28 = vld [vmem:[%s3215_s24 + $0x50] sm:$0xff]   ;;  %v3120_v30 = vld [vmem:[%s3215_s24 + $0x58] sm:$0xff]  }
  0x17   : > { %2931 = vmatpush3.bf16.msra.mxu0 %v3094_v6  ;;  %3078 = vmatpush3.bf16.msra.mxu1 %v3094_v6  ;;  %v3117_v27 = vld [vmem:[%s3215_s24 + $0x148] sm:$0xff]   ;;  %v3119_v29 = vld [vmem:[%s3215_s24 + $0x150] sm:$0xff]   ;;  %v3121_v31 = vld [vmem:[%s3215_s24 + $0x158] sm:$0xff]  }
  0x18   : > { %2932 = vmatprep.subr.bf16.mxu0 %v3095_v7  ;;  %3071 = vmatprep.subr.bf16.mxu1 %v3095_v7  ;;  %v3122_v32 = vld [vmem:[%s3215_s24 + $0x60] sm:$0xff]   ;;  %v3124_v34 = vld [vmem:[%s3215_s24 + $0x68] sm:$0xff]   ;;  %v3126_v36 = vld [vmem:[%s3215_s24 + $0x70] sm:$0xff]  }
  0x19   : > { %v3123_v33 = vld [vmem:[%s3215_s24 + $0x160] sm:$0xff]   ;;  %v3125_v35 = vld [vmem:[%s3215_s24 + $0x168] sm:$0xff]   ;;  %v3127_v37 = vld [vmem:[%s3215_s24 + $0x170] sm:$0xff]  }
  0x1a   : > { %v3128_v38 = vld [vmem:[%s3215_s24 + $0x78] sm:$0xff]   ;;  %v3130_v40 = vld [vmem:[%s3215_s24 + $0x80] sm:$0xff]   ;;  %v3132_v42 = vld [vmem:[%s3215_s24 + $0x88] sm:$0xff]  }
  0x1b   : > { %2933 = vmatpush3.bf16.msra.mxu0 %v3095_v7  ;;  %3079 = vmatpush3.bf16.msra.mxu1 %v3095_v7  ;;  %v3129_v39 = vld [vmem:[%s3215_s24 + $0x178] sm:$0xff]   ;;  %v3131_v41 = vld [vmem:[%s3215_s24 + $0x180] sm:$0xff]   ;;  %v3133_v43 = vld [vmem:[%s3215_s24 + $0x188] sm:$0xff]  }
  0x1c   : > { %2934 = vmatprep.subr.bf16.mxu0 %v3096_v8  ;;  %3072 = vmatprep.subr.bf16.mxu1 %v3096_v8  ;;  %v3134_v44 = vld [vmem:[%s3215_s24 + $0x90] sm:$0xff]   ;;  %v3136_v46 = vld [vmem:[%s3215_s24 + $0x98] sm:$0xff]   ;;  %v3138_v48 = vld [vmem:[%s3215_s24 + $0xa0] sm:$0xff]  }
  0x1d   : > { %v3135_v45 = vld [vmem:[%s3215_s24 + $0x190] sm:$0xff]   ;;  %v3137_v47 = vld [vmem:[%s3215_s24 + $0x198] sm:$0xff]   ;;  %v3139_v49 = vld [vmem:[%s3215_s24 + $0x1a0] sm:$0xff]  }
  0x1e   : > { %v3140_v50 = vld [vmem:[%s3215_s24 + $0xa8] sm:$0xff]   ;;  %v3142_v52 = vld [vmem:[%s3215_s24 + $0xb0] sm:$0xff]   ;;  %v3144_v54 = vld [vmem:[%s3215_s24 + $0xb8] sm:$0xff]  }
  0x1f   : > { %2935 = vmatpush3.bf16.msra.mxu0 %v3096_v8  ;;  %3080 = vmatpush3.bf16.msra.mxu1 %v3096_v8  ;;  %v3141_v51 = vld [vmem:[%s3215_s24 + $0x1a8] sm:$0xff]   ;;  %v3143_v53 = vld [vmem:[%s3215_s24 + $0x1b0] sm:$0xff]   ;;  %v3145_v55 = vld [vmem:[%s3215_s24 + $0x1b8] sm:$0xff]  }
  0x20   : > { %2936 = vmatprep.subr.bf16.mxu0 %v3097_v9  ;;  %3073 = vmatprep.subr.bf16.mxu1 %v3097_v9  ;;  %v3146_v56 = vld [vmem:[%s3215_s24 + $0xc0] sm:$0xff]   ;;  %v3148_v58 = vld [vmem:[%s3215_s24 + $0xc8] sm:$0xff]   ;;  %v3150_v60 = vld [vmem:[%s3215_s24 + $0xd0] sm:$0xff]  }
  0x21   : > { %v3147_v57 = vld [vmem:[%s3215_s24 + $0x1c0] sm:$0xff]   ;;  %v3149_v59 = vld [vmem:[%s3215_s24 + $0x1c8] sm:$0xff]   ;;  %v3151_v61 = vld [vmem:[%s3215_s24 + $0x1d0] sm:$0xff]  }
  0x22   : > { %v3152_v62 = vld [vmem:[%s3215_s24 + $0xd8] sm:$0xff]   ;;  %v3154_v0 = vld [vmem:[%s3215_s24 + $0xe0] sm:$0xff]   ;;  %v3156_v2 = vld [vmem:[%s3215_s24 + $0xe8] sm:$0xff]  }
  0x23   : > { %2937 = vmatpush3.bf16.msra.mxu0 %v3097_v9  ;;  %3081 = vmatpush3.bf16.msra.mxu1 %v3097_v9  ;;  %v3153_v63 = vld [vmem:[%s3215_s24 + $0x1d8] sm:$0xff]   ;;  %v3155_v1 = vld [vmem:[%s3215_s24 + $0x1e0] sm:$0xff]   ;;  %v3157_v3 = vld [vmem:[%s3215_s24 + $0x1e8] sm:$0xff]  }
  0x24   : > { %v3158_v4 = vld [vmem:[%s3215_s24 + $0xf0] sm:$0xff]   ;;  %v3160_v6 = vld [vmem:[%s3215_s24 + $0xf8] sm:$0xff]   ;;  %v3299_v8 = vld [vmem:[%s3505_s2] ss:$0 sm:$0xff] }
  0x25   : > { %v3159_v5 = vld [vmem:[%s3215_s24 + $0x1f0] sm:$0xff]   ;;  %v3161_v7 = vld [vmem:[%s3215_s24 + $0x1f8] sm:$0xff]  }
  0x26   : > { %2939 = vmatmul.mubr.bf16.vlgmr.msra.gmra.mrb[0].mxu0 %v3100_v10  ;;  %3003 = vmatmul.mubr.bf16.vlgmr.msra.gmra.mrb[0].mxu1 %v3101_v11 }
  0x27   : > { %2942 = vmatprep.mubr.bf16.mxu0 %v3102_v12  ;;  %3006 = vmatprep.mubr.bf16.mxu1 %v3103_v13 }
  0x2e   : > { %2943 = vmatmul.mubr.bf16.gmra.mrb[4].mxu0 %v3104_v14  ;;  %3007 = vmatmul.mubr.bf16.gmra.mrb[4].mxu1 %v3105_v15 }
  0x2f   : > { %2946 = vmatprep.mubr.bf16.mxu0 %v3106_v16  ;;  %3010 = vmatprep.mubr.bf16.mxu1 %v3107_v17 }
  0x36   : > { %2947 = vmatmul.mubr.bf16.gmra.mrb[8].mxu0 %v3108_v18  ;;  %3011 = vmatmul.mubr.bf16.gmra.mrb[8].mxu1 %v3109_v19 }
  0x37   : > { %2950 = vmatprep.mubr.bf16.mxu0 %v3110_v20  ;;  %3014 = vmatprep.mubr.bf16.mxu1 %v3111_v21 }
  0x3e   : > { %2951 = vmatmul.mubr.bf16.gmra.mrb[12].mxu0 %v3112_v22  ;;  %3015 = vmatmul.mubr.bf16.gmra.mrb[12].mxu1 %v3113_v23 }
  0x3f   : > { %2954 = vmatprep.mubr.bf16.mxu0 %v3114_v24  ;;  %3018 = vmatprep.mubr.bf16.mxu1 %v3115_v25 }
  0x46   : > { %2955 = vmatmul.mubr.bf16.gmra.mrb[16].mxu0 %v3116_v26  ;;  %3019 = vmatmul.mubr.bf16.gmra.mrb[16].mxu1 %v3117_v27 }
  0x47   : > { %2958 = vmatprep.mubr.bf16.mxu0 %v3118_v28  ;;  %3022 = vmatprep.mubr.bf16.mxu1 %v3119_v29 }
  0x4e   : > { %2959 = vmatmul.mubr.bf16.gmra.mrb[20].mxu0 %v3120_v30  ;;  %3023 = vmatmul.mubr.bf16.gmra.mrb[20].mxu1 %v3121_v31 }
  0x4f   : > { %2962 = vmatprep.mubr.bf16.mxu0 %v3122_v32  ;;  %3026 = vmatprep.mubr.bf16.mxu1 %v3123_v33 }
  0x56   : > { %2963 = vmatmul.mubr.bf16.gmra.mrb[24].mxu0 %v3124_v34  ;;  %3027 = vmatmul.mubr.bf16.gmra.mrb[24].mxu1 %v3125_v35 }
  0x57   : > { %2966 = vmatprep.mubr.bf16.mxu0 %v3126_v36  ;;  %3030 = vmatprep.mubr.bf16.mxu1 %v3127_v37 }
  0x5e   : > { %2967 = vmatmul.mubr.bf16.gmra.mrb[28].mxu0 %v3128_v38  ;;  %3031 = vmatmul.mubr.bf16.gmra.mrb[28].mxu1 %v3129_v39 }
  0x5f   : > { %2970 = vmatprep.mubr.bf16.mxu0 %v3130_v40  ;;  %3034 = vmatprep.mubr.bf16.mxu1 %v3131_v41 }
  0x66   : > { %2971 = vmatmul.mubr.bf16.gmra.mrb[32].mxu0 %v3132_v42  ;;  %3035 = vmatmul.mubr.bf16.gmra.mrb[32].mxu1 %v3133_v43 }
  0x67   : > { %2974 = vmatprep.mubr.bf16.mxu0 %v3134_v44  ;;  %3038 = vmatprep.mubr.bf16.mxu1 %v3135_v45 }
  0x6e   : > { %2975 = vmatmul.mubr.bf16.gmra.mrb[36].mxu0 %v3136_v46  ;;  %3039 = vmatmul.mubr.bf16.gmra.mrb[36].mxu1 %v3137_v47 }
  0x6f   : > { %2978 = vmatprep.mubr.bf16.mxu0 %v3138_v48  ;;  %3042 = vmatprep.mubr.bf16.mxu1 %v3139_v49 }
  0x76   : > { %2979 = vmatmul.mubr.bf16.gmra.mrb[40].mxu0 %v3140_v50  ;;  %3043 = vmatmul.mubr.bf16.gmra.mrb[40].mxu1 %v3141_v51 }
  0x77   : > { %2982 = vmatprep.mubr.bf16.mxu0 %v3142_v52  ;;  %3046 = vmatprep.mubr.bf16.mxu1 %v3143_v53 }
  0x7e   : > { %2983 = vmatmul.mubr.bf16.gmra.mrb[44].mxu0 %v3144_v54  ;;  %3047 = vmatmul.mubr.bf16.gmra.mrb[44].mxu1 %v3145_v55 }
  0x7f   : > { %2986 = vmatprep.mubr.bf16.mxu0 %v3146_v56  ;;  %3050 = vmatprep.mubr.bf16.mxu1 %v3147_v57 }
  0x86   : > { %2987 = vmatmul.mubr.bf16.gmra.mrb[48].mxu0 %v3148_v58  ;;  %3051 = vmatmul.mubr.bf16.gmra.mrb[48].mxu1 %v3149_v59 }
  0x87   : > { %2990 = vmatprep.mubr.bf16.mxu0 %v3150_v60  ;;  %3054 = vmatprep.mubr.bf16.mxu1 %v3151_v61 }
  0x8e   : > { %2991 = vmatmul.mubr.bf16.gmra.mrb[52].mxu0 %v3152_v62  ;;  %3055 = vmatmul.mubr.bf16.gmra.mrb[52].mxu1 %v3153_v63 }
  0x8f   : > { %2994 = vmatprep.mubr.bf16.mxu0 %v3154_v0  ;;  %3058 = vmatprep.mubr.bf16.mxu1 %v3155_v1 }
  0x96   : > { %2995 = vmatmul.mubr.bf16.gmra.mrb[56].mxu0 %v3156_v2  ;;  %3059 = vmatmul.mubr.bf16.gmra.mrb[56].mxu1 %v3157_v3 }
  0x97   : > { %2998 = vmatprep.mubr.bf16.mxu0 %v3158_v4  ;;  %3062 = vmatprep.mubr.bf16.mxu1 %v3159_v5 }
  0x9e   : > { %2999 = vmatmul.mubr.bf16.gmra.mrb[60].mxu0 %v3160_v6  ;;  %3063 = vmatmul.mubr.bf16.gmra.mrb[60].mxu1 %v3161_v7 }
  0xf9   : > { %v2940_v9 = vpop.f32.mrb[0].mxu0  ;;  %v3004_v10 = vpop.f32.mrb[0].mxu1 }
  0xfa   : > { %v801_v11 = vadd.f32 %v2940_v9, %v3299_v8  ;;  %v1057_v12 = vadd.f32 %v3004_v10, %v3299_v8  ;;  %v792_v13 = vpop.f32.mrb[1].mxu0  ;;  %v1048_v14 = vpop.f32.mrb[1].mxu1 }
  0xfb   : > { %v793_v15 = vadd.f32 %v3299_v8, %v792_v13  ;;  %v1049_v16 = vadd.f32 %v3299_v8, %v1048_v14  ;;  %v2941_v17 = vpop.f32.mrb[2].mxu0  ;;  %v3005_v18 = vpop.f32.mrb[2].mxu1 }
  0xfc   : > { %v804_v19 = vadd.f32 %v2941_v17, %v3299_v8  ;;  %v1060_v20 = vadd.f32 %v3005_v18, %v3299_v8  ;;  %v795_v21 = vpop.f32.mrb[3].mxu0  ;;  %v1051_v22 = vpop.f32.mrb[3].mxu1  ;;  %v1305_v25 = vmax.f32 %v801_v11, 0.0  ;;  %v1369_v26 = vmax.f32 %v1057_v12, 0.0 }
  0xfd   : > { %v796_v23 = vadd.f32 %v3299_v8, %v795_v21  ;;  %v1052_v24 = vadd.f32 %v3299_v8, %v1051_v22  ;;  %v1303_v29 = vmax.f32 %v793_v15, 0.0  ;;  %v1367_v30 = vmax.f32 %v1049_v16, 0.0 }
  0xfe   : > { %v1306_v27 = vmax.f32 %v804_v19, 0.0  ;;  %v1370_v28 = vmax.f32 %v1060_v20, 0.0 }
  0xff   : > { %v1304_v31 = vmax.f32 %v796_v23, 0.0  ;;  %v1368_v32 = vmax.f32 %v1052_v24, 0.0 }
 0x100   : > { %v2475_v33 = vpack.c.bf16 %v1306_v27, %v1305_v25  ;;  %v2635_v34 = vpack.c.bf16 %v1370_v28, %v1369_v26 }
 0x101   : > { %v2470_v35 = vpack.c.bf16 %v1304_v31, %v1303_v29  ;;  %v2630_v36 = vpack.c.bf16 %v1368_v32, %v1367_v30  ;;  %v2944_v37 = vpop.f32.mrb[4].mxu0  ;;  %v3008_v38 = vpop.f32.mrb[4].mxu1 }
 0x102   : > { %2787 = vst [vmem:[%s3314_s13 + $0x8] sm:$0xff] %v2475_v33   ;;  %2819 = vst [vmem:[%s3314_s13 + $0x108] sm:$0xff] %v2635_v34   ;;  %v817_v39 = vadd.f32 %v2944_v37, %v3299_v8  ;;  %v1073_v40 = vadd.f32 %v3008_v38, %v3299_v8  ;;  %v808_v41 = vpop.f32.mrb[5].mxu0  ;;  %v1064_v42 = vpop.f32.mrb[5].mxu1 }
 0x103   : > { %2471 = vst [vmem:[%s3314_s13] sm:$0xff] %v2470_v35   ;;  %2818 = vst [vmem:[%s3314_s13 + $0x100] sm:$0xff] %v2630_v36   ;;  %v809_v43 = vadd.f32 %v3299_v8, %v808_v41  ;;  %v1065_v44 = vadd.f32 %v3299_v8, %v1064_v42  ;;  %v2945_v45 = vpop.f32.mrb[6].mxu0  ;;  %v3009_v46 = vpop.f32.mrb[6].mxu1 }
 0x104   : > { %v820_v47 = vadd.f32 %v2945_v45, %v3299_v8  ;;  %v1076_v48 = vadd.f32 %v3009_v46, %v3299_v8  ;;  %v811_v49 = vpop.f32.mrb[7].mxu0  ;;  %v1067_v50 = vpop.f32.mrb[7].mxu1  ;;  %v1309_v53 = vmax.f32 %v817_v39, 0.0  ;;  %v1373_v54 = vmax.f32 %v1073_v40, 0.0 }
 0x105   : > { %v812_v51 = vadd.f32 %v3299_v8, %v811_v49  ;;  %v1068_v52 = vadd.f32 %v3299_v8, %v1067_v50  ;;  %v1307_v57 = vmax.f32 %v809_v43, 0.0  ;;  %v1371_v58 = vmax.f32 %v1065_v44, 0.0 }
 0x106   : > { %v1310_v55 = vmax.f32 %v820_v47, 0.0  ;;  %v1374_v56 = vmax.f32 %v1076_v48, 0.0 }
 0x107   : > { %v1308_v59 = vmax.f32 %v812_v51, 0.0  ;;  %v1372_v60 = vmax.f32 %v1068_v52, 0.0 }
 0x108   : > { %v2485_v61 = vpack.c.bf16 %v1310_v55, %v1309_v53  ;;  %v2645_v62 = vpack.c.bf16 %v1374_v56, %v1373_v54 }
 0x109   : > { %v2480_v63 = vpack.c.bf16 %v1308_v59, %v1307_v57  ;;  %v2640_v0 = vpack.c.bf16 %v1372_v60, %v1371_v58  ;;  %v2948_v1 = vpop.f32.mrb[8].mxu0  ;;  %v3012_v2 = vpop.f32.mrb[8].mxu1 }
 0x10a   : > { %2789 = vst [vmem:[%s3314_s13 + $0x18] sm:$0xff] %v2485_v61   ;;  %2821 = vst [vmem:[%s3314_s13 + $0x118] sm:$0xff] %v2645_v62   ;;  %v833_v3 = vadd.f32 %v2948_v1, %v3299_v8  ;;  %v1089_v4 = vadd.f32 %v3012_v2, %v3299_v8  ;;  %v824_v5 = vpop.f32.mrb[9].mxu0  ;;  %v1080_v6 = vpop.f32.mrb[9].mxu1 }
 0x10b   : > { %2788 = vst [vmem:[%s3314_s13 + $0x10] sm:$0xff] %v2480_v63   ;;  %2820 = vst [vmem:[%s3314_s13 + $0x110] sm:$0xff] %v2640_v0   ;;  %v825_v7 = vadd.f32 %v3299_v8, %v824_v5  ;;  %v1081_v9 = vadd.f32 %v3299_v8, %v1080_v6  ;;  %v2949_v10 = vpop.f32.mrb[10].mxu0  ;;  %v3013_v11 = vpop.f32.mrb[10].mxu1 }
 0x10c   : > { %v836_v12 = vadd.f32 %v2949_v10, %v3299_v8  ;;  %v1092_v13 = vadd.f32 %v3013_v11, %v3299_v8  ;;  %v827_v14 = vpop.f32.mrb[11].mxu0  ;;  %v1083_v15 = vpop.f32.mrb[11].mxu1  ;;  %v1313_v18 = vmax.f32 %v833_v3, 0.0  ;;  %v1377_v19 = vmax.f32 %v1089_v4, 0.0 }
 0x10d   : > { %v828_v16 = vadd.f32 %v3299_v8, %v827_v14  ;;  %v1084_v17 = vadd.f32 %v3299_v8, %v1083_v15  ;;  %v1311_v22 = vmax.f32 %v825_v7, 0.0  ;;  %v1375_v23 = vmax.f32 %v1081_v9, 0.0 }
 0x10e   : > { %v1314_v20 = vmax.f32 %v836_v12, 0.0  ;;  %v1378_v21 = vmax.f32 %v1092_v13, 0.0 }
 0x10f   : > { %v1312_v24 = vmax.f32 %v828_v16, 0.0  ;;  %v1376_v25 = vmax.f32 %v1084_v17, 0.0 }
 0x110   : > { %v2495_v26 = vpack.c.bf16 %v1314_v20, %v1313_v18  ;;  %v2655_v27 = vpack.c.bf16 %v1378_v21, %v1377_v19 }
 0x111   : > { %v2490_v28 = vpack.c.bf16 %v1312_v24, %v1311_v22  ;;  %v2650_v29 = vpack.c.bf16 %v1376_v25, %v1375_v23  ;;  %v2952_v30 = vpop.f32.mrb[12].mxu0  ;;  %v3016_v31 = vpop.f32.mrb[12].mxu1 }
 0x112   : > { %2791 = vst [vmem:[%s3314_s13 + $0x28] sm:$0xff] %v2495_v26   ;;  %2823 = vst [vmem:[%s3314_s13 + $0x128] sm:$0xff] %v2655_v27   ;;  %v849_v32 = vadd.f32 %v2952_v30, %v3299_v8  ;;  %v1105_v33 = vadd.f32 %v3016_v31, %v3299_v8  ;;  %v840_v34 = vpop.f32.mrb[13].mxu0  ;;  %v1096_v35 = vpop.f32.mrb[13].mxu1 }
 0x113   : > { %2790 = vst [vmem:[%s3314_s13 + $0x20] sm:$0xff] %v2490_v28   ;;  %2822 = vst [vmem:[%s3314_s13 + $0x120] sm:$0xff] %v2650_v29   ;;  %v841_v36 = vadd.f32 %v3299_v8, %v840_v34  ;;  %v1097_v37 = vadd.f32 %v3299_v8, %v1096_v35  ;;  %v2953_v38 = vpop.f32.mrb[14].mxu0  ;;  %v3017_v39 = vpop.f32.mrb[14].mxu1 }
 0x114   : > { %v852_v40 = vadd.f32 %v2953_v38, %v3299_v8  ;;  %v1108_v41 = vadd.f32 %v3017_v39, %v3299_v8  ;;  %v843_v42 = vpop.f32.mrb[15].mxu0  ;;  %v1099_v43 = vpop.f32.mrb[15].mxu1  ;;  %v1317_v46 = vmax.f32 %v849_v32, 0.0  ;;  %v1381_v47 = vmax.f32 %v1105_v33, 0.0 }
 0x115   : > { %v844_v44 = vadd.f32 %v3299_v8, %v843_v42  ;;  %v1100_v45 = vadd.f32 %v3299_v8, %v1099_v43  ;;  %v1315_v50 = vmax.f32 %v841_v36, 0.0  ;;  %v1379_v51 = vmax.f32 %v1097_v37, 0.0 }
 0x116   : > { %v1318_v48 = vmax.f32 %v852_v40, 0.0  ;;  %v1382_v49 = vmax.f32 %v1108_v41, 0.0 }
 0x117   : > { %v1316_v52 = vmax.f32 %v844_v44, 0.0  ;;  %v1380_v53 = vmax.f32 %v1100_v45, 0.0 }
 0x118   : > { %v2505_v54 = vpack.c.bf16 %v1318_v48, %v1317_v46  ;;  %v2665_v55 = vpack.c.bf16 %v1382_v49, %v1381_v47 }
 0x119   : > { %v2500_v56 = vpack.c.bf16 %v1316_v52, %v1315_v50  ;;  %v2660_v57 = vpack.c.bf16 %v1380_v53, %v1379_v51  ;;  %v2956_v58 = vpop.f32.mrb[16].mxu0  ;;  %v3020_v59 = vpop.f32.mrb[16].mxu1 }
 0x11a   : > { %2793 = vst [vmem:[%s3314_s13 + $0x38] sm:$0xff] %v2505_v54   ;;  %2825 = vst [vmem:[%s3314_s13 + $0x138] sm:$0xff] %v2665_v55   ;;  %v865_v60 = vadd.f32 %v2956_v58, %v3299_v8  ;;  %v1121_v61 = vadd.f32 %v3020_v59, %v3299_v8  ;;  %v856_v62 = vpop.f32.mrb[17].mxu0  ;;  %v1112_v63 = vpop.f32.mrb[17].mxu1 }
 0x11b   : > { %2792 = vst [vmem:[%s3314_s13 + $0x30] sm:$0xff] %v2500_v56   ;;  %2824 = vst [vmem:[%s3314_s13 + $0x130] sm:$0xff] %v2660_v57   ;;  %v857_v0 = vadd.f32 %v3299_v8, %v856_v62  ;;  %v1113_v1 = vadd.f32 %v3299_v8, %v1112_v63  ;;  %v2957_v2 = vpop.f32.mrb[18].mxu0  ;;  %v3021_v3 = vpop.f32.mrb[18].mxu1 }
 0x11c   : > { %v868_v4 = vadd.f32 %v2957_v2, %v3299_v8  ;;  %v1124_v5 = vadd.f32 %v3021_v3, %v3299_v8  ;;  %v859_v6 = vpop.f32.mrb[19].mxu0  ;;  %v1115_v7 = vpop.f32.mrb[19].mxu1  ;;  %v1321_v11 = vmax.f32 %v865_v60, 0.0  ;;  %v1385_v12 = vmax.f32 %v1121_v61, 0.0 }
 0x11d   : > { %v860_v9 = vadd.f32 %v3299_v8, %v859_v6  ;;  %v1116_v10 = vadd.f32 %v3299_v8, %v1115_v7  ;;  %v1319_v15 = vmax.f32 %v857_v0, 0.0  ;;  %v1383_v16 = vmax.f32 %v1113_v1, 0.0 }
 0x11e   : > { %v1322_v13 = vmax.f32 %v868_v4, 0.0  ;;  %v1386_v14 = vmax.f32 %v1124_v5, 0.0 }
 0x11f   : > { %v1320_v17 = vmax.f32 %v860_v9, 0.0  ;;  %v1384_v18 = vmax.f32 %v1116_v10, 0.0 }
 0x120   : > { %v2515_v19 = vpack.c.bf16 %v1322_v13, %v1321_v11  ;;  %v2675_v20 = vpack.c.bf16 %v1386_v14, %v1385_v12 }
 0x121   : > { %v2510_v21 = vpack.c.bf16 %v1320_v17, %v1319_v15  ;;  %v2670_v22 = vpack.c.bf16 %v1384_v18, %v1383_v16  ;;  %v2960_v23 = vpop.f32.mrb[20].mxu0  ;;  %v3024_v24 = vpop.f32.mrb[20].mxu1 }
 0x122   : > { %2795 = vst [vmem:[%s3314_s13 + $0x48] sm:$0xff] %v2515_v19   ;;  %2827 = vst [vmem:[%s3314_s13 + $0x148] sm:$0xff] %v2675_v20   ;;  %v881_v25 = vadd.f32 %v2960_v23, %v3299_v8  ;;  %v1137_v26 = vadd.f32 %v3024_v24, %v3299_v8  ;;  %v872_v27 = vpop.f32.mrb[21].mxu0  ;;  %v1128_v28 = vpop.f32.mrb[21].mxu1 }
 0x123   : > { %2794 = vst [vmem:[%s3314_s13 + $0x40] sm:$0xff] %v2510_v21   ;;  %2826 = vst [vmem:[%s3314_s13 + $0x140] sm:$0xff] %v2670_v22   ;;  %v873_v29 = vadd.f32 %v3299_v8, %v872_v27  ;;  %v1129_v30 = vadd.f32 %v3299_v8, %v1128_v28  ;;  %v2961_v31 = vpop.f32.mrb[22].mxu0  ;;  %v3025_v32 = vpop.f32.mrb[22].mxu1 }
 0x124   : > { %v884_v33 = vadd.f32 %v2961_v31, %v3299_v8  ;;  %v1140_v34 = vadd.f32 %v3025_v32, %v3299_v8  ;;  %v875_v35 = vpop.f32.mrb[23].mxu0  ;;  %v1131_v36 = vpop.f32.mrb[23].mxu1  ;;  %v1325_v39 = vmax.f32 %v881_v25, 0.0  ;;  %v1389_v40 = vmax.f32 %v1137_v26, 0.0 }
 0x125   : > { %v876_v37 = vadd.f32 %v3299_v8, %v875_v35  ;;  %v1132_v38 = vadd.f32 %v3299_v8, %v1131_v36  ;;  %v1323_v43 = vmax.f32 %v873_v29, 0.0  ;;  %v1387_v44 = vmax.f32 %v1129_v30, 0.0 }
 0x126   : > { %v1326_v41 = vmax.f32 %v884_v33, 0.0  ;;  %v1390_v42 = vmax.f32 %v1140_v34, 0.0 }
 0x127   : > { %v1324_v45 = vmax.f32 %v876_v37, 0.0  ;;  %v1388_v46 = vmax.f32 %v1132_v38, 0.0 }
 0x128   : > { %v2525_v47 = vpack.c.bf16 %v1326_v41, %v1325_v39  ;;  %v2685_v48 = vpack.c.bf16 %v1390_v42, %v1389_v40 }
 0x129   : > { %v2520_v49 = vpack.c.bf16 %v1324_v45, %v1323_v43  ;;  %v2680_v50 = vpack.c.bf16 %v1388_v46, %v1387_v44  ;;  %v2964_v51 = vpop.f32.mrb[24].mxu0  ;;  %v3028_v52 = vpop.f32.mrb[24].mxu1 }
 0x12a   : > { %2797 = vst [vmem:[%s3314_s13 + $0x58] sm:$0xff] %v2525_v47   ;;  %2829 = vst [vmem:[%s3314_s13 + $0x158] sm:$0xff] %v2685_v48   ;;  %v897_v53 = vadd.f32 %v2964_v51, %v3299_v8  ;;  %v1153_v54 = vadd.f32 %v3028_v52, %v3299_v8  ;;  %v888_v55 = vpop.f32.mrb[25].mxu0  ;;  %v1144_v56 = vpop.f32.mrb[25].mxu1 }
 0x12b   : > { %2796 = vst [vmem:[%s3314_s13 + $0x50] sm:$0xff] %v2520_v49   ;;  %2828 = vst [vmem:[%s3314_s13 + $0x150] sm:$0xff] %v2680_v50   ;;  %v889_v57 = vadd.f32 %v3299_v8, %v888_v55  ;;  %v1145_v58 = vadd.f32 %v3299_v8, %v1144_v56  ;;  %v2965_v59 = vpop.f32.mrb[26].mxu0  ;;  %v3029_v60 = vpop.f32.mrb[26].mxu1 }
 0x12c   : > { %v900_v61 = vadd.f32 %v2965_v59, %v3299_v8  ;;  %v1156_v62 = vadd.f32 %v3029_v60, %v3299_v8  ;;  %v891_v63 = vpop.f32.mrb[27].mxu0  ;;  %v1147_v0 = vpop.f32.mrb[27].mxu1  ;;  %v1329_v3 = vmax.f32 %v897_v53, 0.0  ;;  %v1393_v4 = vmax.f32 %v1153_v54, 0.0 }
 0x12d   : > { %v892_v1 = vadd.f32 %v3299_v8, %v891_v63  ;;  %v1148_v2 = vadd.f32 %v3299_v8, %v1147_v0  ;;  %v1327_v7 = vmax.f32 %v889_v57, 0.0  ;;  %v1391_v9 = vmax.f32 %v1145_v58, 0.0 }
 0x12e   : > { %v1330_v5 = vmax.f32 %v900_v61, 0.0  ;;  %v1394_v6 = vmax.f32 %v1156_v62, 0.0 }
 0x12f   : > { %v1328_v10 = vmax.f32 %v892_v1, 0.0  ;;  %v1392_v11 = vmax.f32 %v1148_v2, 0.0 }
 0x130   : > { %v2535_v12 = vpack.c.bf16 %v1330_v5, %v1329_v3  ;;  %v2695_v13 = vpack.c.bf16 %v1394_v6, %v1393_v4 }
 0x131   : > { %v2530_v14 = vpack.c.bf16 %v1328_v10, %v1327_v7  ;;  %v2690_v15 = vpack.c.bf16 %v1392_v11, %v1391_v9  ;;  %v2968_v16 = vpop.f32.mrb[28].mxu0  ;;  %v3032_v17 = vpop.f32.mrb[28].mxu1 }
 0x132   : > { %2799 = vst [vmem:[%s3314_s13 + $0x68] sm:$0xff] %v2535_v12   ;;  %2831 = vst [vmem:[%s3314_s13 + $0x168] sm:$0xff] %v2695_v13   ;;  %v913_v18 = vadd.f32 %v2968_v16, %v3299_v8  ;;  %v1169_v19 = vadd.f32 %v3032_v17, %v3299_v8  ;;  %v904_v20 = vpop.f32.mrb[29].mxu0  ;;  %v1160_v21 = vpop.f32.mrb[29].mxu1 }
 0x133   : > { %2798 = vst [vmem:[%s3314_s13 + $0x60] sm:$0xff] %v2530_v14   ;;  %2830 = vst [vmem:[%s3314_s13 + $0x160] sm:$0xff] %v2690_v15   ;;  %v905_v22 = vadd.f32 %v3299_v8, %v904_v20  ;;  %v1161_v23 = vadd.f32 %v3299_v8, %v1160_v21  ;;  %v2969_v24 = vpop.f32.mrb[30].mxu0  ;;  %v3033_v25 = vpop.f32.mrb[30].mxu1 }
 0x134   : > { %v916_v26 = vadd.f32 %v2969_v24, %v3299_v8  ;;  %v1172_v27 = vadd.f32 %v3033_v25, %v3299_v8  ;;  %v907_v28 = vpop.f32.mrb[31].mxu0  ;;  %v1163_v29 = vpop.f32.mrb[31].mxu1  ;;  %v1333_v32 = vmax.f32 %v913_v18, 0.0  ;;  %v1397_v33 = vmax.f32 %v1169_v19, 0.0 }
 0x135   : > { %v908_v30 = vadd.f32 %v3299_v8, %v907_v28  ;;  %v1164_v31 = vadd.f32 %v3299_v8, %v1163_v29  ;;  %v1331_v36 = vmax.f32 %v905_v22, 0.0  ;;  %v1395_v37 = vmax.f32 %v1161_v23, 0.0 }
 0x136   : > { %v1334_v34 = vmax.f32 %v916_v26, 0.0  ;;  %v1398_v35 = vmax.f32 %v1172_v27, 0.0 }
 0x137   : > { %v1332_v38 = vmax.f32 %v908_v30, 0.0  ;;  %v1396_v39 = vmax.f32 %v1164_v31, 0.0 }
 0x138   : > { %v2545_v40 = vpack.c.bf16 %v1334_v34, %v1333_v32  ;;  %v2705_v41 = vpack.c.bf16 %v1398_v35, %v1397_v33 }
 0x139   : > { %v2540_v42 = vpack.c.bf16 %v1332_v38, %v1331_v36  ;;  %v2700_v43 = vpack.c.bf16 %v1396_v39, %v1395_v37  ;;  %v2972_v44 = vpop.f32.mrb[32].mxu0  ;;  %v3036_v45 = vpop.f32.mrb[32].mxu1 }
 0x13a   : > { %2801 = vst [vmem:[%s3314_s13 + $0x78] sm:$0xff] %v2545_v40   ;;  %2833 = vst [vmem:[%s3314_s13 + $0x178] sm:$0xff] %v2705_v41   ;;  %v929_v46 = vadd.f32 %v2972_v44, %v3299_v8  ;;  %v1185_v47 = vadd.f32 %v3036_v45, %v3299_v8  ;;  %v920_v48 = vpop.f32.mrb[33].mxu0  ;;  %v1176_v49 = vpop.f32.mrb[33].mxu1 }
 0x13b   : > { %2800 = vst [vmem:[%s3314_s13 + $0x70] sm:$0xff] %v2540_v42   ;;  %2832 = vst [vmem:[%s3314_s13 + $0x170] sm:$0xff] %v2700_v43   ;;  %v921_v50 = vadd.f32 %v3299_v8, %v920_v48  ;;  %v1177_v51 = vadd.f32 %v3299_v8, %v1176_v49  ;;  %v2973_v52 = vpop.f32.mrb[34].mxu0  ;;  %v3037_v53 = vpop.f32.mrb[34].mxu1 }
 0x13c   : > { %v932_v54 = vadd.f32 %v2973_v52, %v3299_v8  ;;  %v1188_v55 = vadd.f32 %v3037_v53, %v3299_v8  ;;  %v923_v56 = vpop.f32.mrb[35].mxu0  ;;  %v1179_v57 = vpop.f32.mrb[35].mxu1  ;;  %v1337_v60 = vmax.f32 %v929_v46, 0.0  ;;  %v1401_v61 = vmax.f32 %v1185_v47, 0.0 }
 0x13d   : > { %v924_v58 = vadd.f32 %v3299_v8, %v923_v56  ;;  %v1180_v59 = vadd.f32 %v3299_v8, %v1179_v57  ;;  %v1335_v0 = vmax.f32 %v921_v50, 0.0  ;;  %v1399_v1 = vmax.f32 %v1177_v51, 0.0 }
 0x13e   : > { %v1338_v62 = vmax.f32 %v932_v54, 0.0  ;;  %v1402_v63 = vmax.f32 %v1188_v55, 0.0 }
 0x13f   : > { %v1336_v2 = vmax.f32 %v924_v58, 0.0  ;;  %v1400_v3 = vmax.f32 %v1180_v59, 0.0 }
 0x140   : > { %v2555_v4 = vpack.c.bf16 %v1338_v62, %v1337_v60  ;;  %v2715_v5 = vpack.c.bf16 %v1402_v63, %v1401_v61 }
 0x141   : > { %v2550_v6 = vpack.c.bf16 %v1336_v2, %v1335_v0  ;;  %v2710_v7 = vpack.c.bf16 %v1400_v3, %v1399_v1  ;;  %v2976_v9 = vpop.f32.mrb[36].mxu0  ;;  %v3040_v10 = vpop.f32.mrb[36].mxu1 }
 0x142   : > { %2803 = vst [vmem:[%s3314_s13 + $0x88] sm:$0xff] %v2555_v4   ;;  %2835 = vst [vmem:[%s3314_s13 + $0x188] sm:$0xff] %v2715_v5   ;;  %v945_v11 = vadd.f32 %v2976_v9, %v3299_v8  ;;  %v1201_v12 = vadd.f32 %v3040_v10, %v3299_v8  ;;  %v936_v13 = vpop.f32.mrb[37].mxu0  ;;  %v1192_v14 = vpop.f32.mrb[37].mxu1 }
 0x143   : > { %2802 = vst [vmem:[%s3314_s13 + $0x80] sm:$0xff] %v2550_v6   ;;  %2834 = vst [vmem:[%s3314_s13 + $0x180] sm:$0xff] %v2710_v7   ;;  %v937_v15 = vadd.f32 %v3299_v8, %v936_v13  ;;  %v1193_v16 = vadd.f32 %v3299_v8, %v1192_v14  ;;  %v2977_v17 = vpop.f32.mrb[38].mxu0  ;;  %v3041_v18 = vpop.f32.mrb[38].mxu1 }
 0x144   : > { %v948_v19 = vadd.f32 %v2977_v17, %v3299_v8  ;;  %v1204_v20 = vadd.f32 %v3041_v18, %v3299_v8  ;;  %v939_v21 = vpop.f32.mrb[39].mxu0  ;;  %v1195_v22 = vpop.f32.mrb[39].mxu1  ;;  %v1341_v25 = vmax.f32 %v945_v11, 0.0  ;;  %v1405_v26 = vmax.f32 %v1201_v12, 0.0 }
 0x145   : > { %v940_v23 = vadd.f32 %v3299_v8, %v939_v21  ;;  %v1196_v24 = vadd.f32 %v3299_v8, %v1195_v22  ;;  %v1339_v29 = vmax.f32 %v937_v15, 0.0  ;;  %v1403_v30 = vmax.f32 %v1193_v16, 0.0 }
 0x146   : > { %v1342_v27 = vmax.f32 %v948_v19, 0.0  ;;  %v1406_v28 = vmax.f32 %v1204_v20, 0.0 }
 0x147   : > { %v1340_v31 = vmax.f32 %v940_v23, 0.0  ;;  %v1404_v32 = vmax.f32 %v1196_v24, 0.0 }
 0x148   : > { %v2565_v33 = vpack.c.bf16 %v1342_v27, %v1341_v25  ;;  %v2725_v34 = vpack.c.bf16 %v1406_v28, %v1405_v26 }
 0x149   : > { %v2560_v35 = vpack.c.bf16 %v1340_v31, %v1339_v29  ;;  %v2720_v36 = vpack.c.bf16 %v1404_v32, %v1403_v30  ;;  %v2980_v37 = vpop.f32.mrb[40].mxu0  ;;  %v3044_v38 = vpop.f32.mrb[40].mxu1 }
 0x14a   : > { %2805 = vst [vmem:[%s3314_s13 + $0x98] sm:$0xff] %v2565_v33   ;;  %2837 = vst [vmem:[%s3314_s13 + $0x198] sm:$0xff] %v2725_v34   ;;  %v961_v39 = vadd.f32 %v2980_v37, %v3299_v8  ;;  %v1217_v40 = vadd.f32 %v3044_v38, %v3299_v8  ;;  %v952_v41 = vpop.f32.mrb[41].mxu0  ;;  %v1208_v42 = vpop.f32.mrb[41].mxu1 }
 0x14b   : > { %2804 = vst [vmem:[%s3314_s13 + $0x90] sm:$0xff] %v2560_v35   ;;  %2836 = vst [vmem:[%s3314_s13 + $0x190] sm:$0xff] %v2720_v36   ;;  %v953_v43 = vadd.f32 %v3299_v8, %v952_v41  ;;  %v1209_v44 = vadd.f32 %v3299_v8, %v1208_v42  ;;  %v2981_v45 = vpop.f32.mrb[42].mxu0  ;;  %v3045_v46 = vpop.f32.mrb[42].mxu1 }
 0x14c   : > { %v964_v47 = vadd.f32 %v2981_v45, %v3299_v8  ;;  %v1220_v48 = vadd.f32 %v3045_v46, %v3299_v8  ;;  %v955_v49 = vpop.f32.mrb[43].mxu0  ;;  %v1211_v50 = vpop.f32.mrb[43].mxu1  ;;  %v1345_v53 = vmax.f32 %v961_v39, 0.0  ;;  %v1409_v54 = vmax.f32 %v1217_v40, 0.0 }
 0x14d   : > { %v956_v51 = vadd.f32 %v3299_v8, %v955_v49  ;;  %v1212_v52 = vadd.f32 %v3299_v8, %v1211_v50  ;;  %v1343_v57 = vmax.f32 %v953_v43, 0.0  ;;  %v1407_v58 = vmax.f32 %v1209_v44, 0.0 }
 0x14e   : > { %v1346_v55 = vmax.f32 %v964_v47, 0.0  ;;  %v1410_v56 = vmax.f32 %v1220_v48, 0.0 }
 0x14f   : > { %v1344_v59 = vmax.f32 %v956_v51, 0.0  ;;  %v1408_v60 = vmax.f32 %v1212_v52, 0.0 }
 0x150   : > { %v2575_v61 = vpack.c.bf16 %v1346_v55, %v1345_v53  ;;  %v2735_v62 = vpack.c.bf16 %v1410_v56, %v1409_v54 }
 0x151   : > { %v2570_v63 = vpack.c.bf16 %v1344_v59, %v1343_v57  ;;  %v2730_v0 = vpack.c.bf16 %v1408_v60, %v1407_v58  ;;  %v2984_v1 = vpop.f32.mrb[44].mxu0  ;;  %v3048_v2 = vpop.f32.mrb[44].mxu1 }
 0x152   : > { %2807 = vst [vmem:[%s3314_s13 + $0xa8] sm:$0xff] %v2575_v61   ;;  %2839 = vst [vmem:[%s3314_s13 + $0x1a8] sm:$0xff] %v2735_v62   ;;  %v977_v3 = vadd.f32 %v2984_v1, %v3299_v8  ;;  %v1233_v4 = vadd.f32 %v3048_v2, %v3299_v8  ;;  %v968_v5 = vpop.f32.mrb[45].mxu0  ;;  %v1224_v6 = vpop.f32.mrb[45].mxu1 }
 0x153   : > { %2806 = vst [vmem:[%s3314_s13 + $0xa0] sm:$0xff] %v2570_v63   ;;  %2838 = vst [vmem:[%s3314_s13 + $0x1a0] sm:$0xff] %v2730_v0   ;;  %v969_v7 = vadd.f32 %v3299_v8, %v968_v5  ;;  %v1225_v9 = vadd.f32 %v3299_v8, %v1224_v6  ;;  %v2985_v10 = vpop.f32.mrb[46].mxu0  ;;  %v3049_v11 = vpop.f32.mrb[46].mxu1 }
 0x154   : > { %v980_v12 = vadd.f32 %v2985_v10, %v3299_v8  ;;  %v1236_v13 = vadd.f32 %v3049_v11, %v3299_v8  ;;  %v971_v14 = vpop.f32.mrb[47].mxu0  ;;  %v1227_v15 = vpop.f32.mrb[47].mxu1  ;;  %v1349_v18 = vmax.f32 %v977_v3, 0.0  ;;  %v1413_v19 = vmax.f32 %v1233_v4, 0.0 }
 0x155   : > { %v972_v16 = vadd.f32 %v3299_v8, %v971_v14  ;;  %v1228_v17 = vadd.f32 %v3299_v8, %v1227_v15  ;;  %v1347_v22 = vmax.f32 %v969_v7, 0.0  ;;  %v1411_v23 = vmax.f32 %v1225_v9, 0.0 }
 0x156   : > { %v1350_v20 = vmax.f32 %v980_v12, 0.0  ;;  %v1414_v21 = vmax.f32 %v1236_v13, 0.0 }
 0x157   : > { %v1348_v24 = vmax.f32 %v972_v16, 0.0  ;;  %v1412_v25 = vmax.f32 %v1228_v17, 0.0 }
 0x158   : > { %v2585_v26 = vpack.c.bf16 %v1350_v20, %v1349_v18  ;;  %v2745_v27 = vpack.c.bf16 %v1414_v21, %v1413_v19 }
 0x159   : > { %v2580_v28 = vpack.c.bf16 %v1348_v24, %v1347_v22  ;;  %v2740_v29 = vpack.c.bf16 %v1412_v25, %v1411_v23  ;;  %v2988_v30 = vpop.f32.mrb[48].mxu0  ;;  %v3052_v31 = vpop.f32.mrb[48].mxu1 }
 0x15a   : > { %2809 = vst [vmem:[%s3314_s13 + $0xb8] sm:$0xff] %v2585_v26   ;;  %2841 = vst [vmem:[%s3314_s13 + $0x1b8] sm:$0xff] %v2745_v27   ;;  %v993_v32 = vadd.f32 %v2988_v30, %v3299_v8  ;;  %v1249_v33 = vadd.f32 %v3052_v31, %v3299_v8  ;;  %v984_v34 = vpop.f32.mrb[49].mxu0  ;;  %v1240_v35 = vpop.f32.mrb[49].mxu1 }
 0x15b   : > { %2808 = vst [vmem:[%s3314_s13 + $0xb0] sm:$0xff] %v2580_v28   ;;  %2840 = vst [vmem:[%s3314_s13 + $0x1b0] sm:$0xff] %v2740_v29   ;;  %v985_v36 = vadd.f32 %v3299_v8, %v984_v34  ;;  %v1241_v37 = vadd.f32 %v3299_v8, %v1240_v35  ;;  %v2989_v38 = vpop.f32.mrb[50].mxu0  ;;  %v3053_v39 = vpop.f32.mrb[50].mxu1 }
 0x15c   : > { %v996_v40 = vadd.f32 %v2989_v38, %v3299_v8  ;;  %v1252_v41 = vadd.f32 %v3053_v39, %v3299_v8  ;;  %v987_v42 = vpop.f32.mrb[51].mxu0  ;;  %v1243_v43 = vpop.f32.mrb[51].mxu1  ;;  %v1353_v46 = vmax.f32 %v993_v32, 0.0  ;;  %v1417_v47 = vmax.f32 %v1249_v33, 0.0 }
 0x15d   : > { %v988_v44 = vadd.f32 %v3299_v8, %v987_v42  ;;  %v1244_v45 = vadd.f32 %v3299_v8, %v1243_v43  ;;  %v1351_v50 = vmax.f32 %v985_v36, 0.0  ;;  %v1415_v51 = vmax.f32 %v1241_v37, 0.0 }
 0x15e   : > { %v1354_v48 = vmax.f32 %v996_v40, 0.0  ;;  %v1418_v49 = vmax.f32 %v1252_v41, 0.0 }
 0x15f   : > { %v1352_v52 = vmax.f32 %v988_v44, 0.0  ;;  %v1416_v53 = vmax.f32 %v1244_v45, 0.0 }
 0x160   : > { %v2595_v54 = vpack.c.bf16 %v1354_v48, %v1353_v46  ;;  %v2755_v55 = vpack.c.bf16 %v1418_v49, %v1417_v47 }
 0x161   : > { %v2590_v56 = vpack.c.bf16 %v1352_v52, %v1351_v50  ;;  %v2750_v57 = vpack.c.bf16 %v1416_v53, %v1415_v51  ;;  %v2992_v58 = vpop.f32.mrb[52].mxu0  ;;  %v3056_v59 = vpop.f32.mrb[52].mxu1 }
 0x162   : > { %2811 = vst [vmem:[%s3314_s13 + $0xc8] sm:$0xff] %v2595_v54   ;;  %2843 = vst [vmem:[%s3314_s13 + $0x1c8] sm:$0xff] %v2755_v55   ;;  %v1009_v60 = vadd.f32 %v2992_v58, %v3299_v8  ;;  %v1265_v61 = vadd.f32 %v3056_v59, %v3299_v8  ;;  %v1000_v62 = vpop.f32.mrb[53].mxu0  ;;  %v1256_v63 = vpop.f32.mrb[53].mxu1 }
 0x163   : > { %2810 = vst [vmem:[%s3314_s13 + $0xc0] sm:$0xff] %v2590_v56   ;;  %2842 = vst [vmem:[%s3314_s13 + $0x1c0] sm:$0xff] %v2750_v57   ;;  %v1001_v0 = vadd.f32 %v3299_v8, %v1000_v62  ;;  %v1257_v1 = vadd.f32 %v3299_v8, %v1256_v63  ;;  %v2993_v2 = vpop.f32.mrb[54].mxu0  ;;  %v3057_v3 = vpop.f32.mrb[54].mxu1 }
 0x164   : > { %v1012_v4 = vadd.f32 %v2993_v2, %v3299_v8  ;;  %v1268_v5 = vadd.f32 %v3057_v3, %v3299_v8  ;;  %v1003_v6 = vpop.f32.mrb[55].mxu0  ;;  %v1259_v7 = vpop.f32.mrb[55].mxu1  ;;  %v1357_v11 = vmax.f32 %v1009_v60, 0.0  ;;  %v1421_v12 = vmax.f32 %v1265_v61, 0.0 }
 0x165   : > { %v1004_v9 = vadd.f32 %v3299_v8, %v1003_v6  ;;  %v1260_v10 = vadd.f32 %v3299_v8, %v1259_v7  ;;  %v1355_v15 = vmax.f32 %v1001_v0, 0.0  ;;  %v1419_v16 = vmax.f32 %v1257_v1, 0.0 }
 0x166   : > { %v1358_v13 = vmax.f32 %v1012_v4, 0.0  ;;  %v1422_v14 = vmax.f32 %v1268_v5, 0.0 }
 0x167   : > { %v1356_v17 = vmax.f32 %v1004_v9, 0.0  ;;  %v1420_v18 = vmax.f32 %v1260_v10, 0.0 }
 0x168   : > { %v2605_v19 = vpack.c.bf16 %v1358_v13, %v1357_v11  ;;  %v2765_v20 = vpack.c.bf16 %v1422_v14, %v1421_v12 }
 0x169   : > { %v2600_v21 = vpack.c.bf16 %v1356_v17, %v1355_v15  ;;  %v2760_v22 = vpack.c.bf16 %v1420_v18, %v1419_v16  ;;  %v2996_v23 = vpop.f32.mrb[56].mxu0  ;;  %v3060_v24 = vpop.f32.mrb[56].mxu1 }
 0x16a   : > { %2813 = vst [vmem:[%s3314_s13 + $0xd8] sm:$0xff] %v2605_v19   ;;  %2845 = vst [vmem:[%s3314_s13 + $0x1d8] sm:$0xff] %v2765_v20   ;;  %v1025_v25 = vadd.f32 %v2996_v23, %v3299_v8  ;;  %v1281_v26 = vadd.f32 %v3060_v24, %v3299_v8  ;;  %v1016_v27 = vpop.f32.mrb[57].mxu0  ;;  %v1272_v28 = vpop.f32.mrb[57].mxu1 }
 0x16b   : > { %2812 = vst [vmem:[%s3314_s13 + $0xd0] sm:$0xff] %v2600_v21   ;;  %2844 = vst [vmem:[%s3314_s13 + $0x1d0] sm:$0xff] %v2760_v22   ;;  %v1017_v29 = vadd.f32 %v3299_v8, %v1016_v27  ;;  %v1273_v30 = vadd.f32 %v3299_v8, %v1272_v28  ;;  %v2997_v31 = vpop.f32.mrb[58].mxu0  ;;  %v3061_v32 = vpop.f32.mrb[58].mxu1 }
 0x16c   : > { %v1028_v33 = vadd.f32 %v2997_v31, %v3299_v8  ;;  %v1284_v34 = vadd.f32 %v3061_v32, %v3299_v8  ;;  %v1019_v35 = vpop.f32.mrb[59].mxu0  ;;  %v1275_v36 = vpop.f32.mrb[59].mxu1  ;;  %v1361_v39 = vmax.f32 %v1025_v25, 0.0  ;;  %v1425_v40 = vmax.f32 %v1281_v26, 0.0 }
 0x16d   : > { %v1020_v37 = vadd.f32 %v3299_v8, %v1019_v35  ;;  %v1276_v38 = vadd.f32 %v3299_v8, %v1275_v36  ;;  %v1359_v43 = vmax.f32 %v1017_v29, 0.0  ;;  %v1423_v44 = vmax.f32 %v1273_v30, 0.0 }
 0x16e   : > { %v1362_v41 = vmax.f32 %v1028_v33, 0.0  ;;  %v1426_v42 = vmax.f32 %v1284_v34, 0.0 }
 0x16f   : > { %v1360_v45 = vmax.f32 %v1020_v37, 0.0  ;;  %v1424_v46 = vmax.f32 %v1276_v38, 0.0 }
 0x170   : > { %v2615_v47 = vpack.c.bf16 %v1362_v41, %v1361_v39  ;;  %v2775_v48 = vpack.c.bf16 %v1426_v42, %v1425_v40 }
 0x171   : > { %v2610_v49 = vpack.c.bf16 %v1360_v45, %v1359_v43  ;;  %v2770_v50 = vpack.c.bf16 %v1424_v46, %v1423_v44  ;;  %v3000_v51 = vpop.f32.mrb[60].mxu0  ;;  %v3064_v52 = vpop.f32.mrb[60].mxu1 }
 0x172   : > { %2815 = vst [vmem:[%s3314_s13 + $0xe8] sm:$0xff] %v2615_v47   ;;  %2847 = vst [vmem:[%s3314_s13 + $0x1e8] sm:$0xff] %v2775_v48   ;;  %v1041_v53 = vadd.f32 %v3000_v51, %v3299_v8  ;;  %v1297_v54 = vadd.f32 %v3064_v52, %v3299_v8  ;;  %v1032_v55 = vpop.f32.mrb[61].mxu0  ;;  %v1288_v56 = vpop.f32.mrb[61].mxu1 }
 0x173   : > { %2814 = vst [vmem:[%s3314_s13 + $0xe0] sm:$0xff] %v2610_v49   ;;  %2846 = vst [vmem:[%s3314_s13 + $0x1e0] sm:$0xff] %v2770_v50   ;;  %v1033_v57 = vadd.f32 %v3299_v8, %v1032_v55  ;;  %v1289_v58 = vadd.f32 %v3299_v8, %v1288_v56  ;;  %v3001_v59 = vpop.f32.mrb[62].mxu0  ;;  %v3065_v60 = vpop.f32.mrb[62].mxu1 }
 0x174   : > { %v1044_v61 = vadd.f32 %v3001_v59, %v3299_v8  ;;  %v1300_v62 = vadd.f32 %v3065_v60, %v3299_v8  ;;  %v1035_v63 = vpop.f32.mrb[63].mxu0  ;;  %v1291_v0 = vpop.f32.mrb[63].mxu1  ;;  %v1365_v3 = vmax.f32 %v1041_v53, 0.0  ;;  %v1429_v4 = vmax.f32 %v1297_v54, 0.0 }
 0x175   : > { %v1036_v1 = vadd.f32 %v3299_v8, %v1035_v63  ;;  %v1292_v2 = vadd.f32 %v3299_v8, %v1291_v0  ;;  %v1363_v7 = vmax.f32 %v1033_v57, 0.0  ;;  %v1427_v9 = vmax.f32 %v1289_v58, 0.0 }
 0x176   : > { %v1366_v5 = vmax.f32 %v1044_v61, 0.0  ;;  %v1430_v6 = vmax.f32 %v1300_v62, 0.0 }
 0x177   : > { %v1364_v10 = vmax.f32 %v1036_v1, 0.0  ;;  %v1428_v11 = vmax.f32 %v1292_v2, 0.0 }
 0x178   : > { %v2625_v12 = vpack.c.bf16 %v1366_v5, %v1365_v3  ;;  %v2785_v13 = vpack.c.bf16 %v1430_v6, %v1429_v4 }
 0x179   : > { %v2620_v14 = vpack.c.bf16 %v1364_v10, %v1363_v7  ;;  %v2780_v15 = vpack.c.bf16 %v1428_v11, %v1427_v9 }
 0x17a   : > { %2817 = vst [vmem:[%s3314_s13 + $0xf8] sm:$0xff] %v2625_v12   ;;  %2849 = vst [vmem:[%s3314_s13 + $0x1f8] sm:$0xff] %v2785_v13  }
 0x17b   : > { %2816 = vst [vmem:[%s3314_s13 + $0xf0] sm:$0xff] %v2620_v14   ;;  %2848 = vst [vmem:[%s3314_s13 + $0x1f0] sm:$0xff] %v2780_v15  }
 0x17c PF: > { %s13_s12 = sadd.s32 1, %s3168_s12  }
 0x17d   : > { %p10_p4 = scmp.ge.s32.totalorder %s13_s12, 4  }
 0x17f   :  { %12 = sbr.rel (!%p10_p4) target bundleno = 1 (0x1), region = 62 }

// kernel: forward.51
= control target key start
LH: loop header
LB: loop body
LE: loop exit
PB: predicated region body
PF: predicated region fallthrough
CT: control target
= control target key end

     0   :  { %s2376_s18 = smov 0   ;;  %s3035_s0 = inlined_call_operand.vmem [shape: bf16[2048,128], index: 0, kind: input, shape index: {}]   ;;  %s3036_s1 = inlined_call_operand.vmem [shape: bf16[128,128], index: 1, kind: input, shape index: {}]   ;;  %s3037_s2 = inlined_call_operand.vmem [shape: f32[1,128], index: 2, kind: input, shape index: {}]   ;;  %s3038_s3 = inlined_call_operand.vmem [shape: f32[1,128], index: 3, kind: input, shape index: {}]   ;;  %s3039_s4 = inlined_call_operand.vmem [shape: f32[1,128], index: 4, kind: input, shape index: {}]   ;;  %s3040_s5 = inlined_call_operand.vmem [shape: f32[2048,128], index: 5, kind: output, shape index: {}]  }
   0x1 LB: > { %s1747_s19 = sadd.s32 4294967295, %s2344_s18   ;;  %p1751_p0 = scmp.ge.s32.totalorder %s2344_s18, 1  ;;  %s2344_s18 = sphi %s2376_s18, %s15_s18  }
   0x2   : > { %p188_p1 = scmp.lt.s32.totalorder %s2344_s18, 3 }
   0x4   : > { %p189_p2 = pnand %p1751_p0, %p188_p1 }
   0x5   : > { %v2328_v0 = vld [vmem:[%s3036_s1] sm:$0xff] (!%p189_p2)   ;;  %s1752_s22 = sshll.u32 (!%p189_p2), %s1747_s19, 7  ;;  %v2329_v1 = vld [vmem:[%s3036_s1 + $0x8] sm:$0xff] (!%p189_p2)   ;;  %v2330_v2 = vld [vmem:[%s3036_s1 + $0x10] sm:$0xff] (!%p189_p2)  }
   0x6   : > { %192 = sbr.rel (%p189_p2) target bundleno = 384 (0x180), region = 40  ;;  %p217_p3 = scmp.lt.s32.totalorder (!%p189_p2), %s1752_s22, 255  ;;  %2160 = vmatprep.subr.bf16.mxu0 (!%p189_p2), %v2328_v0  ;;  %2304 = vmatprep.subr.bf16.mxu1 (!%p189_p2), %v2328_v0  ;;  %v2331_v3 = vld [vmem:[%s3036_s1 + $0x18] sm:$0xff] (!%p189_p2)   ;;  %v2408_v5 = vld [vmem:[%s3038_s3] ss:$0 sm:$0xff] (!%p189_p2)  ;;  %v2333_v39 = vld [vmem:[%s3036_s1 + $0x28] sm:$0xff] (!%p189_p2)  }
   0x7   : > { %2161 = vmatpush3.bf16.msra.mxu0 (!%p189_p2), %v2328_v0  ;;  %2312 = vmatpush3.bf16.msra.mxu1 (!%p189_p2), %v2328_v0  ;;  %v2416_v11 = vld [vmem:[%s3039_s4] ss:$0 sm:$0xff] (!%p189_p2)  ;;  %v2334_v58 = vld [vmem:[%s3036_s1 + $0x30] sm:$0xff] (!%p189_p2)  }
   0x8   : > { %2162 = vmatprep.subr.bf16.mxu0 (!%p189_p2), %v2329_v1  ;;  %2305 = vmatprep.subr.bf16.mxu1 (!%p189_p2), %v2329_v1  ;;  %v2332_v21 = vld [vmem:[%s3036_s1 + $0x20] sm:$0xff] (!%p189_p2)  }
   0xb   : > { %2163 = vmatpush3.bf16.msra.mxu0 (!%p189_p2), %v2329_v1  ;;  %2313 = vmatpush3.bf16.msra.mxu1 (!%p189_p2), %v2329_v1 }
   0xc   : > { %2164 = vmatprep.subr.bf16.mxu0 (!%p189_p2), %v2330_v2  ;;  %2306 = vmatprep.subr.bf16.mxu1 (!%p189_p2), %v2330_v2 }
   0xd   : > { %s3042_s22 = smov (!%p217_p3, %s1752_s22), 255 }
   0xe   : > { %s1753_s27 = sshll.u32 %s3042_s22, 2  ;;  %s1755_s26 = sshll.u32 %s3042_s22, 3 }
   0xf   : > { %s2399_s30 = scalar_lea.vmem %s3035_s0, %s1753_s27  ;;  %2165 = vmatpush3.bf16.msra.mxu0 %v2330_v2  ;;  %2314 = vmatpush3.bf16.msra.mxu1 %v2330_v2  ;;  %s2774_s6 = scalar_lea.vmem %s3040_s5, %s1755_s26 }
  0x10   : > { %v1770_v4 = vld [vmem:[%s2399_s30] sm:$0xff]   ;;  %v2025_v9 = vld [vmem:[%s2399_s30 + $0x8] sm:$0xff]   ;;  %v2026_v16 = vld [vmem:[%s2399_s30 + $0x10] sm:$0xff]   ;;  %2166 = vmatprep.subr.bf16.mxu0 %v2331_v3  ;;  %2307 = vmatprep.subr.bf16.mxu1 %v2331_v3 }
  0x11   : > { %v1771_v6 = vunpack.c.l.bf16 %v1770_v4  ;;  %v1772_v7 = vunpack.c.h.bf16 %v1770_v4  ;;  %v2056_v8 = vld [vmem:[%s2399_s30 + $0x100] sm:$0xff]   ;;  %v2057_v10 = vld [vmem:[%s2399_s30 + $0x108] sm:$0xff]   ;;  %v1775_v14 = vunpack.c.l.bf16 %v2025_v9  ;;  %v1776_v15 = vunpack.c.h.bf16 %v2025_v9  ;;  %v2058_v38 = vld [vmem:[%s2399_s30 + $0x110] sm:$0xff]  }
  0x12   : > { %v1899_v12 = vunpack.c.l.bf16 %v2056_v8  ;;  %v1900_v13 = vunpack.c.h.bf16 %v2056_v8  ;;  %v1903_v19 = vunpack.c.l.bf16 %v2057_v10  ;;  %v1904_v20 = vunpack.c.h.bf16 %v2057_v10  ;;  %v2027_v44 = vld [vmem:[%s2399_s30 + $0x18] sm:$0xff]  }
  0x13   : > { %v492_v17 = vmul.f32 %v1771_v6, %v2408_v5  ;;  %v493_v18 = vmul.f32 %v1772_v7, %v2408_v5  ;;  %v494_v24 = vmul.f32 %v1775_v14, %v2408_v5  ;;  %v1779_v25 = vunpack.c.l.bf16 %v2026_v16  ;;  %2167 = vmatpush3.bf16.msra.mxu0 %v2331_v3  ;;  %2315 = vmatpush3.bf16.msra.mxu1 %v2331_v3  ;;  %v2059_v53 = vld [vmem:[%s2399_s30 + $0x118] sm:$0xff]   ;;  %v2028_v3 = vld [vmem:[%s2399_s30 + $0x20] sm:$0xff]  }
  0x14   : > { %v556_v22 = vmul.f32 %v1899_v12, %v2408_v5  ;;  %v557_v23 = vmul.f32 %v1900_v13, %v2408_v5  ;;  %v495_v28 = vmul.f32 %v1776_v15, %v2408_v5  ;;  %v558_v29 = vmul.f32 %v1903_v19, %v2408_v5  ;;  %2168 = vmatprep.subr.bf16.mxu0 %v2332_v21  ;;  %v2335_v14 = vld [vmem:[%s3036_s1 + $0x38] sm:$0xff]   ;;  %v2060_v19 = vld [vmem:[%s2399_s30 + $0x120] sm:$0xff]  }
  0x15   : > { %v627_v26 = vadd.f32 %v2416_v11, %v492_v17  ;;  %v628_v27 = vadd.f32 %v2416_v11, %v493_v18  ;;  %v629_v32 = vadd.f32 %v2416_v11, %v494_v24  ;;  %v559_v33 = vmul.f32 %v1904_v20, %v2408_v5  ;;  %2308 = vmatprep.subr.bf16.mxu1 %v2332_v21 }
  0x16   : > { %v691_v30 = vadd.f32 %v2416_v11, %v556_v22  ;;  %v692_v31 = vadd.f32 %v2416_v11, %v557_v23  ;;  %v630_v36 = vadd.f32 %v2416_v11, %v495_v28  ;;  %v693_v37 = vadd.f32 %v2416_v11, %v558_v29  ;;  %v2029_v28 = vld [vmem:[%s2399_s30 + $0x28] sm:$0xff]  }
  0x17   : > { %v755_v34 = vmax.f32 %v627_v26, 0.0  ;;  %v756_v35 = vmax.f32 %v628_v27, 0.0  ;;  %v757_v42 = vmax.f32 %v629_v32, 0.0  ;;  %v694_v43 = vadd.f32 %v2416_v11, %v559_v33  ;;  %2169 = vmatpush3.bf16.msra.mxu0 %v2332_v21  ;;  %2316 = vmatpush3.bf16.msra.mxu1 %v2332_v21  ;;  %v2061_v33 = vld [vmem:[%s2399_s30 + $0x128] sm:$0xff]  }
  0x18   : > { %v819_v40 = vmax.f32 %v691_v30, 0.0  ;;  %v820_v41 = vmax.f32 %v692_v31, 0.0  ;;  %v758_v46 = vmax.f32 %v630_v36, 0.0  ;;  %v821_v47 = vmax.f32 %v693_v37, 0.0  ;;  %2170 = vmatprep.subr.bf16.mxu0 %v2333_v39  ;;  %2309 = vmatprep.subr.bf16.mxu1 %v2333_v39 }
  0x19   : > { %v883_v45 = vpack.c.bf16 %v756_v35, %v755_v34  ;;  %v1780_v48 = vunpack.c.h.bf16 %v2026_v16  ;;  %v822_v50 = vmax.f32 %v694_v43, 0.0  ;;  %v496_v51 = vmul.f32 %v1779_v25, %v2408_v5 }
  0x1a   : > { %v915_v49 = vpack.c.bf16 %v820_v41, %v819_v40  ;;  %v1907_v52 = vunpack.c.l.bf16 %v2058_v38  ;;  %v2445_v54 = vpack.c.bf16 %v758_v46, %v757_v42  ;;  %v1908_v56 = vunpack.c.h.bf16 %v2058_v38  ;;  %v2030_v42 = vld [vmem:[%s2399_s30 + $0x30] sm:$0xff]  }
  0x1b   : > { %v497_v55 = vmul.f32 %v1780_v48, %v2408_v5  ;;  %v1783_v57 = vunpack.c.l.bf16 %v2027_v44  ;;  %v2451_v59 = vpack.c.bf16 %v822_v50, %v821_v47  ;;  %v631_v60 = vadd.f32 %v2416_v11, %v496_v51  ;;  %2176 = vmatprep.mubr.bf16.mxu0 %v883_v45  ;;  %2171 = vmatpush3.bf16.msra.mxu0 %v2333_v39 }
  0x1c   : > { %v560_v61 = vmul.f32 %v1907_v52, %v2408_v5  ;;  %v1784_v62 = vunpack.c.h.bf16 %v2027_v44  ;;  %2240 = vmatprep.mubr.bf16.mxu1 %v915_v49  ;;  %v561_v0 = vmul.f32 %v1908_v56, %v2408_v5  ;;  %v1911_v2 = vunpack.c.l.bf16 %v2059_v53  ;;  %2317 = vmatpush3.bf16.msra.mxu1 %v2333_v39 }
  0x1d   : > { %v632_v63 = vadd.f32 %v2416_v11, %v497_v55  ;;  %v498_v1 = vmul.f32 %v1783_v57, %v2408_v5  ;;  %v759_v4 = vmax.f32 %v631_v60, 0.0  ;;  %v1912_v8 = vunpack.c.h.bf16 %v2059_v53  ;;  %2172 = vmatprep.subr.bf16.mxu0 %v2334_v58  ;;  %2310 = vmatprep.subr.bf16.mxu1 %v2334_v58 }
  0x1e   : > { %v695_v6 = vadd.f32 %v2416_v11, %v560_v61  ;;  %v499_v7 = vmul.f32 %v1784_v62, %v2408_v5  ;;  %v696_v10 = vadd.f32 %v2416_v11, %v561_v0  ;;  %v562_v13 = vmul.f32 %v1911_v2, %v2408_v5  ;;  %v2062_v61 = vld [vmem:[%s2399_s30 + $0x130] sm:$0xff]   ;;  %v2031_v2 = vld [vmem:[%s2399_s30 + $0x38] sm:$0xff]  }
  0x1f   : > { %v760_v9 = vmax.f32 %v632_v63, 0.0  ;;  %v633_v12 = vadd.f32 %v2416_v11, %v498_v1  ;;  %v563_v17 = vmul.f32 %v1912_v8, %v2408_v5  ;;  %v1787_v18 = vunpack.c.l.bf16 %v2028_v3  ;;  %2173 = vmatpush3.bf16.msra.mxu0 %v2334_v58 }
  0x20   : > { %v823_v15 = vmax.f32 %v695_v6, 0.0  ;;  %v634_v16 = vadd.f32 %v2416_v11, %v499_v7  ;;  %v824_v21 = vmax.f32 %v696_v10, 0.0  ;;  %v697_v23 = vadd.f32 %v2416_v11, %v562_v13  ;;  %2318 = vmatpush3.bf16.msra.mxu1 %v2334_v58  ;;  %2174 = vmatprep.subr.bf16.mxu0 %v2335_v14 }
  0x21   : > { %v885_v20 = vpack.c.bf16 %v760_v9, %v759_v4  ;;  %v761_v22 = vmax.f32 %v633_v12, 0.0  ;;  %v698_v25 = vadd.f32 %v2416_v11, %v563_v17  ;;  %v1788_v26 = vunpack.c.h.bf16 %v2028_v3  ;;  %2311 = vmatprep.subr.bf16.mxu1 %v2335_v14 }
  0x22   : > { %v762_v24 = vmax.f32 %v634_v16, 0.0  ;;  %v500_v27 = vmul.f32 %v1787_v18, %v2408_v5  ;;  %v917_v29 = vpack.c.bf16 %v824_v21, %v823_v15  ;;  %v825_v30 = vmax.f32 %v697_v23, 0.0  ;;  %v2063_v15 = vld [vmem:[%s2399_s30 + $0x138] sm:$0xff]  }
  0x23   : > { %v1915_v31 = vunpack.c.l.bf16 %v2060_v19  ;;  %v1916_v32 = vunpack.c.h.bf16 %v2060_v19  ;;  %v826_v35 = vmax.f32 %v698_v25, 0.0  ;;  %v501_v36 = vmul.f32 %v1788_v26, %v2408_v5  ;;  %2175 = vmatpush3.bf16.msra.mxu0 %v2335_v14 }
  0x24   : > { %v2475_v34 = vpack.c.bf16 %v762_v24, %v761_v22  ;;  %v635_v37 = vadd.f32 %v2416_v11, %v500_v27  ;;  %v1791_v40 = vunpack.c.l.bf16 %v2029_v28  ;;  %v1792_v41 = vunpack.c.h.bf16 %v2029_v28  ;;  %2319 = vmatpush3.bf16.msra.mxu1 %v2335_v14 }
  0x25   : > { %v564_v38 = vmul.f32 %v1915_v31, %v2408_v5  ;;  %v565_v39 = vmul.f32 %v1916_v32, %v2408_v5  ;;  %v918_v43 = vpack.c.bf16 %v826_v35, %v825_v30  ;;  %v636_v44 = vadd.f32 %v2416_v11, %v501_v36 }
  0x26   : > { %v763_v45 = vmax.f32 %v635_v37, 0.0  ;;  %v1919_v46 = vunpack.c.l.bf16 %v2061_v33  ;;  %v502_v49 = vmul.f32 %v1791_v40, %v2408_v5  ;;  %v1920_v50 = vunpack.c.h.bf16 %v2061_v33  ;;  %2177 = vmatmul.mubr.bf16.vlgmr.msra.gmra.mrb[0].mxu0 %v2445_v54  ;;  %v2064_v33 = vld [vmem:[%s2399_s30 + $0x140] sm:$0xff]  }
  0x27   : > { %v699_v47 = vadd.f32 %v2416_v11, %v564_v38  ;;  %v700_v48 = vadd.f32 %v2416_v11, %v565_v39  ;;  %v764_v51 = vmax.f32 %v636_v44, 0.0  ;;  %v503_v52 = vmul.f32 %v1792_v41, %v2408_v5  ;;  %2241 = vmatmul.mubr.bf16.vlgmr.msra.gmra.mrb[0].mxu1 %v2451_v59  ;;  %2180 = vmatprep.mubr.bf16.mxu0 %v885_v20  ;;  %v2032_v20 = vld [vmem:[%s2399_s30 + $0x40] sm:$0xff]  }
  0x28   : > { %v566_v53 = vmul.f32 %v1919_v46, %v2408_v5  ;;  %v1795_v55 = vunpack.c.l.bf16 %v2030_v42  ;;  %v637_v58 = vadd.f32 %v2416_v11, %v502_v49  ;;  %v567_v60 = vmul.f32 %v1920_v50, %v2408_v5  ;;  %2244 = vmatprep.mubr.bf16.mxu1 %v917_v29  ;;  %v2033_v46 = vld [vmem:[%s2399_s30 + $0x48] sm:$0xff]  }
  0x29   : > { %v827_v56 = vmax.f32 %v699_v47, 0.0  ;;  %v828_v57 = vmax.f32 %v700_v48, 0.0  ;;  %v887_v62 = vpack.c.bf16 %v764_v51, %v763_v45  ;;  %v638_v63 = vadd.f32 %v2416_v11, %v503_v52  ;;  %v2065_v51 = vld [vmem:[%s2399_s30 + $0x148] sm:$0xff]  }
  0x2a   : > { %v701_v0 = vadd.f32 %v2416_v11, %v566_v53  ;;  %v1796_v1 = vunpack.c.h.bf16 %v2030_v42  ;;  %v765_v4 = vmax.f32 %v637_v58, 0.0  ;;  %v702_v6 = vadd.f32 %v2416_v11, %v567_v60 }
  0x2b   : > { %v919_v3 = vpack.c.bf16 %v828_v57, %v827_v56  ;;  %v504_v7 = vmul.f32 %v1795_v55, %v2408_v5  ;;  %v766_v54 = vmax.f32 %v638_v63, 0.0  ;;  %v1923_v9 = vunpack.c.l.bf16 %v2062_v61 }
  0x2c   : > { %v829_v8 = vmax.f32 %v701_v0, 0.0  ;;  %v505_v59 = vmul.f32 %v1796_v1, %v2408_v5  ;;  %v830_v10 = vmax.f32 %v702_v6, 0.0  ;;  %v1924_v13 = vunpack.c.h.bf16 %v2062_v61 }
  0x2d   : > { %v639_v12 = vadd.f32 %v2416_v11, %v504_v7  ;;  %v1799_v14 = vunpack.c.l.bf16 %v2031_v2  ;;  %v888_v16 = vpack.c.bf16 %v766_v54, %v765_v4  ;;  %v568_v18 = vmul.f32 %v1923_v9, %v2408_v5 }
  0x2e   : > { %v640_v17 = vadd.f32 %v2416_v11, %v505_v59  ;;  %v1800_v19 = vunpack.c.h.bf16 %v2031_v2  ;;  %v920_v21 = vpack.c.bf16 %v830_v10, %v829_v8  ;;  %v569_v23 = vmul.f32 %v1924_v13, %v2408_v5  ;;  %2181 = vmatmul.mubr.bf16.gmra.mrb[4].mxu0 %v2475_v34  ;;  %v2034_v2 = vld [vmem:[%s2399_s30 + $0x50] sm:$0xff]  }
  0x2f   : > { %v767_v22 = vmax.f32 %v639_v12, 0.0  ;;  %v506_v24 = vmul.f32 %v1799_v14, %v2408_v5  ;;  %v703_v26 = vadd.f32 %v2416_v11, %v568_v18  ;;  %v1927_v28 = vunpack.c.l.bf16 %v2063_v15  ;;  %2245 = vmatmul.mubr.bf16.gmra.mrb[4].mxu1 %v918_v43  ;;  %2184 = vmatprep.mubr.bf16.mxu0 %v887_v62  ;;  %v2066_v10 = vld [vmem:[%s2399_s30 + $0x150] sm:$0xff]  }
  0x30   : > { %v768_v25 = vmax.f32 %v640_v17, 0.0  ;;  %v507_v27 = vmul.f32 %v1800_v19, %v2408_v5  ;;  %v704_v29 = vadd.f32 %v2416_v11, %v569_v23  ;;  %v1928_v31 = vunpack.c.h.bf16 %v2063_v15  ;;  %2248 = vmatprep.mubr.bf16.mxu1 %v919_v3 }
  0x31   : > { %v641_v30 = vadd.f32 %v2416_v11, %v506_v24  ;;  %v1803_v32 = vunpack.c.l.bf16 %v2032_v20  ;;  %v831_v36 = vmax.f32 %v703_v26, 0.0  ;;  %v570_v38 = vmul.f32 %v1927_v28, %v2408_v5 }
  0x32   : > { %v889_v35 = vpack.c.bf16 %v768_v25, %v767_v22  ;;  %v642_v37 = vadd.f32 %v2416_v11, %v507_v27  ;;  %v832_v39 = vmax.f32 %v704_v29, 0.0  ;;  %v571_v41 = vmul.f32 %v1928_v31, %v2408_v5 }
  0x33   : > { %v769_v40 = vmax.f32 %v641_v30, 0.0  ;;  %v1804_v42 = vunpack.c.h.bf16 %v2032_v20  ;;  %v705_v45 = vadd.f32 %v2416_v11, %v570_v38  ;;  %v508_v34 = vmul.f32 %v1803_v32, %v2408_v5  ;;  %v2035_v20 = vld [vmem:[%s2399_s30 + $0x58] sm:$0xff]  }
  0x34   : > { %v770_v44 = vmax.f32 %v642_v37, 0.0  ;;  %v1931_v43 = vunpack.c.l.bf16 %v2064_v33  ;;  %v921_v47 = vpack.c.bf16 %v832_v39, %v831_v36  ;;  %v706_v48 = vadd.f32 %v2416_v11, %v571_v41 }
  0x35   : > { %v509_v49 = vmul.f32 %v1804_v42, %v2408_v5  ;;  %v1932_v50 = vunpack.c.h.bf16 %v2064_v33  ;;  %v833_v53 = vmax.f32 %v705_v45, 0.0  ;;  %v643_v55 = vadd.f32 %v2416_v11, %v508_v34  ;;  %v2067_v33 = vld [vmem:[%s2399_s30 + $0x158] sm:$0xff]  }
  0x36   : > { %v890_v52 = vpack.c.bf16 %v770_v44, %v769_v40  ;;  %v572_v56 = vmul.f32 %v1931_v43, %v2408_v5  ;;  %v834_v57 = vmax.f32 %v706_v48, 0.0  ;;  %v1807_v61 = vunpack.c.l.bf16 %v2033_v46  ;;  %2185 = vmatmul.mubr.bf16.gmra.mrb[8].mxu0 %v888_v16  ;;  %v2036_v44 = vld [vmem:[%s2399_s30 + $0x60] sm:$0xff]  }
  0x37   : > { %v644_v58 = vadd.f32 %v2416_v11, %v509_v49  ;;  %v573_v60 = vmul.f32 %v1932_v50, %v2408_v5  ;;  %v771_v62 = vmax.f32 %v643_v55, 0.0  ;;  %v1808_v0 = vunpack.c.h.bf16 %v2033_v46  ;;  %2249 = vmatmul.mubr.bf16.gmra.mrb[8].mxu1 %v920_v21  ;;  %2188 = vmatprep.mubr.bf16.mxu0 %v889_v35 }
  0x38   : > { %v707_v63 = vadd.f32 %v2416_v11, %v572_v56  ;;  %v1935_v1 = vunpack.c.l.bf16 %v2065_v51  ;;  %v922_v3 = vpack.c.bf16 %v834_v57, %v833_v53  ;;  %v510_v7 = vmul.f32 %v1807_v61, %v2408_v5  ;;  %2252 = vmatprep.mubr.bf16.mxu1 %v921_v47 }
  0x39   : > { %v772_v4 = vmax.f32 %v644_v58, 0.0  ;;  %v708_v6 = vadd.f32 %v2416_v11, %v573_v60  ;;  %v511_v8 = vmul.f32 %v1808_v0, %v2408_v5  ;;  %v1936_v59 = vunpack.c.h.bf16 %v2065_v51  ;;  %v2068_v51 = vld [vmem:[%s2399_s30 + $0x160] sm:$0xff]  }
  0x3a   : > { %v835_v54 = vmax.f32 %v707_v63, 0.0  ;;  %v574_v9 = vmul.f32 %v1935_v1, %v2408_v5  ;;  %v645_v14 = vadd.f32 %v2416_v11, %v510_v7  ;;  %v1811_v15 = vunpack.c.l.bf16 %v2034_v2 }
  0x3b   : > { %v891_v12 = vpack.c.bf16 %v772_v4, %v771_v62  ;;  %v836_v13 = vmax.f32 %v708_v6, 0.0  ;;  %v646_v17 = vadd.f32 %v2416_v11, %v511_v8  ;;  %v575_v16 = vmul.f32 %v1936_v59, %v2408_v5 }
  0x3c   : > { %v709_v18 = vadd.f32 %v2416_v11, %v574_v9  ;;  %v1812_v19 = vunpack.c.h.bf16 %v2034_v2  ;;  %v773_v22 = vmax.f32 %v645_v14, 0.0  ;;  %v512_v23 = vmul.f32 %v1811_v15, %v2408_v5  ;;  %v2037_v2 = vld [vmem:[%s2399_s30 + $0x68] sm:$0xff]  }
  0x3d   : > { %v923_v21 = vpack.c.bf16 %v836_v13, %v835_v54  ;;  %v1939_v24 = vunpack.c.l.bf16 %v2066_v10  ;;  %v774_v25 = vmax.f32 %v646_v17, 0.0  ;;  %v710_v26 = vadd.f32 %v2416_v11, %v575_v16  ;;  %v2069_v54 = vld [vmem:[%s2399_s30 + $0x168] sm:$0xff]  }
  0x3e   : > { %v837_v27 = vmax.f32 %v709_v18, 0.0  ;;  %v513_v28 = vmul.f32 %v1812_v19, %v2408_v5  ;;  %v647_v29 = vadd.f32 %v2416_v11, %v512_v23  ;;  %v1940_v30 = vunpack.c.h.bf16 %v2066_v10  ;;  %2189 = vmatmul.mubr.bf16.gmra.mrb[12].mxu0 %v890_v52 }
  0x3f   : > { %v576_v31 = vmul.f32 %v1939_v24, %v2408_v5  ;;  %v1815_v32 = vunpack.c.l.bf16 %v2035_v20  ;;  %v892_v35 = vpack.c.bf16 %v774_v25, %v773_v22  ;;  %v838_v36 = vmax.f32 %v710_v26, 0.0  ;;  %2253 = vmatmul.mubr.bf16.gmra.mrb[12].mxu1 %v922_v3  ;;  %2192 = vmatprep.mubr.bf16.mxu0 %v891_v12 }
  0x40   : > { %v648_v37 = vadd.f32 %v2416_v11, %v513_v28  ;;  %v1816_v38 = vunpack.c.h.bf16 %v2035_v20  ;;  %v775_v39 = vmax.f32 %v647_v29, 0.0  ;;  %v577_v40 = vmul.f32 %v1940_v30, %v2408_v5  ;;  %2256 = vmatprep.mubr.bf16.mxu1 %v923_v21  ;;  %v2038_v20 = vld [vmem:[%s2399_s30 + $0x70] sm:$0xff]  }
  0x41   : > { %v711_v41 = vadd.f32 %v2416_v11, %v576_v31  ;;  %v514_v42 = vmul.f32 %v1815_v32, %v2408_v5  ;;  %v924_v45 = vpack.c.bf16 %v838_v36, %v837_v27  ;;  %v1943_v46 = vunpack.c.l.bf16 %v2067_v33  ;;  %v2070_v29 = vld [vmem:[%s2399_s30 + $0x170] sm:$0xff]  }
  0x42   : > { %v776_v34 = vmax.f32 %v648_v37, 0.0  ;;  %v515_v43 = vmul.f32 %v1816_v38, %v2408_v5  ;;  %v712_v47 = vadd.f32 %v2416_v11, %v577_v40  ;;  %v1944_v50 = vunpack.c.h.bf16 %v2067_v33 }
  0x43   : > { %v839_v48 = vmax.f32 %v711_v41, 0.0  ;;  %v649_v49 = vadd.f32 %v2416_v11, %v514_v42  ;;  %v578_v52 = vmul.f32 %v1943_v46, %v2408_v5  ;;  %v1819_v56 = vunpack.c.l.bf16 %v2036_v44 }
  0x44   : > { %v893_v53 = vpack.c.bf16 %v776_v34, %v775_v39  ;;  %v650_v55 = vadd.f32 %v2416_v11, %v515_v43  ;;  %v840_v57 = vmax.f32 %v712_v47, 0.0  ;;  %v579_v60 = vmul.f32 %v1944_v50, %v2408_v5  ;;  %v2039_v39 = vld [vmem:[%s2399_s30 + $0x78] sm:$0xff]  }
  0x45   : > { %v777_v58 = vmax.f32 %v649_v49, 0.0  ;;  %v1820_v61 = vunpack.c.h.bf16 %v2036_v44  ;;  %v713_v63 = vadd.f32 %v2416_v11, %v578_v52  ;;  %v516_v0 = vmul.f32 %v1819_v56, %v2408_v5 }
  0x46   : > { %v778_v62 = vmax.f32 %v650_v55, 0.0  ;;  %v1947_v1 = vunpack.c.l.bf16 %v2068_v51  ;;  %v925_v3 = vpack.c.bf16 %v840_v57, %v839_v48  ;;  %v714_v4 = vadd.f32 %v2416_v11, %v579_v60  ;;  %2193 = vmatmul.mubr.bf16.gmra.mrb[16].mxu0 %v892_v35 }
  0x47   : > { %v517_v6 = vmul.f32 %v1820_v61, %v2408_v5  ;;  %v1948_v7 = vunpack.c.h.bf16 %v2068_v51  ;;  %v841_v59 = vmax.f32 %v713_v63, 0.0  ;;  %v651_v9 = vadd.f32 %v2416_v11, %v516_v0  ;;  %2257 = vmatmul.mubr.bf16.gmra.mrb[16].mxu1 %v924_v45  ;;  %2196 = vmatprep.mubr.bf16.mxu0 %v893_v53  ;;  %v2071_v51 = vld [vmem:[%s2399_s30 + $0x178] sm:$0xff]  }
  0x48   : > { %v894_v8 = vpack.c.bf16 %v778_v62, %v777_v58  ;;  %v580_v10 = vmul.f32 %v1947_v1, %v2408_v5  ;;  %v842_v12 = vmax.f32 %v714_v4, 0.0  ;;  %v1823_v15 = vunpack.c.l.bf16 %v2037_v2  ;;  %2260 = vmatprep.mubr.bf16.mxu1 %v925_v3  ;;  %v2040_v62 = vld [vmem:[%s2399_s30 + $0x80] sm:$0xff]  }
  0x49   : > { %v652_v13 = vadd.f32 %v2416_v11, %v517_v6  ;;  %v581_v14 = vmul.f32 %v1948_v7, %v2408_v5  ;;  %v779_v17 = vmax.f32 %v651_v9, 0.0  ;;  %v1824_v18 = vunpack.c.h.bf16 %v2037_v2 }
  0x4a   : > { %v715_v16 = vadd.f32 %v2416_v11, %v580_v10  ;;  %v1951_v19 = vunpack.c.l.bf16 %v2069_v54  ;;  %v926_v21 = vpack.c.bf16 %v842_v12, %v841_v59  ;;  %v518_v24 = vmul.f32 %v1823_v15, %v2408_v5 }
  0x4b   : > { %v780_v22 = vmax.f32 %v652_v13, 0.0  ;;  %v716_v23 = vadd.f32 %v2416_v11, %v581_v14  ;;  %v519_v26 = vmul.f32 %v1824_v18, %v2408_v5  ;;  %v1952_v27 = vunpack.c.h.bf16 %v2069_v54  ;;  %v2072_v54 = vld [vmem:[%s2399_s30 + $0x180] sm:$0xff]  }
  0x4c   : > { %v843_v25 = vmax.f32 %v715_v16, 0.0  ;;  %v582_v28 = vmul.f32 %v1951_v19, %v2408_v5  ;;  %v653_v32 = vadd.f32 %v2416_v11, %v518_v24  ;;  %v1827_v33 = vunpack.c.l.bf16 %v2038_v20 }
  0x4d   : > { %v895_v30 = vpack.c.bf16 %v780_v22, %v779_v17  ;;  %v844_v31 = vmax.f32 %v716_v23, 0.0  ;;  %v654_v35 = vadd.f32 %v2416_v11, %v519_v26  ;;  %v583_v36 = vmul.f32 %v1952_v27, %v2408_v5 }
  0x4e   : > { %v717_v37 = vadd.f32 %v2416_v11, %v582_v28  ;;  %v1828_v38 = vunpack.c.h.bf16 %v2038_v20  ;;  %v781_v41 = vmax.f32 %v653_v32, 0.0  ;;  %v520_v42 = vmul.f32 %v1827_v33, %v2408_v5  ;;  %2197 = vmatmul.mubr.bf16.gmra.mrb[20].mxu0 %v894_v8  ;;  %v2041_v20 = vld [vmem:[%s2399_s30 + $0x88] sm:$0xff]  }
  0x4f   : > { %v927_v40 = vpack.c.bf16 %v844_v31, %v843_v25  ;;  %v1955_v44 = vunpack.c.l.bf16 %v2070_v29  ;;  %v782_v45 = vmax.f32 %v654_v35, 0.0  ;;  %v718_v34 = vadd.f32 %v2416_v11, %v583_v36  ;;  %2261 = vmatmul.mubr.bf16.gmra.mrb[20].mxu1 %v926_v21  ;;  %2200 = vmatprep.mubr.bf16.mxu0 %v895_v30  ;;  %v2073_v25 = vld [vmem:[%s2399_s30 + $0x188] sm:$0xff]  }
  0x50   : > { %v845_v43 = vmax.f32 %v717_v37, 0.0  ;;  %v521_v46 = vmul.f32 %v1828_v38, %v2408_v5  ;;  %v655_v47 = vadd.f32 %v2416_v11, %v520_v42  ;;  %v1956_v48 = vunpack.c.h.bf16 %v2070_v29 }
  0x51   : > { %v584_v49 = vmul.f32 %v1955_v44, %v2408_v5  ;;  %v1831_v50 = vunpack.c.l.bf16 %v2039_v39  ;;  %v896_v53 = vpack.c.bf16 %v782_v45, %v781_v41  ;;  %v846_v55 = vmax.f32 %v718_v34, 0.0  ;;  %2264 = vmatprep.mubr.bf16.mxu1 %v927_v40 }
  0x52   : > { %v656_v52 = vadd.f32 %v2416_v11, %v521_v46  ;;  %v1832_v56 = vunpack.c.h.bf16 %v2039_v39  ;;  %v783_v57 = vmax.f32 %v655_v47, 0.0  ;;  %v585_v58 = vmul.f32 %v1956_v48, %v2408_v5  ;;  %v2042_v39 = vld [vmem:[%s2399_s30 + $0x90] sm:$0xff]  }
  0x53   : > { %v719_v60 = vadd.f32 %v2416_v11, %v584_v49  ;;  %v522_v61 = vmul.f32 %v1831_v50, %v2408_v5  ;;  %v928_v63 = vpack.c.bf16 %v846_v55, %v845_v43  ;;  %v1959_v2 = vunpack.c.l.bf16 %v2071_v51  ;;  %v2074_v47 = vld [vmem:[%s2399_s30 + $0x190] sm:$0xff]  }
  0x54   : > { %v784_v0 = vmax.f32 %v656_v52, 0.0  ;;  %v523_v1 = vmul.f32 %v1832_v56, %v2408_v5  ;;  %v720_v3 = vadd.f32 %v2416_v11, %v585_v58  ;;  %v1960_v7 = vunpack.c.h.bf16 %v2071_v51 }
  0x55   : > { %v847_v4 = vmax.f32 %v719_v60, 0.0  ;;  %v657_v6 = vadd.f32 %v2416_v11, %v522_v61  ;;  %v586_v9 = vmul.f32 %v1959_v2, %v2408_v5  ;;  %v1835_v10 = vunpack.c.l.bf16 %v2040_v62 }
  0x56   : > { %v897_v8 = vpack.c.bf16 %v784_v0, %v783_v57  ;;  %v658_v59 = vadd.f32 %v2416_v11, %v523_v1  ;;  %v848_v12 = vmax.f32 %v720_v3, 0.0  ;;  %v587_v14 = vmul.f32 %v1960_v7, %v2408_v5  ;;  %2201 = vmatmul.mubr.bf16.gmra.mrb[24].mxu0 %v896_v53  ;;  %v2043_v57 = vld [vmem:[%s2399_s30 + $0x98] sm:$0xff]  }
  0x57   : > { %v785_v13 = vmax.f32 %v657_v6, 0.0  ;;  %v1836_v15 = vunpack.c.h.bf16 %v2040_v62  ;;  %v721_v16 = vadd.f32 %v2416_v11, %v586_v9  ;;  %v524_v18 = vmul.f32 %v1835_v10, %v2408_v5  ;;  %2265 = vmatmul.mubr.bf16.gmra.mrb[24].mxu1 %v928_v63 }
  0x58   : > { %v786_v17 = vmax.f32 %v658_v59, 0.0  ;;  %v1963_v19 = vunpack.c.l.bf16 %v2072_v54  ;;  %v929_v21 = vpack.c.bf16 %v848_v12, %v847_v4  ;;  %v722_v22 = vadd.f32 %v2416_v11, %v587_v14  ;;  %2204 = vmatprep.mubr.bf16.mxu0 %v897_v8 }
  0x59   : > { %v525_v23 = vmul.f32 %v1836_v15, %v2408_v5  ;;  %v1964_v24 = vunpack.c.h.bf16 %v2072_v54  ;;  %v849_v27 = vmax.f32 %v721_v16, 0.0  ;;  %v659_v28 = vadd.f32 %v2416_v11, %v524_v18  ;;  %v2075_v54 = vld [vmem:[%s2399_s30 + $0x198] sm:$0xff]  }
  0x5a   : > { %v898_v26 = vpack.c.bf16 %v786_v17, %v785_v13  ;;  %v588_v29 = vmul.f32 %v1963_v19, %v2408_v5  ;;  %2268 = vmatprep.mubr.bf16.mxu1 %v929_v21  ;;  %v850_v30 = vmax.f32 %v722_v22, 0.0  ;;  %v1839_v33 = vunpack.c.l.bf16 %v2041_v20  ;;  %v2044_v17 = vld [vmem:[%s2399_s30 + $0xa0] sm:$0xff]  }
  0x5b   : > { %v660_v31 = vadd.f32 %v2416_v11, %v525_v23  ;;  %v589_v32 = vmul.f32 %v1964_v24, %v2408_v5  ;;  %v787_v35 = vmax.f32 %v659_v28, 0.0  ;;  %v1840_v37 = vunpack.c.h.bf16 %v2041_v20 }
  0x5c   : > { %v723_v36 = vadd.f32 %v2416_v11, %v588_v29  ;;  %v1967_v38 = vunpack.c.l.bf16 %v2073_v25  ;;  %v930_v40 = vpack.c.bf16 %v850_v30, %v849_v27  ;;  %v526_v44 = vmul.f32 %v1839_v33, %v2408_v5 }
  0x5d   : > { %v788_v41 = vmax.f32 %v660_v31, 0.0  ;;  %v724_v42 = vadd.f32 %v2416_v11, %v589_v32  ;;  %v527_v34 = vmul.f32 %v1840_v37, %v2408_v5  ;;  %v1968_v43 = vunpack.c.h.bf16 %v2073_v25  ;;  %v2076_v25 = vld [vmem:[%s2399_s30 + $0x1a0] sm:$0xff]  }
  0x5e   : > { %v851_v45 = vmax.f32 %v723_v36, 0.0  ;;  %v590_v46 = vmul.f32 %v1967_v38, %v2408_v5  ;;  %v661_v50 = vadd.f32 %v2416_v11, %v526_v44  ;;  %v1843_v51 = vunpack.c.l.bf16 %v2042_v39  ;;  %2205 = vmatmul.mubr.bf16.gmra.mrb[28].mxu0 %v898_v26 }
  0x5f   : > { %v899_v48 = vpack.c.bf16 %v788_v41, %v787_v35  ;;  %v852_v49 = vmax.f32 %v724_v42, 0.0  ;;  %v662_v53 = vadd.f32 %v2416_v11, %v527_v34  ;;  %v591_v55 = vmul.f32 %v1968_v43, %v2408_v5  ;;  %2269 = vmatmul.mubr.bf16.gmra.mrb[28].mxu1 %v930_v40 }
  0x60   : > { %v725_v52 = vadd.f32 %v2416_v11, %v590_v46  ;;  %v1844_v56 = vunpack.c.h.bf16 %v2042_v39  ;;  %v789_v60 = vmax.f32 %v661_v50, 0.0  ;;  %v528_v61 = vmul.f32 %v1843_v51, %v2408_v5  ;;  %v2045_v39 = vld [vmem:[%s2399_s30 + $0xa8] sm:$0xff]  }
  0x61   : > { %v931_v58 = vpack.c.bf16 %v852_v49, %v851_v45  ;;  %v1971_v62 = vunpack.c.l.bf16 %v2074_v47  ;;  %v790_v63 = vmax.f32 %v662_v53, 0.0  ;;  %v726_v0 = vadd.f32 %v2416_v11, %v591_v55  ;;  %2208 = vmatprep.mubr.bf16.mxu0 %v899_v48  ;;  %v2077_v45 = vld [vmem:[%s2399_s30 + $0x1a8] sm:$0xff]  }
  0x62   : > { %v853_v1 = vmax.f32 %v725_v52, 0.0  ;;  %v529_v2 = vmul.f32 %v1844_v56, %v2408_v5  ;;  %v663_v3 = vadd.f32 %v2416_v11, %v528_v61  ;;  %v1972_v4 = vunpack.c.h.bf16 %v2074_v47 }
  0x63   : > { %2272 = vmatprep.mubr.bf16.mxu1 %v931_v58  ;;  %v592_v6 = vmul.f32 %v1971_v62, %v2408_v5  ;;  %v1847_v7 = vunpack.c.l.bf16 %v2043_v57  ;;  %v900_v8 = vpack.c.bf16 %v790_v63, %v789_v60  ;;  %v854_v59 = vmax.f32 %v726_v0, 0.0 }
  0x64   : > { %v664_v9 = vadd.f32 %v2416_v11, %v529_v2  ;;  %v1848_v10 = vunpack.c.h.bf16 %v2043_v57  ;;  %v791_v12 = vmax.f32 %v663_v3, 0.0  ;;  %v593_v13 = vmul.f32 %v1972_v4, %v2408_v5  ;;  %v2046_v57 = vld [vmem:[%s2399_s30 + $0xb0] sm:$0xff]  }
  0x65   : > { %v727_v14 = vadd.f32 %v2416_v11, %v592_v6  ;;  %v530_v15 = vmul.f32 %v1847_v7, %v2408_v5  ;;  %v932_v16 = vpack.c.bf16 %v854_v59, %v853_v1  ;;  %v1975_v20 = vunpack.c.l.bf16 %v2075_v54  ;;  %v2078_v3 = vld [vmem:[%s2399_s30 + $0x1b0] sm:$0xff]  }
  0x66   : > { %v792_v18 = vmax.f32 %v664_v9, 0.0  ;;  %v531_v19 = vmul.f32 %v1848_v10, %v2408_v5  ;;  %v728_v21 = vadd.f32 %v2416_v11, %v593_v13  ;;  %v1976_v24 = vunpack.c.h.bf16 %v2075_v54  ;;  %2209 = vmatmul.mubr.bf16.gmra.mrb[32].mxu0 %v900_v8 }
  0x67   : > { %v855_v22 = vmax.f32 %v727_v14, 0.0  ;;  %v665_v23 = vadd.f32 %v2416_v11, %v530_v15  ;;  %v594_v28 = vmul.f32 %v1975_v20, %v2408_v5  ;;  %v1851_v29 = vunpack.c.l.bf16 %v2044_v17  ;;  %2273 = vmatmul.mubr.bf16.gmra.mrb[32].mxu1 %v932_v16  ;;  %v2662_v20 = vld [vmem:[%s3038_s3] ss:$0 sm:$0xff] }
  0x68   : > { %v901_v26 = vpack.c.bf16 %v792_v18, %v791_v12  ;;  %v666_v27 = vadd.f32 %v2416_v11, %v531_v19  ;;  %v856_v30 = vmax.f32 %v728_v21, 0.0  ;;  %v595_v32 = vmul.f32 %v1976_v24, %v2408_v5  ;;  %v2047_v12 = vld [vmem:[%s2399_s30 + $0xb8] sm:$0xff]  }
  0x69   : > { %v793_v31 = vmax.f32 %v665_v23, 0.0  ;;  %v1852_v33 = vunpack.c.h.bf16 %v2044_v17  ;;  %v729_v36 = vadd.f32 %v2416_v11, %v594_v28  ;;  %v532_v37 = vmul.f32 %v1851_v29, %v2408_v5  ;;  %v2671_v28 = vld [vmem:[%s3039_s4] ss:$0 sm:$0xff] }
  0x6a   : > { %v794_v35 = vmax.f32 %v666_v27, 0.0  ;;  %v1979_v38 = vunpack.c.l.bf16 %v2076_v25  ;;  %2212 = vmatprep.mubr.bf16.mxu0 %v901_v26  ;;  %v933_v40 = vpack.c.bf16 %v856_v30, %v855_v22  ;;  %v730_v41 = vadd.f32 %v2416_v11, %v595_v32 }
  0x6b   : > { %v533_v42 = vmul.f32 %v1852_v33, %v2408_v5  ;;  %v1980_v44 = vunpack.c.h.bf16 %v2076_v25  ;;  %v857_v43 = vmax.f32 %v729_v36, 0.0  ;;  %v667_v46 = vadd.f32 %v2416_v11, %v532_v37  ;;  %v2079_v25 = vld [vmem:[%s2399_s30 + $0x1b8] sm:$0xff]  }
  0x6c   : > { %v902_v34 = vpack.c.bf16 %v794_v35, %v793_v31  ;;  %v596_v47 = vmul.f32 %v1979_v38, %v2408_v5  ;;  %2276 = vmatprep.mubr.bf16.mxu1 %v933_v40  ;;  %v858_v48 = vmax.f32 %v730_v41, 0.0  ;;  %v1855_v51 = vunpack.c.l.bf16 %v2045_v39  ;;  %v2048_v35 = vld [vmem:[%s2399_s30 + $0xc0] sm:$0xff]  }
  0x6d   : > { %v668_v49 = vadd.f32 %v2416_v11, %v533_v42  ;;  %v597_v50 = vmul.f32 %v1980_v44, %v2408_v5  ;;  %v795_v53 = vmax.f32 %v667_v46, 0.0  ;;  %v1856_v52 = vunpack.c.h.bf16 %v2045_v39 }
  0x6e   : > { %v731_v55 = vadd.f32 %v2416_v11, %v596_v47  ;;  %v1983_v56 = vunpack.c.l.bf16 %v2077_v45  ;;  %v934_v58 = vpack.c.bf16 %v858_v48, %v857_v43  ;;  %v534_v62 = vmul.f32 %v1855_v51, %v2408_v5  ;;  %2213 = vmatmul.mubr.bf16.gmra.mrb[36].mxu0 %v902_v34 }
  0x6f   : > { %v796_v60 = vmax.f32 %v668_v49, 0.0  ;;  %v732_v61 = vadd.f32 %v2416_v11, %v597_v50  ;;  %v535_v0 = vmul.f32 %v1856_v52, %v2408_v5  ;;  %v1984_v1 = vunpack.c.h.bf16 %v2077_v45  ;;  %v2080_v45 = vld [vmem:[%s2399_s30 + $0x1c0] sm:$0xff]  }
  0x70   : > { %v859_v63 = vmax.f32 %v731_v55, 0.0  ;;  %v598_v2 = vmul.f32 %v1983_v56, %v2408_v5  ;;  %v669_v7 = vadd.f32 %v2416_v11, %v534_v62  ;;  %v1859_v54 = vunpack.c.l.bf16 %v2046_v57  ;;  %2277 = vmatmul.mubr.bf16.gmra.mrb[36].mxu1 %v934_v58 }
  0x71   : > { %v903_v4 = vpack.c.bf16 %v796_v60, %v795_v53  ;;  %v860_v6 = vmax.f32 %v732_v61, 0.0  ;;  %v670_v8 = vadd.f32 %v2416_v11, %v535_v0  ;;  %v599_v59 = vmul.f32 %v1984_v1, %v2408_v5 }
  0x72   : > { %v733_v9 = vadd.f32 %v2416_v11, %v598_v2  ;;  %v1860_v10 = vunpack.c.h.bf16 %v2046_v57  ;;  %v797_v14 = vmax.f32 %v669_v7, 0.0  ;;  %v536_v15 = vmul.f32 %v1859_v54, %v2408_v5  ;;  %v2049_v57 = vld [vmem:[%s2399_s30 + $0xc8] sm:$0xff]  }
  0x73   : > { %2216 = vmatprep.mubr.bf16.mxu0 %v903_v4  ;;  %v935_v13 = vpack.c.bf16 %v860_v6, %v859_v63  ;;  %v1987_v17 = vunpack.c.l.bf16 %v2078_v3  ;;  %v798_v16 = vmax.f32 %v670_v8, 0.0  ;;  %v734_v18 = vadd.f32 %v2416_v11, %v599_v59  ;;  %v2081_v63 = vld [vmem:[%s2399_s30 + $0x1c8] sm:$0xff]  }
  0x74   : > { %v861_v19 = vmax.f32 %v733_v9, 0.0  ;;  %v537_v21 = vmul.f32 %v2662_v20, %v1860_v10  ;;  %v671_v22 = vadd.f32 %v2416_v11, %v536_v15  ;;  %v1988_v23 = vunpack.c.h.bf16 %v2078_v3 }
  0x75   : > { %2280 = vmatprep.mubr.bf16.mxu1 %v935_v13  ;;  %v600_v24 = vmul.f32 %v2662_v20, %v1987_v17  ;;  %v1863_v5 = vunpack.c.l.bf16 %v2047_v12  ;;  %v904_v26 = vpack.c.bf16 %v798_v16, %v797_v14  ;;  %v862_v27 = vmax.f32 %v734_v18, 0.0 }
  0x76   : > { %v672_v29 = vadd.f32 %v2671_v28, %v537_v21  ;;  %v1864_v30 = vunpack.c.h.bf16 %v2047_v12  ;;  %v799_v31 = vmax.f32 %v671_v22, 0.0  ;;  %v601_v32 = vmul.f32 %v2662_v20, %v1988_v23  ;;  %v2050_v12 = vld [vmem:[%s2399_s30 + $0xd0] sm:$0xff]  }
  0x77   : > { %v735_v11 = vadd.f32 %v2671_v28, %v600_v24  ;;  %v538_v33 = vmul.f32 %v2662_v20, %v1863_v5  ;;  %v936_v36 = vpack.c.bf16 %v862_v27, %v861_v19  ;;  %v1991_v39 = vunpack.c.l.bf16 %v2079_v25  ;;  %2217 = vmatmul.mubr.bf16.gmra.mrb[40].mxu0 %v904_v26  ;;  %v2082_v22 = vld [vmem:[%s2399_s30 + $0x1d0] sm:$0xff]  }
  0x78   : > { %v800_v37 = vmax.f32 %v672_v29, 0.0  ;;  %v539_v38 = vmul.f32 %v2662_v20, %v1864_v30  ;;  %v736_v40 = vadd.f32 %v2671_v28, %v601_v32  ;;  %v1992_v44 = vunpack.c.h.bf16 %v2079_v25 }
  0x79   : > { %v863_v41 = vmax.f32 %v735_v11, 0.0  ;;  %v673_v42 = vadd.f32 %v2671_v28, %v538_v33  ;;  %2281 = vmatmul.mubr.bf16.gmra.mrb[40].mxu1 %v936_v36  ;;  %v602_v46 = vmul.f32 %v2662_v20, %v1991_v39  ;;  %v1867_v47 = vunpack.c.l.bf16 %v2048_v35 }
  0x7a   : > { %v905_v34 = vpack.c.bf16 %v800_v37, %v799_v31  ;;  %v674_v43 = vadd.f32 %v2671_v28, %v539_v38  ;;  %v864_v48 = vmax.f32 %v736_v40, 0.0  ;;  %v603_v50 = vmul.f32 %v2662_v20, %v1992_v44  ;;  %v2051_v31 = vld [vmem:[%s2399_s30 + $0xd8] sm:$0xff]  }
  0x7b   : > { %v801_v49 = vmax.f32 %v673_v42, 0.0  ;;  %v1868_v51 = vunpack.c.h.bf16 %v2048_v35  ;;  %v737_v55 = vadd.f32 %v2671_v28, %v602_v46  ;;  %v540_v52 = vmul.f32 %v2662_v20, %v1867_v47 }
  0x7c   : > { %2220 = vmatprep.mubr.bf16.mxu0 %v905_v34  ;;  %v802_v53 = vmax.f32 %v674_v43, 0.0  ;;  %v1995_v56 = vunpack.c.l.bf16 %v2080_v45  ;;  %v937_v58 = vpack.c.bf16 %v864_v48, %v863_v41  ;;  %v738_v60 = vadd.f32 %v2671_v28, %v603_v50 }
  0x7d   : > { %v541_v61 = vmul.f32 %v2662_v20, %v1868_v51  ;;  %v1996_v62 = vunpack.c.h.bf16 %v2080_v45  ;;  %v865_v1 = vmax.f32 %v737_v55, 0.0  ;;  %v675_v2 = vadd.f32 %v2671_v28, %v540_v52  ;;  %v2083_v45 = vld [vmem:[%s2399_s30 + $0x1d8] sm:$0xff]  }
  0x7e   : > { %v906_v0 = vpack.c.bf16 %v802_v53, %v801_v49  ;;  %v604_v3 = vmul.f32 %v2662_v20, %v1995_v56  ;;  %2284 = vmatprep.mubr.bf16.mxu1 %v937_v58  ;;  %v866_v4 = vmax.f32 %v738_v60, 0.0  ;;  %v1871_v54 = vunpack.c.l.bf16 %v2049_v57  ;;  %v2052_v53 = vld [vmem:[%s2399_s30 + $0xe0] sm:$0xff]  }
  0x7f   : > { %v676_v6 = vadd.f32 %v2671_v28, %v541_v61  ;;  %v605_v7 = vmul.f32 %v2662_v20, %v1996_v62  ;;  %v803_v8 = vmax.f32 %v675_v2, 0.0  ;;  %v1872_v9 = vunpack.c.h.bf16 %v2049_v57 }
  0x80   : > { %v739_v59 = vadd.f32 %v2671_v28, %v604_v3  ;;  %v1999_v10 = vunpack.c.l.bf16 %v2081_v63  ;;  %v938_v13 = vpack.c.bf16 %v866_v4, %v865_v1  ;;  %v542_v17 = vmul.f32 %v2662_v20, %v1871_v54  ;;  %2221 = vmatmul.mubr.bf16.gmra.mrb[44].mxu0 %v906_v0 }
  0x81   : > { %v804_v14 = vmax.f32 %v676_v6, 0.0  ;;  %v740_v15 = vadd.f32 %v2671_v28, %v605_v7  ;;  %v543_v18 = vmul.f32 %v2662_v20, %v1872_v9  ;;  %v2000_v19 = vunpack.c.h.bf16 %v2081_v63  ;;  %v2084_v63 = vld [vmem:[%s2399_s30 + $0x1e0] sm:$0xff]  }
  0x82   : > { %v867_v16 = vmax.f32 %v739_v59, 0.0  ;;  %v606_v21 = vmul.f32 %v2662_v20, %v1999_v10  ;;  %2285 = vmatmul.mubr.bf16.gmra.mrb[44].mxu1 %v938_v13  ;;  %v677_v5 = vadd.f32 %v2671_v28, %v542_v17  ;;  %v1875_v25 = vunpack.c.l.bf16 %v2050_v12 }
  0x83   : > { %v907_v23 = vpack.c.bf16 %v804_v14, %v803_v8  ;;  %v868_v24 = vmax.f32 %v740_v15, 0.0  ;;  %v678_v26 = vadd.f32 %v2671_v28, %v543_v18  ;;  %v607_v27 = vmul.f32 %v2662_v20, %v2000_v19 }
  0x84   : > { %v741_v29 = vadd.f32 %v2671_v28, %v606_v21  ;;  %v1876_v30 = vunpack.c.h.bf16 %v2050_v12  ;;  %v805_v11 = vmax.f32 %v677_v5, 0.0  ;;  %v544_v33 = vmul.f32 %v2662_v20, %v1875_v25  ;;  %v2053_v12 = vld [vmem:[%s2399_s30 + $0xe8] sm:$0xff]  }
  0x85   : > { %2224 = vmatprep.mubr.bf16.mxu0 %v907_v23  ;;  %v939_v32 = vpack.c.bf16 %v868_v24, %v867_v16  ;;  %v2003_v35 = vunpack.c.l.bf16 %v2082_v22  ;;  %v806_v36 = vmax.f32 %v678_v26, 0.0  ;;  %v742_v37 = vadd.f32 %v2671_v28, %v607_v27  ;;  %v2085_v16 = vld [vmem:[%s2399_s30 + $0x1e8] sm:$0xff]  }
  0x86   : > { %v869_v38 = vmax.f32 %v741_v29, 0.0  ;;  %v545_v39 = vmul.f32 %v2662_v20, %v1876_v30  ;;  %v679_v40 = vadd.f32 %v2671_v28, %v544_v33  ;;  %v2004_v41 = vunpack.c.h.bf16 %v2082_v22 }
  0x87   : > { %2288 = vmatprep.mubr.bf16.mxu1 %v939_v32  ;;  %v608_v42 = vmul.f32 %v2662_v20, %v2003_v35  ;;  %v1879_v44 = vunpack.c.l.bf16 %v2051_v31  ;;  %v908_v34 = vpack.c.bf16 %v806_v36, %v805_v11  ;;  %v870_v43 = vmax.f32 %v742_v37, 0.0 }
  0x88   : > { %v680_v46 = vadd.f32 %v2671_v28, %v545_v39  ;;  %v1880_v47 = vunpack.c.h.bf16 %v2051_v31  ;;  %v807_v48 = vmax.f32 %v679_v40, 0.0  ;;  %v609_v49 = vmul.f32 %v2662_v20, %v2004_v41  ;;  %v2054_v31 = vld [vmem:[%s2399_s30 + $0xf0] sm:$0xff]  }
  0x89   : > { %v743_v50 = vadd.f32 %v2671_v28, %v608_v42  ;;  %v546_v51 = vmul.f32 %v2662_v20, %v1879_v44  ;;  %2225 = vmatmul.mubr.bf16.gmra.mrb[48].mxu0 %v908_v34  ;;  %v940_v55 = vpack.c.bf16 %v870_v43, %v869_v38  ;;  %v2007_v57 = vunpack.c.l.bf16 %v2083_v45  ;;  %v2086_v40 = vld [vmem:[%s2399_s30 + $0x1f0] sm:$0xff]  }
  0x8a   : > { %v808_v52 = vmax.f32 %v680_v46, 0.0  ;;  %v547_v56 = vmul.f32 %v2662_v20, %v1880_v47  ;;  %v744_v58 = vadd.f32 %v2671_v28, %v609_v49  ;;  %v2008_v62 = vunpack.c.h.bf16 %v2083_v45 }
  0x8b   : > { %v871_v60 = vmax.f32 %v743_v50, 0.0  ;;  %v681_v61 = vadd.f32 %v2671_v28, %v546_v51  ;;  %2289 = vmatmul.mubr.bf16.gmra.mrb[48].mxu1 %v940_v55  ;;  %v610_v2 = vmul.f32 %v2662_v20, %v2007_v57  ;;  %v1883_v3 = vunpack.c.l.bf16 %v2052_v53 }
  0x8c   : > { %v909_v0 = vpack.c.bf16 %v808_v52, %v807_v48  ;;  %v682_v1 = vadd.f32 %v2671_v28, %v547_v56  ;;  %v872_v4 = vmax.f32 %v744_v58, 0.0  ;;  %v611_v7 = vmul.f32 %v2662_v20, %v2008_v62  ;;  %v2055_v48 = vld [vmem:[%s2399_s30 + $0xf8] sm:$0xff]  }
  0x8d   : > { %v809_v6 = vmax.f32 %v681_v61, 0.0  ;;  %v1884_v54 = vunpack.c.h.bf16 %v2052_v53  ;;  %v745_v59 = vadd.f32 %v2671_v28, %v610_v2  ;;  %v548_v9 = vmul.f32 %v2662_v20, %v1883_v3 }
  0x8e   : > { %2228 = vmatprep.mubr.bf16.mxu0 %v909_v0  ;;  %v810_v8 = vmax.f32 %v682_v1, 0.0  ;;  %v2011_v10 = vunpack.c.l.bf16 %v2084_v63  ;;  %v941_v13 = vpack.c.bf16 %v872_v4, %v871_v60  ;;  %v746_v14 = vadd.f32 %v2671_v28, %v611_v7 }
  0x8f   : > { %v549_v15 = vmul.f32 %v2662_v20, %v1884_v54  ;;  %v2012_v17 = vunpack.c.h.bf16 %v2084_v63  ;;  %v873_v19 = vmax.f32 %v745_v59, 0.0  ;;  %v683_v21 = vadd.f32 %v2671_v28, %v548_v9  ;;  %v2087_v63 = vld [vmem:[%s2399_s30 + $0x1f8] sm:$0xff]  }
  0x90   : > { %v910_v18 = vpack.c.bf16 %v810_v8, %v809_v6  ;;  %v612_v22 = vmul.f32 %v2662_v20, %v2011_v10  ;;  %2292 = vmatprep.mubr.bf16.mxu1 %v941_v13  ;;  %v874_v23 = vmax.f32 %v746_v14, 0.0  ;;  %v1887_v25 = vunpack.c.l.bf16 %v2053_v12 }
  0x91   : > { %v684_v24 = vadd.f32 %v2671_v28, %v549_v15  ;;  %v613_v5 = vmul.f32 %v2662_v20, %v2012_v17  ;;  %v811_v26 = vmax.f32 %v683_v21, 0.0  ;;  %v1888_v29 = vunpack.c.h.bf16 %v2053_v12 }
  0x92   : > { %2229 = vmatmul.mubr.bf16.gmra.mrb[52].mxu0 %v910_v18  ;;  %v747_v27 = vadd.f32 %v2671_v28, %v612_v22  ;;  %v2015_v30 = vunpack.c.l.bf16 %v2085_v16  ;;  %v942_v32 = vpack.c.bf16 %v874_v23, %v873_v19  ;;  %v550_v35 = vmul.f32 %v2662_v20, %v1887_v25 }
  0x93   : > { %v812_v11 = vmax.f32 %v684_v24, 0.0  ;;  %v748_v33 = vadd.f32 %v2671_v28, %v613_v5  ;;  %v551_v37 = vmul.f32 %v2662_v20, %v1888_v29  ;;  %v2016_v38 = vunpack.c.h.bf16 %v2085_v16 }
  0x94   : > { %v875_v36 = vmax.f32 %v747_v27, 0.0  ;;  %v614_v39 = vmul.f32 %v2662_v20, %v2015_v30  ;;  %2293 = vmatmul.mubr.bf16.gmra.mrb[52].mxu1 %v942_v32  ;;  %v685_v44 = vadd.f32 %v2671_v28, %v550_v35  ;;  %v1891_v45 = vunpack.c.l.bf16 %v2054_v31 }
  0x95   : > { %v911_v41 = vpack.c.bf16 %v812_v11, %v811_v26  ;;  %v876_v42 = vmax.f32 %v748_v33, 0.0  ;;  %v686_v34 = vadd.f32 %v2671_v28, %v551_v37  ;;  %v615_v43 = vmul.f32 %v2662_v20, %v2016_v38 }
  0x96   : > { %v749_v46 = vadd.f32 %v2671_v28, %v614_v39  ;;  %v1892_v47 = vunpack.c.h.bf16 %v2054_v31  ;;  %v813_v50 = vmax.f32 %v685_v44, 0.0  ;;  %v552_v51 = vmul.f32 %v2662_v20, %v1891_v45  ;;  %v2769_v31 = vld [vmem:[%s3037_s2] ss:$0 sm:$0xff] }
  0x97   : > { %2232 = vmatprep.mubr.bf16.mxu0 %v911_v41  ;;  %v943_v49 = vpack.c.bf16 %v876_v42, %v875_v36  ;;  %v2019_v53 = vunpack.c.l.bf16 %v2086_v40  ;;  %v814_v55 = vmax.f32 %v686_v34, 0.0  ;;  %v750_v52 = vadd.f32 %v2671_v28, %v615_v43 }
  0x98   : > { %v877_v56 = vmax.f32 %v749_v46, 0.0  ;;  %v553_v57 = vmul.f32 %v2662_v20, %v1892_v47  ;;  %v687_v58 = vadd.f32 %v2671_v28, %v552_v51  ;;  %v2020_v60 = vunpack.c.h.bf16 %v2086_v40 }
  0x99   : > { %2296 = vmatprep.mubr.bf16.mxu1 %v943_v49  ;;  %v616_v61 = vmul.f32 %v2662_v20, %v2019_v53  ;;  %v1895_v62 = vunpack.c.l.bf16 %v2055_v48  ;;  %v912_v0 = vpack.c.bf16 %v814_v55, %v813_v50  ;;  %v878_v1 = vmax.f32 %v750_v52, 0.0 }
  0x9a   : > { %v688_v2 = vadd.f32 %v2671_v28, %v553_v57  ;;  %v1896_v3 = vunpack.c.h.bf16 %v2055_v48  ;;  %v815_v4 = vmax.f32 %v687_v58, 0.0  ;;  %v617_v6 = vmul.f32 %v2662_v20, %v2020_v60 }
  0x9b   : > { %v751_v7 = vadd.f32 %v2671_v28, %v616_v61  ;;  %v554_v54 = vmul.f32 %v2662_v20, %v1895_v62  ;;  %2233 = vmatmul.mubr.bf16.gmra.mrb[56].mxu0 %v912_v0  ;;  %v944_v8 = vpack.c.bf16 %v878_v1, %v877_v56  ;;  %v2023_v10 = vunpack.c.l.bf16 %v2087_v63 }
  0x9c   : > { %v816_v59 = vmax.f32 %v688_v2, 0.0  ;;  %v555_v9 = vmul.f32 %v2662_v20, %v1896_v3  ;;  %v752_v12 = vadd.f32 %v2671_v28, %v617_v6  ;;  %v2024_v15 = vunpack.c.h.bf16 %v2087_v63 }
  0x9d   : > { %v879_v13 = vmax.f32 %v751_v7, 0.0  ;;  %v689_v14 = vadd.f32 %v2671_v28, %v554_v54  ;;  %2297 = vmatmul.mubr.bf16.gmra.mrb[56].mxu1 %v944_v8  ;;  %v618_v18 = vmul.f32 %v2662_v20, %v2023_v10 }
  0x9e   : > { %v913_v17 = vpack.c.bf16 %v816_v59, %v815_v4  ;;  %v690_v16 = vadd.f32 %v2671_v28, %v555_v9  ;;  %v880_v19 = vmax.f32 %v752_v12, 0.0  ;;  %v619_v22 = vmul.f32 %v2662_v20, %v2024_v15 }
  0x9f   : > { %v817_v21 = vmax.f32 %v689_v14, 0.0  ;;  %v753_v24 = vadd.f32 %v2671_v28, %v618_v18 }
  0xa0   : > { %2236 = vmatprep.mubr.bf16.mxu0 %v913_v17  ;;  %v818_v23 = vmax.f32 %v690_v16, 0.0  ;;  %v945_v5 = vpack.c.bf16 %v880_v19, %v879_v13  ;;  %v754_v25 = vadd.f32 %v2671_v28, %v619_v22 }
  0xa1   : > { %v881_v27 = vmax.f32 %v753_v24, 0.0 }
  0xa2   : > { %v914_v26 = vpack.c.bf16 %v818_v23, %v817_v21  ;;  %2300 = vmatprep.mubr.bf16.mxu1 %v945_v5  ;;  %v882_v29 = vmax.f32 %v754_v25, 0.0 }
  0xa4   : > { %2237 = vmatmul.mubr.bf16.gmra.mrb[60].mxu0 %v914_v26  ;;  %v946_v30 = vpack.c.bf16 %v882_v29, %v881_v27 }
  0xa6   : > { %2301 = vmatmul.mubr.bf16.gmra.mrb[60].mxu1 %v946_v30 }
  0xf9   : > { %v2178_v20 = vpop.f32.mrb[0].mxu0 }
  0xfa   : > { %v2242_v28 = vpop.f32.mrb[0].mxu1  ;;  %v1061_v32 = vadd.f32 %v2178_v20, %v2769_v31  ;;  %v1052_v33 = vpop.f32.mrb[1].mxu0 }
  0xfb   : > { %v1317_v11 = vadd.f32 %v2242_v28, %v2769_v31  ;;  %v1308_v35 = vpop.f32.mrb[1].mxu1  ;;  %v1053_v36 = vadd.f32 %v2769_v31, %v1052_v33  ;;  %v2179_v38 = vpop.f32.mrb[2].mxu0 }
  0xfc   : > { %v1309_v37 = vadd.f32 %v2769_v31, %v1308_v35  ;;  %v2243_v39 = vpop.f32.mrb[2].mxu1  ;;  %1565 = vst [vmem:[%s2774_s6 + $0x10] sm:$0xff] %v1061_v32  ;;  %v1064_v40 = vadd.f32 %v2179_v38, %v2769_v31  ;;  %v1055_v42 = vpop.f32.mrb[3].mxu0 }
  0xfd   : > { %1629 = vst [vmem:[%s2774_s6 + $0x210] sm:$0xff] %v1317_v11  ;;  %v1320_v41 = vadd.f32 %v2243_v39, %v2769_v31  ;;  %v1311_v44 = vpop.f32.mrb[3].mxu1  ;;  %1563 = vst [vmem:[%s2774_s6] sm:$0xff] %v1053_v36  ;;  %v1056_v45 = vadd.f32 %v2769_v31, %v1055_v42 }
  0xfe   : > { %1627 = vst [vmem:[%s2774_s6 + $0x200] sm:$0xff] %v1309_v37  ;;  %v1312_v34 = vadd.f32 %v2769_v31, %v1311_v44  ;;  %1566 = vst [vmem:[%s2774_s6 + $0x18] sm:$0xff] %v1064_v40 }
  0xff   : > { %1630 = vst [vmem:[%s2774_s6 + $0x218] sm:$0xff] %v1320_v41  ;;  %1564 = vst [vmem:[%s2774_s6 + $0x8] sm:$0xff] %v1056_v45 }
 0x100   : > { %1628 = vst [vmem:[%s2774_s6 + $0x208] sm:$0xff] %v1312_v34 }
 0x101   : > { %v2182_v43 = vpop.f32.mrb[4].mxu0 }
 0x102   : > { %v2246_v46 = vpop.f32.mrb[4].mxu1  ;;  %v1077_v47 = vadd.f32 %v2182_v43, %v2769_v31  ;;  %v1068_v49 = vpop.f32.mrb[5].mxu0 }
 0x103   : > { %v1333_v48 = vadd.f32 %v2246_v46, %v2769_v31  ;;  %v1324_v50 = vpop.f32.mrb[5].mxu1  ;;  %v1069_v51 = vadd.f32 %v2769_v31, %v1068_v49  ;;  %v2183_v55 = vpop.f32.mrb[6].mxu0 }
 0x104   : > { %v1325_v53 = vadd.f32 %v2769_v31, %v1324_v50  ;;  %v2247_v52 = vpop.f32.mrb[6].mxu1  ;;  %1569 = vst [vmem:[%s2774_s6 + $0x30] sm:$0xff] %v1077_v47  ;;  %v1080_v56 = vadd.f32 %v2183_v55, %v2769_v31  ;;  %v1071_v58 = vpop.f32.mrb[7].mxu0 }
 0x105   : > { %1633 = vst [vmem:[%s2774_s6 + $0x230] sm:$0xff] %v1333_v48  ;;  %v1336_v57 = vadd.f32 %v2247_v52, %v2769_v31  ;;  %v1327_v60 = vpop.f32.mrb[7].mxu1  ;;  %1567 = vst [vmem:[%s2774_s6 + $0x20] sm:$0xff] %v1069_v51  ;;  %v1072_v61 = vadd.f32 %v2769_v31, %v1071_v58 }
 0x106   : > { %1631 = vst [vmem:[%s2774_s6 + $0x220] sm:$0xff] %v1325_v53  ;;  %v1328_v62 = vadd.f32 %v2769_v31, %v1327_v60  ;;  %1570 = vst [vmem:[%s2774_s6 + $0x38] sm:$0xff] %v1080_v56 }
 0x107   : > { %1634 = vst [vmem:[%s2774_s6 + $0x238] sm:$0xff] %v1336_v57  ;;  %1568 = vst [vmem:[%s2774_s6 + $0x28] sm:$0xff] %v1072_v61 }
 0x108   : > { %1632 = vst [vmem:[%s2774_s6 + $0x228] sm:$0xff] %v1328_v62 }
 0x109   : > { %v2186_v63 = vpop.f32.mrb[8].mxu0 }
 0x10a   : > { %v2250_v0 = vpop.f32.mrb[8].mxu1  ;;  %v1093_v1 = vadd.f32 %v2186_v63, %v2769_v31  ;;  %v1084_v3 = vpop.f32.mrb[9].mxu0 }
 0x10b   : > { %v1349_v2 = vadd.f32 %v2250_v0, %v2769_v31  ;;  %v1340_v4 = vpop.f32.mrb[9].mxu1  ;;  %v1085_v6 = vadd.f32 %v2769_v31, %v1084_v3  ;;  %v2187_v54 = vpop.f32.mrb[10].mxu0 }
 0x10c   : > { %v1341_v7 = vadd.f32 %v2769_v31, %v1340_v4  ;;  %v2251_v8 = vpop.f32.mrb[10].mxu1  ;;  %1573 = vst [vmem:[%s2774_s6 + $0x50] sm:$0xff] %v1093_v1  ;;  %v1096_v59 = vadd.f32 %v2187_v54, %v2769_v31  ;;  %v1087_v10 = vpop.f32.mrb[11].mxu0 }
 0x10d   : > { %1637 = vst [vmem:[%s2774_s6 + $0x250] sm:$0xff] %v1349_v2  ;;  %v1352_v9 = vadd.f32 %v2251_v8, %v2769_v31  ;;  %v1343_v12 = vpop.f32.mrb[11].mxu1  ;;  %1571 = vst [vmem:[%s2774_s6 + $0x40] sm:$0xff] %v1085_v6  ;;  %v1088_v13 = vadd.f32 %v2769_v31, %v1087_v10 }
 0x10e   : > { %1635 = vst [vmem:[%s2774_s6 + $0x240] sm:$0xff] %v1341_v7  ;;  %v1344_v14 = vadd.f32 %v2769_v31, %v1343_v12  ;;  %1574 = vst [vmem:[%s2774_s6 + $0x58] sm:$0xff] %v1096_v59 }
 0x10f   : > { %1638 = vst [vmem:[%s2774_s6 + $0x258] sm:$0xff] %v1352_v9  ;;  %1572 = vst [vmem:[%s2774_s6 + $0x48] sm:$0xff] %v1088_v13 }
 0x110   : > { %1636 = vst [vmem:[%s2774_s6 + $0x248] sm:$0xff] %v1344_v14 }
 0x111   : > { %v2190_v15 = vpop.f32.mrb[12].mxu0 }
 0x112   : > { %v2254_v17 = vpop.f32.mrb[12].mxu1  ;;  %v1109_v16 = vadd.f32 %v2190_v15, %v2769_v31  ;;  %v1100_v19 = vpop.f32.mrb[13].mxu0 }
 0x113   : > { %v1365_v18 = vadd.f32 %v2254_v17, %v2769_v31  ;;  %v1356_v21 = vpop.f32.mrb[13].mxu1  ;;  %v1101_v22 = vadd.f32 %v2769_v31, %v1100_v19  ;;  %v2191_v24 = vpop.f32.mrb[14].mxu0 }
 0x114   : > { %v1357_v23 = vadd.f32 %v2769_v31, %v1356_v21  ;;  %v2255_v5 = vpop.f32.mrb[14].mxu1  ;;  %1577 = vst [vmem:[%s2774_s6 + $0x70] sm:$0xff] %v1109_v16  ;;  %v1112_v25 = vadd.f32 %v2191_v24, %v2769_v31  ;;  %v1103_v27 = vpop.f32.mrb[15].mxu0 }
 0x115   : > { %1641 = vst [vmem:[%s2774_s6 + $0x270] sm:$0xff] %v1365_v18  ;;  %v1368_v26 = vadd.f32 %v2255_v5, %v2769_v31  ;;  %v1359_v29 = vpop.f32.mrb[15].mxu1  ;;  %1575 = vst [vmem:[%s2774_s6 + $0x60] sm:$0xff] %v1101_v22  ;;  %v1104_v30 = vadd.f32 %v2769_v31, %v1103_v27 }
 0x116   : > { %1639 = vst [vmem:[%s2774_s6 + $0x260] sm:$0xff] %v1357_v23  ;;  %v1360_v20 = vadd.f32 %v2769_v31, %v1359_v29  ;;  %1578 = vst [vmem:[%s2774_s6 + $0x78] sm:$0xff] %v1112_v25 }
 0x117   : > { %1642 = vst [vmem:[%s2774_s6 + $0x278] sm:$0xff] %v1368_v26  ;;  %1576 = vst [vmem:[%s2774_s6 + $0x68] sm:$0xff] %v1104_v30 }
 0x118   : > { %1640 = vst [vmem:[%s2774_s6 + $0x268] sm:$0xff] %v1360_v20 }
 0x119   : > { %v2194_v28 = vpop.f32.mrb[16].mxu0 }
 0x11a   : > { %v2258_v32 = vpop.f32.mrb[16].mxu1  ;;  %v1125_v11 = vadd.f32 %v2194_v28, %v2769_v31  ;;  %v1116_v35 = vpop.f32.mrb[17].mxu0 }
 0x11b   : > { %v1381_v33 = vadd.f32 %v2258_v32, %v2769_v31  ;;  %v1372_v36 = vpop.f32.mrb[17].mxu1  ;;  %v1117_v37 = vadd.f32 %v2769_v31, %v1116_v35  ;;  %v2195_v39 = vpop.f32.mrb[18].mxu0 }
 0x11c   : > { %v1373_v38 = vadd.f32 %v2769_v31, %v1372_v36  ;;  %v2259_v40 = vpop.f32.mrb[18].mxu1  ;;  %1581 = vst [vmem:[%s2774_s6 + $0x90] sm:$0xff] %v1125_v11  ;;  %v1128_v41 = vadd.f32 %v2195_v39, %v2769_v31  ;;  %v1119_v44 = vpop.f32.mrb[19].mxu0 }
 0x11d   : > { %1645 = vst [vmem:[%s2774_s6 + $0x290] sm:$0xff] %v1381_v33  ;;  %v1384_v42 = vadd.f32 %v2259_v40, %v2769_v31  ;;  %v1375_v45 = vpop.f32.mrb[19].mxu1  ;;  %1579 = vst [vmem:[%s2774_s6 + $0x80] sm:$0xff] %v1117_v37  ;;  %v1120_v34 = vadd.f32 %v2769_v31, %v1119_v44 }
 0x11e   : > { %1643 = vst [vmem:[%s2774_s6 + $0x280] sm:$0xff] %v1373_v38  ;;  %v1376_v43 = vadd.f32 %v2769_v31, %v1375_v45  ;;  %1582 = vst [vmem:[%s2774_s6 + $0x98] sm:$0xff] %v1128_v41 }
 0x11f   : > { %1646 = vst [vmem:[%s2774_s6 + $0x298] sm:$0xff] %v1384_v42  ;;  %1580 = vst [vmem:[%s2774_s6 + $0x88] sm:$0xff] %v1120_v34 }
 0x120   : > { %1644 = vst [vmem:[%s2774_s6 + $0x288] sm:$0xff] %v1376_v43 }
 0x121   : > { %v2198_v46 = vpop.f32.mrb[20].mxu0 }
 0x122   : > { %v2262_v47 = vpop.f32.mrb[20].mxu1  ;;  %v1141_v48 = vadd.f32 %v2198_v46, %v2769_v31  ;;  %v1132_v50 = vpop.f32.mrb[21].mxu0 }
 0x123   : > { %v1397_v49 = vadd.f32 %v2262_v47, %v2769_v31  ;;  %v1388_v51 = vpop.f32.mrb[21].mxu1  ;;  %v1133_v53 = vadd.f32 %v2769_v31, %v1132_v50  ;;  %v2199_v52 = vpop.f32.mrb[22].mxu0 }
 0x124   : > { %v1389_v55 = vadd.f32 %v2769_v31, %v1388_v51  ;;  %v2263_v56 = vpop.f32.mrb[22].mxu1  ;;  %1585 = vst [vmem:[%s2774_s6 + $0xb0] sm:$0xff] %v1141_v48  ;;  %v1144_v57 = vadd.f32 %v2199_v52, %v2769_v31  ;;  %v1135_v60 = vpop.f32.mrb[23].mxu0 }
 0x125   : > { %1649 = vst [vmem:[%s2774_s6 + $0x2b0] sm:$0xff] %v1397_v49  ;;  %v1400_v58 = vadd.f32 %v2263_v56, %v2769_v31  ;;  %v1391_v61 = vpop.f32.mrb[23].mxu1  ;;  %1583 = vst [vmem:[%s2774_s6 + $0xa0] sm:$0xff] %v1133_v53  ;;  %v1136_v62 = vadd.f32 %v2769_v31, %v1135_v60 }
 0x126   : > { %1647 = vst [vmem:[%s2774_s6 + $0x2a0] sm:$0xff] %v1389_v55  ;;  %v1392_v63 = vadd.f32 %v2769_v31, %v1391_v61  ;;  %1586 = vst [vmem:[%s2774_s6 + $0xb8] sm:$0xff] %v1144_v57 }
 0x127   : > { %1650 = vst [vmem:[%s2774_s6 + $0x2b8] sm:$0xff] %v1400_v58  ;;  %1584 = vst [vmem:[%s2774_s6 + $0xa8] sm:$0xff] %v1136_v62 }
 0x128   : > { %1648 = vst [vmem:[%s2774_s6 + $0x2a8] sm:$0xff] %v1392_v63 }
 0x129   : > { %v2202_v0 = vpop.f32.mrb[24].mxu0 }
 0x12a   : > { %v2266_v1 = vpop.f32.mrb[24].mxu1  ;;  %v1157_v2 = vadd.f32 %v2202_v0, %v2769_v31  ;;  %v1148_v4 = vpop.f32.mrb[25].mxu0 }
 0x12b   : > { %v1413_v3 = vadd.f32 %v2266_v1, %v2769_v31  ;;  %v1404_v6 = vpop.f32.mrb[25].mxu1  ;;  %v1149_v7 = vadd.f32 %v2769_v31, %v1148_v4  ;;  %v2203_v8 = vpop.f32.mrb[26].mxu0 }
 0x12c   : > { %v1405_v54 = vadd.f32 %v2769_v31, %v1404_v6  ;;  %v2267_v59 = vpop.f32.mrb[26].mxu1  ;;  %1589 = vst [vmem:[%s2774_s6 + $0xd0] sm:$0xff] %v1157_v2  ;;  %v1160_v9 = vadd.f32 %v2203_v8, %v2769_v31  ;;  %v1151_v12 = vpop.f32.mrb[27].mxu0 }
 0x12d   : > { %1653 = vst [vmem:[%s2774_s6 + $0x2d0] sm:$0xff] %v1413_v3  ;;  %v1416_v10 = vadd.f32 %v2267_v59, %v2769_v31  ;;  %v1407_v13 = vpop.f32.mrb[27].mxu1  ;;  %1587 = vst [vmem:[%s2774_s6 + $0xc0] sm:$0xff] %v1149_v7  ;;  %v1152_v14 = vadd.f32 %v2769_v31, %v1151_v12 }
 0x12e   : > { %1651 = vst [vmem:[%s2774_s6 + $0x2c0] sm:$0xff] %v1405_v54  ;;  %v1408_v15 = vadd.f32 %v2769_v31, %v1407_v13  ;;  %1590 = vst [vmem:[%s2774_s6 + $0xd8] sm:$0xff] %v1160_v9 }
 0x12f   : > { %1654 = vst [vmem:[%s2774_s6 + $0x2d8] sm:$0xff] %v1416_v10  ;;  %1588 = vst [vmem:[%s2774_s6 + $0xc8] sm:$0xff] %v1152_v14 }
 0x130   : > { %1652 = vst [vmem:[%s2774_s6 + $0x2c8] sm:$0xff] %v1408_v15 }
 0x131   : > { %v2206_v17 = vpop.f32.mrb[28].mxu0 }
 0x132   : > { %v2270_v16 = vpop.f32.mrb[28].mxu1  ;;  %v1173_v18 = vadd.f32 %v2206_v17, %v2769_v31  ;;  %v1164_v21 = vpop.f32.mrb[29].mxu0 }
 0x133   : > { %v1429_v19 = vadd.f32 %v2270_v16, %v2769_v31  ;;  %v1420_v22 = vpop.f32.mrb[29].mxu1  ;;  %v1165_v23 = vadd.f32 %v2769_v31, %v1164_v21  ;;  %v2207_v5 = vpop.f32.mrb[30].mxu0 }
 0x134   : > { %v1421_v24 = vadd.f32 %v2769_v31, %v1420_v22  ;;  %v2271_v25 = vpop.f32.mrb[30].mxu1  ;;  %1593 = vst [vmem:[%s2774_s6 + $0xf0] sm:$0xff] %v1173_v18  ;;  %v1176_v26 = vadd.f32 %v2207_v5, %v2769_v31  ;;  %v1167_v29 = vpop.f32.mrb[31].mxu0 }
 0x135   : > { %1657 = vst [vmem:[%s2774_s6 + $0x2f0] sm:$0xff] %v1429_v19  ;;  %v1432_v27 = vadd.f32 %v2271_v25, %v2769_v31  ;;  %v1423_v30 = vpop.f32.mrb[31].mxu1  ;;  %1591 = vst [vmem:[%s2774_s6 + $0xe0] sm:$0xff] %v1165_v23  ;;  %v1168_v20 = vadd.f32 %v2769_v31, %v1167_v29 }
 0x136   : > { %1655 = vst [vmem:[%s2774_s6 + $0x2e0] sm:$0xff] %v1421_v24  ;;  %v1424_v28 = vadd.f32 %v2769_v31, %v1423_v30  ;;  %1594 = vst [vmem:[%s2774_s6 + $0xf8] sm:$0xff] %v1176_v26 }
 0x137   : > { %1658 = vst [vmem:[%s2774_s6 + $0x2f8] sm:$0xff] %v1432_v27  ;;  %1592 = vst [vmem:[%s2774_s6 + $0xe8] sm:$0xff] %v1168_v20 }
 0x138   : > { %1656 = vst [vmem:[%s2774_s6 + $0x2e8] sm:$0xff] %v1424_v28 }
 0x139   : > { %v2210_v32 = vpop.f32.mrb[32].mxu0 }
 0x13a   : > { %v2274_v11 = vpop.f32.mrb[32].mxu1  ;;  %v1189_v33 = vadd.f32 %v2210_v32, %v2769_v31  ;;  %v1180_v36 = vpop.f32.mrb[33].mxu0 }
 0x13b   : > { %v1445_v35 = vadd.f32 %v2274_v11, %v2769_v31  ;;  %v1436_v37 = vpop.f32.mrb[33].mxu1  ;;  %v1181_v38 = vadd.f32 %v2769_v31, %v1180_v36  ;;  %v2211_v40 = vpop.f32.mrb[34].mxu0 }
 0x13c   : > { %v1437_v39 = vadd.f32 %v2769_v31, %v1436_v37  ;;  %v2275_v41 = vpop.f32.mrb[34].mxu1  ;;  %1597 = vst [vmem:[%s2774_s6 + $0x110] sm:$0xff] %v1189_v33  ;;  %v1192_v42 = vadd.f32 %v2211_v40, %v2769_v31  ;;  %v1183_v45 = vpop.f32.mrb[35].mxu0 }
 0x13d   : > { %1661 = vst [vmem:[%s2774_s6 + $0x310] sm:$0xff] %v1445_v35  ;;  %v1448_v44 = vadd.f32 %v2275_v41, %v2769_v31  ;;  %v1439_v34 = vpop.f32.mrb[35].mxu1  ;;  %1595 = vst [vmem:[%s2774_s6 + $0x100] sm:$0xff] %v1181_v38  ;;  %v1184_v43 = vadd.f32 %v2769_v31, %v1183_v45 }
 0x13e   : > { %1659 = vst [vmem:[%s2774_s6 + $0x300] sm:$0xff] %v1437_v39  ;;  %v1440_v46 = vadd.f32 %v2769_v31, %v1439_v34  ;;  %1598 = vst [vmem:[%s2774_s6 + $0x118] sm:$0xff] %v1192_v42 }
 0x13f   : > { %1662 = vst [vmem:[%s2774_s6 + $0x318] sm:$0xff] %v1448_v44  ;;  %1596 = vst [vmem:[%s2774_s6 + $0x108] sm:$0xff] %v1184_v43 }
 0x140   : > { %1660 = vst [vmem:[%s2774_s6 + $0x308] sm:$0xff] %v1440_v46 }
 0x141   : > { %v2214_v47 = vpop.f32.mrb[36].mxu0 }
 0x142   : > { %v1205_v49 = vadd.f32 %v2214_v47, %v2769_v31  ;;  %v1196_v51 = vpop.f32.mrb[37].mxu0 }
 0x143   : > { %v2278_v48 = vpop.f32.mrb[36].mxu1  ;;  %v1197_v55 = vadd.f32 %v2769_v31, %v1196_v51  ;;  %v2215_v56 = vpop.f32.mrb[38].mxu0 }
 0x144   : > { %v1461_v50 = vadd.f32 %v2278_v48, %v2769_v31  ;;  %v1452_v53 = vpop.f32.mrb[37].mxu1  ;;  %1601 = vst [vmem:[%s2774_s6 + $0x130] sm:$0xff] %v1205_v49  ;;  %v1208_v58 = vadd.f32 %v2215_v56, %v2769_v31  ;;  %v1199_v61 = vpop.f32.mrb[39].mxu0 }
 0x145   : > { %v1453_v52 = vadd.f32 %v2769_v31, %v1452_v53  ;;  %v2279_v57 = vpop.f32.mrb[38].mxu1  ;;  %1599 = vst [vmem:[%s2774_s6 + $0x120] sm:$0xff] %v1197_v55  ;;  %v1200_v63 = vadd.f32 %v2769_v31, %v1199_v61 }
 0x146   : > { %1665 = vst [vmem:[%s2774_s6 + $0x330] sm:$0xff] %v1461_v50  ;;  %v1464_v60 = vadd.f32 %v2279_v57, %v2769_v31  ;;  %v1455_v62 = vpop.f32.mrb[39].mxu1  ;;  %1602 = vst [vmem:[%s2774_s6 + $0x138] sm:$0xff] %v1208_v58 }
 0x147   : > { %1663 = vst [vmem:[%s2774_s6 + $0x320] sm:$0xff] %v1453_v52  ;;  %v1456_v0 = vadd.f32 %v2769_v31, %v1455_v62  ;;  %1600 = vst [vmem:[%s2774_s6 + $0x128] sm:$0xff] %v1200_v63 }
 0x148   : > { %1666 = vst [vmem:[%s2774_s6 + $0x338] sm:$0xff] %v1464_v60 }
 0x149   : > { %1664 = vst [vmem:[%s2774_s6 + $0x328] sm:$0xff] %v1456_v0 }
 0x14a   : > { %v2218_v1 = vpop.f32.mrb[40].mxu0 }
 0x14b   : > { %v1221_v3 = vadd.f32 %v2218_v1, %v2769_v31  ;;  %v1212_v6 = vpop.f32.mrb[41].mxu0 }
 0x14c   : > { %v2282_v2 = vpop.f32.mrb[40].mxu1  ;;  %v1213_v54 = vadd.f32 %v2769_v31, %v1212_v6  ;;  %v2219_v59 = vpop.f32.mrb[42].mxu0 }
 0x14d   : > { %v1477_v4 = vadd.f32 %v2282_v2, %v2769_v31  ;;  %v1468_v7 = vpop.f32.mrb[41].mxu1  ;;  %1605 = vst [vmem:[%s2774_s6 + $0x150] sm:$0xff] %v1221_v3  ;;  %v1224_v10 = vadd.f32 %v2219_v59, %v2769_v31  ;;  %v1215_v13 = vpop.f32.mrb[43].mxu0 }
 0x14e   : > { %v1469_v8 = vadd.f32 %v2769_v31, %v1468_v7  ;;  %v2283_v9 = vpop.f32.mrb[42].mxu1  ;;  %1603 = vst [vmem:[%s2774_s6 + $0x140] sm:$0xff] %v1213_v54  ;;  %v1216_v15 = vadd.f32 %v2769_v31, %v1215_v13 }
 0x14f   : > { %1669 = vst [vmem:[%s2774_s6 + $0x350] sm:$0xff] %v1477_v4  ;;  %v1480_v12 = vadd.f32 %v2283_v9, %v2769_v31  ;;  %v1471_v14 = vpop.f32.mrb[43].mxu1  ;;  %1606 = vst [vmem:[%s2774_s6 + $0x158] sm:$0xff] %v1224_v10 }
 0x150   : > { %1667 = vst [vmem:[%s2774_s6 + $0x340] sm:$0xff] %v1469_v8  ;;  %v1472_v17 = vadd.f32 %v2769_v31, %v1471_v14  ;;  %1604 = vst [vmem:[%s2774_s6 + $0x148] sm:$0xff] %v1216_v15 }
 0x151   : > { %1670 = vst [vmem:[%s2774_s6 + $0x358] sm:$0xff] %v1480_v12 }
 0x152   : > { %1668 = vst [vmem:[%s2774_s6 + $0x348] sm:$0xff] %v1472_v17 }
 0x153   : > { %v2222_v16 = vpop.f32.mrb[44].mxu0 }
 0x154   : > { %v1237_v18 = vadd.f32 %v2222_v16, %v2769_v31  ;;  %v1228_v21 = vpop.f32.mrb[45].mxu0 }
 0x155   : > { %v2286_v19 = vpop.f32.mrb[44].mxu1  ;;  %v1229_v23 = vadd.f32 %v2769_v31, %v1228_v21  ;;  %v2223_v5 = vpop.f32.mrb[46].mxu0 }
 0x156   : > { %v1493_v22 = vadd.f32 %v2286_v19, %v2769_v31  ;;  %v1484_v24 = vpop.f32.mrb[45].mxu1  ;;  %1609 = vst [vmem:[%s2774_s6 + $0x170] sm:$0xff] %v1237_v18  ;;  %v1240_v26 = vadd.f32 %v2223_v5, %v2769_v31  ;;  %v1231_v29 = vpop.f32.mrb[47].mxu0 }
 0x157   : > { %v1485_v25 = vadd.f32 %v2769_v31, %v1484_v24  ;;  %v2287_v27 = vpop.f32.mrb[46].mxu1  ;;  %1607 = vst [vmem:[%s2774_s6 + $0x160] sm:$0xff] %v1229_v23  ;;  %v1232_v20 = vadd.f32 %v2769_v31, %v1231_v29 }
 0x158   : > { %1673 = vst [vmem:[%s2774_s6 + $0x370] sm:$0xff] %v1493_v22  ;;  %v1496_v30 = vadd.f32 %v2287_v27, %v2769_v31  ;;  %v1487_v28 = vpop.f32.mrb[47].mxu1  ;;  %1610 = vst [vmem:[%s2774_s6 + $0x178] sm:$0xff] %v1240_v26 }
 0x159   : > { %1671 = vst [vmem:[%s2774_s6 + $0x360] sm:$0xff] %v1485_v25  ;;  %v1488_v32 = vadd.f32 %v2769_v31, %v1487_v28  ;;  %1608 = vst [vmem:[%s2774_s6 + $0x168] sm:$0xff] %v1232_v20 }
 0x15a   : > { %1674 = vst [vmem:[%s2774_s6 + $0x378] sm:$0xff] %v1496_v30 }
 0x15b   : > { %1672 = vst [vmem:[%s2774_s6 + $0x368] sm:$0xff] %v1488_v32 }
 0x15c   : > { %v2226_v11 = vpop.f32.mrb[48].mxu0 }
 0x15d   : > { %v1253_v33 = vadd.f32 %v2226_v11, %v2769_v31  ;;  %v1244_v35 = vpop.f32.mrb[49].mxu0 }
 0x15e   : > { %v2290_v36 = vpop.f32.mrb[48].mxu1  ;;  %v1245_v37 = vadd.f32 %v2769_v31, %v1244_v35  ;;  %v2227_v38 = vpop.f32.mrb[50].mxu0 }
 0x15f   : > { %1613 = vst [vmem:[%s2774_s6 + $0x190] sm:$0xff] %v1253_v33  ;;  %v1509_v39 = vadd.f32 %v2290_v36, %v2769_v31  ;;  %v1500_v40 = vpop.f32.mrb[49].mxu1  ;;  %v1256_v41 = vadd.f32 %v2227_v38, %v2769_v31  ;;  %v1247_v42 = vpop.f32.mrb[51].mxu0 }
 0x160   : > { %1611 = vst [vmem:[%s2774_s6 + $0x180] sm:$0xff] %v1245_v37  ;;  %v1501_v44 = vadd.f32 %v2769_v31, %v1500_v40  ;;  %v2291_v45 = vpop.f32.mrb[50].mxu1  ;;  %v1248_v34 = vadd.f32 %v2769_v31, %v1247_v42 }
 0x161   : > { %1677 = vst [vmem:[%s2774_s6 + $0x390] sm:$0xff] %v1509_v39  ;;  %1614 = vst [vmem:[%s2774_s6 + $0x198] sm:$0xff] %v1256_v41  ;;  %v1512_v43 = vadd.f32 %v2291_v45, %v2769_v31  ;;  %v1503_v46 = vpop.f32.mrb[51].mxu1 }
 0x162   : > { %1675 = vst [vmem:[%s2774_s6 + $0x380] sm:$0xff] %v1501_v44  ;;  %1612 = vst [vmem:[%s2774_s6 + $0x188] sm:$0xff] %v1248_v34  ;;  %v1504_v47 = vadd.f32 %v2769_v31, %v1503_v46 }
 0x163   : > { %1678 = vst [vmem:[%s2774_s6 + $0x398] sm:$0xff] %v1512_v43 }
 0x164   : > { %1676 = vst [vmem:[%s2774_s6 + $0x388] sm:$0xff] %v1504_v47 }
 0x165   : > { %v2230_v48 = vpop.f32.mrb[52].mxu0 }
 0x166   : > { %v1269_v49 = vadd.f32 %v2230_v48, %v2769_v31  ;;  %v1260_v50 = vpop.f32.mrb[53].mxu0 }
 0x167   : > { %v1261_v51 = vadd.f32 %v2769_v31, %v1260_v50  ;;  %v2231_v53 = vpop.f32.mrb[54].mxu0  ;;  %v2294_v55 = vpop.f32.mrb[52].mxu1 }
 0x168   : > { %1617 = vst [vmem:[%s2774_s6 + $0x1b0] sm:$0xff] %v1269_v49  ;;  %v1272_v52 = vadd.f32 %v2231_v53, %v2769_v31  ;;  %v1263_v56 = vpop.f32.mrb[55].mxu0  ;;  %v1525_v57 = vadd.f32 %v2294_v55, %v2769_v31  ;;  %v1516_v58 = vpop.f32.mrb[53].mxu1 }
 0x169   : > { %1615 = vst [vmem:[%s2774_s6 + $0x1a0] sm:$0xff] %v1261_v51  ;;  %v1264_v60 = vadd.f32 %v2769_v31, %v1263_v56  ;;  %v1517_v61 = vadd.f32 %v2769_v31, %v1516_v58  ;;  %v2295_v62 = vpop.f32.mrb[54].mxu1 }
 0x16a   : > { %1618 = vst [vmem:[%s2774_s6 + $0x1b8] sm:$0xff] %v1272_v52  ;;  %1681 = vst [vmem:[%s2774_s6 + $0x3b0] sm:$0xff] %v1525_v57  ;;  %v1528_v63 = vadd.f32 %v2295_v62, %v2769_v31  ;;  %v1519_v0 = vpop.f32.mrb[55].mxu1 }
 0x16b   : > { %1616 = vst [vmem:[%s2774_s6 + $0x1a8] sm:$0xff] %v1264_v60  ;;  %1679 = vst [vmem:[%s2774_s6 + $0x3a0] sm:$0xff] %v1517_v61  ;;  %v1520_v1 = vadd.f32 %v2769_v31, %v1519_v0 }
 0x16c   : > { %1682 = vst [vmem:[%s2774_s6 + $0x3b8] sm:$0xff] %v1528_v63 }
 0x16d   : > { %1680 = vst [vmem:[%s2774_s6 + $0x3a8] sm:$0xff] %v1520_v1 }
 0x16e   : > { %v2234_v2 = vpop.f32.mrb[56].mxu0 }
 0x16f   : > { %v1285_v3 = vadd.f32 %v2234_v2, %v2769_v31  ;;  %v1276_v4 = vpop.f32.mrb[57].mxu0 }
 0x170   : > { %v2298_v6 = vpop.f32.mrb[56].mxu1  ;;  %v1277_v7 = vadd.f32 %v2769_v31, %v1276_v4  ;;  %v2235_v54 = vpop.f32.mrb[58].mxu0 }
 0x171   : > { %1621 = vst [vmem:[%s2774_s6 + $0x1d0] sm:$0xff] %v1285_v3  ;;  %v1541_v8 = vadd.f32 %v2298_v6, %v2769_v31  ;;  %v1532_v59 = vpop.f32.mrb[57].mxu1  ;;  %v1288_v9 = vadd.f32 %v2235_v54, %v2769_v31  ;;  %v1279_v10 = vpop.f32.mrb[59].mxu0 }
 0x172   : > { %1619 = vst [vmem:[%s2774_s6 + $0x1c0] sm:$0xff] %v1277_v7  ;;  %v1533_v12 = vadd.f32 %v2769_v31, %v1532_v59  ;;  %v2299_v13 = vpop.f32.mrb[58].mxu1  ;;  %v1280_v14 = vadd.f32 %v2769_v31, %v1279_v10 }
 0x173   : > { %1685 = vst [vmem:[%s2774_s6 + $0x3d0] sm:$0xff] %v1541_v8  ;;  %1622 = vst [vmem:[%s2774_s6 + $0x1d8] sm:$0xff] %v1288_v9  ;;  %v1544_v15 = vadd.f32 %v2299_v13, %v2769_v31  ;;  %v1535_v17 = vpop.f32.mrb[59].mxu1 }
 0x174   : > { %1683 = vst [vmem:[%s2774_s6 + $0x3c0] sm:$0xff] %v1533_v12  ;;  %1620 = vst [vmem:[%s2774_s6 + $0x1c8] sm:$0xff] %v1280_v14  ;;  %v1536_v16 = vadd.f32 %v2769_v31, %v1535_v17 }
 0x175   : > { %1686 = vst [vmem:[%s2774_s6 + $0x3d8] sm:$0xff] %v1544_v15 }
 0x176   : > { %1684 = vst [vmem:[%s2774_s6 + $0x3c8] sm:$0xff] %v1536_v16 }
 0x177   : > { %v2238_v18 = vpop.f32.mrb[60].mxu0 }
 0x178   : > { %v1301_v19 = vadd.f32 %v2238_v18, %v2769_v31  ;;  %v1292_v21 = vpop.f32.mrb[61].mxu0 }
 0x179   : > { %v1293_v22 = vadd.f32 %v2769_v31, %v1292_v21  ;;  %v2239_v23 = vpop.f32.mrb[62].mxu0  ;;  %v2302_v24 = vpop.f32.mrb[60].mxu1 }
 0x17a   : > { %1625 = vst [vmem:[%s2774_s6 + $0x1f0] sm:$0xff] %v1301_v19  ;;  %v1304_v5 = vadd.f32 %v2239_v23, %v2769_v31  ;;  %v1295_v25 = vpop.f32.mrb[63].mxu0  ;;  %v1557_v26 = vadd.f32 %v2302_v24, %v2769_v31  ;;  %v1548_v27 = vpop.f32.mrb[61].mxu1 }
 0x17b   : > { %1623 = vst [vmem:[%s2774_s6 + $0x1e0] sm:$0xff] %v1293_v22  ;;  %v1296_v29 = vadd.f32 %v2769_v31, %v1295_v25  ;;  %v1549_v30 = vadd.f32 %v2769_v31, %v1548_v27  ;;  %v2303_v20 = vpop.f32.mrb[62].mxu1 }
 0x17c   : > { %1626 = vst [vmem:[%s2774_s6 + $0x1f8] sm:$0xff] %v1304_v5  ;;  %1689 = vst [vmem:[%s2774_s6 + $0x3f0] sm:$0xff] %v1557_v26  ;;  %v1560_v28 = vadd.f32 %v2303_v20, %v2769_v31  ;;  %v1551_v32 = vpop.f32.mrb[63].mxu1 }
 0x17d   : > { %1624 = vst [vmem:[%s2774_s6 + $0x1e8] sm:$0xff] %v1296_v29  ;;  %1687 = vst [vmem:[%s2774_s6 + $0x3e0] sm:$0xff] %v1549_v30  ;;  %v1552_v11 = vadd.f32 %v2769_v31, %v1551_v32 }
 0x17e   : > { %1690 = vst [vmem:[%s2774_s6 + $0x3f8] sm:$0xff] %v1560_v28 }
 0x17f   : > { %1688 = vst [vmem:[%s2774_s6 + $0x3e8] sm:$0xff] %v1552_v11 }
 0x180 PF: > { %s15_s18 = sadd.s32 1, %s2344_s18  }
 0x181   : > { %p12_p4 = scmp.ge.s32.totalorder %s15_s18, 4  }
 0x183   :  { %14 = sbr.rel (!%p12_p4) target bundleno = 1 (0x1), region = 70 }

// kernel: forward.29
= control target key start
LH: loop header
LB: loop body
LE: loop exit
PB: predicated region body
PF: predicated region fallthrough
CT: control target
= control target key end

     0   :  { %s4774_s24 = smov 0   ;;  %s6488_s0 = inlined_call_operand.vmem [shape: bf16[2048,128], index: 0, kind: input, shape index: {}]   ;;  %s6489_s1 = inlined_call_operand.vmem [shape: bf16[128,128], index: 1, kind: input, shape index: {}]   ;;  %s6490_s2 = inlined_call_operand.vmem [shape: f32[1,128], index: 2, kind: input, shape index: {}]   ;;  %s6491_s3 = inlined_call_operand.vmem [shape: bf16[2048,128], index: 3, kind: input, shape index: {}]   ;;  %s6492_s4 = inlined_call_operand.vmem [shape: f32[1,128], index: 4, kind: input, shape index: {}]   ;;  %s6493_s5 = inlined_call_operand.vmem [shape: f32[1,128], index: 5, kind: input, shape index: {}]   ;;  %s6494_s6 = inlined_call_operand.vmem [shape: bf16[2048,128], index: 6, kind: output, shape index: {0}]   ;;  %s6495_s7 = inlined_call_operand.vmem [shape: f32[16,128], index: 7, kind: output, shape index: {1}]  }
   0x1 LB: > { %s4780_s25 = sadd.s32 4294967295, %s4732_s24   ;;  %p3365_p0 = scmp.ge.s32.totalorder %s4732_s24, 1  ;;  %s4732_s24 = sphi %s4774_s24, %s18_s24  }
   0x2   : > { %p252_p1 = scmp.lt.s32.totalorder %s4732_s24, 3 }
   0x4   : > { %p253_p2 = pnand %p3365_p0, %p252_p1 }
   0x6   : > { %256 = sbr.rel (%p253_p2) target bundleno = 550 (0x226), region = 44 }
   0xd   : > { %v4648_v0 = vld [vmem:[%s6489_s1] sm:$0xff]   ;;  %s3366_s28 = sshll.u32 %s4780_s25, 7  ;;  %v4649_v1 = vld [vmem:[%s6489_s1 + $0x8] sm:$0xff]   ;;  %v4650_v2 = vld [vmem:[%s6489_s1 + $0x10] sm:$0xff]   ;;  %p311_p4 = scmp.lt.s32.totalorder %s4780_s25, 1 }
   0xe   : > { %p294_p3 = scmp.lt.s32.totalorder %s3366_s28, 255  ;;  %4480 = vmatprep.subr.bf16.mxu0 %v4648_v0  ;;  %4624 = vmatprep.subr.bf16.mxu1 %v4648_v0  ;;  %v4651_v3 = vld [vmem:[%s6489_s1 + $0x18] sm:$0xff]   ;;  %v4652_v5 = vld [vmem:[%s6489_s1 + $0x20] sm:$0xff]   ;;  %v4653_v6 = vld [vmem:[%s6489_s1 + $0x28] sm:$0xff]  }
   0xf   : > { %4481 = vmatpush3.bf16.msra.mxu0 %v4648_v0  ;;  %4632 = vmatpush3.bf16.msra.mxu1 %v4648_v0  ;;  %v4654_v7 = vld [vmem:[%s6489_s1 + $0x30] sm:$0xff]   ;;  %v4655_v8 = vld [vmem:[%s6489_s1 + $0x38] sm:$0xff]   ;;  %s6753_s25 = smov (!%p311_p4, %s4780_s25), 1 }
  0x10   : > { %s6751_s28 = smov (!%p294_p3, %s3366_s28), 255  ;;  %4482 = vmatprep.subr.bf16.mxu0 %v4649_v1  ;;  %4625 = vmatprep.subr.bf16.mxu1 %v4649_v1 }
  0x11   : > { %s4794_s10 = sshll.u32 %s6751_s28, 2 }
  0x12   : > { %s4800_s13 = scalar_lea.vmem %s6488_s0, %s4794_s10  ;;  %s4885_s28 = scalar_lea.vmem %s6491_s3, %s4794_s10 }
  0x13   : > { %4483 = vmatpush3.bf16.msra.mxu0 %v4649_v1  ;;  %4633 = vmatpush3.bf16.msra.mxu1 %v4649_v1  ;;  %v4656_v4 = vld [vmem:[%s4800_s13] sm:$0xff]   ;;  %v4657_v9 = vld [vmem:[%s4800_s13 + $0x8] sm:$0xff]   ;;  %v4658_v10 = vld [vmem:[%s4800_s13 + $0x10] sm:$0xff]   ;;  %s5287_s15 = scalar_lea.vmem %s6494_s6, %s4794_s10 }
  0x14   : > { %4484 = vmatprep.subr.bf16.mxu0 %v4650_v2  ;;  %4626 = vmatprep.subr.bf16.mxu1 %v4650_v2  ;;  %v4659_v11 = vld [vmem:[%s4800_s13 + $0x18] sm:$0xff]   ;;  %v4660_v12 = vld [vmem:[%s4800_s13 + $0x20] sm:$0xff]   ;;  %v4689_v14 = vld [vmem:[%s4800_s13 + $0x108] sm:$0xff]  }
  0x15   : > { %4496 = vmatprep.mubr.bf16.mxu0 %v4656_v4  ;;  %v4688_v13 = vld [vmem:[%s4800_s13 + $0x100] sm:$0xff]   ;;  %v4690_v15 = vld [vmem:[%s4800_s13 + $0x110] sm:$0xff]   ;;  %v4661_v16 = vld [vmem:[%s4800_s13 + $0x28] sm:$0xff]  }
  0x16   : > { %4560 = vmatprep.mubr.bf16.mxu1 %v4688_v13  ;;  %v4662_v17 = vld [vmem:[%s4800_s13 + $0x30] sm:$0xff]   ;;  %v4691_v18 = vld [vmem:[%s4800_s13 + $0x118] sm:$0xff]   ;;  %v4692_v19 = vld [vmem:[%s4800_s13 + $0x120] sm:$0xff]  }
  0x17   : > { %4485 = vmatpush3.bf16.msra.mxu0 %v4650_v2  ;;  %4634 = vmatpush3.bf16.msra.mxu1 %v4650_v2  ;;  %v4663_v20 = vld [vmem:[%s4800_s13 + $0x38] sm:$0xff]   ;;  %v4664_v21 = vld [vmem:[%s4800_s13 + $0x40] sm:$0xff]   ;;  %v4693_v22 = vld [vmem:[%s4800_s13 + $0x128] sm:$0xff]  }
  0x18   : > { %4486 = vmatprep.subr.bf16.mxu0 %v4651_v3  ;;  %4627 = vmatprep.subr.bf16.mxu1 %v4651_v3  ;;  %v4694_v23 = vld [vmem:[%s4800_s13 + $0x130] sm:$0xff]   ;;  %v4665_v24 = vld [vmem:[%s4800_s13 + $0x48] sm:$0xff]   ;;  %v4695_v26 = vld [vmem:[%s4800_s13 + $0x138] sm:$0xff]  }
  0x19   : > { %v4666_v25 = vld [vmem:[%s4800_s13 + $0x50] sm:$0xff]   ;;  %v4696_v27 = vld [vmem:[%s4800_s13 + $0x140] sm:$0xff]   ;;  %v4667_v28 = vld [vmem:[%s4800_s13 + $0x58] sm:$0xff]  }
  0x1a   : > { %v4668_v29 = vld [vmem:[%s4800_s13 + $0x60] sm:$0xff]   ;;  %v4697_v30 = vld [vmem:[%s4800_s13 + $0x148] sm:$0xff]   ;;  %v4698_v31 = vld [vmem:[%s4800_s13 + $0x150] sm:$0xff]  }
  0x1b   : > { %4487 = vmatpush3.bf16.msra.mxu0 %v4651_v3  ;;  %4635 = vmatpush3.bf16.msra.mxu1 %v4651_v3  ;;  %v4669_v32 = vld [vmem:[%s4800_s13 + $0x68] sm:$0xff]   ;;  %v4670_v33 = vld [vmem:[%s4800_s13 + $0x70] sm:$0xff]   ;;  %v4699_v34 = vld [vmem:[%s4800_s13 + $0x158] sm:$0xff]  }
  0x1c   : > { %4488 = vmatprep.subr.bf16.mxu0 %v4652_v5  ;;  %4628 = vmatprep.subr.bf16.mxu1 %v4652_v5  ;;  %v4700_v35 = vld [vmem:[%s4800_s13 + $0x160] sm:$0xff]   ;;  %v4671_v36 = vld [vmem:[%s4800_s13 + $0x78] sm:$0xff]   ;;  %v4701_v38 = vld [vmem:[%s4800_s13 + $0x168] sm:$0xff]  }
  0x1d   : > { %v4672_v37 = vld [vmem:[%s4800_s13 + $0x80] sm:$0xff]   ;;  %v4702_v39 = vld [vmem:[%s4800_s13 + $0x170] sm:$0xff]   ;;  %v4673_v40 = vld [vmem:[%s4800_s13 + $0x88] sm:$0xff]  }
  0x1e   : > { %v4674_v41 = vld [vmem:[%s4800_s13 + $0x90] sm:$0xff]   ;;  %v4703_v42 = vld [vmem:[%s4800_s13 + $0x178] sm:$0xff]   ;;  %v4704_v43 = vld [vmem:[%s4800_s13 + $0x180] sm:$0xff]  }
  0x1f   : > { %4489 = vmatpush3.bf16.msra.mxu0 %v4652_v5  ;;  %4636 = vmatpush3.bf16.msra.mxu1 %v4652_v5  ;;  %v4675_v44 = vld [vmem:[%s4800_s13 + $0x98] sm:$0xff]   ;;  %v4676_v45 = vld [vmem:[%s4800_s13 + $0xa0] sm:$0xff]   ;;  %v4705_v46 = vld [vmem:[%s4800_s13 + $0x188] sm:$0xff]  }
  0x20   : > { %4490 = vmatprep.subr.bf16.mxu0 %v4653_v6  ;;  %4629 = vmatprep.subr.bf16.mxu1 %v4653_v6  ;;  %v4706_v47 = vld [vmem:[%s4800_s13 + $0x190] sm:$0xff]   ;;  %v4677_v48 = vld [vmem:[%s4800_s13 + $0xa8] sm:$0xff]   ;;  %v4707_v50 = vld [vmem:[%s4800_s13 + $0x198] sm:$0xff]  }
  0x21   : > { %v4678_v49 = vld [vmem:[%s4800_s13 + $0xb0] sm:$0xff]   ;;  %v4708_v51 = vld [vmem:[%s4800_s13 + $0x1a0] sm:$0xff]   ;;  %v4679_v52 = vld [vmem:[%s4800_s13 + $0xb8] sm:$0xff]  }
  0x22   : > { %v4680_v53 = vld [vmem:[%s4800_s13 + $0xc0] sm:$0xff]   ;;  %v4709_v54 = vld [vmem:[%s4800_s13 + $0x1a8] sm:$0xff]   ;;  %v4710_v55 = vld [vmem:[%s4800_s13 + $0x1b0] sm:$0xff]  }
  0x23   : > { %4491 = vmatpush3.bf16.msra.mxu0 %v4653_v6  ;;  %4637 = vmatpush3.bf16.msra.mxu1 %v4653_v6  ;;  %v4681_v56 = vld [vmem:[%s4800_s13 + $0xc8] sm:$0xff]   ;;  %v4682_v57 = vld [vmem:[%s4800_s13 + $0xd0] sm:$0xff]   ;;  %v4711_v58 = vld [vmem:[%s4800_s13 + $0x1b8] sm:$0xff]  }
  0x24   : > { %4492 = vmatprep.subr.bf16.mxu0 %v4654_v7  ;;  %4630 = vmatprep.subr.bf16.mxu1 %v4654_v7  ;;  %v4712_v59 = vld [vmem:[%s4800_s13 + $0x1c0] sm:$0xff]   ;;  %v4683_v60 = vld [vmem:[%s4800_s13 + $0xd8] sm:$0xff]   ;;  %v4713_v62 = vld [vmem:[%s4800_s13 + $0x1c8] sm:$0xff]  }
  0x25   : > { %v4684_v61 = vld [vmem:[%s4800_s13 + $0xe0] sm:$0xff]   ;;  %v4714_v63 = vld [vmem:[%s4800_s13 + $0x1d0] sm:$0xff]   ;;  %v4685_v0 = vld [vmem:[%s4800_s13 + $0xe8] sm:$0xff]  }
  0x26   : > { %v4686_v1 = vld [vmem:[%s4800_s13 + $0xf0] sm:$0xff]   ;;  %v4715_v2 = vld [vmem:[%s4800_s13 + $0x1d8] sm:$0xff]   ;;  %v4716_v3 = vld [vmem:[%s4800_s13 + $0x1e0] sm:$0xff]  }
  0x27   : > { %4493 = vmatpush3.bf16.msra.mxu0 %v4654_v7  ;;  %4638 = vmatpush3.bf16.msra.mxu1 %v4654_v7  ;;  %v4687_v4 = vld [vmem:[%s4800_s13 + $0xf8] sm:$0xff]   ;;  %v4717_v5 = vld [vmem:[%s4800_s13 + $0x1e8] sm:$0xff]   ;;  %v4718_v6 = vld [vmem:[%s4800_s13 + $0x1f0] sm:$0xff]  }
  0x28   : > { %4494 = vmatprep.subr.bf16.mxu0 %v4655_v8  ;;  %4631 = vmatprep.subr.bf16.mxu1 %v4655_v8  ;;  %v4719_v7 = vld [vmem:[%s4800_s13 + $0x1f8] sm:$0xff]  }
  0x2b   : > { %4495 = vmatpush3.bf16.msra.mxu0 %v4655_v8  ;;  %4639 = vmatpush3.bf16.msra.mxu1 %v4655_v8  ;;  %v4282_v8 = vld [vmem:[%s4885_s28 + $0x8] sm:$0xff]  }
  0x2c   : > { %v3713_v13 = vunpack.c.h.bf16 %v4282_v8 }
  0x2e   : > { %4497 = vmatmul.mubr.bf16.vlgmr.msra.gmra.mrb[0].mxu0 %v4657_v9  ;;  %4561 = vmatmul.mubr.bf16.vlgmr.msra.gmra.mrb[0].mxu1 %v4689_v14  ;;  %v3707_v9 = vld [vmem:[%s4885_s28] sm:$0xff]   ;;  %v4284_v14 = vld [vmem:[%s4885_s28 + $0x18] sm:$0xff]  }
  0x2f   : > { %4500 = vmatprep.mubr.bf16.mxu0 %v4658_v10  ;;  %4564 = vmatprep.mubr.bf16.mxu1 %v4690_v15  ;;  %v3712_v10 = vunpack.c.l.bf16 %v4282_v8  ;;  %v4283_v15 = vld [vmem:[%s4885_s28 + $0x10] sm:$0xff]  }
  0x30   : > { %v4303_v8 = vld [vmem:[%s4885_s28 + $0xb0] sm:$0xff]  }
  0x36   : > { %4501 = vmatmul.mubr.bf16.gmra.mrb[4].mxu0 %v4659_v11  ;;  %4565 = vmatmul.mubr.bf16.gmra.mrb[4].mxu1 %v4691_v18  ;;  %v3708_v11 = vunpack.c.l.bf16 %v3707_v9  ;;  %v4901_v18 = vld [vmem:[%s6493_s5] ss:$0 sm:$0xff] }
  0x37   : > { %4504 = vmatprep.mubr.bf16.mxu0 %v4660_v12  ;;  %4568 = vmatprep.mubr.bf16.mxu1 %v4692_v19  ;;  %v4892_v12 = vld [vmem:[%s6492_s4] ss:$0 sm:$0xff]  ;;  %v3709_v19 = vunpack.c.h.bf16 %v3707_v9 }
  0x3e   : > { %4505 = vmatmul.mubr.bf16.gmra.mrb[8].mxu0 %v4661_v16  ;;  %4569 = vmatmul.mubr.bf16.gmra.mrb[8].mxu1 %v4693_v22  ;;  %v1709_v16 = vmul.f32 %v3712_v10, %v4892_v12  ;;  %v4285_v22 = vld [vmem:[%s4885_s28 + $0x20] sm:$0xff]  }
  0x3f   : > { %4508 = vmatprep.mubr.bf16.mxu0 %v4662_v17  ;;  %4572 = vmatprep.mubr.bf16.mxu1 %v4694_v23  ;;  %v1707_v17 = vmul.f32 %v3708_v11, %v4892_v12  ;;  %v1710_v23 = vmul.f32 %v3713_v13, %v4892_v12  ;;  %v4291_v13 = vld [vmem:[%s4885_s28 + $0x50] sm:$0xff]  }
  0x46   : > { %4509 = vmatmul.mubr.bf16.gmra.mrb[12].mxu0 %v4663_v20  ;;  %4573 = vmatmul.mubr.bf16.gmra.mrb[12].mxu1 %v4695_v26  ;;  %v3720_v20 = vunpack.c.l.bf16 %v4284_v14  ;;  %v3717_v26 = vunpack.c.h.bf16 %v4283_v15 }
  0x47   : > { %4512 = vmatprep.mubr.bf16.mxu0 %v4664_v21  ;;  %4576 = vmatprep.mubr.bf16.mxu1 %v4696_v27  ;;  %v4286_v21 = vld [vmem:[%s4885_s28 + $0x28] sm:$0xff]   ;;  %v4907_v27 = vadd.f32 %v4901_v18, %v1709_v16 }
  0x4e   : > { %4513 = vmatmul.mubr.bf16.gmra.mrb[16].mxu0 %v4665_v24  ;;  %4577 = vmatmul.mubr.bf16.gmra.mrb[16].mxu1 %v4697_v30  ;;  %v3716_v24 = vunpack.c.l.bf16 %v4283_v15  ;;  %v3724_v30 = vunpack.c.l.bf16 %v4285_v22 }
  0x4f   : > { %4516 = vmatprep.mubr.bf16.mxu0 %v4666_v25  ;;  %4580 = vmatprep.mubr.bf16.mxu1 %v4698_v31  ;;  %v3721_v25 = vunpack.c.h.bf16 %v4284_v14  ;;  %v1708_v31 = vmul.f32 %v3709_v19, %v4892_v12 }
  0x56   : > { %4517 = vmatmul.mubr.bf16.gmra.mrb[20].mxu0 %v4667_v28  ;;  %4581 = vmatmul.mubr.bf16.gmra.mrb[20].mxu1 %v4699_v34  ;;  %v4910_v28 = vadd.f32 %v4901_v18, %v1707_v17  ;;  %v3725_v34 = vunpack.c.h.bf16 %v4285_v22 }
  0x57   : > { %4520 = vmatprep.mubr.bf16.mxu0 %v4668_v29  ;;  %4584 = vmatprep.mubr.bf16.mxu1 %v4700_v35  ;;  %v3728_v29 = vunpack.c.l.bf16 %v4286_v21  ;;  %v4915_v35 = vadd.f32 %v4901_v18, %v1710_v23  ;;  %v4294_v23 = vld [vmem:[%s4885_s28 + $0x68] sm:$0xff]  }
  0x5e   : > { %4521 = vmatmul.mubr.bf16.gmra.mrb[24].mxu0 %v4669_v32  ;;  %4585 = vmatmul.mubr.bf16.gmra.mrb[24].mxu1 %v4701_v38  ;;  %v1713_v32 = vmul.f32 %v3720_v20, %v4892_v12  ;;  %v1712_v38 = vmul.f32 %v3717_v26, %v4892_v12 }
  0x5f   : > { %4524 = vmatprep.mubr.bf16.mxu0 %v4670_v33  ;;  %4588 = vmatprep.mubr.bf16.mxu1 %v4702_v39  ;;  %v3729_v33 = vunpack.c.h.bf16 %v4286_v21  ;;  %v4288_v39 = vld [vmem:[%s4885_s28 + $0x38] sm:$0xff]  }
  0x66   : > { %4525 = vmatmul.mubr.bf16.gmra.mrb[28].mxu0 %v4671_v36  ;;  %4589 = vmatmul.mubr.bf16.gmra.mrb[28].mxu1 %v4703_v42  ;;  %v1711_v36 = vmul.f32 %v3716_v24, %v4892_v12  ;;  %v1717_v42 = vmul.f32 %v3728_v29, %v4892_v12  ;;  %v4293_v24 = vld [vmem:[%s4885_s28 + $0x60] sm:$0xff]   ;;  %v3748_v29 = vunpack.c.l.bf16 %v4291_v13 }
  0x67   : > { %4528 = vmatprep.mubr.bf16.mxu0 %v4672_v37  ;;  %4592 = vmatprep.mubr.bf16.mxu1 %v4704_v43  ;;  %v1714_v37 = vmul.f32 %v3721_v25, %v4892_v12  ;;  %v1715_v43 = vmul.f32 %v3724_v30, %v4892_v12 }
  0x6e   : > { %4529 = vmatmul.mubr.bf16.gmra.mrb[32].mxu0 %v4673_v40  ;;  %4593 = vmatmul.mubr.bf16.gmra.mrb[32].mxu1 %v4705_v46  ;;  %v4930_v46 = vadd.f32 %v4901_v18, %v1713_v32  ;;  %v4308_v40 = vld [vmem:[%s4885_s28 + $0xd8] sm:$0xff]  }
  0x6f   : > { %4532 = vmatprep.mubr.bf16.mxu0 %v4674_v41  ;;  %4596 = vmatprep.mubr.bf16.mxu1 %v4706_v47  ;;  %v1718_v47 = vmul.f32 %v3729_v33, %v4892_v12 }
  0x76   : > { %4533 = vmatmul.mubr.bf16.gmra.mrb[36].mxu0 %v4675_v44  ;;  %4597 = vmatmul.mubr.bf16.gmra.mrb[36].mxu1 %v4707_v50  ;;  %v4287_v44 = vld [vmem:[%s4885_s28 + $0x30] sm:$0xff]   ;;  %v4289_v50 = vld [vmem:[%s4885_s28 + $0x40] sm:$0xff]  }
  0x77   : > { %4536 = vmatprep.mubr.bf16.mxu0 %v4676_v45  ;;  %4600 = vmatprep.mubr.bf16.mxu1 %v4708_v51  ;;  %v4927_v45 = vadd.f32 %v4901_v18, %v1708_v31  ;;  %v3741_v21 = vunpack.c.h.bf16 %v4289_v50 }
  0x7e   : > { %4537 = vmatmul.mubr.bf16.gmra.mrb[40].mxu0 %v4677_v48  ;;  %4601 = vmatmul.mubr.bf16.gmra.mrb[40].mxu1 %v4709_v54  ;;  %v1716_v48 = vmul.f32 %v3725_v34, %v4892_v12  ;;  %v3736_v54 = vunpack.c.l.bf16 %v4288_v39  ;;  %v3749_v34 = vunpack.c.h.bf16 %v4291_v13 }
  0x7f   : > { %4540 = vmatprep.mubr.bf16.mxu0 %v4678_v49  ;;  %4604 = vmatprep.mubr.bf16.mxu1 %v4710_v55  ;;  %v4290_v49 = vld [vmem:[%s4885_s28 + $0x48] sm:$0xff]   ;;  %v4944_v55 = vadd.f32 %v4901_v18, %v1712_v38  ;;  %v3760_v38 = vunpack.c.l.bf16 %v4294_v23 }
  0x86   : > { %4541 = vmatmul.mubr.bf16.gmra.mrb[44].mxu0 %v4679_v52  ;;  %4605 = vmatmul.mubr.bf16.gmra.mrb[44].mxu1 %v4711_v58  ;;  %v4938_v52 = vadd.f32 %v4901_v18, %v1711_v36  ;;  %v3733_v58 = vunpack.c.h.bf16 %v4287_v44 }
  0x87   : > { %4544 = vmatprep.mubr.bf16.mxu0 %v4680_v53  ;;  %4608 = vmatprep.mubr.bf16.mxu1 %v4712_v59  ;;  %v4941_v53 = vadd.f32 %v4901_v18, %v1714_v37  ;;  %v4947_v59 = vadd.f32 %v4901_v18, %v1717_v42  ;;  %v1724_v42 = vmul.f32 %v3741_v21, %v4892_v12  ;;  %v4298_v21 = vld [vmem:[%s4885_s28 + $0x88] sm:$0xff]  }
  0x88   : > { %v1720_v11 = vmul.f32 %v3733_v58, %v4892_v12 }
  0x8a   : > { %v4988_v33 = vadd.f32 %v4901_v18, %v1720_v11  ;;  %v5015_v11 = vadd.f32 %v4901_v18, %v1724_v42 }
  0x8e   : > { %4545 = vmatmul.mubr.bf16.gmra.mrb[48].mxu0 %v4681_v56  ;;  %4609 = vmatmul.mubr.bf16.gmra.mrb[48].mxu1 %v4713_v62  ;;  %v3732_v56 = vunpack.c.l.bf16 %v4287_v44  ;;  %v3740_v62 = vunpack.c.l.bf16 %v4289_v50  ;;  %v3761_v44 = vunpack.c.h.bf16 %v4294_v23  ;;  %v1727_v50 = vmul.f32 %v3748_v29, %v4892_v12 }
  0x8f   : > { %4548 = vmatprep.mubr.bf16.mxu0 %v4682_v57  ;;  %4612 = vmatprep.mubr.bf16.mxu1 %v4714_v63  ;;  %v3737_v57 = vunpack.c.h.bf16 %v4288_v39  ;;  %v3756_v39 = vunpack.c.l.bf16 %v4293_v24 }
  0x90   : > { %v1719_v9 = vmul.f32 %v3732_v56, %v4892_v12  ;;  %v1723_v17 = vmul.f32 %v3740_v62, %v4892_v12  ;;  %v4296_v62 = vld [vmem:[%s4885_s28 + $0x78] sm:$0xff]   ;;  %v4301_v56 = vld [vmem:[%s4885_s28 + $0xa0] sm:$0xff]  }
  0x91   : > { %v1722_v10 = vmul.f32 %v3737_v57, %v4892_v12  ;;  %v3768_v29 = vunpack.c.l.bf16 %v4296_v62  ;;  %v3789_v19 = vunpack.c.h.bf16 %v4301_v56 }
  0x92   : > { %v4982_v31 = vadd.f32 %v4901_v18, %v1719_v9  ;;  %v4994_v37 = vadd.f32 %v4901_v18, %v1723_v17  ;;  %v1731_v9 = vmul.f32 %v3756_v39, %v4892_v12 }
  0x93   : > { %v4985_v32 = vadd.f32 %v4901_v18, %v1722_v10  ;;  %v4295_v10 = vld [vmem:[%s4885_s28 + $0x70] sm:$0xff]  }
  0x94   : > { %v3765_v39 = vunpack.c.h.bf16 %v4295_v10 }
  0x96   : > { %4549 = vmatmul.mubr.bf16.gmra.mrb[52].mxu0 %v4683_v60  ;;  %4613 = vmatmul.mubr.bf16.gmra.mrb[52].mxu1 %v4715_v2  ;;  %v4950_v60 = vadd.f32 %v4901_v18, %v1715_v43  ;;  %v4958_v2 = vadd.f32 %v4901_v18, %v1716_v48 }
  0x97   : > { %4552 = vmatprep.mubr.bf16.mxu0 %v4684_v61  ;;  %4616 = vmatprep.mubr.bf16.mxu1 %v4716_v3  ;;  %v3744_v61 = vunpack.c.l.bf16 %v4290_v49 }
  0x99   : > { %v1725_v16 = vmul.f32 %v3744_v61, %v4892_v12  ;;  %v1728_v61 = vmul.f32 %v3749_v34, %v4892_v12  ;;  %v3764_v34 = vunpack.c.l.bf16 %v4295_v10  ;;  %v3777_v10 = vunpack.c.h.bf16 %v4298_v21 }
  0x9b   : > { %v4991_v36 = vadd.f32 %v4901_v18, %v1725_v16  ;;  %v1734_v16 = vmul.f32 %v3761_v44, %v4892_v12  ;;  %v3776_v44 = vunpack.c.l.bf16 %v4298_v21  ;;  %v3788_v21 = vunpack.c.l.bf16 %v4301_v56  ;;  %v4304_v56 = vld [vmem:[%s4885_s28 + $0xb8] sm:$0xff]  }
  0x9c   : > { %v3801_v3 = vunpack.c.h.bf16 %v4304_v56 }
  0x9e   : > { %4553 = vmatmul.mubr.bf16.gmra.mrb[56].mxu0 %v4685_v0  ;;  %4617 = vmatmul.mubr.bf16.gmra.mrb[56].mxu1 %v4717_v5  ;;  %v1721_v5 = vmul.f32 %v3736_v54, %v4892_v12 }
  0x9f   : > { %4556 = vmatprep.mubr.bf16.mxu0 %v4686_v1  ;;  %4620 = vmatprep.mubr.bf16.mxu1 %v4718_v6  ;;  %v4955_v1 = vadd.f32 %v4901_v18, %v1718_v47  ;;  %v3745_v6 = vunpack.c.h.bf16 %v4290_v49  ;;  %v3757_v47 = vunpack.c.h.bf16 %v4293_v24  ;;  %v5026_v24 = vadd.f32 %v4901_v18, %v1727_v50 }
  0xa0   : > { %v4978_v25 = vadd.f32 %v4901_v18, %v1721_v5  ;;  %v4300_v5 = vld [vmem:[%s4885_s28 + $0x98] sm:$0xff]  }
  0xa1   : > { %v1726_v26 = vmul.f32 %v3745_v6, %v4892_v12  ;;  %v1732_v17 = vmul.f32 %v3757_v47, %v4892_v12  ;;  %v1736_v6 = vmul.f32 %v3765_v39, %v4892_v12  ;;  %v3784_v48 = vunpack.c.l.bf16 %v4300_v5 }
  0xa2   : > { %v1742_v39 = vmul.f32 %v3777_v10, %v4892_v12  ;;  %v3785_v20 = vunpack.c.h.bf16 %v4300_v5 }
  0xa3   : > { %v5000_v49 = vadd.f32 %v4901_v18, %v1726_v26  ;;  %v5046_v23 = vadd.f32 %v4901_v18, %v1732_v17  ;;  %v4299_v17 = vld [vmem:[%s4885_s28 + $0x90] sm:$0xff]  }
  0xa4   : > { %v3780_v58 = vunpack.c.l.bf16 %v4299_v17 }
  0xa6   : > { %4557 = vmatmul.mubr.bf16.gmra.mrb[60].mxu0 %v4687_v4  ;;  %4621 = vmatmul.mubr.bf16.gmra.mrb[60].mxu1 %v4719_v7  ;;  %v4292_v7 = vld [vmem:[%s4885_s28 + $0x58] sm:$0xff]   ;;  %v4305_v4 = vld [vmem:[%s4885_s28 + $0xc0] sm:$0xff]  }
  0xa7   : > { %v3752_v22 = vunpack.c.l.bf16 %v4292_v7  ;;  %v3753_v30 = vunpack.c.h.bf16 %v4292_v7  ;;  %v1733_v7 = vmul.f32 %v3760_v38, %v4892_v12  ;;  %v3769_v38 = vunpack.c.h.bf16 %v4296_v62 }
  0xa9   : > { %v1729_v43 = vmul.f32 %v3752_v22, %v4892_v12  ;;  %v1730_v54 = vmul.f32 %v3753_v30, %v4892_v12  ;;  %v4297_v22 = vld [vmem:[%s4885_s28 + $0x80] sm:$0xff]   ;;  %v5032_v30 = vadd.f32 %v4901_v18, %v1728_v61  ;;  %v5035_v42 = vadd.f32 %v4901_v18, %v1733_v7 }
  0xaa   : > { %v3772_v47 = vunpack.c.l.bf16 %v4297_v22  ;;  %v5043_v61 = vadd.f32 %v4901_v18, %v1734_v16  ;;  %v1738_v16 = vmul.f32 %v3769_v38, %v4892_v12  ;;  %v1741_v7 = vmul.f32 %v3776_v44, %v4892_v12 }
  0xab   : > { %v5018_v13 = vadd.f32 %v4901_v18, %v1729_v43  ;;  %v5029_v26 = vadd.f32 %v4901_v18, %v1730_v54  ;;  %v5038_v43 = vadd.f32 %v4901_v18, %v1731_v9  ;;  %v1737_v9 = vmul.f32 %v3768_v29, %v4892_v12 }
  0xac   : > { %v1735_v54 = vmul.f32 %v3764_v34, %v4892_v12  ;;  %v1739_v29 = vmul.f32 %v3772_v47, %v4892_v12  ;;  %v3773_v50 = vunpack.c.h.bf16 %v4297_v22  ;;  %v4302_v34 = vld [vmem:[%s4885_s28 + $0xa8] sm:$0xff]   ;;  %v5073_v44 = vadd.f32 %v4901_v18, %v1738_v16 }
  0xad   : > { %v5066_v38 = vadd.f32 %v4901_v18, %v1737_v9  ;;  %v5076_v47 = vadd.f32 %v4901_v18, %v1736_v6  ;;  %v3781_v22 = vunpack.c.h.bf16 %v4299_v17  ;;  %v5079_v57 = vadd.f32 %v4901_v18, %v1741_v7 }
  0xae   : > { %v5070_v62 = vadd.f32 %v4901_v18, %v1735_v54  ;;  %6533 = vst [vmem:[#allocation3_spill] sm:$0xff] %v5073_v44  ;;  %v5082_v9 = vadd.f32 %v4901_v18, %v1739_v29  ;;  %v3792_v10 = vunpack.c.l.bf16 %v4302_v34  ;;  %v1740_v5 = vmul.f32 %v3773_v50, %v4892_v12  ;;  %v4306_v50 = vld [vmem:[%s4885_s28 + $0xc8] sm:$0xff]  }
  0xaf   : > { %6532 = vst [vmem:[#allocation2_spill] sm:$0xff] %v5066_v38  ;;  %6534 = vst [vmem:[#allocation4_spill] sm:$0xff] %v5076_v47  ;;  %v1745_v54 = vmul.f32 %v3784_v48, %v4892_v12  ;;  %v3793_v16 = vunpack.c.h.bf16 %v4302_v34  ;;  %v5088_v17 = vadd.f32 %v4901_v18, %v1742_v39  ;;  %v1743_v7 = vmul.f32 %v3780_v58, %v4892_v12 }
  0xb0   : > { %6535 = vst [vmem:[#allocation5_spill] sm:$0xff] %v5079_v57  ;;  %6536 = vst [vmem:[#allocation6_spill] sm:$0xff] %v5082_v9  ;;  %v1746_v29 = vmul.f32 %v3785_v20, %v4892_v12  ;;  %v1744_v34 = vmul.f32 %v3781_v22, %v4892_v12  ;;  %v1749_v15 = vmul.f32 %v3792_v10, %v4892_v12  ;;  %v3800_v10 = vunpack.c.l.bf16 %v4304_v56 }
  0xb1   : > { %6537 = vst [vmem:[#allocation7_spill] sm:$0xff] %v5088_v17  ;;  %v1747_v58 = vmul.f32 %v3788_v21, %v4892_v12  ;;  %v5103_v20 = vadd.f32 %v4901_v18, %v1740_v5  ;;  %v5106_v14 = vadd.f32 %v4901_v18, %v1745_v54  ;;  %v1750_v48 = vmul.f32 %v3793_v16, %v4892_v12 }
  0xb2   : > { %v1748_v22 = vmul.f32 %v3789_v19, %v4892_v12  ;;  %v5114_v39 = vadd.f32 %v4901_v18, %v1743_v7  ;;  %v5117_v21 = vadd.f32 %v4901_v18, %v1746_v29  ;;  %v5120_v5 = vadd.f32 %v4901_v18, %v1744_v34 }
  0xb3   : > { %6538 = vst [vmem:[#allocation8_spill] sm:$0xff] %v5103_v20  ;;  %6539 = vst [vmem:[#allocation9_spill] sm:$0xff] %v5106_v14  ;;  %v3796_v54 = vunpack.c.l.bf16 %v4303_v8  ;;  %v3797_v16 = vunpack.c.h.bf16 %v4303_v8  ;;  %v5123_v19 = vadd.f32 %v4901_v18, %v1749_v15  ;;  %v5126_v0 = vadd.f32 %v4901_v18, %v1747_v58 }
  0xb4   : > { %6540 = vst [vmem:[#allocation10_spill] sm:$0xff] %v5114_v39  ;;  %6541 = vst [vmem:[#allocation11_spill] sm:$0xff] %v5117_v21  ;;  %v3808_v7 = vunpack.c.l.bf16 %v4306_v50  ;;  %v3804_v6 = vunpack.c.l.bf16 %v4305_v4  ;;  %v5131_v34 = vadd.f32 %v4901_v18, %v1750_v48  ;;  %v5134_v51 = vadd.f32 %v4901_v18, %v1748_v22  ;;  %v4307_v22 = vld [vmem:[%s4885_s28 + $0xd0] sm:$0xff]   ;;  %v4309_v39 = vld [vmem:[%s4885_s28 + $0xe0] sm:$0xff]  }
  0xb5   : > { %6542 = vst [vmem:[#allocation12_spill] sm:$0xff] %v5120_v5  ;;  %6543 = vst [vmem:[#allocation13_spill] sm:$0xff] %v5123_v19  ;;  %v1753_v56 = vmul.f32 %v3800_v10, %v4892_v12  ;;  %v3809_v58 = vunpack.c.h.bf16 %v4306_v50  ;;  %v1751_v63 = vmul.f32 %v3796_v54, %v4892_v12  ;;  %v1754_v48 = vmul.f32 %v3801_v3, %v4892_v12  ;;  %v4310_v54 = vld [vmem:[%s4885_s28 + $0xe8] sm:$0xff]  }
  0xb6   : > { %6544 = vst [vmem:[#allocation14_spill] sm:$0xff] %v5126_v0  ;;  %6545 = vst [vmem:[#allocation15_spill] sm:$0xff] %v5131_v34  ;;  %v1752_v41 = vmul.f32 %v3797_v16, %v4892_v12  ;;  %v1757_v15 = vmul.f32 %v3808_v7, %v4892_v12  ;;  %v1755_v10 = vmul.f32 %v3804_v6, %v4892_v12  ;;  %v3805_v29 = vunpack.c.h.bf16 %v4305_v4 }
  0xb7   : > { %6546 = vst [vmem:[#allocation16_spill] sm:$0xff] %v5134_v51  ;;  %v3816_v5 = vunpack.c.l.bf16 %v4308_v40  ;;  %v5154_v3 = vadd.f32 %v4901_v18, %v1753_v56  ;;  %v1758_v16 = vmul.f32 %v3809_v58, %v4892_v12  ;;  %v3812_v14 = vunpack.c.l.bf16 %v4307_v22 }
  0xb8   : > { %v3817_v19 = vunpack.c.h.bf16 %v4308_v40  ;;  %v5158_v8 = vadd.f32 %v4901_v18, %v1751_v63  ;;  %v5161_v6 = vadd.f32 %v4901_v18, %v1754_v48  ;;  %v5164_v7 = vadd.f32 %v4901_v18, %v1752_v41 }
  0xb9   : > { %6547 = vst [vmem:[#allocation17_spill] sm:$0xff] %v5154_v3  ;;  %v3813_v4 = vunpack.c.h.bf16 %v4307_v22  ;;  %v5167_v21 = vadd.f32 %v4901_v18, %v1757_v15  ;;  %v5170_v56 = vadd.f32 %v4901_v18, %v1755_v10  ;;  %v3824_v58 = vunpack.c.l.bf16 %v4310_v54  ;;  %v5200_v10 = vld [vmem:[%s4885_s28 + $0xf0] sm:$0xff]  }
  0xba   : > { %6548 = vst [vmem:[#allocation18_spill] sm:$0xff] %v5158_v8  ;;  %6549 = vst [vmem:[#allocation19_spill] sm:$0xff] %v5161_v6  ;;  %v3820_v50 = vunpack.c.l.bf16 %v4309_v39  ;;  %v1756_v40 = vmul.f32 %v3805_v29, %v4892_v12  ;;  %v1761_v63 = vmul.f32 %v3816_v5, %v4892_v12  ;;  %v3825_v51 = vunpack.c.h.bf16 %v4310_v54 }
  0xbb   : > { %6550 = vst [vmem:[#allocation20_spill] sm:$0xff] %v5164_v7  ;;  %6551 = vst [vmem:[#allocation21_spill] sm:$0xff] %v5167_v21  ;;  %v3821_v48 = vunpack.c.h.bf16 %v4309_v39  ;;  %v5176_v41 = vadd.f32 %v4901_v18, %v1758_v16  ;;  %v1759_v15 = vmul.f32 %v3812_v14, %v4892_v12  ;;  %v1762_v22 = vmul.f32 %v3817_v19, %v4892_v12  ;;  %v5185_v39 = vld [vmem:[%s4885_s28 + $0xf8] sm:$0xff]   ;;  %v4313_v21 = vld [vmem:[%s4885_s28 + $0x100] sm:$0xff]  }
  0xbc   : > { %6552 = vst [vmem:[#allocation22_spill] sm:$0xff] %v5170_v56  ;;  %v1760_v5 = vmul.f32 %v3813_v4, %v4892_v12  ;;  %v1765_v14 = vmul.f32 %v3824_v58, %v4892_v12  ;;  %v1763_v19 = vmul.f32 %v3820_v50, %v4892_v12  ;;  %v5192_v34 = vadd.f32 %v4901_v18, %v1756_v40  ;;  %v4314_v40 = vld [vmem:[%s4885_s28 + $0x108] sm:$0xff]  }
  0xbd   : > { %6553 = vst [vmem:[#allocation23_spill] sm:$0xff] %v5176_v41  ;;  %v5195_v0 = vadd.f32 %v4901_v18, %v1761_v63  ;;  %v1766_v29 = vmul.f32 %v3825_v51, %v4892_v12  ;;  %v1764_v4 = vmul.f32 %v3821_v48, %v4892_v12  ;;  %v5204_v16 = vadd.f32 %v4901_v18, %v1759_v15 }
  0xbe   : > { %6554 = vst [vmem:[#allocation24_spill] sm:$0xff] %v5192_v34  ;;  %v5207_v58 = vadd.f32 %v4901_v18, %v1762_v22  ;;  %v3832_v50 = vunpack.c.l.bf16 %v5185_v39  ;;  %v5213_v63 = vadd.f32 %v4901_v18, %v1760_v5  ;;  %v3840_v51 = vunpack.c.l.bf16 %v4314_v40 }
  0xbf   : > { %6555 = vst [vmem:[#allocation25_spill] sm:$0xff] %v5195_v0  ;;  %6556 = vst [vmem:[#allocation26_spill] sm:$0xff] %v5204_v16  ;;  %v3836_v56 = vunpack.c.l.bf16 %v4313_v21  ;;  %v3841_v48 = vunpack.c.h.bf16 %v4314_v40  ;;  %v5216_v7 = vadd.f32 %v4901_v18, %v1765_v14  ;;  %v5219_v54 = vadd.f32 %v4901_v18, %v1763_v19  ;;  %v5233_v14 = vld [vmem:[%s6490_s2] ss:$0 sm:$0xff] }
  0xc0   : > { %6557 = vst [vmem:[#allocation27_spill] sm:$0xff] %v5207_v58  ;;  %6558 = vst [vmem:[#allocation28_spill] sm:$0xff] %v5213_v63  ;;  %v3828_v15 = vunpack.c.l.bf16 %v5200_v10  ;;  %v3837_v22 = vunpack.c.h.bf16 %v4313_v21  ;;  %v5225_v3 = vadd.f32 %v4901_v18, %v1766_v29  ;;  %v5228_v5 = vadd.f32 %v4901_v18, %v1764_v4 }
  0xc1   : > { %6559 = vst [vmem:[#allocation29_spill] sm:$0xff] %v5216_v7  ;;  %6560 = vst [vmem:[#allocation30_spill] sm:$0xff] %v5219_v54  ;;  %v1769_v40 = vmul.f32 %v3832_v50, %v4892_v12  ;;  %v1773_v21 = vmul.f32 %v3840_v51, %v4892_v12  ;;  %v1771_v41 = vmul.f32 %v3836_v56, %v4892_v12  ;;  %v3833_v51 = vunpack.c.h.bf16 %v5185_v39 }
  0xc2   : > { %6561 = vst [vmem:[#allocation31_spill] sm:$0xff] %v5225_v3  ;;  %6562 = vst [vmem:[#allocation32_spill] sm:$0xff] %v5228_v5  ;;  %v1774_v4 = vmul.f32 %v3841_v48, %v4892_v12  ;;  %v1772_v0 = vmul.f32 %v3837_v22, %v4892_v12  ;;  %v1767_v50 = vmul.f32 %v3828_v15, %v4892_v12  ;;  %v4315_v15 = vld [vmem:[%s4885_s28 + $0x110] sm:$0xff]   ;;  %v6563_v5 = vmax.f32 %v4910_v28, 0.0 }
  0xc3   : > { %v5253_v8 = vadd.f32 %v4901_v18, %v1769_v40  ;;  %v5256_v19 = vadd.f32 %v4901_v18, %v1773_v21  ;;  %v5259_v39 = vadd.f32 %v4901_v18, %v1771_v41  ;;  %v5277_v7 = vmul.f32 %v3833_v51, %v4892_v12 }
  0xc4   : > { %v5265_v22 = vadd.f32 %v4901_v18, %v1774_v4  ;;  %v5274_v41 = vadd.f32 %v4901_v18, %v1767_v50  ;;  %v6565_v4 = vmax.f32 %v4915_v35, 0.0  ;;  %v6566_v28 = vmax.f32 %v4927_v45, 0.0 }
 0x101   : > { %v4498_v34 = vpop.f32.mrb[0].mxu0 }
 0x102   : > { %v942_v56 = vadd.f32 %v4498_v34, %v5233_v14  ;;  %v933_v6 = vpop.f32.mrb[1].mxu0  ;;  %v4316_v34 = vld [vmem:[%s4885_s28 + $0x118] sm:$0xff]  }
 0x103   : > { %v934_v63 = vadd.f32 %v5233_v14, %v933_v6  ;;  %v4499_v58 = vpop.f32.mrb[2].mxu0  ;;  %v5268_v6 = vadd.f32 %v4901_v18, %v1772_v0  ;;  %v3848_v40 = vunpack.c.l.bf16 %v4316_v34  ;;  %v3844_v0 = vunpack.c.l.bf16 %v4315_v15 }
 0x104   : > { %v945_v29 = vadd.f32 %v4499_v58, %v5233_v14  ;;  %v936_v48 = vpop.f32.mrb[3].mxu0  ;;  %v6564_v58 = vmax.f32 %v4907_v27, 0.0  ;;  %v3849_v20 = vunpack.c.h.bf16 %v4316_v34  ;;  %v3845_v27 = vunpack.c.h.bf16 %v4315_v15 }
 0x105   : > { %v2098_v21 = vadd.f32 %v6563_v5, %v934_v63  ;;  %v937_v3 = vadd.f32 %v5233_v14, %v936_v48  ;;  %v2036_v5 = vmax.f32 %v5256_v19, 0.0  ;;  %v1775_v15 = vmul.f32 %v3844_v0, %v4892_v12 }
 0x106   : > { %v2100_v54 = vadd.f32 %v6564_v58, %v942_v56  ;;  %v2101_v16 = vadd.f32 %v6565_v4, %v945_v29  ;;  %v1777_v56 = vmul.f32 %v3848_v40, %v4892_v12  ;;  %v1778_v50 = vmul.f32 %v3849_v20, %v4892_v12 }
 0x107   : > { %v2099_v63 = vadd.f32 %v6566_v28, %v937_v3  ;;  %v3000_v48 = vmul.f32 %v2098_v21, %v2098_v21  ;;  %v4562_v28 = vpop.f32.mrb[0].mxu1 }
 0x108   : > { %v3970_v51 = vpack.c.bf16 %v2101_v16, %v2100_v54  ;;  %v3002_v17 = vmul.f32 %v2100_v54, %v2100_v54  ;;  %v1189_v9 = vpop.f32.mrb[1].mxu1  ;;  %v5307_v0 = vadd.f32 %v4901_v18, %v1777_v56 }
 0x109   : > { %v3965_v34 = vpack.c.bf16 %v2099_v63, %v2098_v21  ;;  %v2866_v58 = vadd.f32 %v2099_v63, %v2098_v21  ;;  %v3001_v4 = vmul.f32 %v2099_v63, %v2099_v63  ;;  %v4502_v45 = vpop.f32.mrb[4].mxu0  ;;  %v1776_v21 = vmul.f32 %v3845_v27, %v4892_v12  ;;  %v4563_v38 = vpop.f32.mrb[2].mxu1 }
 0x10a   : > { %4345 = vst [vmem:[%s5287_s15 + $0x8] sm:$0xff] %v3970_v51   ;;  %v958_v3 = vadd.f32 %v4502_v45, %v5233_v14  ;;  %v949_v19 = vpop.f32.mrb[5].mxu0  ;;  %v3003_v63 = vmul.f32 %v2101_v16, %v2101_v16  ;;  %v6567_v51 = vmax.f32 %v4930_v46, 0.0  ;;  %v6569_v27 = vmax.f32 %v4941_v53, 0.0 }
 0x10b   : > { %3966 = vst [vmem:[%s5287_s15] sm:$0xff] %v3965_v34   ;;  %v2867_v35 = vadd.f32 %v2866_v58, %v2100_v54  ;;  %v3128_v29 = vadd.f32 %v3001_v4, %v3000_v48  ;;  %v950_v40 = vadd.f32 %v5233_v14, %v949_v19  ;;  %v4503_v57 = vpop.f32.mrb[6].mxu0  ;;  %v6568_v48 = vmax.f32 %v4938_v52, 0.0  ;;  %v1192_v4 = vpop.f32.mrb[3].mxu1 }
 0x10c   : > { %v2104_v47 = vadd.f32 %v6567_v51, %v958_v3  ;;  %v961_v45 = vadd.f32 %v4503_v57, %v5233_v14  ;;  %v952_v44 = vpop.f32.mrb[7].mxu0  ;;  %v1198_v46 = vadd.f32 %v4562_v28, %v5233_v14  ;;  %v1190_v57 = vadd.f32 %v5233_v14, %v1189_v9 }
 0x10d   : > { %v2868_v20 = vadd.f32 %v2867_v35, %v2101_v16  ;;  %v3129_v54 = vadd.f32 %v3128_v29, %v3002_v17  ;;  %v2102_v34 = vadd.f32 %v6568_v48, %v950_v40  ;;  %v953_v58 = vadd.f32 %v5233_v14, %v952_v44 }
 0x10e   : > { %v2105_v19 = vadd.f32 %v6569_v27, %v961_v45  ;;  %v5317_v3 = vadd.f32 %v4901_v18, %v1775_v15  ;;  %v6570_v52 = vmax.f32 %v4944_v55, 0.0  ;;  %v3006_v29 = vmul.f32 %v2104_v47, %v2104_v47 }
 0x10f   : > { %v3130_v56 = vadd.f32 %v3129_v54, %v3003_v63  ;;  %v2869_v16 = vadd.f32 %v2868_v20, %v2102_v34  ;;  %v3004_v17 = vmul.f32 %v2102_v34, %v2102_v34  ;;  %v2040_v53 = vmax.f32 %v5307_v0, 0.0 }
 0x110   : > { %v2103_v35 = vadd.f32 %v6570_v52, %v953_v58  ;;  %v3980_v44 = vpack.c.bf16 %v2105_v19, %v2104_v47  ;;  %v5323_v40 = vadd.f32 %v4901_v18, %v1778_v50  ;;  %v5327_v54 = vadd.f32 %v2036_v5, %v1198_v46  ;;  %v4566_v58 = vpop.f32.mrb[4].mxu1 }
 0x111   : > { %v3131_v28 = vadd.f32 %v3130_v56, %v3004_v17  ;;  %v4506_v15 = vpop.f32.mrb[8].mxu0  ;;  %v1201_v55 = vadd.f32 %v4563_v38, %v5233_v14  ;;  %v1193_v48 = vadd.f32 %v5233_v14, %v1192_v4  ;;  %v1205_v52 = vpop.f32.mrb[5].mxu1  ;;  %v6572_v38 = vmax.f32 %v5265_v22, 0.0 }
 0x112   : > { %v3975_v51 = vpack.c.bf16 %v2103_v35, %v2102_v34  ;;  %v2870_v9 = vadd.f32 %v2869_v16, %v2103_v35  ;;  %v3005_v45 = vmul.f32 %v2103_v35, %v2103_v35  ;;  %4347 = vst [vmem:[%s5287_s15 + $0x18] sm:$0xff] %v3980_v44   ;;  %v974_v63 = vadd.f32 %v4506_v15, %v5233_v14  ;;  %v965_v20 = vpop.f32.mrb[9].mxu0 }
 0x113   : > { %v966_v56 = vadd.f32 %v5233_v14, %v965_v20  ;;  %v4507_v34 = vpop.f32.mrb[10].mxu0  ;;  %v6571_v16 = vmax.f32 %v5259_v39, 0.0  ;;  %v3007_v35 = vmul.f32 %v2105_v19, %v2105_v19  ;;  %v5340_v44 = vadd.f32 %v6572_v38, %v1201_v55 }
 0x114   : > { %4346 = vst [vmem:[%s5287_s15 + $0x10] sm:$0xff] %v3975_v51   ;;  %v2871_v27 = vadd.f32 %v2870_v9, %v2104_v47  ;;  %v3132_v50 = vadd.f32 %v3131_v28, %v3005_v45  ;;  %v977_v5 = vadd.f32 %v4507_v34, %v5233_v14  ;;  %v968_v46 = vpop.f32.mrb[11].mxu0  ;;  %v6574_v4 = vmax.f32 %v5268_v6, 0.0  ;;  %v4567_v28 = vpop.f32.mrb[6].mxu1 }
 0x115   : > { %v5335_v17 = vadd.f32 %v6571_v16, %v1190_v57  ;;  %6573 = vst [vmem:[#allocation33_spill] sm:$0xff] %v5340_v44  ;;  %v6575_v39 = vmax.f32 %v4950_v60, 0.0  ;;  %v969_v45 = vadd.f32 %v5233_v14, %v968_v46  ;;  %v1208_v15 = vpop.f32.mrb[7].mxu1  ;;  %v6576_v20 = vmax.f32 %v4947_v59, 0.0 }
 0x116   : > { %v5344_v47 = vadd.f32 %v6574_v4, %v1193_v48  ;;  %v2872_v51 = vadd.f32 %v2871_v27, %v2105_v19  ;;  %v3133_v9 = vadd.f32 %v3132_v50, %v3006_v29  ;;  %v6577_v22 = vmax.f32 %v4955_v1, 0.0 }
 0x117   : > { %v2106_v57 = vadd.f32 %v6575_v39, %v966_v56  ;;  %v2108_v34 = vadd.f32 %v6576_v20, %v974_v63  ;;  %v4130_v6 = vpack.c.bf16 %v5340_v44, %v5327_v54  ;;  %v5356_v48 = vadd.f32 %v4901_v18, %v1776_v21 }
 0x118   : > { %v2109_v55 = vadd.f32 %v6577_v22, %v977_v5  ;;  %v3134_v19 = vadd.f32 %v3133_v9, %v3007_v35  ;;  %v6578_v27 = vmax.f32 %v4958_v2, 0.0  ;;  %v4125_v59 = vpack.c.bf16 %v5344_v47, %v5335_v17 }
 0x119   : > { %v2873_v29 = vadd.f32 %v2872_v51, %v2106_v57  ;;  %v3008_v60 = vmul.f32 %v2106_v57, %v2106_v57  ;;  %4377 = vst [vmem:[%s5287_s15 + $0x108] sm:$0xff] %v4130_v6   ;;  %v1214_v1 = vadd.f32 %v4566_v58, %v5233_v14  ;;  %v2038_v63 = vmax.f32 %v5317_v3, 0.0  ;;  %v4510_v46 = vpop.f32.mrb[12].mxu0  ;;  %v5371_v58 = vpop.f32.mrb[8].mxu1 }
 0x11a   : > { %v2107_v50 = vadd.f32 %v6578_v27, %v969_v45  ;;  %v3990_v56 = vpack.c.bf16 %v2109_v55, %v2108_v34  ;;  %v990_v38 = vadd.f32 %v4510_v46, %v5233_v14  ;;  %v981_v2 = vpop.f32.mrb[13].mxu0  ;;  %4376 = vst [vmem:[%s5287_s15 + $0x100] sm:$0xff] %v4125_v59   ;;  %v1217_v4 = vadd.f32 %v4567_v28, %v5233_v14  ;;  %v5375_v22 = vpop.f32.mrb[9].mxu1 }
 0x11b   : > { %v3135_v16 = vadd.f32 %v3134_v19, %v3008_v60  ;;  %v2041_v51 = vmax.f32 %v5323_v40, 0.0  ;;  %v2039_v9 = vmax.f32 %v5356_v48, 0.0  ;;  %v3010_v39 = vmul.f32 %v2108_v34, %v2108_v34  ;;  %v4511_v20 = vpop.f32.mrb[14].mxu0  ;;  %v5383_v48 = vpop.f32.mrb[10].mxu1 }
 0x11c   : > { %v3985_v21 = vpack.c.bf16 %v2107_v50, %v2106_v57  ;;  %v2874_v5 = vadd.f32 %v2873_v29, %v2107_v50  ;;  %v3009_v35 = vmul.f32 %v2107_v50, %v2107_v50  ;;  %4349 = vst [vmem:[%s5287_s15 + $0x28] sm:$0xff] %v3990_v56   ;;  %v982_v45 = vadd.f32 %v5233_v14, %v981_v2  ;;  %v984_v29 = vpop.f32.mrb[15].mxu0  ;;  %v5388_v59 = vpop.f32.mrb[11].mxu1  ;;  %v5400_v2 = vld [vmem:[%s4885_s28 + $0x128] sm:$0xff]  }
 0x11d   : > { %v3011_v6 = vmul.f32 %v2109_v55, %v2109_v55  ;;  %v993_v19 = vadd.f32 %v4511_v20, %v5233_v14  ;;  %v5380_v40 = vadd.f32 %v2040_v53, %v1214_v1  ;;  %v1206_v28 = vadd.f32 %v5233_v14, %v1205_v52 }
 0x11e   : > { %4348 = vst [vmem:[%s5287_s15 + $0x20] sm:$0xff] %v3985_v21   ;;  %v2875_v3 = vadd.f32 %v2874_v5, %v2108_v34  ;;  %v3136_v57 = vadd.f32 %v3135_v16, %v3009_v35  ;;  %v6580_v27 = vmax.f32 %v4982_v31, 0.0  ;;  %v985_v56 = vadd.f32 %v5233_v14, %v984_v29 }
 0x11f   : > { %6579 = vst [vmem:[#allocation34_spill] sm:$0xff] %v5380_v40  ;;  %v6581_v16 = vmax.f32 %v4978_v25, 0.0  ;;  %v6582_v0 = vmax.f32 %v4985_v32, 0.0  ;;  %v5394_v1 = vadd.f32 %v2041_v51, %v1217_v4  ;;  %v1209_v52 = vadd.f32 %v5233_v14, %v1208_v15 }
 0x120   : > { %v2876_v34 = vadd.f32 %v2875_v3, %v2109_v55  ;;  %v3137_v60 = vadd.f32 %v3136_v57, %v3010_v39  ;;  %v2110_v50 = vadd.f32 %v6580_v27, %v982_v45  ;;  %v6584_v31 = vmax.f32 %v4988_v33, 0.0 }
 0x121   : > { %v2112_v21 = vadd.f32 %v6581_v16, %v990_v38  ;;  %v2113_v53 = vadd.f32 %v6582_v0, %v993_v19  ;;  %6583 = vst [vmem:[#allocation35_spill] sm:$0xff] %v5394_v1  ;;  %v6585_v25 = vunpack.c.h.bf16 %v5200_v10  ;;  %v5405_v38 = vadd.f32 %v2038_v63, %v1206_v28  ;;  %v4514_v33 = vpop.f32.mrb[16].mxu0  ;;  %v5416_v19 = vpop.f32.mrb[12].mxu1 }
 0x122   : > { %v3138_v55 = vadd.f32 %v3137_v60, %v3011_v6  ;;  %v2877_v5 = vadd.f32 %v2876_v34, %v2110_v50  ;;  %v3012_v35 = vmul.f32 %v2110_v50, %v2110_v50  ;;  %v2111_v46 = vadd.f32 %v6584_v31, %v985_v56  ;;  %v997_v20 = vpop.f32.mrb[17].mxu0  ;;  %v5423_v56 = vpop.f32.mrb[13].mxu1 }
 0x123   : > { %v4000_v39 = vpack.c.bf16 %v2113_v53, %v2112_v21  ;;  %v1768_v32 = vmul.f32 %v6585_v25, %v4892_v12  ;;  %v4140_v15 = vpack.c.bf16 %v5394_v1, %v5380_v40  ;;  %v1006_v45 = vadd.f32 %v4514_v33, %v5233_v14  ;;  %v4515_v27 = vpop.f32.mrb[18].mxu0 }
 0x124   : > { %v3139_v4 = vadd.f32 %v3138_v55, %v3012_v35  ;;  %v3995_v51 = vpack.c.bf16 %v2111_v46, %v2110_v50  ;;  %v2878_v3 = vadd.f32 %v2877_v5, %v2111_v46  ;;  %v3013_v57 = vmul.f32 %v2111_v46, %v2111_v46  ;;  %v5421_v50 = vld [vmem:[%s4885_s28 + $0x120] sm:$0xff]   ;;  %v1000_v0 = vpop.f32.mrb[19].mxu0  ;;  %v5432_v55 = vpop.f32.mrb[14].mxu1 }
 0x125   : > { %4351 = vst [vmem:[%s5287_s15 + $0x38] sm:$0xff] %v4000_v39   ;;  %4379 = vst [vmem:[%s5287_s15 + $0x118] sm:$0xff] %v4140_v15   ;;  %v5413_v10 = vadd.f32 %v2039_v9, %v1209_v52  ;;  %v3856_v63 = vunpack.c.l.bf16 %v5400_v2  ;;  %v3014_v29 = vmul.f32 %v2112_v21, %v2112_v21  ;;  %v998_v60 = vadd.f32 %v5233_v14, %v997_v20  ;;  %v5437_v25 = vpop.f32.mrb[15].mxu1 }
 0x126   : > { %4350 = vst [vmem:[%s5287_s15 + $0x30] sm:$0xff] %v3995_v51   ;;  %v2879_v28 = vadd.f32 %v2878_v3, %v2112_v21  ;;  %v3140_v34 = vadd.f32 %v3139_v4, %v3013_v57  ;;  %v3015_v16 = vmul.f32 %v2113_v53, %v2113_v53  ;;  %v1009_v9 = vadd.f32 %v4515_v27, %v5233_v14 }
 0x127   : > { %v5428_v52 = vadd.f32 %v4901_v18, %v5277_v7  ;;  %v4135_v21 = vpack.c.bf16 %v5413_v10, %v5405_v38  ;;  %v6586_v31 = vmax.f32 %v4994_v37, 0.0  ;;  %v1001_v39 = vadd.f32 %v5233_v14, %v1000_v0 }
 0x128   : > { %v2880_v5 = vadd.f32 %v2879_v28, %v2113_v53  ;;  %v3141_v35 = vadd.f32 %v3140_v34, %v3014_v29  ;;  %v6587_v15 = vmax.f32 %v4991_v36, 0.0  ;;  %v6588_v7 = vmax.f32 %v5000_v49, 0.0 }
 0x129   : > { %v2114_v46 = vadd.f32 %v6586_v31, %v998_v60  ;;  %4378 = vst [vmem:[%s5287_s15 + $0x110] sm:$0xff] %v4135_v21   ;;  %v1781_v3 = vmul.f32 %v3856_v63, %v4892_v12  ;;  %v3852_v53 = vunpack.c.l.bf16 %v5421_v50  ;;  %v6589_v20 = vmax.f32 %v5015_v11, 0.0 }
 0x12a   : > { %v2116_v4 = vadd.f32 %v6587_v15, %v1006_v45  ;;  %v2117_v51 = vadd.f32 %v6588_v7, %v1009_v9  ;;  %v3142_v57 = vadd.f32 %v3141_v35, %v3015_v16  ;;  %v5450_v36 = vadd.f32 %v4901_v18, %v1768_v32  ;;  %v4518_v9 = vpop.f32.mrb[20].mxu0  ;;  %v5459_v32 = vpop.f32.mrb[16].mxu1 }
 0x12b   : > { %v2881_v33 = vadd.f32 %v2880_v5, %v2114_v46  ;;  %v3016_v37 = vmul.f32 %v2114_v46, %v2114_v46  ;;  %v2115_v29 = vadd.f32 %v6589_v20, %v1001_v39  ;;  %v1916_v49 = vadd.f32 %v4901_v18, %v1781_v3  ;;  %v1013_v0 = vpop.f32.mrb[21].mxu0  ;;  %v5463_v15 = vpop.f32.mrb[17].mxu1 }
 0x12c   : > { %v4010_v28 = vpack.c.bf16 %v2117_v51, %v2116_v4  ;;  %v1022_v16 = vadd.f32 %v4518_v9, %v5233_v14  ;;  %v1230_v21 = vadd.f32 %v5371_v58, %v5233_v14  ;;  %v1779_v5 = vmul.f32 %v3852_v53, %v4892_v12  ;;  %v4519_v39 = vpop.f32.mrb[22].mxu0 }
 0x12d   : > { %v3143_v45 = vadd.f32 %v3142_v57, %v3016_v37  ;;  %v4005_v60 = vpack.c.bf16 %v2115_v29, %v2114_v46  ;;  %v2882_v63 = vadd.f32 %v2881_v33, %v2115_v29  ;;  %v3017_v27 = vmul.f32 %v2115_v29, %v2115_v29  ;;  %v1016_v57 = vpop.f32.mrb[23].mxu0  ;;  %v5467_v37 = vpop.f32.mrb[18].mxu1 }
 0x12e   : > { %4353 = vst [vmem:[%s5287_s15 + $0x48] sm:$0xff] %v4010_v28   ;;  %v3018_v35 = vmul.f32 %v2116_v4, %v2116_v4  ;;  %v1014_v46 = vadd.f32 %v5233_v14, %v1013_v0  ;;  %v3019_v7 = vmul.f32 %v2117_v51, %v2117_v51  ;;  %v1025_v3 = vadd.f32 %v4519_v39, %v5233_v14  ;;  %v5472_v28 = vpop.f32.mrb[19].mxu1 }
 0x12f   : > { %4352 = vst [vmem:[%s5287_s15 + $0x40] sm:$0xff] %v4005_v60   ;;  %v2883_v18 = vadd.f32 %v2882_v63, %v2116_v4  ;;  %v3144_v31 = vadd.f32 %v3143_v45, %v3017_v27  ;;  %v2044_v33 = vmax.f32 %v1916_v49, 0.0  ;;  %v3857_v58 = vunpack.c.h.bf16 %v5400_v2 }
 0x130   : > { %v6590_v20 = vmax.f32 %v5026_v24, 0.0  ;;  %v1017_v29 = vadd.f32 %v5233_v14, %v1016_v57  ;;  %v6591_v45 = vmax.f32 %v5018_v13, 0.0  ;;  %v6592_v63 = vmax.f32 %v5029_v26, 0.0 }
 0x131   : > { %v2884_v12 = vadd.f32 %v2883_v18, %v2117_v51  ;;  %v3145_v53 = vadd.f32 %v3144_v31, %v3018_v35  ;;  %v5480_v2 = vadd.f32 %v5233_v14, %v5375_v22  ;;  %v5485_v51 = vld [vmem:[%s6493_s5] ss:$0 sm:$0xff]  ;;  %v6593_v13 = vmax.f32 %v5032_v30, 0.0  ;;  %v4522_v30 = vpop.f32.mrb[24].mxu0 }
 0x132   : > { %v2118_v4 = vadd.f32 %v6590_v20, %v1014_v46  ;;  %v2120_v60 = vadd.f32 %v6591_v45, %v1022_v16  ;;  %v2121_v27 = vadd.f32 %v6592_v63, %v1025_v3  ;;  %v1914_v24 = vadd.f32 %v5485_v51, %v1779_v5  ;;  %v5497_v18 = vld [vmem:[%s6492_s4] ss:$0 sm:$0xff]  ;;  %v1029_v3 = vpop.f32.mrb[25].mxu0 }
 0x133   : > { %v3146_v49 = vadd.f32 %v3145_v53, %v3019_v7  ;;  %v2119_v16 = vadd.f32 %v6593_v13, %v1017_v29  ;;  %v5490_v35 = vadd.f32 %v2044_v33, %v1230_v21  ;;  %v1233_v22 = vadd.f32 %v5383_v48, %v5233_v14  ;;  %v4523_v29 = vpop.f32.mrb[26].mxu0 }
 0x134   : > { %v2885_v9 = vadd.f32 %v2884_v12, %v2118_v4  ;;  %v3020_v0 = vmul.f32 %v2118_v4, %v2118_v4  ;;  %v4020_v26 = vpack.c.bf16 %v2121_v27, %v2120_v60  ;;  %v1782_v5 = vmul.f32 %v5497_v18, %v3857_v58  ;;  %v5504_v12 = vpop.f32.mrb[20].mxu1 }
 0x135   : > { %6594 = vst [vmem:[#allocation36_spill] sm:$0xff] %v5490_v35  ;;  %v4015_v46 = vpack.c.bf16 %v2119_v16, %v2118_v4  ;;  %v3021_v7 = vmul.f32 %v2119_v16, %v2119_v16  ;;  %v1038_v21 = vadd.f32 %v4522_v30, %v5233_v14  ;;  %v2042_v57 = vmax.f32 %v1914_v24, 0.0  ;;  %v5508_v45 = vpop.f32.mrb[21].mxu1 }
 0x136   : > { %v3147_v31 = vadd.f32 %v3146_v49, %v3020_v0  ;;  %v2886_v39 = vadd.f32 %v2885_v9, %v2119_v16  ;;  %4355 = vst [vmem:[%s5287_s15 + $0x58] sm:$0xff] %v4020_v26   ;;  %v1917_v48 = vadd.f32 %v5485_v51, %v1782_v5  ;;  %v3853_v33 = vunpack.c.h.bf16 %v5421_v50  ;;  %v1032_v9 = vpop.f32.mrb[27].mxu0  ;;  %v5512_v50 = vpop.f32.mrb[22].mxu1 }
 0x137   : > { %v3022_v53 = vmul.f32 %v2120_v60, %v2120_v60  ;;  %4354 = vst [vmem:[%s5287_s15 + $0x50] sm:$0xff] %v4015_v46   ;;  %v1030_v4 = vadd.f32 %v5233_v14, %v1029_v3  ;;  %v3023_v63 = vmul.f32 %v2121_v27, %v2121_v27  ;;  %v1041_v49 = vadd.f32 %v4523_v29, %v5233_v14 }
 0x138   : > { %v2887_v20 = vadd.f32 %v2886_v39, %v2120_v60  ;;  %v3148_v58 = vadd.f32 %v3147_v31, %v3021_v7  ;;  %v2045_v24 = vmax.f32 %v1917_v48, 0.0  ;;  %v1780_v0 = vmul.f32 %v5497_v18, %v3853_v33  ;;  %v5517_v31 = vpop.f32.mrb[23].mxu1 }
 0x139   : > { %v6595_v60 = vmax.f32 %v5038_v43, 0.0  ;;  %v1033_v5 = vadd.f32 %v5233_v14, %v1032_v9  ;;  %v6596_v46 = vmax.f32 %v5035_v42, 0.0  ;;  %v6597_v7 = vmax.f32 %v5043_v61, 0.0 }
 0x13a   : > { %v2888_v13 = vadd.f32 %v2887_v20, %v2121_v27  ;;  %v3149_v16 = vadd.f32 %v3148_v58, %v3022_v53  ;;  %v5523_v3 = vadd.f32 %v2045_v24, %v1233_v22  ;;  %v1915_v48 = vadd.f32 %v5485_v51, %v1780_v0  ;;  %v5529_v58 = vld [vmem:[%s4885_s28 + $0x138] sm:$0xff]  }
 0x13b   : > { %v2122_v26 = vadd.f32 %v6595_v60, %v1030_v4  ;;  %v2124_v39 = vadd.f32 %v6596_v46, %v1038_v21  ;;  %v2125_v30 = vadd.f32 %v6597_v7, %v1041_v49  ;;  %v6599_v43 = vmax.f32 %v5046_v23, 0.0  ;;  %v4526_v23 = vpop.f32.mrb[28].mxu0  ;;  %v5543_v60 = vpop.f32.mrb[24].mxu1 }
 0x13c   : > { %6598 = vst [vmem:[#allocation37_spill] sm:$0xff] %v5523_v3  ;;  %v3150_v27 = vadd.f32 %v3149_v16, %v3023_v63  ;;  %v4150_v61 = vpack.c.bf16 %v5523_v3, %v5490_v35  ;;  %v1225_v22 = vadd.f32 %v5233_v14, %v5388_v59  ;;  %v1054_v9 = vadd.f32 %v4526_v23, %v5233_v14  ;;  %v1045_v24 = vpop.f32.mrb[29].mxu0 }
 0x13d   : > { %v2889_v33 = vadd.f32 %v2888_v13, %v2122_v26  ;;  %v3024_v53 = vmul.f32 %v2122_v26, %v2122_v26  ;;  %v2123_v20 = vadd.f32 %v6599_v43, %v1033_v5  ;;  %v4030_v4 = vpack.c.bf16 %v2125_v30, %v2124_v39  ;;  %v4527_v7 = vpop.f32.mrb[30].mxu0 }
 0x13e   : > { %v5539_v0 = vadd.f32 %v2042_v57, %v5480_v2  ;;  %4381 = vst [vmem:[%s5287_s15 + $0x128] sm:$0xff] %v4150_v61   ;;  %v2043_v13 = vmax.f32 %v1915_v48, 0.0  ;;  %v3864_v16 = vunpack.c.l.bf16 %v5529_v58  ;;  %v3026_v59 = vmul.f32 %v2124_v39, %v2124_v39  ;;  %v1048_v57 = vpop.f32.mrb[31].mxu0 }
 0x13f   : > { %v3151_v21 = vadd.f32 %v3150_v27, %v3024_v53  ;;  %v4025_v29 = vpack.c.bf16 %v2123_v20, %v2122_v26  ;;  %v2890_v63 = vadd.f32 %v2889_v33, %v2123_v20  ;;  %v3025_v49 = vmul.f32 %v2123_v20, %v2123_v20  ;;  %4357 = vst [vmem:[%s5287_s15 + $0x68] sm:$0xff] %v4030_v4   ;;  %v5548_v27 = vld [vmem:[%s4885_s28 + $0x130] sm:$0xff]   ;;  %v5550_v33 = vpop.f32.mrb[25].mxu1 }
 0x140   : > { %v1046_v46 = vadd.f32 %v5233_v14, %v1045_v24  ;;  %v3027_v53 = vmul.f32 %v2125_v30, %v2125_v30  ;;  %v1057_v2 = vadd.f32 %v4527_v7, %v5233_v14  ;;  %v5553_v48 = vadd.f32 %v2043_v13, %v1225_v22  ;;  %v5556_v20 = vpop.f32.mrb[26].mxu1  ;;  %v6603_v7 = vld [vmem:[#allocation3_spill] sm:$0xff] }
 0x141   : > { %4356 = vst [vmem:[%s5287_s15 + $0x60] sm:$0xff] %v4025_v29   ;;  %v2891_v26 = vadd.f32 %v2890_v63, %v2124_v39  ;;  %v3152_v5 = vadd.f32 %v3151_v21, %v3025_v49  ;;  %v1785_v43 = vmul.f32 %v5497_v18, %v3864_v16  ;;  %v6600_v61 = vmax.f32 %v5070_v62, 0.0  ;;  %v5561_v63 = vpop.f32.mrb[27].mxu1  ;;  %v6601_v49 = vld [vmem:[#allocation2_spill] sm:$0xff] }
 0x142   : > { %v1049_v29 = vadd.f32 %v5233_v14, %v1048_v57  ;;  %v6602_v23 = vmax.f32 %v6601_v49, 0.0  ;;  %v6604_v22 = vmax.f32 %v6603_v7, 0.0  ;;  %v4145_v16 = vpack.c.bf16 %v5553_v48, %v5539_v0  ;;  %v4530_v7 = vpop.f32.mrb[32].mxu0  ;;  %v5591_v42 = vpop.f32.mrb[28].mxu1 }
 0x143   : > { %v2892_v4 = vadd.f32 %v2891_v26, %v2125_v30  ;;  %v3153_v39 = vadd.f32 %v3152_v5, %v3026_v59  ;;  %v2126_v21 = vadd.f32 %v6600_v61, %v1046_v46  ;;  %v3860_v30 = vunpack.c.l.bf16 %v5548_v27  ;;  %v6605_v5 = vld [vmem:[#allocation4_spill] sm:$0xff] }
 0x144   : > { %v2128_v24 = vadd.f32 %v6602_v23, %v1054_v9  ;;  %v2129_v13 = vadd.f32 %v6604_v22, %v1057_v2  ;;  %v6606_v46 = vmax.f32 %v6605_v5, 0.0  ;;  %v5574_v49 = vmul.f32 %v5327_v54, %v5327_v54  ;;  %4380 = vst [vmem:[%s5287_s15 + $0x120] sm:$0xff] %v4145_v16   ;;  %v1061_v22 = vpop.f32.mrb[33].mxu0  ;;  %6609 = vst [vmem:[#allocation4_spill] sm:$0xff] %v5591_v42 }
 0x145   : > { %v3154_v59 = vadd.f32 %v3153_v39, %v3027_v53  ;;  %v2893_v26 = vadd.f32 %v2892_v4, %v2126_v21  ;;  %v3028_v62 = vmul.f32 %v2126_v21, %v2126_v21  ;;  %v5578_v9 = vmul.f32 %v5335_v17, %v5335_v17 }
 0x146   : > { %v2127_v57 = vadd.f32 %v6606_v46, %v1049_v29  ;;  %v4040_v61 = vpack.c.bf16 %v2129_v13, %v2128_v24  ;;  %6607 = vst [vmem:[#allocation2_spill] sm:$0xff] %v5574_v49  ;;  %v1920_v2 = vadd.f32 %v5485_v51, %v1785_v43  ;;  %v1070_v29 = vadd.f32 %v4530_v7, %v5233_v14 }
 0x147   : > { %v3155_v23 = vadd.f32 %v3154_v59, %v3028_v62  ;;  %v5586_v5 = vmul.f32 %v5340_v44, %v5340_v44  ;;  %v1246_v46 = vadd.f32 %v5416_v19, %v5233_v14  ;;  %v1783_v16 = vmul.f32 %v5497_v18, %v3860_v30  ;;  %v4531_v62 = vpop.f32.mrb[34].mxu0  ;;  %v6617_v44 = vld [vmem:[#allocation7_spill] sm:$0xff] }
 0x148   : > { %v4035_v53 = vpack.c.bf16 %v2127_v57, %v2126_v21  ;;  %v2894_v4 = vadd.f32 %v2893_v26, %v2127_v57  ;;  %v3029_v39 = vmul.f32 %v2127_v57, %v2127_v57  ;;  %4359 = vst [vmem:[%s5287_s15 + $0x78] sm:$0xff] %v4040_v61   ;;  %v3030_v43 = vmul.f32 %v2128_v24, %v2128_v24  ;;  %v5595_v57 = vpop.f32.mrb[29].mxu1  ;;  %v1064_v11 = vpop.f32.mrb[35].mxu0 }
 0x149   : > { %6608 = vst [vmem:[#allocation3_spill] sm:$0xff] %v5586_v5  ;;  %v1062_v26 = vadd.f32 %v5233_v14, %v1061_v22  ;;  %6610 = vst [vmem:[#allocation38_spill] sm:$0xff] %v5595_v57  ;;  %v3031_v61 = vmul.f32 %v2129_v13, %v2129_v13  ;;  %v1073_v7 = vadd.f32 %v4531_v62, %v5233_v14  ;;  %v2048_v6 = vmax.f32 %v1920_v2, 0.0  ;;  %v5599_v34 = vpop.f32.mrb[30].mxu1  ;;  %v6612_v5 = vld [vmem:[#allocation6_spill] sm:$0xff] }
 0x14a   : > { %4358 = vst [vmem:[%s5287_s15 + $0x70] sm:$0xff] %v4035_v53   ;;  %v2895_v21 = vadd.f32 %v2894_v4, %v2128_v24  ;;  %v3156_v59 = vadd.f32 %v3155_v23, %v3029_v39  ;;  %v3865_v19 = vunpack.c.h.bf16 %v5529_v58  ;;  %6611 = vst [vmem:[#allocation39_spill] sm:$0xff] %v5599_v34  ;;  %v6613_v53 = vmax.f32 %v6612_v5, 0.0  ;;  %v5604_v4 = vpop.f32.mrb[31].mxu1  ;;  %v6615_v39 = vld [vmem:[#allocation5_spill] sm:$0xff] }
 0x14b   : > { %v1065_v23 = vadd.f32 %v5233_v14, %v1064_v11  ;;  %6614 = vst [vmem:[#allocation6_spill] sm:$0xff] %v5604_v4  ;;  %v6616_v22 = vmax.f32 %v6615_v39, 0.0  ;;  %v6618_v62 = vmax.f32 %v6617_v44, 0.0  ;;  %v1238_v58 = vadd.f32 %v5233_v14, %v5423_v56 }
 0x14c   : > { %v2896_v30 = vadd.f32 %v2895_v21, %v2129_v13  ;;  %v3157_v42 = vadd.f32 %v3156_v59, %v3030_v43  ;;  %v2130_v24 = vadd.f32 %v6613_v53, %v1062_v26  ;;  %v1918_v13 = vadd.f32 %v5485_v51, %v1783_v16  ;;  %v6619_v21 = vld [vmem:[#allocation8_spill] sm:$0xff]  ;;  %v4534_v16 = vpop.f32.mrb[36].mxu0 }
 0x14d   : > { %v2132_v57 = vadd.f32 %v6616_v22, %v1070_v29  ;;  %v2133_v49 = vadd.f32 %v6618_v62, %v1073_v7  ;;  %v6620_v59 = vmax.f32 %v6619_v21, 0.0  ;;  %v5615_v53 = vadd.f32 %v2048_v6, %v1246_v46  ;;  %v5624_v46 = vpop.f32.mrb[32].mxu1 }
 0x14e   : > { %v3158_v2 = vadd.f32 %v3157_v42, %v3031_v61  ;;  %v2897_v43 = vadd.f32 %v2896_v30, %v2130_v24  ;;  %v3032_v5 = vmul.f32 %v2130_v24, %v2130_v24  ;;  %v1249_v44 = vadd.f32 %v5432_v55, %v5233_v14  ;;  %v1077_v61 = vpop.f32.mrb[37].mxu0  ;;  %6621 = vst [vmem:[#allocation5_spill] sm:$0xff] %v5624_v46 }
 0x14f   : > { %v2131_v11 = vadd.f32 %v6620_v59, %v1065_v23  ;;  %v4050_v26 = vpack.c.bf16 %v2133_v49, %v2132_v57  ;;  %v1786_v29 = vmul.f32 %v5497_v18, %v3865_v19  ;;  %v1086_v42 = vadd.f32 %v4534_v16, %v5233_v14  ;;  %v6627_v16 = vld [vmem:[#allocation9_spill] sm:$0xff] }
 0x150   : > { %v3159_v7 = vadd.f32 %v3158_v2, %v3032_v5  ;;  %v2046_v30 = vmax.f32 %v1918_v13, 0.0  ;;  %v3861_v6 = vunpack.c.h.bf16 %v5548_v27  ;;  %v3034_v62 = vmul.f32 %v2132_v57, %v2132_v57  ;;  %v4535_v2 = vpop.f32.mrb[38].mxu0 }
 0x151   : > { %v4045_v39 = vpack.c.bf16 %v2131_v11, %v2130_v24  ;;  %v2898_v56 = vadd.f32 %v2897_v43, %v2131_v11  ;;  %v3033_v22 = vmul.f32 %v2131_v11, %v2131_v11  ;;  %4361 = vst [vmem:[%s5287_s15 + $0x88] sm:$0xff] %v4050_v26   ;;  %v1921_v23 = vadd.f32 %v5485_v51, %v1786_v29  ;;  %v5628_v43 = vpop.f32.mrb[33].mxu1  ;;  %v1080_v59 = vpop.f32.mrb[39].mxu0 }
 0x152   : > { %v1078_v24 = vadd.f32 %v5233_v14, %v1077_v61  ;;  %6622 = vst [vmem:[#allocation7_spill] sm:$0xff] %v5628_v43  ;;  %v3035_v5 = vmul.f32 %v2133_v49, %v2133_v49  ;;  %v1089_v21 = vadd.f32 %v4535_v2, %v5233_v14  ;;  %v1784_v11 = vmul.f32 %v5497_v18, %v3861_v6  ;;  %v5632_v27 = vpop.f32.mrb[34].mxu1  ;;  %v6629_v2 = vld [vmem:[#allocation11_spill] sm:$0xff] }
 0x153   : > { %4360 = vst [vmem:[%s5287_s15 + $0x80] sm:$0xff] %v4045_v39   ;;  %v2899_v55 = vadd.f32 %v2898_v56, %v2132_v57  ;;  %v3160_v19 = vadd.f32 %v3159_v7, %v3033_v22  ;;  %v2049_v13 = vmax.f32 %v1921_v23, 0.0  ;;  %6623 = vst [vmem:[#allocation8_spill] sm:$0xff] %v5632_v27  ;;  %v6624_v39 = vld [vmem:[#allocation10_spill] sm:$0xff]  ;;  %v1081_v56 = vadd.f32 %v5233_v14, %v1080_v59  ;;  %v5637_v22 = vpop.f32.mrb[35].mxu1  ;;  %v6641_v27 = vld [vmem:[#allocation15_spill] sm:$0xff] }
 0x154   : > { %v6625_v57 = vmax.f32 %v6624_v39, 0.0  ;;  %6626 = vst [vmem:[#allocation10_spill] sm:$0xff] %v5637_v22  ;;  %v6628_v61 = vmax.f32 %v6627_v16, 0.0  ;;  %v6630_v46 = vmax.f32 %v6629_v2, 0.0  ;;  %v1919_v6 = vadd.f32 %v5485_v51, %v1784_v11  ;;  %v5649_v39 = vld [vmem:[%s4885_s28 + $0x148] sm:$0xff]  }
 0x155   : > { %v2900_v26 = vadd.f32 %v2899_v55, %v2133_v49  ;;  %v3161_v29 = vadd.f32 %v3160_v19, %v3034_v62  ;;  %v5643_v4 = vadd.f32 %v2049_v13, %v1249_v44  ;;  %v6631_v19 = vld [vmem:[#allocation12_spill] sm:$0xff]  ;;  %v5661_v16 = vadd.f32 %v2046_v30, %v1238_v58 }
 0x156   : > { %v2134_v7 = vadd.f32 %v6625_v57, %v1078_v24  ;;  %v2136_v43 = vadd.f32 %v6628_v61, %v1086_v42  ;;  %v2137_v23 = vadd.f32 %v6630_v46, %v1089_v21  ;;  %v6632_v24 = vmax.f32 %v6631_v19, 0.0  ;;  %v5665_v19 = vpop.f32.mrb[36].mxu1 }
 0x157   : > { %v3162_v49 = vadd.f32 %v3161_v29, %v3035_v5  ;;  %v5653_v42 = vmul.f32 %v5344_v47, %v5344_v47  ;;  %v4160_v44 = vpack.c.bf16 %v5643_v4, %v5615_v53  ;;  %v1241_v46 = vadd.f32 %v5233_v14, %v5437_v25  ;;  %6633 = vst [vmem:[#allocation9_spill] sm:$0xff] %v5665_v19 }
 0x158   : > { %v2901_v62 = vadd.f32 %v2900_v26, %v2134_v7  ;;  %v3036_v55 = vmul.f32 %v2134_v7, %v2134_v7  ;;  %v2135_v59 = vadd.f32 %v6632_v24, %v1081_v56  ;;  %v4060_v57 = vpack.c.bf16 %v2137_v23, %v2136_v43  ;;  %v4538_v26 = vpop.f32.mrb[40].mxu0 }
 0x159   : > { %v1102_v29 = vadd.f32 %v4538_v26, %v5233_v14  ;;  %v1093_v56 = vpop.f32.mrb[41].mxu0  ;;  %4383 = vst [vmem:[%s5287_s15 + $0x138] sm:$0xff] %v4160_v44   ;;  %v2047_v61 = vmax.f32 %v1919_v6, 0.0  ;;  %v3872_v2 = vunpack.c.l.bf16 %v5649_v39  ;;  %v3038_v24 = vmul.f32 %v2136_v43, %v2136_v43 }
 0x15a   : > { %v3163_v5 = vadd.f32 %v3162_v49, %v3036_v55  ;;  %v4055_v21 = vpack.c.bf16 %v2135_v59, %v2134_v7  ;;  %v2902_v13 = vadd.f32 %v2901_v62, %v2135_v59  ;;  %v3037_v11 = vmul.f32 %v2135_v59, %v2135_v59  ;;  %4363 = vst [vmem:[%s5287_s15 + $0x98] sm:$0xff] %v4060_v57   ;;  %v4539_v62 = vpop.f32.mrb[42].mxu0  ;;  %v5670_v55 = vld [vmem:[%s4885_s28 + $0x140] sm:$0xff]   ;;  %v5672_v59 = vpop.f32.mrb[37].mxu1 }
 0x15b   : > { %v1094_v49 = vadd.f32 %v5233_v14, %v1093_v56  ;;  %6634 = vst [vmem:[#allocation11_spill] sm:$0xff] %v5672_v59  ;;  %v3039_v57 = vmul.f32 %v2137_v23, %v2137_v23  ;;  %v1105_v58 = vadd.f32 %v4539_v62, %v5233_v14  ;;  %v1096_v30 = vpop.f32.mrb[43].mxu0  ;;  %v5675_v6 = vadd.f32 %v2047_v61, %v1241_v46  ;;  %v5678_v26 = vpop.f32.mrb[38].mxu1  ;;  %v6639_v59 = vld [vmem:[#allocation13_spill] sm:$0xff] }
 0x15c   : > { %4362 = vst [vmem:[%s5287_s15 + $0x90] sm:$0xff] %v4055_v21   ;;  %v2903_v25 = vadd.f32 %v2902_v13, %v2136_v43  ;;  %v3164_v7 = vadd.f32 %v3163_v5, %v3037_v11  ;;  %v1789_v44 = vmul.f32 %v5497_v18, %v3872_v2  ;;  %6635 = vst [vmem:[#allocation12_spill] sm:$0xff] %v5678_v26  ;;  %v6636_v5 = vld [vmem:[#allocation14_spill] sm:$0xff]  ;;  %v5683_v19 = vpop.f32.mrb[39].mxu1  ;;  %v6640_v22 = vmax.f32 %v6639_v59, 0.0 }
 0x15d   : > { %v6637_v13 = vmax.f32 %v6636_v5, 0.0  ;;  %v1097_v56 = vadd.f32 %v5233_v14, %v1096_v30  ;;  %6638 = vst [vmem:[#allocation14_spill] sm:$0xff] %v5683_v19  ;;  %v6642_v46 = vmax.f32 %v6641_v27, 0.0  ;;  %v4155_v2 = vpack.c.bf16 %v5675_v6, %v5661_v16  ;;  %v5713_v19 = vpop.f32.mrb[40].mxu1 }
 0x15e   : > { %v2904_v21 = vadd.f32 %v2903_v25, %v2137_v23  ;;  %v3165_v43 = vadd.f32 %v3164_v7, %v3038_v24  ;;  %v2140_v62 = vadd.f32 %v6640_v22, %v1102_v29  ;;  %v3868_v23 = vunpack.c.l.bf16 %v5670_v55 }
 0x15f   : > { %v2138_v11 = vadd.f32 %v6637_v13, %v1094_v49  ;;  %v2141_v61 = vadd.f32 %v6642_v46, %v1105_v58  ;;  %v6643_v49 = vld [vmem:[#allocation16_spill] sm:$0xff]  ;;  %v5696_v59 = vmul.f32 %v5380_v40, %v5380_v40  ;;  %v5700_v27 = vmul.f32 %v5405_v38, %v5405_v38  ;;  %4382 = vst [vmem:[%s5287_s15 + $0x130] sm:$0xff] %v4155_v2   ;;  %v6655_v40 = vld [vmem:[#allocation19_spill] sm:$0xff] }
 0x160   : > { %v3166_v24 = vadd.f32 %v3165_v43, %v3039_v57  ;;  %v6644_v5 = vmax.f32 %v6643_v49, 0.0  ;;  %v1924_v22 = vadd.f32 %v5485_v51, %v1789_v44  ;;  %v4542_v43 = vpop.f32.mrb[44].mxu0  ;;  %v5708_v49 = vmul.f32 %v5394_v1, %v5394_v1  ;;  %6647 = vst [vmem:[#allocation16_spill] sm:$0xff] %v5713_v19 }
 0x161   : > { %v2905_v25 = vadd.f32 %v2904_v21, %v2138_v11  ;;  %v3040_v7 = vmul.f32 %v2138_v11, %v2138_v11  ;;  %v4070_v13 = vpack.c.bf16 %v2141_v61, %v2140_v62  ;;  %6645 = vst [vmem:[#allocation13_spill] sm:$0xff] %v5696_v59  ;;  %v1109_v46 = vpop.f32.mrb[45].mxu0  ;;  %v1787_v2 = vmul.f32 %v5497_v18, %v3868_v23  ;;  %v6650_v59 = vld [vmem:[#allocation18_spill] sm:$0xff] }
 0x162   : > { %v2139_v30 = vadd.f32 %v6644_v5, %v1097_v56  ;;  %v1118_v56 = vadd.f32 %v4542_v43, %v5233_v14  ;;  %6646 = vst [vmem:[#allocation15_spill] sm:$0xff] %v5708_v49  ;;  %v1262_v5 = vadd.f32 %v5459_v32, %v5233_v14  ;;  %v3042_v44 = vmul.f32 %v2140_v62, %v2140_v62 }
 0x163   : > { %v3167_v29 = vadd.f32 %v3166_v24, %v3040_v7  ;;  %4365 = vst [vmem:[%s5287_s15 + $0xa8] sm:$0xff] %v4070_v13   ;;  %v4543_v7 = vpop.f32.mrb[46].mxu0  ;;  %v3043_v13 = vmul.f32 %v2141_v61, %v2141_v61  ;;  %v2052_v49 = vmax.f32 %v1924_v22, 0.0  ;;  %v3873_v32 = vunpack.c.h.bf16 %v5649_v39  ;;  %v5735_v39 = vld [vmem:[%s6490_s2] ss:$0 sm:$0xff] }
 0x164   : > { %v4065_v57 = vpack.c.bf16 %v2139_v30, %v2138_v11  ;;  %v2906_v58 = vadd.f32 %v2905_v25, %v2139_v30  ;;  %v3041_v21 = vmul.f32 %v2139_v30, %v2139_v30  ;;  %v1110_v25 = vadd.f32 %v5233_v14, %v1109_v46  ;;  %v5717_v30 = vpop.f32.mrb[41].mxu1  ;;  %v1112_v26 = vpop.f32.mrb[47].mxu0 }
 0x165   : > { %6648 = vst [vmem:[#allocation40_spill] sm:$0xff] %v5717_v30  ;;  %v1121_v43 = vadd.f32 %v4543_v7, %v5233_v14  ;;  %v5721_v1 = vpop.f32.mrb[42].mxu1  ;;  %v6656_v7 = vmax.f32 %v6655_v40, 0.0  ;;  %v5742_v40 = vadd.f32 %v2052_v49, %v1262_v5  ;;  %v3869_v49 = vunpack.c.h.bf16 %v5670_v55 }
 0x166   : > { %4364 = vst [vmem:[%s5287_s15 + $0xa0] sm:$0xff] %v4065_v57   ;;  %v2907_v11 = vadd.f32 %v2906_v58, %v2140_v62  ;;  %v3168_v24 = vadd.f32 %v3167_v29, %v3041_v21  ;;  %6649 = vst [vmem:[#allocation41_spill] sm:$0xff] %v5721_v1  ;;  %v6651_v57 = vmax.f32 %v6650_v59, 0.0  ;;  %v1113_v29 = vadd.f32 %v5233_v14, %v1112_v26  ;;  %v5726_v58 = vpop.f32.mrb[43].mxu1  ;;  %v6653_v21 = vld [vmem:[#allocation17_spill] sm:$0xff] }
 0x167   : > { %6652 = vst [vmem:[#allocation18_spill] sm:$0xff] %v5726_v58  ;;  %v6654_v46 = vmax.f32 %v6653_v21, 0.0  ;;  %v2145_v34 = vadd.f32 %v6656_v7, %v1121_v43  ;;  %v1922_v59 = vadd.f32 %v5485_v51, %v1787_v2  ;;  %v1790_v43 = vmul.f32 %v5497_v18, %v3873_v32  ;;  %v4546_v2 = vpop.f32.mrb[48].mxu0  ;;  %v5751_v5 = vpop.f32.mrb[44].mxu1 }
 0x168   : > { %v2908_v23 = vadd.f32 %v2907_v11, %v2141_v61  ;;  %v3169_v19 = vadd.f32 %v3168_v24, %v3042_v44  ;;  %v2142_v62 = vadd.f32 %v6651_v57, %v1110_v25  ;;  %v1254_v61 = vadd.f32 %v5735_v39, %v5463_v15  ;;  %v6657_v44 = vld [vmem:[#allocation20_spill] sm:$0xff]  ;;  %6659 = vst [vmem:[#allocation17_spill] sm:$0xff] %v5751_v5 }
 0x169   : > { %v2144_v30 = vadd.f32 %v6654_v46, %v1118_v56  ;;  %v6658_v11 = vmax.f32 %v6657_v44, 0.0  ;;  %v1265_v25 = vadd.f32 %v5735_v39, %v5467_v37 }
 0x16a   : > { %v3170_v14 = vadd.f32 %v3169_v19, %v3043_v13  ;;  %v2909_v26 = vadd.f32 %v2908_v23, %v2142_v62  ;;  %v3044_v22 = vmul.f32 %v2142_v62, %v2142_v62  ;;  %v1134_v19 = vadd.f32 %v5735_v39, %v4546_v2  ;;  %v1125_v13 = vpop.f32.mrb[49].mxu0  ;;  %v6665_v2 = vld [vmem:[#allocation21_spill] sm:$0xff] }
 0x16b   : > { %v2143_v56 = vadd.f32 %v6658_v11, %v1113_v29  ;;  %v4080_v24 = vpack.c.bf16 %v2145_v34, %v2144_v30  ;;  %v2050_v23 = vmax.f32 %v1922_v59, 0.0  ;;  %v1925_v29 = vadd.f32 %v5485_v51, %v1790_v43 }
 0x16c   : > { %v3171_v57 = vadd.f32 %v3170_v14, %v3044_v22  ;;  %v3046_v7 = vmul.f32 %v2144_v30, %v2144_v30  ;;  %v4547_v14 = vpop.f32.mrb[50].mxu0  ;;  %v3047_v22 = vmul.f32 %v2145_v34, %v2145_v34 }
 0x16d   : > { %v4075_v21 = vpack.c.bf16 %v2143_v56, %v2142_v62  ;;  %v2910_v15 = vadd.f32 %v2909_v26, %v2143_v56  ;;  %v3045_v46 = vmul.f32 %v2143_v56, %v2143_v56  ;;  %4367 = vst [vmem:[%s5287_s15 + $0xb8] sm:$0xff] %v4080_v24   ;;  %v1126_v62 = vadd.f32 %v5735_v39, %v1125_v13  ;;  %v5755_v26 = vpop.f32.mrb[45].mxu1  ;;  %v1128_v11 = vpop.f32.mrb[51].mxu0 }
 0x16e   : > { %6660 = vst [vmem:[#allocation19_spill] sm:$0xff] %v5755_v26  ;;  %v1137_v44 = vadd.f32 %v5735_v39, %v4547_v14  ;;  %v2053_v59 = vmax.f32 %v1925_v29, 0.0  ;;  %v1788_v56 = vmul.f32 %v5497_v18, %v3869_v49  ;;  %v5759_v55 = vpop.f32.mrb[46].mxu1  ;;  %v6666_v13 = vmax.f32 %v6665_v2, 0.0  ;;  %v6667_v14 = vld [vmem:[#allocation23_spill] sm:$0xff] }
 0x16f   : > { %4366 = vst [vmem:[%s5287_s15 + $0xb0] sm:$0xff] %v4075_v21   ;;  %v2911_v37 = vadd.f32 %v2910_v15, %v2144_v30  ;;  %v3172_v32 = vadd.f32 %v3171_v57, %v3045_v46  ;;  %6661 = vst [vmem:[#allocation20_spill] sm:$0xff] %v5759_v55  ;;  %v6662_v21 = vld [vmem:[#allocation22_spill] sm:$0xff]  ;;  %v1129_v15 = vadd.f32 %v5735_v39, %v1128_v11  ;;  %v5764_v46 = vpop.f32.mrb[47].mxu1  ;;  %v6668_v5 = vmax.f32 %v6667_v14, 0.0  ;;  %v6679_v55 = vld [vmem:[#allocation27_spill] sm:$0xff] }
 0x170   : > { %v6663_v30 = vmax.f32 %v6662_v21, 0.0  ;;  %6664 = vst [vmem:[#allocation22_spill] sm:$0xff] %v5764_v46  ;;  %v2148_v26 = vadd.f32 %v6666_v13, %v1134_v19  ;;  %v5770_v58 = vadd.f32 %v2053_v59, %v1265_v25  ;;  %v1923_v49 = vadd.f32 %v5485_v51, %v1788_v56  ;;  %v5776_v21 = vld [vmem:[%s4885_s28 + $0x158] sm:$0xff]  }
 0x171   : > { %v2912_v24 = vadd.f32 %v2911_v37, %v2145_v34  ;;  %v3173_v43 = vadd.f32 %v3172_v32, %v3046_v7  ;;  %v2149_v29 = vadd.f32 %v6668_v5, %v1137_v44  ;;  %v6669_v32 = vld [vmem:[#allocation24_spill] sm:$0xff]  ;;  %v5780_v19 = vmul.f32 %v5413_v10, %v5413_v10 }
 0x172   : > { %v2146_v57 = vadd.f32 %v6663_v30, %v1126_v62  ;;  %v6670_v62 = vmax.f32 %v6669_v32, 0.0  ;;  %v4170_v25 = vpack.c.bf16 %v5770_v58, %v5742_v40  ;;  %v1257_v5 = vadd.f32 %v5735_v39, %v5472_v28  ;;  %v5792_v32 = vpop.f32.mrb[48].mxu1 }
 0x173   : > { %v3174_v34 = vadd.f32 %v3173_v43, %v3047_v22  ;;  %v4090_v30 = vpack.c.bf16 %v2149_v29, %v2148_v26  ;;  %v5788_v2 = vadd.f32 %v2050_v23, %v1254_v61  ;;  %v2051_v13 = vmax.f32 %v1923_v49, 0.0  ;;  %6671 = vst [vmem:[#allocation21_spill] sm:$0xff] %v5792_v32 }
 0x174   : > { %v2913_v7 = vadd.f32 %v2912_v24, %v2146_v57  ;;  %v3048_v37 = vmul.f32 %v2146_v57, %v2146_v57  ;;  %v2147_v11 = vadd.f32 %v6670_v62, %v1129_v15  ;;  %v4550_v24 = vpop.f32.mrb[52].mxu0  ;;  %4385 = vst [vmem:[%s5287_s15 + $0x148] sm:$0xff] %v4170_v25   ;;  %v3880_v14 = vunpack.c.l.bf16 %v5776_v21 }
 0x175   : > { %4369 = vst [vmem:[%s5287_s15 + $0xc8] sm:$0xff] %v4090_v30   ;;  %v1150_v43 = vadd.f32 %v5735_v39, %v4550_v24  ;;  %v1141_v15 = vpop.f32.mrb[53].mxu0  ;;  %v3050_v62 = vmul.f32 %v2148_v26, %v2148_v26  ;;  %v3051_v30 = vmul.f32 %v2149_v29, %v2149_v29  ;;  %v5802_v49 = vadd.f32 %v2051_v13, %v1257_v5 }
 0x176   : > { %v3175_v22 = vadd.f32 %v3174_v34, %v3048_v37  ;;  %v4085_v44 = vpack.c.bf16 %v2147_v11, %v2146_v57  ;;  %v2914_v59 = vadd.f32 %v2913_v7, %v2147_v11  ;;  %v3049_v56 = vmul.f32 %v2147_v11, %v2147_v11  ;;  %v4551_v7 = vpop.f32.mrb[54].mxu0  ;;  %v5797_v37 = vld [vmem:[%s4885_s28 + $0x150] sm:$0xff]   ;;  %v5799_v11 = vpop.f32.mrb[49].mxu1 }
 0x177   : > { %v1142_v34 = vadd.f32 %v5735_v39, %v1141_v15  ;;  %6672 = vst [vmem:[#allocation23_spill] sm:$0xff] %v5799_v11  ;;  %v1153_v61 = vadd.f32 %v5735_v39, %v4551_v7  ;;  %v1144_v23 = vpop.f32.mrb[55].mxu0  ;;  %v1793_v25 = vmul.f32 %v5497_v18, %v3880_v14  ;;  %v5805_v24 = vpop.f32.mrb[50].mxu1  ;;  %v6677_v11 = vld [vmem:[#allocation25_spill] sm:$0xff]  ;;  %v6680_v5 = vmax.f32 %v6679_v55, 0.0 }
 0x178   : > { %4368 = vst [vmem:[%s5287_s15 + $0xc0] sm:$0xff] %v4085_v44   ;;  %v2915_v28 = vadd.f32 %v2914_v59, %v2148_v26  ;;  %v3176_v57 = vadd.f32 %v3175_v22, %v3049_v56  ;;  %6673 = vst [vmem:[#allocation24_spill] sm:$0xff] %v5805_v24  ;;  %v6674_v22 = vld [vmem:[#allocation26_spill] sm:$0xff]  ;;  %v1145_v15 = vadd.f32 %v5735_v39, %v1144_v23  ;;  %v5810_v32 = vpop.f32.mrb[51].mxu1  ;;  %v6678_v46 = vmax.f32 %v6677_v11, 0.0 }
 0x179   : > { %v6675_v59 = vmax.f32 %v6674_v22, 0.0  ;;  %6676 = vst [vmem:[#allocation26_spill] sm:$0xff] %v5810_v32  ;;  %v2153_v13 = vadd.f32 %v6680_v5, %v1153_v61  ;;  %v4165_v14 = vpack.c.bf16 %v5802_v49, %v5788_v2  ;;  %v5823_v11 = vmul.f32 %v5490_v35, %v5490_v35  ;;  %v5840_v32 = vpop.f32.mrb[52].mxu1 }
 0x17a   : > { %v2916_v44 = vadd.f32 %v2915_v28, %v2149_v29  ;;  %v3177_v26 = vadd.f32 %v3176_v57, %v3050_v62  ;;  %v2152_v7 = vadd.f32 %v6678_v46, %v1150_v43  ;;  %v3876_v29 = vunpack.c.l.bf16 %v5797_v37 }
 0x17b   : > { %v2150_v56 = vadd.f32 %v6675_v59, %v1142_v34  ;;  %v6681_v34 = vld [vmem:[#allocation28_spill] sm:$0xff]  ;;  %6683 = vst [vmem:[#allocation25_spill] sm:$0xff] %v5823_v11  ;;  %v5827_v55 = vmul.f32 %v5539_v0, %v5539_v0  ;;  %4384 = vst [vmem:[%s5287_s15 + $0x140] sm:$0xff] %v4165_v14   ;;  %v1928_v46 = vadd.f32 %v5485_v51, %v1793_v25  ;;  %v6691_v11 = vld [vmem:[#allocation31_spill] sm:$0xff] }
 0x17c   : > { %v3178_v62 = vadd.f32 %v3177_v26, %v3051_v30  ;;  %v6682_v22 = vmax.f32 %v6681_v34, 0.0  ;;  %v4100_v59 = vpack.c.bf16 %v2153_v13, %v2152_v7  ;;  %v4554_v26 = vpop.f32.mrb[56].mxu0  ;;  %v5835_v34 = vmul.f32 %v5523_v3, %v5523_v3  ;;  %6685 = vst [vmem:[#allocation28_spill] sm:$0xff] %v5840_v32  ;;  %v6687_v3 = vld [vmem:[#allocation30_spill] sm:$0xff] }
 0x17d   : > { %v2917_v28 = vadd.f32 %v2916_v44, %v2150_v56  ;;  %v3052_v57 = vmul.f32 %v2150_v56, %v2150_v56  ;;  %v1157_v5 = vpop.f32.mrb[57].mxu0  ;;  %v1791_v14 = vmul.f32 %v5497_v18, %v3876_v29  ;;  %v3054_v25 = vmul.f32 %v2152_v7, %v2152_v7 }
 0x17e   : > { %v2151_v23 = vadd.f32 %v6682_v22, %v1145_v15  ;;  %4371 = vst [vmem:[%s5287_s15 + $0xd8] sm:$0xff] %v4100_v59   ;;  %v1166_v15 = vadd.f32 %v5735_v39, %v4554_v26  ;;  %6684 = vst [vmem:[#allocation27_spill] sm:$0xff] %v5835_v34  ;;  %v1278_v22 = vadd.f32 %v5735_v39, %v5504_v12  ;;  %v2056_v1 = vmax.f32 %v1928_v46, 0.0 }
 0x17f   : > { %v3179_v43 = vadd.f32 %v3178_v62, %v3052_v57  ;;  %v4555_v57 = vpop.f32.mrb[58].mxu0  ;;  %v3055_v59 = vmul.f32 %v2153_v13, %v2153_v13  ;;  %v3881_v12 = vunpack.c.h.bf16 %v5776_v21  ;;  %v1270_v21 = vadd.f32 %v5735_v39, %v5508_v45 }
 0x180   : > { %v4095_v30 = vpack.c.bf16 %v2151_v23, %v2150_v56  ;;  %v2918_v61 = vadd.f32 %v2917_v28, %v2151_v23  ;;  %v3053_v44 = vmul.f32 %v2151_v23, %v2151_v23  ;;  %v1158_v28 = vadd.f32 %v5735_v39, %v1157_v5  ;;  %v5844_v23 = vpop.f32.mrb[53].mxu1  ;;  %v1160_v24 = vpop.f32.mrb[59].mxu0 }
 0x181   : > { %6686 = vst [vmem:[#allocation42_spill] sm:$0xff] %v5844_v23  ;;  %v1169_v26 = vadd.f32 %v5735_v39, %v4555_v57  ;;  %v5848_v34 = vpop.f32.mrb[54].mxu1  ;;  %v6692_v57 = vmax.f32 %v6691_v11, 0.0  ;;  %v1281_v11 = vadd.f32 %v5735_v39, %v5512_v50 }
 0x182   : > { %4370 = vst [vmem:[%s5287_s15 + $0xd0] sm:$0xff] %v4095_v30   ;;  %v2919_v56 = vadd.f32 %v2918_v61, %v2152_v7  ;;  %v3180_v62 = vadd.f32 %v3179_v43, %v3053_v44  ;;  %v6688_v30 = vmax.f32 %v6687_v3, 0.0  ;;  %v1161_v43 = vadd.f32 %v5735_v39, %v1160_v24  ;;  %v5853_v61 = vpop.f32.mrb[55].mxu1  ;;  %v6689_v44 = vld [vmem:[#allocation29_spill] sm:$0xff] }
 0x183   : > { %v6690_v5 = vmax.f32 %v6689_v44, 0.0  ;;  %v2157_v35 = vadd.f32 %v6692_v57, %v1169_v26 }
 0x184   : > { %v2920_v29 = vadd.f32 %v2919_v56, %v2153_v13  ;;  %v3181_v32 = vadd.f32 %v3180_v62, %v3054_v25  ;;  %v2154_v7 = vadd.f32 %v6688_v30, %v1158_v28  ;;  %v1926_v13 = vadd.f32 %v5485_v51, %v1791_v14  ;;  %v6693_v56 = vld [vmem:[#allocation32_spill] sm:$0xff]  ;;  %v4558_v14 = vpop.f32.mrb[60].mxu0 }
 0x185   : > { %v2156_v23 = vadd.f32 %v6690_v5, %v1166_v15  ;;  %v6694_v62 = vmax.f32 %v6693_v56, 0.0  ;;  %v5864_v30 = vadd.f32 %v2056_v1, %v1278_v22  ;;  %v1794_v15 = vmul.f32 %v5497_v18, %v3881_v12  ;;  %v5873_v22 = vpop.f32.mrb[56].mxu1 }
 0x186   : > { %v3182_v46 = vadd.f32 %v3181_v32, %v3055_v59  ;;  %v2921_v25 = vadd.f32 %v2920_v29, %v2154_v7  ;;  %v3056_v3 = vmul.f32 %v2154_v7, %v2154_v7  ;;  %v1182_v32 = vadd.f32 %v5735_v39, %v4558_v14  ;;  %v1173_v59 = vpop.f32.mrb[61].mxu0 }
 0x187   : > { %v2155_v24 = vadd.f32 %v6694_v62, %v1161_v43  ;;  %v4110_v28 = vpack.c.bf16 %v2157_v35, %v2156_v23  ;;  %v2054_v29 = vmax.f32 %v1926_v13, 0.0  ;;  %v1929_v43 = vadd.f32 %v5485_v51, %v1794_v15 }
 0x188   : > { %v3183_v26 = vadd.f32 %v3182_v46, %v3056_v3  ;;  %v3877_v1 = vunpack.c.h.bf16 %v5797_v37  ;;  %v3058_v57 = vmul.f32 %v2156_v23, %v2156_v23  ;;  %v4559_v46 = vpop.f32.mrb[62].mxu0  ;;  %v3059_v3 = vmul.f32 %v2157_v35, %v2157_v35 }
 0x189   : > { %v4105_v44 = vpack.c.bf16 %v2155_v24, %v2154_v7  ;;  %v2922_v45 = vadd.f32 %v2921_v25, %v2155_v24  ;;  %v3057_v5 = vmul.f32 %v2155_v24, %v2155_v24  ;;  %4373 = vst [vmem:[%s5287_s15 + $0xe8] sm:$0xff] %v4110_v28   ;;  %v1174_v7 = vadd.f32 %v5735_v39, %v1173_v59  ;;  %v5877_v25 = vpop.f32.mrb[57].mxu1  ;;  %v1176_v62 = vpop.f32.mrb[63].mxu0 }
 0x18a   : > { %6695 = vst [vmem:[#allocation30_spill] sm:$0xff] %v5877_v25  ;;  %v1185_v56 = vadd.f32 %v5735_v39, %v4559_v46  ;;  %v2057_v13 = vmax.f32 %v1929_v43, 0.0  ;;  %v1792_v24 = vmul.f32 %v5497_v18, %v3877_v1  ;;  %v5881_v37 = vpop.f32.mrb[58].mxu1  ;;  %v6700_v59 = vmax.f32 %v5428_v52, 0.0 }
 0x18b   : > { %4372 = vst [vmem:[%s5287_s15 + $0xe0] sm:$0xff] %v4105_v44   ;;  %v2923_v50 = vadd.f32 %v2922_v45, %v2156_v23  ;;  %v3184_v12 = vadd.f32 %v3183_v26, %v3057_v5  ;;  %6696 = vst [vmem:[#allocation29_spill] sm:$0xff] %v5881_v37  ;;  %v6697_v23 = vmax.f32 %v5274_v41, 0.0  ;;  %v1177_v44 = vadd.f32 %v5735_v39, %v1176_v62  ;;  %v5886_v45 = vpop.f32.mrb[59].mxu1  ;;  %v4325_v62 = vld [vmem:[%s4885_s28 + $0x160] sm:$0xff]  }
 0x18c   : > { %6698 = vst [vmem:[#allocation31_spill] sm:$0xff] %v5886_v45  ;;  %v6699_v5 = vmax.f32 %v5253_v8, 0.0  ;;  %v2161_v43 = vadd.f32 %v6700_v59, %v1185_v56  ;;  %v5892_v46 = vadd.f32 %v2057_v13, %v1281_v11  ;;  %v1927_v1 = vadd.f32 %v5485_v51, %v1792_v24 }
 0x18d   : > { %v2924_v28 = vadd.f32 %v2923_v50, %v2157_v35  ;;  %v3185_v15 = vadd.f32 %v3184_v12, %v3058_v57  ;;  %v2158_v26 = vadd.f32 %v6697_v23, %v1174_v7  ;;  %v6701_v50 = vmax.f32 %v5450_v36, 0.0  ;;  %v4326_v7 = vld [vmem:[%s4885_s28 + $0x168] sm:$0xff]  }
 0x18e   : > { %v2160_v14 = vadd.f32 %v6699_v5, %v1182_v32  ;;  %v5899_v8 = vadd.f32 %v2054_v29, %v1270_v21  ;;  %v4180_v52 = vpack.c.bf16 %v5892_v46, %v5864_v30  ;;  %v1273_v11 = vadd.f32 %v5735_v39, %v5517_v31  ;;  %v5909_v21 = vpop.f32.mrb[60].mxu1 }
 0x18f   : > { %v3186_v35 = vadd.f32 %v3185_v15, %v3059_v3  ;;  %v2925_v57 = vadd.f32 %v2924_v28, %v2158_v26  ;;  %v3060_v41 = vmul.f32 %v2158_v26, %v2158_v26  ;;  %v2159_v12 = vadd.f32 %v6701_v50, %v1177_v44  ;;  %6702 = vst [vmem:[#allocation32_spill] sm:$0xff] %v5909_v21  ;;  %v5912_v59 = vpop.f32.mrb[61].mxu1 }
 0x190   : > { %v4120_v23 = vpack.c.bf16 %v2161_v43, %v2160_v14  ;;  %4387 = vst [vmem:[%s5287_s15 + $0x158] sm:$0xff] %v4180_v52   ;;  %v2055_v36 = vmax.f32 %v1927_v1, 0.0  ;;  %v1294_v24 = vadd.f32 %v5735_v39, %v5543_v60  ;;  %v3888_v28 = vunpack.c.l.bf16 %v4326_v7  ;;  %6703 = vst [vmem:[#allocation43_spill] sm:$0xff] %v5912_v59  ;;  %v5918_v60 = vpop.f32.mrb[62].mxu1 }
 0x191   : > { %v3187_v32 = vadd.f32 %v3186_v35, %v3060_v41  ;;  %v4115_v56 = vpack.c.bf16 %v2159_v12, %v2158_v26  ;;  %v2926_v3 = vadd.f32 %v2925_v57, %v2159_v12  ;;  %v3061_v13 = vmul.f32 %v2159_v12, %v2159_v12  ;;  %6704 = vst [vmem:[#allocation44_spill] sm:$0xff] %v5918_v60  ;;  %v5922_v52 = vpop.f32.mrb[63].mxu1 }
 0x192   : > { %4375 = vst [vmem:[%s5287_s15 + $0xf8] sm:$0xff] %v4120_v23   ;;  %v3884_v15 = vunpack.c.l.bf16 %v4325_v62  ;;  %v3062_v29 = vmul.f32 %v2160_v14, %v2160_v14  ;;  %v3889_v31 = vunpack.c.h.bf16 %v4326_v7  ;;  %v3063_v26 = vmul.f32 %v2161_v43, %v2161_v43  ;;  %6705 = vst [vmem:[#allocation45_spill] sm:$0xff] %v5922_v52  ;;  %v6714_v52 = vld [vmem:[#allocation35_spill] sm:$0xff] }
 0x193   : > { %4374 = vst [vmem:[%s5287_s15 + $0xf0] sm:$0xff] %v4115_v56   ;;  %v2927_v44 = vadd.f32 %v2926_v3, %v2160_v14  ;;  %v3188_v5 = vadd.f32 %v3187_v32, %v3061_v13  ;;  %v5914_v35 = vadd.f32 %v2055_v36, %v1273_v11  ;;  %v1797_v1 = vmul.f32 %v5497_v18, %v3888_v28  ;;  %v4328_v14 = vld [vmem:[%s4885_s28 + $0x178] sm:$0xff]  }
 0x194   : > { %v1795_v57 = vmul.f32 %v5497_v18, %v3884_v15  ;;  %v1798_v12 = vmul.f32 %v5497_v18, %v3889_v31  ;;  %v3885_v23 = vunpack.c.h.bf16 %v4325_v62  ;;  %v1297_v56 = vadd.f32 %v5735_v39, %v5556_v20 }
 0x195   : > { %v2928_v41 = vadd.f32 %v2927_v44, %v2161_v43  ;;  %v3189_v50 = vadd.f32 %v3188_v5, %v3062_v29  ;;  %v4175_v7 = vpack.c.bf16 %v5914_v35, %v5899_v8  ;;  %v1932_v11 = vadd.f32 %v5485_v51, %v1797_v1 }
 0x196   : > { %v1930_v32 = vadd.f32 %v5485_v51, %v1795_v57  ;;  %v1933_v13 = vadd.f32 %v5485_v51, %v1798_v12  ;;  %v1796_v62 = vmul.f32 %v5497_v18, %v3885_v23  ;;  %v1286_v28 = vadd.f32 %v5735_v39, %v5550_v33 }
 0x197   : > { %v3190_v3 = vadd.f32 %v3189_v50, %v3063_v26  ;;  %v2929_v43 = vadd.f32 %v2928_v41, %v5335_v17  ;;  %4386 = vst [vmem:[%s5287_s15 + $0x150] sm:$0xff] %v4175_v7   ;;  %v2060_v36 = vmax.f32 %v1932_v11, 0.0  ;;  %v3896_v29 = vunpack.c.l.bf16 %v4328_v14  ;;  %v4327_v26 = vld [vmem:[%s4885_s28 + $0x170] sm:$0xff]   ;;  %v6706_v7 = vld [vmem:[#allocation2_spill] sm:$0xff] }
 0x198   : > { %v2058_v15 = vmax.f32 %v1930_v32, 0.0  ;;  %v2061_v31 = vmax.f32 %v1933_v13, 0.0  ;;  %v1931_v20 = vadd.f32 %v5485_v51, %v1796_v62  ;;  %v5942_v17 = vmul.f32 %v5553_v48, %v5553_v48  ;;  %v6707_v32 = vld [vmem:[#allocation33_spill] sm:$0xff] }
 0x199   : > { %v3191_v44 = vadd.f32 %v3190_v3, %v5578_v9  ;;  %v2930_v5 = vadd.f32 %v2929_v43, %v5344_v47  ;;  %v5944_v1 = vadd.f32 %v2060_v36, %v1294_v24  ;;  %v1289_v57 = vadd.f32 %v5735_v39, %v5561_v63  ;;  %v6708_v36 = vld [vmem:[#allocation3_spill] sm:$0xff] }
 0x19a   : > { %v1801_v33 = vmul.f32 %v5497_v18, %v3896_v29  ;;  %v5951_v47 = vadd.f32 %v2061_v31, %v1297_v56  ;;  %v2059_v50 = vmax.f32 %v1931_v20, 0.0  ;;  %v5955_v12 = vmul.f32 %v5615_v53, %v5615_v53  ;;  %v6709_v31 = vld [vmem:[#allocation4_spill] sm:$0xff] }
 0x19b   : > { %v2931_v41 = vadd.f32 %v2930_v5, %v5327_v54  ;;  %v3192_v9 = vadd.f32 %v3191_v44, %v5653_v42  ;;  %v5957_v23 = vadd.f32 %v2058_v15, %v1286_v28  ;;  %v3892_v63 = vunpack.c.l.bf16 %v4327_v26  ;;  %v4330_v44 = vld [vmem:[%s4885_s28 + $0x188] sm:$0xff]  }
 0x19c   : > { %v1936_v24 = vadd.f32 %v5485_v51, %v1801_v33  ;;  %v5964_v42 = vmul.f32 %v5661_v16, %v5661_v16  ;;  %v4190_v56 = vpack.c.bf16 %v5951_v47, %v5944_v1  ;;  %v5970_v3 = vmul.f32 %v5643_v4, %v5643_v4 }
 0x19d   : > { %v3193_v11 = vadd.f32 %v3192_v9, %v6706_v7  ;;  %v2932_v54 = vadd.f32 %v2931_v41, %v6707_v32  ;;  %v5974_v43 = vmul.f32 %v5675_v6, %v5675_v6  ;;  %v5976_v51 = vadd.f32 %v2059_v50, %v1289_v57  ;;  %v6710_v7 = vld [vmem:[#allocation38_spill] sm:$0xff] }
 0x19e   : > { %v1799_v13 = vmul.f32 %v5497_v18, %v3892_v63  ;;  %v5983_v15 = vmul.f32 %v5742_v40, %v5742_v40  ;;  %4389 = vst [vmem:[%s5287_s15 + $0x168] sm:$0xff] %v4190_v56   ;;  %v3897_v29 = vunpack.c.h.bf16 %v4328_v14  ;;  %v1310_v20 = vadd.f32 %v5735_v39, %v6709_v31  ;;  %v6002_v14 = vld [vmem:[%s6492_s4] ss:$0 sm:$0xff]  ;;  %v6713_v31 = vld [vmem:[#allocation13_spill] sm:$0xff] }
 0x19f   : > { %v2933_v62 = vadd.f32 %v2932_v54, %v5405_v38  ;;  %v3194_v28 = vadd.f32 %v3193_v11, %v6708_v36  ;;  %v4185_v5 = vpack.c.bf16 %v5976_v51, %v5957_v23  ;;  %v2064_v18 = vmax.f32 %v1936_v24, 0.0  ;;  %v5994_v38 = vld [vmem:[%s6493_s5] ss:$0 sm:$0xff] }
 0x1a0   : > { %v1934_v57 = vadd.f32 %v5994_v38, %v1799_v13  ;;  %v1802_v9 = vmul.f32 %v6002_v14, %v3897_v29  ;;  %v3893_v50 = vunpack.c.h.bf16 %v4327_v26  ;;  %v4329_v24 = vld [vmem:[%s4885_s28 + $0x180] sm:$0xff]   ;;  %v6008_v63 = vmul.f32 %v5788_v2, %v5788_v2 }
 0x1a1   : > { %v3195_v33 = vadd.f32 %v3194_v28, %v5700_v27  ;;  %v2934_v41 = vadd.f32 %v2933_v62, %v5413_v10  ;;  %4388 = vst [vmem:[%s5287_s15 + $0x160] sm:$0xff] %v4185_v5   ;;  %v1302_v11 = vadd.f32 %v5735_v39, %v6710_v7  ;;  %v6711_v27 = vld [vmem:[#allocation39_spill] sm:$0xff]  ;;  %v3904_v32 = vunpack.c.l.bf16 %v4330_v44  ;;  %v6712_v54 = vld [vmem:[#allocation34_spill] sm:$0xff] }
 0x1a2   : > { %v1313_v10 = vadd.f32 %v5735_v39, %v6711_v27  ;;  %v1937_v62 = vadd.f32 %v5994_v38, %v1802_v9  ;;  %v1800_v26 = vmul.f32 %v6002_v14, %v3893_v50  ;;  %v6019_v36 = vadd.f32 %v2064_v18, %v1310_v20  ;;  %v6716_v9 = vld [vmem:[#allocation15_spill] sm:$0xff] }
 0x1a3   : > { %v2935_v56 = vadd.f32 %v2934_v41, %v6712_v54  ;;  %v3196_v13 = vadd.f32 %v3195_v33, %v5780_v19  ;;  %v2062_v28 = vmax.f32 %v1934_v57, 0.0  ;;  %v1805_v29 = vmul.f32 %v6002_v14, %v3904_v32  ;;  %v6715_v33 = vld [vmem:[#allocation6_spill] sm:$0xff] }
 0x1a4   : > { %v3900_v5 = vunpack.c.l.bf16 %v4329_v24  ;;  %v2065_v27 = vmax.f32 %v1937_v62, 0.0  ;;  %v1935_v60 = vadd.f32 %v5994_v38, %v1800_v26  ;;  %v6027_v19 = vmul.f32 %v5770_v58, %v5770_v58 }
 0x1a5   : > { %v3197_v7 = vadd.f32 %v3196_v13, %v6713_v31  ;;  %v2936_v59 = vadd.f32 %v2935_v56, %v6714_v52  ;;  %v1305_v41 = vadd.f32 %v5735_v39, %v6715_v33  ;;  %v1940_v20 = vadd.f32 %v5994_v38, %v1805_v29  ;;  %v4331_v33 = vld [vmem:[%s4885_s28 + $0x190] sm:$0xff]  }
 0x1a6   : > { %v1803_v18 = vmul.f32 %v6002_v14, %v3900_v5  ;;  %v6035_v32 = vadd.f32 %v2065_v27, %v1313_v10  ;;  %v2063_v52 = vmax.f32 %v1935_v60, 0.0  ;;  %v6039_v54 = vmul.f32 %v5802_v49, %v5802_v49  ;;  %v6717_v10 = vld [vmem:[#allocation5_spill] sm:$0xff] }
 0x1a7   : > { %v2937_v57 = vadd.f32 %v2936_v59, %v5539_v0  ;;  %v3198_v50 = vadd.f32 %v3197_v7, %v6716_v9  ;;  %v6043_v56 = vmul.f32 %v5864_v30, %v5864_v30  ;;  %v6045_v13 = vadd.f32 %v2062_v28, %v1302_v11  ;;  %v6718_v28 = vld [vmem:[#allocation36_spill] sm:$0xff]  ;;  %v4332_v27 = vld [vmem:[%s4885_s28 + $0x198] sm:$0xff]  }
 0x1a8   : > { %v3905_v62 = vunpack.c.h.bf16 %v4330_v44  ;;  %v4200_v60 = vpack.c.bf16 %v6035_v32, %v6019_v36  ;;  %v1326_v26 = vadd.f32 %v5735_v39, %v6717_v10  ;;  %v6053_v29 = vadd.f32 %v2063_v52, %v1305_v41  ;;  %v6722_v52 = vld [vmem:[#allocation25_spill] sm:$0xff] }
 0x1a9   : > { %v3199_v0 = vadd.f32 %v3198_v50, %v5827_v55  ;;  %v2938_v59 = vadd.f32 %v2937_v57, %v5553_v48  ;;  %v2068_v5 = vmax.f32 %v1940_v20, 0.0  ;;  %v1938_v31 = vadd.f32 %v5994_v38, %v1803_v18  ;;  %v6719_v20 = vld [vmem:[#allocation7_spill] sm:$0xff]  ;;  %v6720_v57 = vld [vmem:[#allocation8_spill] sm:$0xff]  ;;  %v6721_v50 = vld [vmem:[#allocation10_spill] sm:$0xff] }
 0x1aa   : > { %v1806_v11 = vmul.f32 %v6002_v14, %v3905_v62  ;;  %v6061_v48 = vmul.f32 %v5899_v8, %v5899_v8  ;;  %4391 = vst [vmem:[%s5287_s15 + $0x178] sm:$0xff] %v4200_v60   ;;  %v3901_v7 = vunpack.c.h.bf16 %v4329_v24  ;;  %v4195_v41 = vpack.c.bf16 %v6053_v29, %v6045_v13 }
 0x1ab   : > { %v2939_v44 = vadd.f32 %v2938_v59, %v6718_v28  ;;  %v3200_v55 = vadd.f32 %v3199_v0, %v5942_v17  ;;  %v1318_v18 = vadd.f32 %v5735_v39, %v6719_v20  ;;  %v1329_v9 = vadd.f32 %v5735_v39, %v6720_v57  ;;  %v6723_v0 = vld [vmem:[#allocation37_spill] sm:$0xff]  ;;  %v6724_v57 = vld [vmem:[#allocation27_spill] sm:$0xff] }
 0x1ac   : > { %v1321_v17 = vadd.f32 %v5735_v39, %v6721_v50  ;;  %v1941_v24 = vadd.f32 %v5994_v38, %v1806_v11  ;;  %v1804_v60 = vmul.f32 %v6002_v14, %v3901_v7  ;;  %4390 = vst [vmem:[%s5287_s15 + $0x170] sm:$0xff] %v4195_v41   ;;  %v6079_v10 = vadd.f32 %v2068_v5, %v1326_v26 }
 0x1ad   : > { %v3201_v62 = vadd.f32 %v3200_v55, %v6722_v52  ;;  %v2940_v59 = vadd.f32 %v2939_v44, %v6723_v0  ;;  %v2066_v28 = vmax.f32 %v1938_v31, 0.0  ;;  %v3912_v21 = vunpack.c.l.bf16 %v4332_v27  ;;  %v6725_v55 = vld [vmem:[#allocation9_spill] sm:$0xff] }
 0x1ae   : > { %v3908_v20 = vunpack.c.l.bf16 %v4331_v33  ;;  %v2069_v37 = vmax.f32 %v1941_v24, 0.0  ;;  %v1939_v50 = vadd.f32 %v5994_v38, %v1804_v60  ;;  %v1342_v44 = vadd.f32 %v5735_v39, %v6725_v55 }
 0x1af   : > { %v2941_v45 = vadd.f32 %v2940_v59, %v5661_v16  ;;  %v3202_v25 = vadd.f32 %v3201_v62, %v6724_v57  ;;  %v1809_v11 = vmul.f32 %v6002_v14, %v3912_v21  ;;  %v3913_v41 = vunpack.c.h.bf16 %v4332_v27  ;;  %v6727_v57 = vld [vmem:[#allocation11_spill] sm:$0xff] }
 0x1b0   : > { %v1807_v7 = vmul.f32 %v6002_v14, %v3908_v20  ;;  %v6090_v31 = vadd.f32 %v2069_v37, %v1329_v9  ;;  %v2067_v16 = vmax.f32 %v1939_v50, 0.0  ;;  %v6092_v52 = vadd.f32 %v2066_v28, %v1318_v18  ;;  %v6726_v9 = vld [vmem:[#allocation12_spill] sm:$0xff]  ;;  %v4334_v28 = vld [vmem:[%s4885_s28 + $0x1a8] sm:$0xff]  }
 0x1b1   : > { %v3203_v26 = vadd.f32 %v3202_v25, %v5964_v42  ;;  %v2942_v5 = vadd.f32 %v2941_v45, %v5675_v6  ;;  %v1944_v62 = vadd.f32 %v5994_v38, %v1809_v11  ;;  %v1810_v21 = vmul.f32 %v6002_v14, %v3913_v41  ;;  %v4333_v41 = vld [vmem:[%s4885_s28 + $0x1a0] sm:$0xff]  }
 0x1b2   : > { %v1942_v0 = vadd.f32 %v5994_v38, %v1807_v7  ;;  %v6101_v6 = vmul.f32 %v5892_v46, %v5892_v46  ;;  %v4210_v25 = vpack.c.bf16 %v6090_v31, %v6079_v10  ;;  %v6107_v37 = vmul.f32 %v5914_v35, %v5914_v35 }
 0x1b3   : > { %v2943_v59 = vadd.f32 %v2942_v5, %v5615_v53  ;;  %v3204_v27 = vadd.f32 %v3203_v26, %v5974_v43  ;;  %v6109_v45 = vadd.f32 %v2067_v16, %v1321_v17  ;;  %v2072_v42 = vmax.f32 %v1944_v62, 0.0  ;;  %v6728_v26 = vld [vmem:[#allocation14_spill] sm:$0xff] }
 0x1b4   : > { %v1945_v18 = vadd.f32 %v5994_v38, %v1810_v21  ;;  %4393 = vst [vmem:[%s5287_s15 + $0x188] sm:$0xff] %v4210_v25   ;;  %v1345_v24 = vadd.f32 %v5735_v39, %v6726_v9  ;;  %v3909_v60 = vunpack.c.h.bf16 %v4331_v33  ;;  %v1334_v50 = vadd.f32 %v5735_v39, %v6727_v57  ;;  %v6729_v21 = vld [vmem:[#allocation16_spill] sm:$0xff] }
 0x1b5   : > { %v3205_v53 = vadd.f32 %v3204_v27, %v5955_v12  ;;  %v2944_v43 = vadd.f32 %v2943_v59, %v5643_v4  ;;  %v4205_v20 = vpack.c.bf16 %v6109_v45, %v6092_v52  ;;  %v6120_v17 = vadd.f32 %v2072_v42, %v1342_v44 }
 0x1b6   : > { %v2070_v55 = vmax.f32 %v1942_v0, 0.0  ;;  %v2073_v11 = vmax.f32 %v1945_v18, 0.0  ;;  %v1808_v7 = vmul.f32 %v6002_v14, %v3909_v60  ;;  %v6130_v33 = vmul.f32 %v5944_v1, %v5944_v1 }
 0x1b7   : > { %v2945_v12 = vadd.f32 %v2944_v43, %v5788_v2  ;;  %v3206_v4 = vadd.f32 %v3205_v53, %v5970_v3  ;;  %v6134_v44 = vmul.f32 %v5957_v23, %v5957_v23  ;;  %4392 = vst [vmem:[%s5287_s15 + $0x180] sm:$0xff] %v4205_v20   ;;  %v1337_v5 = vadd.f32 %v5735_v39, %v6728_v26  ;;  %v4336_v26 = vld [vmem:[%s4885_s28 + $0x1b8] sm:$0xff]  }
 0x1b8   : > { %v3920_v16 = vunpack.c.l.bf16 %v4334_v28  ;;  %v6141_v62 = vadd.f32 %v2073_v11, %v1345_v24  ;;  %v1943_v0 = vadd.f32 %v5994_v38, %v1808_v7  ;;  %v1358_v59 = vadd.f32 %v5735_v39, %v6729_v21 }
 0x1b9   : > { %v3207_v2 = vadd.f32 %v3206_v4, %v6008_v63  ;;  %v2946_v3 = vadd.f32 %v2945_v12, %v5802_v49  ;;  %v3916_v25 = vunpack.c.l.bf16 %v4333_v41  ;;  %v3921_v42 = vunpack.c.h.bf16 %v4334_v28 }
 0x1ba   : > { %v1813_v27 = vmul.f32 %v6002_v14, %v3920_v16  ;;  %v6149_v43 = vadd.f32 %v2070_v55, %v1334_v50  ;;  %v4220_v49 = vpack.c.bf16 %v6141_v62, %v6120_v17  ;;  %v2071_v63 = vmax.f32 %v1943_v0, 0.0  ;;  %v6731_v16 = vld [vmem:[#allocation40_spill] sm:$0xff] }
 0x1bb   : > { %v2947_v18 = vadd.f32 %v2946_v3, %v5742_v40  ;;  %v3208_v53 = vadd.f32 %v3207_v2, %v6039_v54  ;;  %v1811_v24 = vmul.f32 %v6002_v14, %v3916_v25  ;;  %v1814_v60 = vmul.f32 %v6002_v14, %v3921_v42 }
 0x1bc   : > { %v1948_v9 = vadd.f32 %v5994_v38, %v1813_v27  ;;  %v6160_v40 = vmul.f32 %v5951_v47, %v5951_v47  ;;  %4395 = vst [vmem:[%s5287_s15 + $0x198] sm:$0xff] %v4220_v49   ;;  %v3917_v54 = vunpack.c.h.bf16 %v4333_v41  ;;  %v6163_v57 = vadd.f32 %v2071_v63, %v1337_v5  ;;  %v4335_v27 = vld [vmem:[%s4885_s28 + $0x1b0] sm:$0xff]  }
 0x1bd   : > { %v3209_v20 = vadd.f32 %v3208_v53, %v5983_v15  ;;  %v2948_v28 = vadd.f32 %v2947_v18, %v5770_v58  ;;  %v1946_v55 = vadd.f32 %v5994_v38, %v1811_v24  ;;  %v1949_v12 = vadd.f32 %v5994_v38, %v1814_v60  ;;  %v6730_v58 = vld [vmem:[#allocation41_spill] sm:$0xff] }
 0x1be   : > { %v2076_v50 = vmax.f32 %v1948_v9, 0.0  ;;  %v1361_v11 = vadd.f32 %v5735_v39, %v6730_v58  ;;  %v1812_v7 = vmul.f32 %v6002_v14, %v3917_v54  ;;  %v4215_v41 = vpack.c.bf16 %v6163_v57, %v6149_v43 }
 0x1bf   : > { %v2949_v4 = vadd.f32 %v2948_v28, %v5899_v8  ;;  %v3210_v15 = vadd.f32 %v3209_v20, %v6027_v19  ;;  %v1350_v2 = vadd.f32 %v5735_v39, %v6731_v16  ;;  %v2074_v3 = vmax.f32 %v1946_v55, 0.0 }
 0x1c0   : > { %v6175_v5 = vadd.f32 %v2076_v50, %v1358_v59  ;;  %v2077_v19 = vmax.f32 %v1949_v12, 0.0  ;;  %v1947_v21 = vadd.f32 %v5994_v38, %v1812_v7  ;;  %v3089_v25 = vmul.f32 %v5976_v51, %v5976_v51  ;;  %4394 = vst [vmem:[%s5287_s15 + $0x190] sm:$0xff] %v4215_v41   ;;  %v6732_v59 = vld [vmem:[#allocation18_spill] sm:$0xff]  ;;  %v4338_v7 = vld [vmem:[%s4885_s28 + $0x1c8] sm:$0xff]  }
 0x1c1   : > { %v3211_v8 = vadd.f32 %v3210_v15, %v6061_v48  ;;  %v2950_v0 = vadd.f32 %v2949_v4, %v5914_v35  ;;  %v6187_v42 = vmul.f32 %v6019_v36, %v6019_v36  ;;  %v1353_v18 = vadd.f32 %v5735_v39, %v6732_v59  ;;  %v6736_v59 = vld [vmem:[#allocation22_spill] sm:$0xff] }
 0x1c2   : > { %v3928_v53 = vunpack.c.l.bf16 %v4336_v26  ;;  %v6194_v49 = vadd.f32 %v2077_v19, %v1361_v11  ;;  %v2075_v63 = vmax.f32 %v1947_v21, 0.0  ;;  %v3092_v9 = vmul.f32 %v6045_v13, %v6045_v13  ;;  %v6735_v21 = vld [vmem:[#allocation20_spill] sm:$0xff] }
 0x1c3   : > { %v2951_v48 = vadd.f32 %v2950_v0, %v5864_v30  ;;  %v3212_v35 = vadd.f32 %v3211_v8, %v6107_v37  ;;  %v6198_v24 = vadd.f32 %v2074_v3, %v1350_v2  ;;  %v3924_v20 = vunpack.c.l.bf16 %v4335_v27  ;;  %v6734_v2 = vld [vmem:[#allocation19_spill] sm:$0xff] }
 0x1c4   : > { %v1817_v60 = vmul.f32 %v6002_v14, %v3928_v53  ;;  %v6205_v30 = vmul.f32 %v6035_v32, %v6035_v32  ;;  %v4230_v37 = vpack.c.bf16 %v6194_v49, %v6175_v5  ;;  %v6209_v50 = vadd.f32 %v2075_v63, %v1353_v18  ;;  %v4337_v63 = vld [vmem:[%s4885_s28 + $0x1c0] sm:$0xff]  }
 0x1c5   : > { %v3213_v28 = vadd.f32 %v3212_v35, %v6043_v56  ;;  %v2952_v54 = vadd.f32 %v2951_v48, %v5892_v46  ;;  %v1815_v12 = vmul.f32 %v6002_v14, %v3924_v20  ;;  %v3929_v4 = vunpack.c.h.bf16 %v4336_v26  ;;  %v6733_v46 = vld [vmem:[#allocation17_spill] sm:$0xff] }
 0x1c6   : > { %v1952_v55 = vadd.f32 %v5994_v38, %v1817_v60  ;;  %4397 = vst [vmem:[%s5287_s15 + $0x1a8] sm:$0xff] %v4230_v37   ;;  %v1374_v58 = vadd.f32 %v5735_v39, %v6733_v46  ;;  %v3925_v11 = vunpack.c.h.bf16 %v4335_v27  ;;  %v4225_v41 = vpack.c.bf16 %v6209_v50, %v6198_v24 }
 0x1c7   : > { %v2953_v15 = vadd.f32 %v2952_v54, %v5957_v23  ;;  %v3214_v56 = vadd.f32 %v3213_v28, %v6101_v6  ;;  %v1366_v3 = vadd.f32 %v5735_v39, %v6734_v2  ;;  %v1950_v26 = vadd.f32 %v5994_v38, %v1815_v12 }
 0x1c8   : > { %v2080_v16 = vmax.f32 %v1952_v55, 0.0  ;;  %v1818_v8 = vmul.f32 %v6002_v14, %v3929_v4  ;;  %v1816_v0 = vmul.f32 %v6002_v14, %v3925_v11  ;;  %4396 = vst [vmem:[%s5287_s15 + $0x1a0] sm:$0xff] %v4225_v41   ;;  %v1377_v27 = vadd.f32 %v5735_v39, %v6735_v21 }
 0x1c9   : > { %v3215_v23 = vadd.f32 %v3214_v56, %v6134_v44  ;;  %v2954_v6 = vadd.f32 %v2953_v15, %v5976_v51  ;;  %v2078_v19 = vmax.f32 %v1950_v26, 0.0  ;;  %v1369_v18 = vadd.f32 %v5735_v39, %v6736_v59  ;;  %v4339_v59 = vld [vmem:[%s4885_s28 + $0x1d0] sm:$0xff]  }
 0x1ca   : > { %v3936_v53 = vunpack.c.l.bf16 %v4338_v7  ;;  %v1953_v44 = vadd.f32 %v5994_v38, %v1818_v8  ;;  %v1951_v51 = vadd.f32 %v5994_v38, %v1816_v0  ;;  %v3093_v60 = vmul.f32 %v6053_v29, %v6053_v29  ;;  %v6737_v8 = vld [vmem:[#allocation21_spill] sm:$0xff] }
 0x1cb   : > { %v2955_v48 = vadd.f32 %v2954_v6, %v5944_v1  ;;  %v3216_v35 = vadd.f32 %v3215_v23, %v3089_v25  ;;  %v6241_v20 = vmul.f32 %v6079_v10, %v6079_v10  ;;  %v6243_v28 = vadd.f32 %v2080_v16, %v1374_v58  ;;  %v4340_v23 = vld [vmem:[%s4885_s28 + $0x1d8] sm:$0xff]  }
 0x1cc   : > { %v1821_v54 = vmul.f32 %v6002_v14, %v3936_v53  ;;  %v2081_v25 = vmax.f32 %v1953_v44, 0.0  ;;  %v2079_v55 = vmax.f32 %v1951_v51, 0.0  ;;  %v3096_v12 = vmul.f32 %v6092_v52, %v6092_v52  ;;  %v6738_v53 = vld [vmem:[#allocation23_spill] sm:$0xff] }
 0x1cd   : > { %v3217_v37 = vadd.f32 %v3216_v35, %v6130_v33  ;;  %v2956_v1 = vadd.f32 %v2955_v48, %v5951_v47  ;;  %v6250_v4 = vadd.f32 %v2078_v19, %v1366_v3  ;;  %v3932_v56 = vunpack.c.l.bf16 %v4337_v63  ;;  %v6739_v35 = vld [vmem:[#allocation24_spill] sm:$0xff] }
 0x1ce   : > { %v1956_v15 = vadd.f32 %v5994_v38, %v1821_v54  ;;  %v6255_v11 = vadd.f32 %v2081_v25, %v1377_v27  ;;  %v6257_v33 = vadd.f32 %v2079_v55, %v1369_v18  ;;  %v6261_v47 = vmul.f32 %v6090_v31, %v6090_v31 }
 0x1cf   : > { %v2957_v46 = vadd.f32 %v2956_v1, %v6045_v13  ;;  %v3218_v58 = vadd.f32 %v3217_v37, %v6160_v40  ;;  %v3097_v41 = vmul.f32 %v6109_v45, %v6109_v45  ;;  %v1819_v16 = vmul.f32 %v6002_v14, %v3932_v56 }
 0x1d0   : > { %v3937_v2 = vunpack.c.h.bf16 %v4338_v7  ;;  %v6269_v40 = vmul.f32 %v6120_v17, %v6120_v17  ;;  %v4240_v26 = vpack.c.bf16 %v6255_v11, %v6243_v28  ;;  %v4235_v6 = vpack.c.bf16 %v6257_v33, %v6250_v4 }
 0x1d1   : > { %v3219_v3 = vadd.f32 %v3218_v58, %v3092_v9  ;;  %v2958_v13 = vadd.f32 %v2957_v46, %v6053_v29  ;;  %v1390_v0 = vadd.f32 %v5735_v39, %v6737_v8  ;;  %v2084_v19 = vmax.f32 %v1956_v15, 0.0 }
 0x1d2   : > { %v1954_v9 = vadd.f32 %v5994_v38, %v1819_v16  ;;  %4399 = vst [vmem:[%s5287_s15 + $0x1b8] sm:$0xff] %v4240_v26   ;;  %v1822_v21 = vmul.f32 %v6002_v14, %v3937_v2  ;;  %v3933_v27 = vunpack.c.h.bf16 %v4337_v63  ;;  %v3100_v18 = vmul.f32 %v6149_v43, %v6149_v43  ;;  %4398 = vst [vmem:[%s5287_s15 + $0x1b0] sm:$0xff] %v4235_v6  }
 0x1d3   : > { %v2959_v7 = vadd.f32 %v2958_v13, %v6019_v36  ;;  %v3220_v29 = vadd.f32 %v3219_v3, %v3093_v60  ;;  %v1382_v48 = vadd.f32 %v5735_v39, %v6738_v53  ;;  %v1393_v44 = vadd.f32 %v5735_v39, %v6739_v35 }
 0x1d4   : > { %v3944_v51 = vunpack.c.l.bf16 %v4340_v23  ;;  %v1957_v60 = vadd.f32 %v5994_v38, %v1822_v21  ;;  %v1820_v63 = vmul.f32 %v6002_v14, %v3933_v27  ;;  %v6294_v37 = vadd.f32 %v2084_v19, %v1390_v0 }
 0x1d5   : > { %v3221_v54 = vadd.f32 %v3220_v29, %v6187_v42  ;;  %v2960_v36 = vadd.f32 %v2959_v7, %v6035_v32  ;;  %v2082_v1 = vmax.f32 %v1954_v9, 0.0  ;;  %v3940_v55 = vunpack.c.l.bf16 %v4339_v59  ;;  %v6740_v42 = vld [vmem:[#allocation26_spill] sm:$0xff]  ;;  %v6741_v7 = vld [vmem:[#allocation28_spill] sm:$0xff] }
 0x1d6   : > { %v1825_v25 = vmul.f32 %v6002_v14, %v3944_v51  ;;  %v2085_v46 = vmax.f32 %v1957_v60, 0.0  ;;  %v1955_v58 = vadd.f32 %v5994_v38, %v1820_v63  ;;  %v6302_v32 = vmul.f32 %v6141_v62, %v6141_v62  ;;  %v6325_v9 = vld [vmem:[%s6490_s2] ss:$0 sm:$0xff] }
 0x1d7   : > { %v2961_v15 = vadd.f32 %v2960_v36, %v6092_v52  ;;  %v3222_v56 = vadd.f32 %v3221_v54, %v6205_v30  ;;  %v1385_v16 = vadd.f32 %v5735_v39, %v6740_v42  ;;  %v1823_v3 = vmul.f32 %v6002_v14, %v3940_v55  ;;  %v4341_v51 = vld [vmem:[%s4885_s28 + $0x1e0] sm:$0xff]  }
 0x1d8   : > { %v1960_v2 = vadd.f32 %v5994_v38, %v1825_v25  ;;  %v6309_v52 = vadd.f32 %v2085_v46, %v1393_v44  ;;  %v2083_v30 = vmax.f32 %v1955_v58, 0.0  ;;  %v3101_v6 = vmul.f32 %v6163_v57, %v6163_v57  ;;  %v4342_v44 = vld [vmem:[%s4885_s28 + $0x1e8] sm:$0xff]   ;;  %v6742_v36 = vld [vmem:[#allocation42_spill] sm:$0xff] }
 0x1d9   : > { %v3223_v13 = vadd.f32 %v3222_v56, %v3096_v12  ;;  %v2962_v26 = vadd.f32 %v2961_v15, %v6109_v45  ;;  %v6315_v8 = vmul.f32 %v6175_v5, %v6175_v5  ;;  %v6317_v0 = vadd.f32 %v2082_v1, %v1382_v48 }
 0x1da   : > { %v3945_v39 = vunpack.c.h.bf16 %v4340_v23  ;;  %v4250_v45 = vpack.c.bf16 %v6309_v52, %v6294_v37  ;;  %v1406_v29 = vadd.f32 %v6325_v9, %v6741_v7  ;;  %v6329_v21 = vadd.f32 %v2083_v30, %v1385_v16 }
 0x1db   : > { %v2963_v12 = vadd.f32 %v2962_v26, %v6079_v10  ;;  %v3224_v19 = vadd.f32 %v3223_v13, %v3097_v41  ;;  %v2088_v27 = vmax.f32 %v1960_v2, 0.0  ;;  %v1958_v23 = vadd.f32 %v5994_v38, %v1823_v3 }
 0x1dc   : > { %v1826_v53 = vmul.f32 %v6002_v14, %v3945_v39  ;;  %v3104_v48 = vmul.f32 %v6198_v24, %v6198_v24  ;;  %4401 = vst [vmem:[%s5287_s15 + $0x1c8] sm:$0xff] %v4250_v45   ;;  %v3941_v35 = vunpack.c.h.bf16 %v4339_v59  ;;  %v4245_v54 = vpack.c.bf16 %v6329_v21, %v6317_v0 }
 0x1dd   : > { %v3225_v10 = vadd.f32 %v3224_v19, %v6241_v20  ;;  %v2964_v41 = vadd.f32 %v2963_v12, %v6090_v31  ;;  %v1398_v60 = vadd.f32 %v6325_v9, %v6742_v36  ;;  %v1409_v63 = vadd.f32 %v6325_v9, %v5848_v34 }
 0x1de   : > { %v1401_v20 = vadd.f32 %v6325_v9, %v5853_v61  ;;  %v1961_v59 = vadd.f32 %v5994_v38, %v1826_v53  ;;  %v1824_v25 = vmul.f32 %v6002_v14, %v3941_v35  ;;  %4400 = vst [vmem:[%s5287_s15 + $0x1c0] sm:$0xff] %v4245_v54   ;;  %v6353_v55 = vadd.f32 %v2088_v27, %v1406_v29  ;;  %v6744_v54 = vld [vmem:[#allocation30_spill] sm:$0xff] }
 0x1df   : > { %v2965_v31 = vadd.f32 %v2964_v41, %v6149_v43  ;;  %v3226_v1 = vadd.f32 %v3225_v10, %v6261_v47  ;;  %v2086_v15 = vmax.f32 %v1958_v23, 0.0  ;;  %v3952_v56 = vunpack.c.l.bf16 %v4342_v44  ;;  %v4344_v41 = vld [vmem:[%s4885_s28 + $0x1f8] sm:$0xff]  }
 0x1e0   : > { %v3948_v46 = vunpack.c.l.bf16 %v4341_v51  ;;  %v2089_v42 = vmax.f32 %v1961_v59, 0.0  ;;  %v1959_v61 = vadd.f32 %v5994_v38, %v1824_v25  ;;  %v1422_v43 = vadd.f32 %v6325_v9, %v5873_v22  ;;  %v6745_v59 = vld [vmem:[#allocation31_spill] sm:$0xff] }
 0x1e1   : > { %v3227_v58 = vadd.f32 %v3226_v1, %v3100_v18  ;;  %v2966_v34 = vadd.f32 %v2965_v31, %v6163_v57  ;;  %v1829_v47 = vmul.f32 %v6002_v14, %v3952_v56  ;;  %v3953_v2 = vunpack.c.h.bf16 %v4342_v44  ;;  %v4343_v31 = vld [vmem:[%s4885_s28 + $0x1f0] sm:$0xff]   ;;  %s3372_s28 = sshll.u32 %s6753_s25, 3 }
 0x1e2   : > { %v1827_v16 = vmul.f32 %v6002_v14, %v3948_v46  ;;  %v6362_v26 = vadd.f32 %v2089_v42, %v1409_v63  ;;  %v2087_v18 = vmax.f32 %v1959_v61, 0.0  ;;  %v6364_v30 = vadd.f32 %v2086_v15, %v1398_v60  ;;  %s314_s9 = scalar_lea.vmem %s6495_s7, %s3372_s28 }
 0x1e3   : > { %v2967_v3 = vadd.f32 %v2966_v34, %v6120_v17  ;;  %v3228_v13 = vadd.f32 %v3227_v58, %v3101_v6  ;;  %v1964_v57 = vadd.f32 %v5994_v38, %v1829_v47  ;;  %v1830_v22 = vmul.f32 %v6002_v14, %v3953_v2  ;;  %v6746_v58 = vld [vmem:[#allocation32_spill] sm:$0xff] }
 0x1e4   : > { %v1962_v39 = vadd.f32 %v5994_v38, %v1827_v16  ;;  %v3107_v17 = vmul.f32 %v6194_v49, %v6194_v49  ;;  %v4260_v6 = vpack.c.bf16 %v6362_v26, %v6353_v55  ;;  %v3105_v45 = vmul.f32 %v6209_v50, %v6209_v50 }
 0x1e5   : > { %v3229_v12 = vadd.f32 %v3228_v13, %v6269_v40  ;;  %v2968_v19 = vadd.f32 %v2967_v3, %v6141_v62  ;;  %v6377_v7 = vadd.f32 %v2087_v18, %v1401_v20  ;;  %v2092_v29 = vmax.f32 %v1964_v57, 0.0  ;;  %v6743_v62 = vld [vmem:[#allocation29_spill] sm:$0xff] }
 0x1e6   : > { %v1965_v27 = vadd.f32 %v5994_v38, %v1830_v22  ;;  %4403 = vst [vmem:[%s5287_s15 + $0x1d8] sm:$0xff] %v4260_v6   ;;  %v1425_v53 = vadd.f32 %v6325_v9, %v6743_v62  ;;  %v3949_v10 = vunpack.c.h.bf16 %v4341_v51  ;;  %v1414_v36 = vadd.f32 %v6325_v9, %v6744_v54 }
 0x1e7   : > { %v2969_v23 = vadd.f32 %v2968_v19, %v6198_v24  ;;  %v3230_v40 = vadd.f32 %v3229_v12, %v6302_v32  ;;  %v4255_v35 = vpack.c.bf16 %v6377_v7, %v6364_v30  ;;  %v6388_v44 = vadd.f32 %v2092_v29, %v1422_v43 }
 0x1e8   : > { %v2090_v60 = vmax.f32 %v1962_v39, 0.0  ;;  %v2093_v32 = vmax.f32 %v1965_v27, 0.0  ;;  %v1828_v20 = vmul.f32 %v6002_v14, %v3949_v10  ;;  %v3110_v51 = vmul.f32 %v6243_v28, %v6243_v28 }
 0x1e9   : > { %v3231_v63 = vadd.f32 %v3230_v40, %v3104_v48  ;;  %v2970_v24 = vadd.f32 %v2969_v23, %v6209_v50  ;;  %v3108_v1 = vmul.f32 %v6250_v4, %v6250_v4  ;;  %4402 = vst [vmem:[%s5287_s15 + $0x1d0] sm:$0xff] %v4255_v35   ;;  %v1417_v25 = vadd.f32 %v6325_v9, %v6745_v59  ;;  %v6747_v23 = vld [vmem:[#allocation44_spill] sm:$0xff] }
 0x1ea   : > { %v3960_v15 = vunpack.c.l.bf16 %v4344_v41  ;;  %v6403_v46 = vadd.f32 %v2093_v32, %v1425_v53  ;;  %v1963_v50 = vadd.f32 %v5994_v38, %v1828_v20  ;;  %v1438_v34 = vadd.f32 %v6325_v9, %v6746_v58  ;;  %v6748_v53 = vld [vmem:[#allocation43_spill] sm:$0xff] }
 0x1eb   : > { %v2971_v56 = vadd.f32 %v2970_v24, %v6175_v5  ;;  %v3232_v48 = vadd.f32 %v3231_v63, %v3105_v45  ;;  %v3956_v61 = vunpack.c.l.bf16 %v4343_v31  ;;  %v3961_v43 = vunpack.c.h.bf16 %v4344_v41  ;;  %v6749_v63 = vld [vmem:[#allocation45_spill] sm:$0xff] }
 0x1ec   : > { %v1833_v42 = vmul.f32 %v6002_v14, %v3960_v15  ;;  %v6411_v2 = vadd.f32 %v2090_v60, %v1414_v36  ;;  %v4270_v5 = vpack.c.bf16 %v6403_v46, %v6388_v44  ;;  %v2091_v3 = vmax.f32 %v1963_v50, 0.0 }
 0x1ed   : > { %v3233_v47 = vadd.f32 %v3232_v48, %v6315_v8  ;;  %v2972_v16 = vadd.f32 %v2971_v56, %v6194_v49  ;;  %v1831_v18 = vmul.f32 %v6002_v14, %v3956_v61  ;;  %v1834_v57 = vmul.f32 %v6002_v14, %v3961_v43 }
 0x1ee   : > { %v1968_v13 = vadd.f32 %v5994_v38, %v1833_v42  ;;  %v3109_v8 = vmul.f32 %v6257_v33, %v6257_v33  ;;  %4405 = vst [vmem:[%s5287_s15 + $0x1e8] sm:$0xff] %v4270_v5   ;;  %v3957_v49 = vunpack.c.h.bf16 %v4343_v31  ;;  %v2219_v12 = vadd.f32 %v2091_v3, %v1417_v25 }
 0x1ef   : > { %v2973_v39 = vadd.f32 %v2972_v16, %v6250_v4  ;;  %v3234_v22 = vadd.f32 %v3233_v47, %v3107_v17  ;;  %v1966_v6 = vadd.f32 %v5994_v38, %v1831_v18  ;;  %v1969_v45 = vadd.f32 %v5994_v38, %v1834_v57 }
 0x1f0   : > { %v2096_v19 = vmax.f32 %v1968_v13, 0.0  ;;  %v1441_v40 = vadd.f32 %v6325_v9, %v6747_v23  ;;  %v1832_v4 = vmul.f32 %v6002_v14, %v3957_v49  ;;  %v4265_v17 = vpack.c.bf16 %v2219_v12, %v6411_v2 }
 0x1f1   : > { %v3235_v29 = vadd.f32 %v3234_v22, %v3108_v1  ;;  %v2974_v27 = vadd.f32 %v2973_v39, %v6257_v33  ;;  %v1430_v10 = vadd.f32 %v6325_v9, %v6748_v53  ;;  %v2094_v41 = vmax.f32 %v1966_v6, 0.0 }
 0x1f2   : > { %v6429_v62 = vadd.f32 %v2096_v19, %v1438_v34  ;;  %v2097_v36 = vmax.f32 %v1969_v45, 0.0  ;;  %v1967_v60 = vadd.f32 %v5994_v38, %v1832_v4  ;;  %v3111_v33 = vmul.f32 %v6255_v11, %v6255_v11  ;;  %4404 = vst [vmem:[%s5287_s15 + $0x1e0] sm:$0xff] %v4265_v17  }
 0x1f3   : > { %v2975_v35 = vadd.f32 %v2974_v27, %v6243_v28  ;;  %v3236_v54 = vadd.f32 %v3235_v29, %v3109_v8  ;;  %v3112_v14 = vmul.f32 %v6317_v0, %v6317_v0  ;;  %v1433_v24 = vadd.f32 %v6325_v9, %v6749_v63 }
 0x1f4   : > { %v2225_v28 = vadd.f32 %v2097_v36, %v1441_v40  ;;  %v2095_v31 = vmax.f32 %v1967_v60, 0.0  ;;  %v2222_v1 = vadd.f32 %v2094_v41, %v1430_v10  ;;  %v3113_v50 = vmul.f32 %v6329_v21, %v6329_v21 }
 0x1f5   : > { %v3237_v32 = vadd.f32 %v3236_v54, %v3110_v51  ;;  %v2976_v20 = vadd.f32 %v2975_v35, %v6255_v11  ;;  %v3114_v11 = vmul.f32 %v6294_v37, %v6294_v37  ;;  %v3116_v61 = vmul.f32 %v6364_v30, %v6364_v30 }
 0x1f6   : > { %v4280_v25 = vpack.c.bf16 %v2225_v28, %v6429_v62  ;;  %v2223_v15 = vadd.f32 %v2095_v31, %v1433_v24  ;;  %v3118_v5 = vmul.f32 %v6353_v55, %v6353_v55  ;;  %v3121_v49 = vmul.f32 %v2219_v12, %v2219_v12 }
 0x1f7   : > { %v2977_v38 = vadd.f32 %v2976_v20, %v6317_v0  ;;  %v3238_v59 = vadd.f32 %v3237_v32, %v3111_v33  ;;  %v3115_v0 = vmul.f32 %v6309_v52, %v6309_v52  ;;  %v3122_v19 = vmul.f32 %v6388_v44, %v6388_v44 }
 0x1f8   : > { %4407 = vst [vmem:[%s5287_s15 + $0x1f8] sm:$0xff] %v4280_v25   ;;  %v4275_v9 = vpack.c.bf16 %v2223_v15, %v2222_v1  ;;  %v3123_v45 = vmul.f32 %v6403_v46, %v6403_v46  ;;  %v3124_v27 = vmul.f32 %v2222_v1, %v2222_v1  ;;  %v3126_v17 = vmul.f32 %v6429_v62, %v6429_v62 }
 0x1f9   : > { %v3239_v56 = vadd.f32 %v3238_v59, %v3112_v14  ;;  %v2978_v48 = vadd.f32 %v2977_v38, %v6329_v21  ;;  %v3127_v10 = vmul.f32 %v2225_v28, %v2225_v28 }
 0x1fa   : > { %4406 = vst [vmem:[%s5287_s15 + $0x1f0] sm:$0xff] %v4275_v9  }
 0x1fb   : > { %v2979_v51 = vadd.f32 %v2978_v48, %v6294_v37  ;;  %v3240_v58 = vadd.f32 %v3239_v56, %v3113_v50  ;;  %v3117_v37 = vmul.f32 %v6377_v7, %v6377_v7 }
 0x1fd   : > { %v3241_v34 = vadd.f32 %v3240_v58, %v3114_v11  ;;  %v2980_v42 = vadd.f32 %v2979_v51, %v6309_v52  ;;  %v3119_v52 = vmul.f32 %v6362_v26, %v6362_v26 }
 0x1ff   : > { %v2981_v21 = vadd.f32 %v2980_v42, %v6364_v30  ;;  %v3242_v43 = vadd.f32 %v3241_v34, %v3115_v0  ;;  %v3120_v30 = vmul.f32 %v6411_v2, %v6411_v2 }
 0x201   : > { %v3243_v47 = vadd.f32 %v3242_v43, %v3116_v61  ;;  %v2982_v16 = vadd.f32 %v2981_v21, %v6377_v7 }
 0x203   : > { %v2983_v3 = vadd.f32 %v2982_v16, %v6353_v55  ;;  %v3244_v13 = vadd.f32 %v3243_v47, %v3117_v37 }
 0x205   : > { %v3245_v18 = vadd.f32 %v3244_v13, %v3118_v5  ;;  %v2984_v57 = vadd.f32 %v2983_v3, %v6362_v26 }
 0x207   : > { %v2985_v39 = vadd.f32 %v2984_v57, %v6411_v2  ;;  %v3246_v22 = vadd.f32 %v3245_v18, %v3119_v52 }
 0x209   : > { %v3247_v8 = vadd.f32 %v3246_v22, %v3120_v30  ;;  %v2986_v7 = vadd.f32 %v2985_v39, %v2219_v12  ;;  %v3125_v12 = vmul.f32 %v2223_v15, %v2223_v15 }
 0x20b   : > { %v2987_v55 = vadd.f32 %v2986_v7, %v6388_v44  ;;  %v3248_v6 = vadd.f32 %v3247_v8, %v3121_v49 }
 0x20d   : > { %v3249_v26 = vadd.f32 %v3248_v6, %v3122_v19  ;;  %v2988_v29 = vadd.f32 %v2987_v55, %v6403_v46 }
 0x20f   : > { %v2989_v2 = vadd.f32 %v2988_v29, %v2222_v1  ;;  %v3250_v23 = vadd.f32 %v3249_v26, %v3123_v45 }
 0x211   : > { %v3251_v40 = vadd.f32 %v3250_v23, %v3124_v27  ;;  %v2990_v4 = vadd.f32 %v2989_v2, %v2223_v15 }
 0x213   : > { %v2991_v53 = vadd.f32 %v2990_v4, %v6429_v62  ;;  %v3252_v44 = vadd.f32 %v3251_v40, %v3125_v12 }
 0x215   : > { %v2992_v41 = vadd.f32 %v2991_v53, %v2225_v28  ;;  %v3253_v35 = vadd.f32 %v3252_v44, %v3126_v17 }
 0x217   : > { %v2993_v54 = vrot.slane %v2992_v41, 4  ;;  %v3254_v36 = vadd.f32 %v3253_v35, %v3127_v10 }
 0x219   : > { %v2994_v46 = vadd.f32 %v2993_v54, %v2992_v41  ;;  %v3255_v60 = vrot.slane %v3254_v36, 4 }
 0x21b   : > { %v2995_v33 = vrot.slane %v2994_v46, 2  ;;  %v3256_v14 = vadd.f32 %v3255_v60, %v3254_v36 }
 0x21d   : > { %v2996_v63 = vadd.f32 %v2995_v33, %v2994_v46  ;;  %v3257_v24 = vrot.slane %v3256_v14, 2 }
 0x21f   : > { %v2997_v32 = vrot.slane %v2996_v63, 1  ;;  %v3258_v20 = vadd.f32 %v3257_v24, %v3256_v14 }
 0x221   : > { %v2998_v62 = vadd.f32 %v2997_v32, %v2996_v63  ;;  %v3259_v31 = vrot.slane %v3258_v20, 1 }
 0x223   : > { %2999 = vst [vmem:[%s314_s9] sm:$0x1] %v2998_v62  ;;  %v3260_v28 = vadd.f32 %v3259_v31, %v3258_v20 }
 0x225   : > { %3261 = vst [vmem:[%s314_s9 + $0x1] sm:$0x1] %v3260_v28 }
 0x226 PF: > { %s18_s24 = sadd.s32 1, %s4732_s24  }
 0x227   : > { %p15_p5 = scmp.ge.s32.totalorder %s18_s24, 4  }
 0x229   :  { %17 = sbr.rel (!%p15_p5) target bundleno = 1 (0x1), region = 89 }

</bundles_post_ra>
